<compile_context>
chip_gen: v6e
topology: v6e:2x2x1
jax: 0.10.0
libtpu: 0.0.40
codegen_flags: <defaults>
</compile_context>

<pallas_src>
import functools
import math

import jax
import jax.numpy as jnp
from jax.experimental import pallas as pl
from jax.experimental.pallas import tpu as pltpu


_LN_EPS = 1e-5
_PARALLEL = pltpu.CompilerParams(dimension_semantics=("parallel",))


def _round_up(n, m):
    return ((n + m - 1) // m) * m


# --------------------------- in-kernel building blocks ---------------------------

def _layer_norm(x, g, b, eps=_LN_EPS):
    mu = jnp.mean(x, axis=-1, keepdims=True)
    xc = x - mu
    var = jnp.mean(xc * xc, axis=-1, keepdims=True)
    return xc * jax.lax.rsqrt(var + eps) * g + b


def _mha_core(q, k, v, num_heads):
    """q: (Lq, D), k/v: (Lk, D) -> (Lq, D). All heads handled in one batched
    contraction (head axis = dot_general batch dim), no per-head slicing."""
    lq, d = q.shape
    lk = k.shape[0]
    dh = d // num_heads
    scale = 1.0 / math.sqrt(dh)
    qh = q.reshape(lq, num_heads, dh)
    kh = k.reshape(lk, num_heads, dh)
    vh = v.reshape(lk, num_heads, dh)
    s = jnp.einsum("qhd,khd->hqk", qh, kh,
                   preferred_element_type=jnp.float32) * scale
    s = s - jnp.max(s, axis=-1, keepdims=True)
    p = jnp.exp(s)
    # approx reciprocal -> EUP slot; ~1e-3 rel. error, fine for inference.
    p = p * pl.reciprocal(jnp.sum(p, axis=-1, keepdims=True), approx=True)
    o = jnp.einsum("hqk,khd->qhd", p, vh, preferred_element_type=jnp.float32)
    return o.reshape(lq, d)


def _encoder_block(x, wqkv, wo, w1, w2, vec, num_heads, d, d_ff):
    """Post-LN transformer encoder layer.  vec rows:
    0 bqkv | 1 bo | 2 ln1_g | 3 ln1_b | 4 b1 | 5 b2 | 6 ln2_g | 7 ln2_b"""
    bqkv = vec[0:1, :3 * d]
    bo = vec[1:2, :d]
    ln1_g, ln1_b = vec[2:3, :d], vec[3:4, :d]
    b1 = vec[4:5, :d_ff]
    b2 = vec[5:6, :d]
    ln2_g, ln2_b = vec[6:7, :d], vec[7:8, :d]

    qkv = jnp.dot(x, wqkv, preferred_element_type=jnp.float32) + bqkv
    attn = _mha_core(qkv[:, :d], qkv[:, d:2 * d], qkv[:, 2 * d:3 * d], num_heads)
    attn = jnp.dot(attn, wo, preferred_element_type=jnp.float32) + bo
    h = _layer_norm(x + attn, ln1_g, ln1_b)

    ff = jnp.maximum(jnp.dot(h, w1, preferred_element_type=jnp.float32) + b1, 0.0)
    ff = jnp.dot(ff, w2, preferred_element_type=jnp.float32) + b2
    return _layer_norm(h + ff, ln2_g, ln2_b)


def _decoder_block(x, mem, wqkv, wo_s, wq_c, wkv_c, wo_c, w1, w2, vec,
                   num_heads, d, d_ff):
    """Post-LN transformer decoder layer (self-attn + cross-attn + FFN).
    vec rows: 0 bqkv | 1 bo_s | 2 ln1_g | 3 ln1_b | 4 bq_c | 5 bkv_c | 6 bo_c
              | 7 ln2_g | 8 ln2_b | 9 b1 | 10 b2 | 11 ln3_g | 12 ln3_b"""
    bqkv = vec[0:1, :3 * d]
    bo_s = vec[1:2, :d]
    ln1_g, ln1_b = vec[2:3, :d], vec[3:4, :d]
    bq_c = vec[4:5, :d]
    bkv_c = vec[5:6, :2 * d]
    bo_c = vec[6:7, :d]
    ln2_g, ln2_b = vec[7:8, :d], vec[8:9, :d]
    b1 = vec[9:10, :d_ff]
    b2 = vec[10:11, :d]
    ln3_g, ln3_b = vec[11:12, :d], vec[12:13, :d]

    # self-attention over the character queries
    qkv = jnp.dot(x, wqkv, preferred_element_type=jnp.float32) + bqkv
    sa = _mha_core(qkv[:, :d], qkv[:, d:2 * d], qkv[:, 2 * d:3 * d], num_heads)
    sa = jnp.dot(sa, wo_s, preferred_element_type=jnp.float32) + bo_s
    h = _layer_norm(x + sa, ln1_g, ln1_b)

    # cross-attention into the encoder memory (fused KV projection)
    qc = jnp.dot(h, wq_c, preferred_element_type=jnp.float32) + bq_c
    kv = jnp.dot(mem, wkv_c, preferred_element_type=jnp.float32) + bkv_c
    ca = _mha_core(qc, kv[:, :d], kv[:, d:2 * d], num_heads)
    ca = jnp.dot(ca, wo_c, preferred_element_type=jnp.float32) + bo_c
    h = _layer_norm(h + ca, ln2_g, ln2_b)

    # feed-forward
    ff = jnp.maximum(jnp.dot(h, w1, preferred_element_type=jnp.float32) + b1, 0.0)
    ff = jnp.dot(ff, w2, preferred_element_type=jnp.float32) + b2
    return _layer_norm(h + ff, ln3_g, ln3_b)


# ----------------------------- fused forward kernel ------------------------------

def _i2c2w_kernel(tokens_ref, patch_w_ref, pe_bias_ref, query_ref,
                  enc_wqkv_ref, enc_wo_ref, enc_w1_ref, enc_w2_ref, enc_vec_ref,
                  dec_wqkv_ref, dec_wo_s_ref, dec_wq_c_ref, dec_wkv_c_ref,
                  dec_wo_c_ref, dec_w1_ref, dec_w2_ref, dec_vec_ref,
                  heads_w_ref, emb_w_ref,
                  c2w_wqkv_ref, c2w_wo_ref, c2w_w1_ref, c2w_w2_ref, c2w_vec_ref,
                  word_w_ref, misc_ref,
                  logits_ref, word_ref,
                  *, num_heads, d_model, d_ff, num_enc, num_dec, num_c2w,
                  head_pad, word_pad):
    d = d_model

    # ---- ImageToCharacter: pixel embedding + PE (patch bias folded into PE) ----
    feat = (jnp.dot(tokens_ref[0], patch_w_ref[...],
                    preferred_element_type=jnp.float32) + pe_bias_ref[...])

    for l in range(num_enc):                      # static, unrolled
        feat = _encoder_block(feat, enc_wqkv_ref[l], enc_wo_ref[l],
                              enc_w1_ref[l], enc_w2_ref[l], enc_vec_ref[l],
                              num_heads, d, d_ff)

    q = query_ref[...]
    for l in range(num_dec):
        q = _decoder_block(q, feat, dec_wqkv_ref[l], dec_wo_s_ref[l],
                           dec_wq_c_ref[l], dec_wkv_c_ref[l], dec_wo_c_ref[l],
                           dec_w1_ref[l], dec_w2_ref[l], dec_vec_ref[l],
                           num_heads, d, d_ff)

    misc = misc_ref[...]
    heads_b = misc[0:1, :head_pad]
    emb_b = misc[1:2, :d]
    word_b = misc[2:3, :word_pad]

    # fused char-head + pos-head, lane-padded to 128 columns (lane-dense store)
    logits = jnp.dot(q, heads_w_ref[...], preferred_element_type=jnp.float32) + heads_b
    logits_ref[0] = logits.astype(logits_ref.dtype)

    # ---- CharacterToWord ----
    # Input embedding reuses the padded logits (padded columns of heads_w/heads_b
    # and padded rows of emb_w are exactly zero, so they contribute nothing).
    c2w_x = jnp.dot(logits, emb_w_ref[...], preferred_element_type=jnp.float32) + emb_b

    for l in range(num_c2w):
        c2w_x = _encoder_block(c2w_x, c2w_wqkv_ref[l], c2w_wo_ref[l],
                               c2w_w1_ref[l], c2w_w2_ref[l], c2w_vec_ref[l],
                               num_heads, d, d_ff)

    word_ref[0] = (jnp.dot(c2w_x, word_w_ref[...],
                           preferred_element_type=jnp.float32)
                   + word_b).astype(word_ref.dtype)


def _rep(shape):
    # Weight block identical for every grid step (fetched once, stays resident).
    return pl.BlockSpec(shape, lambda b: (0,) * len(shape))


def _batched(shape3d):
    return pl.BlockSpec(shape3d, lambda b: (b, 0, 0))


def i2c2w_forward(params, x, cfg):
    B, C, H, W = x.shape
    d = cfg["d_model"]
    nh = cfg["num_heads"]
    d_ff = cfg["d_ff"]
    nc = cfg["num_classes"]
    ml = cfg["max_length"]
    Ne = cfg["num_encoder_layers"]
    Nd = cfg["num_decoder_layers"]
    L = H * W
    p = params

    P = p["heads_w"].shape[1]        # 128-padded char+pos head width
    Pw = p["word_w"].shape[1]        # 128-padded word head width
    Wv = p["enc_vec"].shape[-1]
    Wm = p["misc_vec"].shape[-1]
    Nc = p["c2w_wqkv"].shape[0]

    tokens = x.transpose(0, 2, 3, 1).reshape(B, L, C)     # NCHW -> (B, HW, C)

    kernel = functools.partial(
        _i2c2w_kernel, num_heads=nh, d_model=d, d_ff=d_ff,
        num_enc=Ne, num_dec=Nd, num_c2w=Nc, head_pad=P, word_pad=Pw)

    logits_pad, word_pad_out = pl.pallas_call(
        kernel,
        out_shape=(jax.ShapeDtypeStruct((B, ml, P), jnp.float32),
                   jax.ShapeDtypeStruct((B, ml, Pw), jnp.float32)),
        grid=(B,),
        in_specs=[
            _batched((1, L, C)),                    # tokens
            _rep((C, d)),                           # patch_w
            _rep((L, d)),                           # pe (+patch bias)
            _rep((ml, d)),                          # query_embed
            _rep((Ne, d, 3 * d)), _rep((Ne, d, d)),               # enc attn
            _rep((Ne, d, d_ff)), _rep((Ne, d_ff, d)),             # enc ffn
            _rep((Ne, 8, Wv)),                                    # enc packed vecs
            _rep((Nd, d, 3 * d)), _rep((Nd, d, d)),               # dec self-attn
            _rep((Nd, d, d)), _rep((Nd, d, 2 * d)), _rep((Nd, d, d)),  # dec cross
            _rep((Nd, d, d_ff)), _rep((Nd, d_ff, d)),             # dec ffn
            _rep((Nd, 16, Wv)),                                   # dec packed vecs
            _rep((d, P)),                           # fused char+pos head
            _rep((P, d)),                           # c2w input embedding
            _rep((Nc, d, 3 * d)), _rep((Nc, d, d)),               # c2w attn
            _rep((Nc, d, d_ff)), _rep((Nc, d_ff, d)),             # c2w ffn
            _rep((Nc, 8, Wv)),                                    # c2w packed vecs
            _rep((d, Pw)),                          # word head
            _rep((8, Wm)),                          # misc biases
        ],
        out_specs=(_batched((1, ml, P)), _batched((1, ml, Pw))),
        compiler_params=_PARALLEL,
    )(tokens, p["patch_w"], p["pe_bias"], p["query_embed"],
      p["enc_wqkv"], p["enc_wo"], p["enc_w1"], p["enc_w2"], p["enc_vec"],
      p["dec_wqkv"], p["dec_wo_s"], p["dec_wq_c"], p["dec_wkv_c"],
      p["dec_wo_c"], p["dec_w1"], p["dec_w2"], p["dec_vec"],
      p["heads_w"], p["emb_w"],
      p["c2w_wqkv"], p["c2w_wo"], p["c2w_w1"], p["c2w_w2"], p["c2w_vec"],
      p["word_w"], p["misc_vec"])

    char_logits = logits_pad[:, :, :nc]
    pos_logits = logits_pad[:, :, nc:nc + ml]
    word_logits = word_pad_out[:, :, :nc]
    return char_logits, pos_logits, word_logits


# ------------------------------ parameter init -----------------------------------

def _keys(seed, n):
    return iter(jax.random.split(jax.random.PRNGKey(seed), n))


def _w(kit, shape):
    return jax.random.normal(next(kit), shape, jnp.float32) * 0.02


def _stack(kit, n, shape):
    return jnp.stack([_w(kit, shape) for _ in range(n)], axis=0)


def sinusoidal_pe(length, d_model):
    # NOTE: concatenated [sin | cos] layout (column permutation of the
    # interleaved PyTorch reference layout).
    pos = jnp.arange(length, dtype=jnp.float32)[:, None]
    i = jnp.arange(d_model // 2, dtype=jnp.float32)[None, :]
    angle = pos / jnp.power(10000.0, 2.0 * i / d_model)
    return jnp.concatenate([jnp.sin(angle), jnp.cos(angle)], axis=-1)  # (L, d)


def init_i2c2w_params(cfg, seed=0):
    d, d_ff = cfg["d_model"], cfg["d_ff"]
    nc, ml = cfg["num_classes"], cfg["max_length"]
    C = cfg["in_channels"]
    Ne, Nd = cfg["num_encoder_layers"], cfg["num_decoder_layers"]
    Nc = Nd                                   # CharacterToWord layer count
    L = cfg["height"] * cfg["width"]
    kit = _keys(seed, 1024)

    Wv = _round_up(max(3 * d, 2 * d, d_ff, d), 128)
    P = _round_up(nc + ml, 128)               # fused char+pos head width
    Pw = _round_up(nc, 128)                   # word head width
    Wm = max(P, Pw, _round_up(d, 128))

    # packed per-layer bias / LayerNorm vectors (zeros; LN gammas = 1)
    enc_vec = jnp.zeros((Ne, 8, Wv), jnp.float32)
    enc_vec = enc_vec.at[:, 2, :d].set(1.0).at[:, 6, :d].set(1.0)
    dec_vec = jnp.zeros((Nd, 16, Wv), jnp.float32)
    dec_vec = (dec_vec.at[:, 2, :d].set(1.0)
               .at[:, 7, :d].set(1.0).at[:, 11, :d].set(1.0))
    c2w_vec = jnp.zeros((Nc, 8, Wv), jnp.float32)
    c2w_vec = c2w_vec.at[:, 2, :d].set(1.0).at[:, 6, :d].set(1.0)

    # fused char + pos heads, padded to a lane-dense 128-wide slab
    heads_w = jnp.zeros((d, P), jnp.float32)
    heads_w = (heads_w.at[:, :nc].set(_w(kit, (d, nc)))
               .at[:, nc:nc + ml].set(_w(kit, (d, ml))))

    # CharacterToWord input embedding of the (padded) char/pos logits
    emb_w = jnp.zeros((P, d), jnp.float32)
    emb_w = (emb_w.at[:nc, :].set(_w(kit, (nc, d)))
             .at[nc:nc + ml, :].set(_w(kit, (ml, d))))

    word_w = jnp.zeros((d, Pw), jnp.float32).at[:, :nc].set(_w(kit, (d, nc)))

    # misc biases packed into one (8, Wm) tile:
    # row0 heads_b | row1 emb_b | row2 word_b   (all zero at init)
    misc_vec = jnp.zeros((8, Wm), jnp.float32)

    return dict(
        patch_w=_w(kit, (C, d)),
        pe_bias=sinusoidal_pe(L, d),           # patch bias (zero) folded in
        query_embed=_w(kit, (ml, d)),
        enc_wqkv=_stack(kit, Ne, (d, 3 * d)),
        enc_wo=_stack(kit, Ne, (d, d)),
        enc_w1=_stack(kit, Ne, (d, d_ff)),
        enc_w2=_stack(kit, Ne, (d_ff, d)),
        enc_vec=enc_vec,
        dec_wqkv=_stack(kit, Nd, (d, 3 * d)),
        dec_wo_s=_stack(kit, Nd, (d, d)),
        dec_wq_c=_stack(kit, Nd, (d, d)),
        dec_wkv_c=_stack(kit, Nd, (d, 2 * d)),
        dec_wo_c=_stack(kit, Nd, (d, d)),
        dec_w1=_stack(kit, Nd, (d, d_ff)),
        dec_w2=_stack(kit, Nd, (d_ff, d)),
        dec_vec=dec_vec,
        heads_w=heads_w,
        emb_w=emb_w,
        c2w_wqkv=_stack(kit, Nc, (d, 3 * d)),
        c2w_wo=_stack(kit, Nc, (d, d)),
        c2w_w1=_stack(kit, Nc, (d, d_ff)),
        c2w_w2=_stack(kit, Nc, (d_ff, d)),
        c2w_vec=c2w_vec,
        word_w=word_w,
        misc_vec=misc_vec,
    )


# ------------------------------------ main ----------------------------------------

if __name__ == "__main__":
    cfg = dict(
        d_model=32, num_heads=4, num_encoder_layers=1, num_decoder_layers=1,
        d_ff=64, height=8, width=16, max_length=8, dropout=0.0,
        num_classes=37, in_channels=3,
    )
    params = init_i2c2w_params(cfg, seed=0)

    x = jax.random.normal(jax.random.PRNGKey(0),
                          (2, cfg["in_channels"], cfg["height"], cfg["width"]),
                          jnp.float32)

    fwd = jax.jit(functools.partial(i2c2w_forward, cfg=cfg))
    char_logits, pos_logits, word_logits = fwd(params, x)
    jax.block_until_ready((char_logits, pos_logits, word_logits))

    assert char_logits.shape == (2, cfg["max_length"], cfg["num_classes"])
    assert pos_logits.shape == (2, cfg["max_length"], cfg["max_length"])
    assert word_logits.shape == (2, cfg["max_length"], cfg["num_classes"])
    assert char_logits.dtype == jnp.float32
    assert bool(jnp.all(jnp.isfinite(char_logits)))
    assert bool(jnp.all(jnp.isfinite(word_logits)))
    print("KERNEL_OK")
</pallas_src>

<mosaic_0001>
module attributes {stable_mosaic.version = 11 : i64} {
  func.func @_i2c2w_kernel(%arg0: i32, %arg1: memref<1x128x3xf32, #tpu.memory_space<vmem>>, %arg2: memref<3x32xf32, #tpu.memory_space<vmem>>, %arg3: memref<128x32xf32, #tpu.memory_space<vmem>>, %arg4: memref<8x32xf32, #tpu.memory_space<vmem>>, %arg5: memref<1x32x96xf32, #tpu.memory_space<vmem>>, %arg6: memref<1x32x32xf32, #tpu.memory_space<vmem>>, %arg7: memref<1x32x64xf32, #tpu.memory_space<vmem>>, %arg8: memref<1x64x32xf32, #tpu.memory_space<vmem>>, %arg9: memref<1x8x128xf32, #tpu.memory_space<vmem>>, %arg10: memref<1x32x96xf32, #tpu.memory_space<vmem>>, %arg11: memref<1x32x32xf32, #tpu.memory_space<vmem>>, %arg12: memref<1x32x32xf32, #tpu.memory_space<vmem>>, %arg13: memref<1x32x64xf32, #tpu.memory_space<vmem>>, %arg14: memref<1x32x32xf32, #tpu.memory_space<vmem>>, %arg15: memref<1x32x64xf32, #tpu.memory_space<vmem>>, %arg16: memref<1x64x32xf32, #tpu.memory_space<vmem>>, %arg17: memref<1x16x128xf32, #tpu.memory_space<vmem>>, %arg18: memref<32x128xf32, #tpu.memory_space<vmem>>, %arg19: memref<128x32xf32, #tpu.memory_space<vmem>>, %arg20: memref<1x32x96xf32, #tpu.memory_space<vmem>>, %arg21: memref<1x32x32xf32, #tpu.memory_space<vmem>>, %arg22: memref<1x32x64xf32, #tpu.memory_space<vmem>>, %arg23: memref<1x64x32xf32, #tpu.memory_space<vmem>>, %arg24: memref<1x8x128xf32, #tpu.memory_space<vmem>>, %arg25: memref<32x128xf32, #tpu.memory_space<vmem>>, %arg26: memref<8x128xf32, #tpu.memory_space<vmem>>, %arg27: memref<1x8x128xf32, #tpu.memory_space<vmem>>, %arg28: memref<1x8x128xf32, #tpu.memory_space<vmem>>) attributes {dimension_semantics = [#tpu.dimension_semantics<parallel>], iteration_bounds = array<i64: 2>, scalar_prefetch = 0 : i64, scratch_operands = 0 : i64, tpu.core_type = #tpu.core_type<tc>, window_params = [{transform_indices = @transform_0, window_bounds = array<i64: 1, 128, 3>}, {pipeline_mode = #tpu.pipeline_mode<synchronous>, transform_indices = @transform_1, window_bounds = array<i64: 3, 32>}, {pipeline_mode = #tpu.pipeline_mode<synchronous>, transform_indices = @transform_2, window_bounds = array<i64: 128, 32>}, {pipeline_mode = #tpu.pipeline_mode<synchronous>, transform_indices = @transform_3, window_bounds = array<i64: 8, 32>}, {pipeline_mode = #tpu.pipeline_mode<synchronous>, transform_indices = @transform_4, window_bounds = array<i64: 1, 32, 96>}, {pipeline_mode = #tpu.pipeline_mode<synchronous>, transform_indices = @transform_5, window_bounds = array<i64: 1, 32, 32>}, {pipeline_mode = #tpu.pipeline_mode<synchronous>, transform_indices = @transform_6, window_bounds = array<i64: 1, 32, 64>}, {pipeline_mode = #tpu.pipeline_mode<synchronous>, transform_indices = @transform_7, window_bounds = array<i64: 1, 64, 32>}, {pipeline_mode = #tpu.pipeline_mode<synchronous>, transform_indices = @transform_8, window_bounds = array<i64: 1, 8, 128>}, {pipeline_mode = #tpu.pipeline_mode<synchronous>, transform_indices = @transform_9, window_bounds = array<i64: 1, 32, 96>}, {pipeline_mode = #tpu.pipeline_mode<synchronous>, transform_indices = @transform_10, window_bounds = array<i64: 1, 32, 32>}, {pipeline_mode = #tpu.pipeline_mode<synchronous>, transform_indices = @transform_11, window_bounds = array<i64: 1, 32, 32>}, {pipeline_mode = #tpu.pipeline_mode<synchronous>, transform_indices = @transform_12, window_bounds = array<i64: 1, 32, 64>}, {pipeline_mode = #tpu.pipeline_mode<synchronous>, transform_indices = @transform_13, window_bounds = array<i64: 1, 32, 32>}, {pipeline_mode = #tpu.pipeline_mode<synchronous>, transform_indices = @transform_14, window_bounds = array<i64: 1, 32, 64>}, {pipeline_mode = #tpu.pipeline_mode<synchronous>, transform_indices = @transform_15, window_bounds = array<i64: 1, 64, 32>}, {pipeline_mode = #tpu.pipeline_mode<synchronous>, transform_indices = @transform_16, window_bounds = array<i64: 1, 16, 128>}, {pipeline_mode = #tpu.pipeline_mode<synchronous>, transform_indices = @transform_17, window_bounds = array<i64: 32, 128>}, {pipeline_mode = #tpu.pipeline_mode<synchronous>, transform_indices = @transform_18, window_bounds = array<i64: 128, 32>}, {pipeline_mode = #tpu.pipeline_mode<synchronous>, transform_indices = @transform_19, window_bounds = array<i64: 1, 32, 96>}, {pipeline_mode = #tpu.pipeline_mode<synchronous>, transform_indices = @transform_20, window_bounds = array<i64: 1, 32, 32>}, {pipeline_mode = #tpu.pipeline_mode<synchronous>, transform_indices = @transform_21, window_bounds = array<i64: 1, 32, 64>}, {pipeline_mode = #tpu.pipeline_mode<synchronous>, transform_indices = @transform_22, window_bounds = array<i64: 1, 64, 32>}, {pipeline_mode = #tpu.pipeline_mode<synchronous>, transform_indices = @transform_23, window_bounds = array<i64: 1, 8, 128>}, {pipeline_mode = #tpu.pipeline_mode<synchronous>, transform_indices = @transform_24, window_bounds = array<i64: 32, 128>}, {pipeline_mode = #tpu.pipeline_mode<synchronous>, transform_indices = @transform_25, window_bounds = array<i64: 8, 128>}, {transform_indices = @transform_26, window_bounds = array<i64: 1, 8, 128>}, {transform_indices = @transform_27, window_bounds = array<i64: 1, 8, 128>}]} {
    %c0 = arith.constant 0 : index
    %c0_0 = arith.constant 0 : index
    %c0_1 = arith.constant 0 : index
    %0 = vector.load %arg1[%c0, %c0_0, %c0_1] : memref<1x128x3xf32, #tpu.memory_space<vmem>>, vector<1x128x3xf32>
    %1 = vector.shape_cast %0 : vector<1x128x3xf32> to vector<128x3xf32>
    %c0_2 = arith.constant 0 : index
    %c0_3 = arith.constant 0 : index
    %2 = vector.load %arg2[%c0_2, %c0_3] : memref<3x32xf32, #tpu.memory_space<vmem>>, vector<3x32xf32>
    %cst = arith.constant dense<0.000000e+00> : vector<128x32xf32>
    %3 = tpu.matmul %1, %2, %cst {dimension_numbers = #tpu.dot_dimension_numbers<[1], [0], [0], [1], [0, 0, 1, 1], [], []>} : vector<128x3xf32>, vector<3x32xf32>, vector<128x32xf32> -> vector<128x32xf32>
    %c0_4 = arith.constant 0 : index
    %c0_5 = arith.constant 0 : index
    %4 = vector.load %arg3[%c0_4, %c0_5] : memref<128x32xf32, #tpu.memory_space<vmem>>, vector<128x32xf32>
    %5 = arith.addf %3, %4 : vector<128x32xf32>
    %c0_6 = arith.constant 0 : index
    %c0_7 = arith.constant 0 : index
    %c0_8 = arith.constant 0 : index
    %6 = vector.load %arg5[%c0_6, %c0_7, %c0_8] : memref<1x32x96xf32, #tpu.memory_space<vmem>>, vector<1x32x96xf32>
    %7 = vector.shape_cast %6 : vector<1x32x96xf32> to vector<32x96xf32>
    %c0_9 = arith.constant 0 : index
    %c0_10 = arith.constant 0 : index
    %c0_11 = arith.constant 0 : index
    %8 = vector.load %arg6[%c0_9, %c0_10, %c0_11] : memref<1x32x32xf32, #tpu.memory_space<vmem>>, vector<1x32x32xf32>
    %9 = vector.shape_cast %8 : vector<1x32x32xf32> to vector<32x32xf32>
    %c0_12 = arith.constant 0 : index
    %c0_13 = arith.constant 0 : index
    %c0_14 = arith.constant 0 : index
    %10 = vector.load %arg7[%c0_12, %c0_13, %c0_14] : memref<1x32x64xf32, #tpu.memory_space<vmem>>, vector<1x32x64xf32>
    %11 = vector.shape_cast %10 : vector<1x32x64xf32> to vector<32x64xf32>
    %c0_15 = arith.constant 0 : index
    %c0_16 = arith.constant 0 : index
    %c0_17 = arith.constant 0 : index
    %12 = vector.load %arg8[%c0_15, %c0_16, %c0_17] : memref<1x64x32xf32, #tpu.memory_space<vmem>>, vector<1x64x32xf32>
    %13 = vector.shape_cast %12 : vector<1x64x32xf32> to vector<64x32xf32>
    %c0_18 = arith.constant 0 : index
    %c0_19 = arith.constant 0 : index
    %c0_20 = arith.constant 0 : index
    %14 = vector.load %arg9[%c0_18, %c0_19, %c0_20] : memref<1x8x128xf32, #tpu.memory_space<vmem>>, vector<1x8x128xf32>
    %15 = vector.shape_cast %14 : vector<1x8x128xf32> to vector<8x128xf32>
    %16 = vector.extract_strided_slice %15 {offsets = [0, 0], sizes = [1, 96], strides = [1, 1]} : vector<8x128xf32> to vector<1x96xf32>
    %17 = vector.extract_strided_slice %15 {offsets = [1, 0], sizes = [1, 32], strides = [1, 1]} : vector<8x128xf32> to vector<1x32xf32>
    %18 = vector.extract_strided_slice %15 {offsets = [2, 0], sizes = [1, 32], strides = [1, 1]} : vector<8x128xf32> to vector<1x32xf32>
    %19 = vector.extract_strided_slice %15 {offsets = [3, 0], sizes = [1, 32], strides = [1, 1]} : vector<8x128xf32> to vector<1x32xf32>
    %20 = vector.extract_strided_slice %15 {offsets = [4, 0], sizes = [1, 64], strides = [1, 1]} : vector<8x128xf32> to vector<1x64xf32>
    %21 = vector.extract_strided_slice %15 {offsets = [5, 0], sizes = [1, 32], strides = [1, 1]} : vector<8x128xf32> to vector<1x32xf32>
    %22 = vector.extract_strided_slice %15 {offsets = [6, 0], sizes = [1, 32], strides = [1, 1]} : vector<8x128xf32> to vector<1x32xf32>
    %23 = vector.extract_strided_slice %15 {offsets = [7, 0], sizes = [1, 32], strides = [1, 1]} : vector<8x128xf32> to vector<1x32xf32>
    %cst_21 = arith.constant dense<0.000000e+00> : vector<128x96xf32>
    %24 = tpu.matmul %5, %7, %cst_21 {dimension_numbers = #tpu.dot_dimension_numbers<[1], [0], [0], [1], [0, 0, 1, 1], [], []>} : vector<128x32xf32>, vector<32x96xf32>, vector<128x96xf32> -> vector<128x96xf32>
    %25 = vector.broadcast %16 : vector<1x96xf32> to vector<128x96xf32>
    %26 = arith.addf %24, %25 : vector<128x96xf32>
    %27 = vector.extract_strided_slice %26 {offsets = [0, 0], sizes = [128, 32], strides = [1, 1]} : vector<128x96xf32> to vector<128x32xf32>
    %28 = vector.extract_strided_slice %26 {offsets = [0, 32], sizes = [128, 32], strides = [1, 1]} : vector<128x96xf32> to vector<128x32xf32>
    %29 = vector.extract_strided_slice %26 {offsets = [0, 64], sizes = [128, 32], strides = [1, 1]} : vector<128x96xf32> to vector<128x32xf32>
    %30 = vector.shape_cast %27 : vector<128x32xf32> to vector<128x4x8xf32>
    %31 = vector.shape_cast %28 : vector<128x32xf32> to vector<128x4x8xf32>
    %32 = vector.shape_cast %29 : vector<128x32xf32> to vector<128x4x8xf32>
    "tpu.trace_start"() <{level = 10 : i32, message = "qhd,khd->hqk"}> : () -> ()
    %cst_22 = arith.constant dense<0.000000e+00> : vector<4x128x128xf32>
    %33 = tpu.matmul %30, %31, %cst_22 {dimension_numbers = #tpu.dot_dimension_numbers<[2], [2], [0], [0], [0, 1, 0, 0, 1, 0], [1], [1]>} : vector<128x4x8xf32>, vector<128x4x8xf32>, vector<4x128x128xf32> -> vector<4x128x128xf32>
    "tpu.trace_stop"() : () -> ()
    %cst_23 = arith.constant 0.353553385 : f32
    %34 = vector.broadcast %cst_23 : f32 to vector<4x128x128xf32>
    %35 = arith.mulf %33, %34 : vector<4x128x128xf32>
    %cst_24 = arith.constant dense<0xFF800000> : vector<4x128xf32>
    %36 = vector.multi_reduction <maximumf>, %35, %cst_24 [2] : vector<4x128x128xf32> to vector<4x128xf32>
    %37 = vector.shape_cast %36 : vector<4x128xf32> to vector<4x128x1xf32>
    %38 = vector.broadcast %37 : vector<4x128x1xf32> to vector<4x128x128xf32>
    %39 = arith.subf %35, %38 : vector<4x128x128xf32>
    %40 = math.exp %39 : vector<4x128x128xf32>
    %cst_25 = arith.constant dense<0.000000e+00> : vector<4x128xf32>
    %41 = vector.multi_reduction <add>, %40, %cst_25 [2] : vector<4x128x128xf32> to vector<4x128xf32>
    %42 = vector.shape_cast %41 : vector<4x128xf32> to vector<4x128x1xf32>
    %43 = tpu.reciprocal %42 {approx = true} : vector<4x128x1xf32> -> vector<4x128x1xf32>
    %44 = vector.broadcast %43 : vector<4x128x1xf32> to vector<4x128x128xf32>
    %45 = arith.mulf %40, %44 : vector<4x128x128xf32>
    "tpu.trace_start"() <{level = 10 : i32, message = "hqk,khd->qhd"}> : () -> ()
    %cst_26 = arith.constant dense<0.000000e+00> : vector<4x8x128xf32>
    %46 = tpu.matmul %32, %45, %cst_26 {dimension_numbers = #tpu.dot_dimension_numbers<[0], [2], [2], [1], [0, 1, 0, 2, 1, 1], [1], [0]>} : vector<128x4x8xf32>, vector<4x128x128xf32>, vector<4x8x128xf32> -> vector<4x8x128xf32>
    %47 = tpu.transpose %46, [2, 0, 1] : vector<4x8x128xf32> -> vector<128x4x8xf32>
    "tpu.trace_stop"() : () -> ()
    %48 = vector.shape_cast %47 : vector<128x4x8xf32> to vector<128x32xf32>
    %cst_27 = arith.constant dense<0.000000e+00> : vector<128x32xf32>
    %49 = tpu.matmul %48, %9, %cst_27 {dimension_numbers = #tpu.dot_dimension_numbers<[1], [0], [0], [1], [0, 0, 1, 1], [], []>} : vector<128x32xf32>, vector<32x32xf32>, vector<128x32xf32> -> vector<128x32xf32>
    %50 = vector.broadcast %17 : vector<1x32xf32> to vector<128x32xf32>
    %51 = arith.addf %49, %50 : vector<128x32xf32>
    %52 = arith.addf %5, %51 : vector<128x32xf32>
    %cst_28 = arith.constant dense<0.000000e+00> : vector<128xf32>
    %53 = vector.multi_reduction <add>, %52, %cst_28 [1] : vector<128x32xf32> to vector<128xf32>
    %54 = vector.shape_cast %53 : vector<128xf32> to vector<128x1xf32>
    %cst_29 = arith.constant 3.200000e+01 : f32
    %55 = vector.broadcast %cst_29 : f32 to vector<128x1xf32>
    %56 = arith.divf %54, %55 : vector<128x1xf32>
    %57 = vector.broadcast %56 : vector<128x1xf32> to vector<128x32xf32>
    %58 = arith.subf %52, %57 : vector<128x32xf32>
    %59 = arith.mulf %58, %58 : vector<128x32xf32>
    %cst_30 = arith.constant dense<0.000000e+00> : vector<128xf32>
    %60 = vector.multi_reduction <add>, %59, %cst_30 [1] : vector<128x32xf32> to vector<128xf32>
    %61 = vector.shape_cast %60 : vector<128xf32> to vector<128x1xf32>
    %cst_31 = arith.constant 3.200000e+01 : f32
    %62 = vector.broadcast %cst_31 : f32 to vector<128x1xf32>
    %63 = arith.divf %61, %62 : vector<128x1xf32>
    %cst_32 = arith.constant 9.99999974E-6 : f32
    %64 = vector.broadcast %cst_32 : f32 to vector<128x1xf32>
    %65 = arith.addf %63, %64 : vector<128x1xf32>
    %66 = math.rsqrt %65 : vector<128x1xf32>
    %67 = vector.broadcast %66 : vector<128x1xf32> to vector<128x32xf32>
    %68 = arith.mulf %58, %67 : vector<128x32xf32>
    %69 = vector.broadcast %18 : vector<1x32xf32> to vector<128x32xf32>
    %70 = arith.mulf %68, %69 : vector<128x32xf32>
    %71 = vector.broadcast %19 : vector<1x32xf32> to vector<128x32xf32>
    %72 = arith.addf %70, %71 : vector<128x32xf32>
    %cst_33 = arith.constant dense<0.000000e+00> : vector<128x64xf32>
    %73 = tpu.matmul %72, %11, %cst_33 {dimension_numbers = #tpu.dot_dimension_numbers<[1], [0], [0], [1], [0, 0, 1, 1], [], []>} : vector<128x32xf32>, vector<32x64xf32>, vector<128x64xf32> -> vector<128x64xf32>
    %74 = vector.broadcast %20 : vector<1x64xf32> to vector<128x64xf32>
    %75 = arith.addf %73, %74 : vector<128x64xf32>
    %cst_34 = arith.constant 0.000000e+00 : f32
    %76 = vector.broadcast %cst_34 : f32 to vector<128x64xf32>
    %77 = arith.maximumf %75, %76 : vector<128x64xf32>
    %cst_35 = arith.constant dense<0.000000e+00> : vector<128x32xf32>
    %78 = tpu.matmul %77, %13, %cst_35 {dimension_numbers = #tpu.dot_dimension_numbers<[1], [0], [0], [1], [0, 0, 1, 1], [], []>} : vector<128x64xf32>, vector<64x32xf32>, vector<128x32xf32> -> vector<128x32xf32>
    %79 = vector.broadcast %21 : vector<1x32xf32> to vector<128x32xf32>
    %80 = arith.addf %78, %79 : vector<128x32xf32>
    %81 = arith.addf %72, %80 : vector<128x32xf32>
    %cst_36 = arith.constant dense<0.000000e+00> : vector<128xf32>
    %82 = vector.multi_reduction <add>, %81, %cst_36 [1] : vector<128x32xf32> to vector<128xf32>
    %83 = vector.shape_cast %82 : vector<128xf32> to vector<128x1xf32>
    %cst_37 = arith.constant 3.200000e+01 : f32
    %84 = vector.broadcast %cst_37 : f32 to vector<128x1xf32>
    %85 = arith.divf %83, %84 : vector<128x1xf32>
    %86 = vector.broadcast %85 : vector<128x1xf32> to vector<128x32xf32>
    %87 = arith.subf %81, %86 : vector<128x32xf32>
    %88 = arith.mulf %87, %87 : vector<128x32xf32>
    %cst_38 = arith.constant dense<0.000000e+00> : vector<128xf32>
    %89 = vector.multi_reduction <add>, %88, %cst_38 [1] : vector<128x32xf32> to vector<128xf32>
    %90 = vector.shape_cast %89 : vector<128xf32> to vector<128x1xf32>
    %cst_39 = arith.constant 3.200000e+01 : f32
    %91 = vector.broadcast %cst_39 : f32 to vector<128x1xf32>
    %92 = arith.divf %90, %91 : vector<128x1xf32>
    %cst_40 = arith.constant 9.99999974E-6 : f32
    %93 = vector.broadcast %cst_40 : f32 to vector<128x1xf32>
    %94 = arith.addf %92, %93 : vector<128x1xf32>
    %95 = math.rsqrt %94 : vector<128x1xf32>
    %96 = vector.broadcast %95 : vector<128x1xf32> to vector<128x32xf32>
    %97 = arith.mulf %87, %96 : vector<128x32xf32>
    %98 = vector.broadcast %22 : vector<1x32xf32> to vector<128x32xf32>
    %99 = arith.mulf %97, %98 : vector<128x32xf32>
    %100 = vector.broadcast %23 : vector<1x32xf32> to vector<128x32xf32>
    %101 = arith.addf %99, %100 : vector<128x32xf32>
    %c0_41 = arith.constant 0 : index
    %c0_42 = arith.constant 0 : index
    %102 = vector.load %arg4[%c0_41, %c0_42] : memref<8x32xf32, #tpu.memory_space<vmem>>, vector<8x32xf32>
    %c0_43 = arith.constant 0 : index
    %c0_44 = arith.constant 0 : index
    %c0_45 = arith.constant 0 : index
    %103 = vector.load %arg10[%c0_43, %c0_44, %c0_45] : memref<1x32x96xf32, #tpu.memory_space<vmem>>, vector<1x32x96xf32>
    %104 = vector.shape_cast %103 : vector<1x32x96xf32> to vector<32x96xf32>
    %c0_46 = arith.constant 0 : index
    %c0_47 = arith.constant 0 : index
    %c0_48 = arith.constant 0 : index
    %105 = vector.load %arg11[%c0_46, %c0_47, %c0_48] : memref<1x32x32xf32, #tpu.memory_space<vmem>>, vector<1x32x32xf32>
    %106 = vector.shape_cast %105 : vector<1x32x32xf32> to vector<32x32xf32>
    %c0_49 = arith.constant 0 : index
    %c0_50 = arith.constant 0 : index
    %c0_51 = arith.constant 0 : index
    %107 = vector.load %arg12[%c0_49, %c0_50, %c0_51] : memref<1x32x32xf32, #tpu.memory_space<vmem>>, vector<1x32x32xf32>
    %108 = vector.shape_cast %107 : vector<1x32x32xf32> to vector<32x32xf32>
    %c0_52 = arith.constant 0 : index
    %c0_53 = arith.constant 0 : index
    %c0_54 = arith.constant 0 : index
    %109 = vector.load %arg13[%c0_52, %c0_53, %c0_54] : memref<1x32x64xf32, #tpu.memory_space<vmem>>, vector<1x32x64xf32>
    %110 = vector.shape_cast %109 : vector<1x32x64xf32> to vector<32x64xf32>
    %c0_55 = arith.constant 0 : index
    %c0_56 = arith.constant 0 : index
    %c0_57 = arith.constant 0 : index
    %111 = vector.load %arg14[%c0_55, %c0_56, %c0_57] : memref<1x32x32xf32, #tpu.memory_space<vmem>>, vector<1x32x32xf32>
    %112 = vector.shape_cast %111 : vector<1x32x32xf32> to vector<32x32xf32>
    %c0_58 = arith.constant 0 : index
    %c0_59 = arith.constant 0 : index
    %c0_60 = arith.constant 0 : index
    %113 = vector.load %arg15[%c0_58, %c0_59, %c0_60] : memref<1x32x64xf32, #tpu.memory_space<vmem>>, vector<1x32x64xf32>
    %114 = vector.shape_cast %113 : vector<1x32x64xf32> to vector<32x64xf32>
    %c0_61 = arith.constant 0 : index
    %c0_62 = arith.constant 0 : index
    %c0_63 = arith.constant 0 : index
    %115 = vector.load %arg16[%c0_61, %c0_62, %c0_63] : memref<1x64x32xf32, #tpu.memory_space<vmem>>, vector<1x64x32xf32>
    %116 = vector.shape_cast %115 : vector<1x64x32xf32> to vector<64x32xf32>
    %c0_64 = arith.constant 0 : index
    %c0_65 = arith.constant 0 : index
    %c0_66 = arith.constant 0 : index
    %117 = vector.load %arg17[%c0_64, %c0_65, %c0_66] : memref<1x16x128xf32, #tpu.memory_space<vmem>>, vector<1x16x128xf32>
    %118 = vector.shape_cast %117 : vector<1x16x128xf32> to vector<16x128xf32>
    %119 = vector.extract_strided_slice %118 {offsets = [0, 0], sizes = [1, 96], strides = [1, 1]} : vector<16x128xf32> to vector<1x96xf32>
    %120 = vector.extract_strided_slice %118 {offsets = [1, 0], sizes = [1, 32], strides = [1, 1]} : vector<16x128xf32> to vector<1x32xf32>
    %121 = vector.extract_strided_slice %118 {offsets = [2, 0], sizes = [1, 32], strides = [1, 1]} : vector<16x128xf32> to vector<1x32xf32>
    %122 = vector.extract_strided_slice %118 {offsets = [3, 0], sizes = [1, 32], strides = [1, 1]} : vector<16x128xf32> to vector<1x32xf32>
    %123 = vector.extract_strided_slice %118 {offsets = [4, 0], sizes = [1, 32], strides = [1, 1]} : vector<16x128xf32> to vector<1x32xf32>
    %124 = vector.extract_strided_slice %118 {offsets = [5, 0], sizes = [1, 64], strides = [1, 1]} : vector<16x128xf32> to vector<1x64xf32>
    %125 = vector.extract_strided_slice %118 {offsets = [6, 0], sizes = [1, 32], strides = [1, 1]} : vector<16x128xf32> to vector<1x32xf32>
    %126 = vector.extract_strided_slice %118 {offsets = [7, 0], sizes = [1, 32], strides = [1, 1]} : vector<16x128xf32> to vector<1x32xf32>
    %127 = vector.extract_strided_slice %118 {offsets = [8, 0], sizes = [1, 32], strides = [1, 1]} : vector<16x128xf32> to vector<1x32xf32>
    %128 = vector.extract_strided_slice %118 {offsets = [9, 0], sizes = [1, 64], strides = [1, 1]} : vector<16x128xf32> to vector<1x64xf32>
    %129 = vector.extract_strided_slice %118 {offsets = [10, 0], sizes = [1, 32], strides = [1, 1]} : vector<16x128xf32> to vector<1x32xf32>
    %130 = vector.extract_strided_slice %118 {offsets = [11, 0], sizes = [1, 32], strides = [1, 1]} : vector<16x128xf32> to vector<1x32xf32>
    %131 = vector.extract_strided_slice %118 {offsets = [12, 0], sizes = [1, 32], strides = [1, 1]} : vector<16x128xf32> to vector<1x32xf32>
    %cst_67 = arith.constant dense<0.000000e+00> : vector<8x96xf32>
    %132 = tpu.matmul %102, %104, %cst_67 {dimension_numbers = #tpu.dot_dimension_numbers<[1], [0], [0], [1], [0, 0, 1, 1], [], []>} : vector<8x32xf32>, vector<32x96xf32>, vector<8x96xf32> -> vector<8x96xf32>
    %133 = vector.broadcast %119 : vector<1x96xf32> to vector<8x96xf32>
    %134 = arith.addf %132, %133 : vector<8x96xf32>
    %135 = vector.extract_strided_slice %134 {offsets = [0, 0], sizes = [8, 32], strides = [1, 1]} : vector<8x96xf32> to vector<8x32xf32>
    %136 = vector.extract_strided_slice %134 {offsets = [0, 32], sizes = [8, 32], strides = [1, 1]} : vector<8x96xf32> to vector<8x32xf32>
    %137 = vector.extract_strided_slice %134 {offsets = [0, 64], sizes = [8, 32], strides = [1, 1]} : vector<8x96xf32> to vector<8x32xf32>
    %138 = vector.shape_cast %135 : vector<8x32xf32> to vector<8x4x8xf32>
    %139 = vector.shape_cast %136 : vector<8x32xf32> to vector<8x4x8xf32>
    %140 = vector.shape_cast %137 : vector<8x32xf32> to vector<8x4x8xf32>
    "tpu.trace_start"() <{level = 10 : i32, message = "qhd,khd->hqk"}> : () -> ()
    %cst_68 = arith.constant dense<0.000000e+00> : vector<4x8x8xf32>
    %141 = tpu.matmul %138, %139, %cst_68 {dimension_numbers = #tpu.dot_dimension_numbers<[2], [2], [0], [0], [0, 1, 0, 0, 1, 0], [1], [1]>} : vector<8x4x8xf32>, vector<8x4x8xf32>, vector<4x8x8xf32> -> vector<4x8x8xf32>
    "tpu.trace_stop"() : () -> ()
    %cst_69 = arith.constant 0.353553385 : f32
    %142 = vector.broadcast %cst_69 : f32 to vector<4x8x8xf32>
    %143 = arith.mulf %141, %142 : vector<4x8x8xf32>
    %cst_70 = arith.constant dense<0xFF800000> : vector<4x8xf32>
    %144 = vector.multi_reduction <maximumf>, %143, %cst_70 [2] : vector<4x8x8xf32> to vector<4x8xf32>
    %145 = vector.shape_cast %144 : vector<4x8xf32> to vector<4x8x1xf32>
    %146 = vector.broadcast %145 : vector<4x8x1xf32> to vector<4x8x8xf32>
    %147 = arith.subf %143, %146 : vector<4x8x8xf32>
    %148 = math.exp %147 : vector<4x8x8xf32>
    %cst_71 = arith.constant dense<0.000000e+00> : vector<4x8xf32>
    %149 = vector.multi_reduction <add>, %148, %cst_71 [2] : vector<4x8x8xf32> to vector<4x8xf32>
    %150 = vector.shape_cast %149 : vector<4x8xf32> to vector<4x8x1xf32>
    %151 = tpu.reciprocal %150 {approx = true} : vector<4x8x1xf32> -> vector<4x8x1xf32>
    %152 = vector.broadcast %151 : vector<4x8x1xf32> to vector<4x8x8xf32>
    %153 = arith.mulf %148, %152 : vector<4x8x8xf32>
    "tpu.trace_start"() <{level = 10 : i32, message = "hqk,khd->qhd"}> : () -> ()
    %cst_72 = arith.constant dense<0.000000e+00> : vector<4x8x8xf32>
    %154 = tpu.matmul %140, %153, %cst_72 {dimension_numbers = #tpu.dot_dimension_numbers<[0], [2], [2], [1], [0, 1, 0, 2, 1, 1], [1], [0]>} : vector<8x4x8xf32>, vector<4x8x8xf32>, vector<4x8x8xf32> -> vector<4x8x8xf32>
    %155 = tpu.transpose %154, [2, 0, 1] : vector<4x8x8xf32> -> vector<8x4x8xf32>
    "tpu.trace_stop"() : () -> ()
    %156 = vector.shape_cast %155 : vector<8x4x8xf32> to vector<8x32xf32>
    %cst_73 = arith.constant dense<0.000000e+00> : vector<8x32xf32>
    %157 = tpu.matmul %156, %106, %cst_73 {dimension_numbers = #tpu.dot_dimension_numbers<[1], [0], [0], [1], [0, 0, 1, 1], [], []>} : vector<8x32xf32>, vector<32x32xf32>, vector<8x32xf32> -> vector<8x32xf32>
    %158 = vector.broadcast %120 : vector<1x32xf32> to vector<8x32xf32>
    %159 = arith.addf %157, %158 : vector<8x32xf32>
    %160 = arith.addf %102, %159 : vector<8x32xf32>
    %cst_74 = arith.constant dense<0.000000e+00> : vector<8xf32>
    %161 = vector.multi_reduction <add>, %160, %cst_74 [1] : vector<8x32xf32> to vector<8xf32>
    %162 = vector.shape_cast %161 : vector<8xf32> to vector<8x1xf32>
    %cst_75 = arith.constant 3.200000e+01 : f32
    %163 = vector.broadcast %cst_75 : f32 to vector<8x1xf32>
    %164 = arith.divf %162, %163 : vector<8x1xf32>
    %165 = vector.broadcast %164 : vector<8x1xf32> to vector<8x32xf32>
    %166 = arith.subf %160, %165 : vector<8x32xf32>
    %167 = arith.mulf %166, %166 : vector<8x32xf32>
    %cst_76 = arith.constant dense<0.000000e+00> : vector<8xf32>
    %168 = vector.multi_reduction <add>, %167, %cst_76 [1] : vector<8x32xf32> to vector<8xf32>
    %169 = vector.shape_cast %168 : vector<8xf32> to vector<8x1xf32>
    %cst_77 = arith.constant 3.200000e+01 : f32
    %170 = vector.broadcast %cst_77 : f32 to vector<8x1xf32>
    %171 = arith.divf %169, %170 : vector<8x1xf32>
    %cst_78 = arith.constant 9.99999974E-6 : f32
    %172 = vector.broadcast %cst_78 : f32 to vector<8x1xf32>
    %173 = arith.addf %171, %172 : vector<8x1xf32>
    %174 = math.rsqrt %173 : vector<8x1xf32>
    %175 = vector.broadcast %174 : vector<8x1xf32> to vector<8x32xf32>
    %176 = arith.mulf %166, %175 : vector<8x32xf32>
    %177 = vector.broadcast %121 : vector<1x32xf32> to vector<8x32xf32>
    %178 = arith.mulf %176, %177 : vector<8x32xf32>
    %179 = vector.broadcast %122 : vector<1x32xf32> to vector<8x32xf32>
    %180 = arith.addf %178, %179 : vector<8x32xf32>
    %cst_79 = arith.constant dense<0.000000e+00> : vector<8x32xf32>
    %181 = tpu.matmul %180, %108, %cst_79 {dimension_numbers = #tpu.dot_dimension_numbers<[1], [0], [0], [1], [0, 0, 1, 1], [], []>} : vector<8x32xf32>, vector<32x32xf32>, vector<8x32xf32> -> vector<8x32xf32>
    %182 = vector.broadcast %123 : vector<1x32xf32> to vector<8x32xf32>
    %183 = arith.addf %181, %182 : vector<8x32xf32>
    %cst_80 = arith.constant dense<0.000000e+00> : vector<128x64xf32>
    %184 = tpu.matmul %101, %110, %cst_80 {dimension_numbers = #tpu.dot_dimension_numbers<[1], [0], [0], [1], [0, 0, 1, 1], [], []>} : vector<128x32xf32>, vector<32x64xf32>, vector<128x64xf32> -> vector<128x64xf32>
    %185 = vector.broadcast %124 : vector<1x64xf32> to vector<128x64xf32>
    %186 = arith.addf %184, %185 : vector<128x64xf32>
    %187 = vector.extract_strided_slice %186 {offsets = [0, 0], sizes = [128, 32], strides = [1, 1]} : vector<128x64xf32> to vector<128x32xf32>
    %188 = vector.extract_strided_slice %186 {offsets = [0, 32], sizes = [128, 32], strides = [1, 1]} : vector<128x64xf32> to vector<128x32xf32>
    %189 = vector.shape_cast %183 : vector<8x32xf32> to vector<8x4x8xf32>
    %190 = vector.shape_cast %187 : vector<128x32xf32> to vector<128x4x8xf32>
    %191 = vector.shape_cast %188 : vector<128x32xf32> to vector<128x4x8xf32>
    "tpu.trace_start"() <{level = 10 : i32, message = "qhd,khd->hqk"}> : () -> ()
    %cst_81 = arith.constant dense<0.000000e+00> : vector<4x8x128xf32>
    %192 = tpu.matmul %189, %190, %cst_81 {dimension_numbers = #tpu.dot_dimension_numbers<[2], [2], [0], [0], [0, 1, 0, 0, 1, 0], [1], [1]>} : vector<8x4x8xf32>, vector<128x4x8xf32>, vector<4x8x128xf32> -> vector<4x8x128xf32>
    "tpu.trace_stop"() : () -> ()
    %cst_82 = arith.constant 0.353553385 : f32
    %193 = vector.broadcast %cst_82 : f32 to vector<4x8x128xf32>
    %194 = arith.mulf %192, %193 : vector<4x8x128xf32>
    %cst_83 = arith.constant dense<0xFF800000> : vector<4x8xf32>
    %195 = vector.multi_reduction <maximumf>, %194, %cst_83 [2] : vector<4x8x128xf32> to vector<4x8xf32>
    %196 = vector.shape_cast %195 : vector<4x8xf32> to vector<4x8x1xf32>
    %197 = vector.broadcast %196 : vector<4x8x1xf32> to vector<4x8x128xf32>
    %198 = arith.subf %194, %197 : vector<4x8x128xf32>
    %199 = math.exp %198 : vector<4x8x128xf32>
    %cst_84 = arith.constant dense<0.000000e+00> : vector<4x8xf32>
    %200 = vector.multi_reduction <add>, %199, %cst_84 [2] : vector<4x8x128xf32> to vector<4x8xf32>
    %201 = vector.shape_cast %200 : vector<4x8xf32> to vector<4x8x1xf32>
    %202 = tpu.reciprocal %201 {approx = true} : vector<4x8x1xf32> -> vector<4x8x1xf32>
    %203 = vector.broadcast %202 : vector<4x8x1xf32> to vector<4x8x128xf32>
    %204 = arith.mulf %199, %203 : vector<4x8x128xf32>
    "tpu.trace_start"() <{level = 10 : i32, message = "hqk,khd->qhd"}> : () -> ()
    %cst_85 = arith.constant dense<0.000000e+00> : vector<4x8x8xf32>
    %205 = tpu.matmul %191, %204, %cst_85 {dimension_numbers = #tpu.dot_dimension_numbers<[0], [2], [2], [1], [0, 1, 0, 2, 1, 1], [1], [0]>} : vector<128x4x8xf32>, vector<4x8x128xf32>, vector<4x8x8xf32> -> vector<4x8x8xf32>
    %206 = tpu.transpose %205, [2, 0, 1] : vector<4x8x8xf32> -> vector<8x4x8xf32>
    "tpu.trace_stop"() : () -> ()
    %207 = vector.shape_cast %206 : vector<8x4x8xf32> to vector<8x32xf32>
    %cst_86 = arith.constant dense<0.000000e+00> : vector<8x32xf32>
    %208 = tpu.matmul %207, %112, %cst_86 {dimension_numbers = #tpu.dot_dimension_numbers<[1], [0], [0], [1], [0, 0, 1, 1], [], []>} : vector<8x32xf32>, vector<32x32xf32>, vector<8x32xf32> -> vector<8x32xf32>
    %209 = vector.broadcast %125 : vector<1x32xf32> to vector<8x32xf32>
    %210 = arith.addf %208, %209 : vector<8x32xf32>
    %211 = arith.addf %180, %210 : vector<8x32xf32>
    %cst_87 = arith.constant dense<0.000000e+00> : vector<8xf32>
    %212 = vector.multi_reduction <add>, %211, %cst_87 [1] : vector<8x32xf32> to vector<8xf32>
    %213 = vector.shape_cast %212 : vector<8xf32> to vector<8x1xf32>
    %cst_88 = arith.constant 3.200000e+01 : f32
    %214 = vector.broadcast %cst_88 : f32 to vector<8x1xf32>
    %215 = arith.divf %213, %214 : vector<8x1xf32>
    %216 = vector.broadcast %215 : vector<8x1xf32> to vector<8x32xf32>
    %217 = arith.subf %211, %216 : vector<8x32xf32>
    %218 = arith.mulf %217, %217 : vector<8x32xf32>
    %cst_89 = arith.constant dense<0.000000e+00> : vector<8xf32>
    %219 = vector.multi_reduction <add>, %218, %cst_89 [1] : vector<8x32xf32> to vector<8xf32>
    %220 = vector.shape_cast %219 : vector<8xf32> to vector<8x1xf32>
    %cst_90 = arith.constant 3.200000e+01 : f32
    %221 = vector.broadcast %cst_90 : f32 to vector<8x1xf32>
    %222 = arith.divf %220, %221 : vector<8x1xf32>
    %cst_91 = arith.constant 9.99999974E-6 : f32
    %223 = vector.broadcast %cst_91 : f32 to vector<8x1xf32>
    %224 = arith.addf %222, %223 : vector<8x1xf32>
    %225 = math.rsqrt %224 : vector<8x1xf32>
    %226 = vector.broadcast %225 : vector<8x1xf32> to vector<8x32xf32>
    %227 = arith.mulf %217, %226 : vector<8x32xf32>
    %228 = vector.broadcast %126 : vector<1x32xf32> to vector<8x32xf32>
    %229 = arith.mulf %227, %228 : vector<8x32xf32>
    %230 = vector.broadcast %127 : vector<1x32xf32> to vector<8x32xf32>
    %231 = arith.addf %229, %230 : vector<8x32xf32>
    %cst_92 = arith.constant dense<0.000000e+00> : vector<8x64xf32>
    %232 = tpu.matmul %231, %114, %cst_92 {dimension_numbers = #tpu.dot_dimension_numbers<[1], [0], [0], [1], [0, 0, 1, 1], [], []>} : vector<8x32xf32>, vector<32x64xf32>, vector<8x64xf32> -> vector<8x64xf32>
    %233 = vector.broadcast %128 : vector<1x64xf32> to vector<8x64xf32>
    %234 = arith.addf %232, %233 : vector<8x64xf32>
    %cst_93 = arith.constant 0.000000e+00 : f32
    %235 = vector.broadcast %cst_93 : f32 to vector<8x64xf32>
    %236 = arith.maximumf %234, %235 : vector<8x64xf32>
    %cst_94 = arith.constant dense<0.000000e+00> : vector<8x32xf32>
    %237 = tpu.matmul %236, %116, %cst_94 {dimension_numbers = #tpu.dot_dimension_numbers<[1], [0], [0], [1], [0, 0, 1, 1], [], []>} : vector<8x64xf32>, vector<64x32xf32>, vector<8x32xf32> -> vector<8x32xf32>
    %238 = vector.broadcast %129 : vector<1x32xf32> to vector<8x32xf32>
    %239 = arith.addf %237, %238 : vector<8x32xf32>
    %240 = arith.addf %231, %239 : vector<8x32xf32>
    %cst_95 = arith.constant dense<0.000000e+00> : vector<8xf32>
    %241 = vector.multi_reduction <add>, %240, %cst_95 [1] : vector<8x32xf32> to vector<8xf32>
    %242 = vector.shape_cast %241 : vector<8xf32> to vector<8x1xf32>
    %cst_96 = arith.constant 3.200000e+01 : f32
    %243 = vector.broadcast %cst_96 : f32 to vector<8x1xf32>
    %244 = arith.divf %242, %243 : vector<8x1xf32>
    %245 = vector.broadcast %244 : vector<8x1xf32> to vector<8x32xf32>
    %246 = arith.subf %240, %245 : vector<8x32xf32>
    %247 = arith.mulf %246, %246 : vector<8x32xf32>
    %cst_97 = arith.constant dense<0.000000e+00> : vector<8xf32>
    %248 = vector.multi_reduction <add>, %247, %cst_97 [1] : vector<8x32xf32> to vector<8xf32>
    %249 = vector.shape_cast %248 : vector<8xf32> to vector<8x1xf32>
    %cst_98 = arith.constant 3.200000e+01 : f32
    %250 = vector.broadcast %cst_98 : f32 to vector<8x1xf32>
    %251 = arith.divf %249, %250 : vector<8x1xf32>
    %cst_99 = arith.constant 9.99999974E-6 : f32
    %252 = vector.broadcast %cst_99 : f32 to vector<8x1xf32>
    %253 = arith.addf %251, %252 : vector<8x1xf32>
    %254 = math.rsqrt %253 : vector<8x1xf32>
    %255 = vector.broadcast %254 : vector<8x1xf32> to vector<8x32xf32>
    %256 = arith.mulf %246, %255 : vector<8x32xf32>
    %257 = vector.broadcast %130 : vector<1x32xf32> to vector<8x32xf32>
    %258 = arith.mulf %256, %257 : vector<8x32xf32>
    %259 = vector.broadcast %131 : vector<1x32xf32> to vector<8x32xf32>
    %260 = arith.addf %258, %259 : vector<8x32xf32>
    %c0_100 = arith.constant 0 : index
    %c0_101 = arith.constant 0 : index
    %261 = vector.load %arg26[%c0_100, %c0_101] : memref<8x128xf32, #tpu.memory_space<vmem>>, vector<8x128xf32>
    %262 = vector.extract_strided_slice %261 {offsets = [0, 0], sizes = [1, 128], strides = [1, 1]} : vector<8x128xf32> to vector<1x128xf32>
    %263 = vector.extract_strided_slice %261 {offsets = [1, 0], sizes = [1, 32], strides = [1, 1]} : vector<8x128xf32> to vector<1x32xf32>
    %264 = vector.extract_strided_slice %261 {offsets = [2, 0], sizes = [1, 128], strides = [1, 1]} : vector<8x128xf32> to vector<1x128xf32>
    %c0_102 = arith.constant 0 : index
    %c0_103 = arith.constant 0 : index
    %265 = vector.load %arg18[%c0_102, %c0_103] : memref<32x128xf32, #tpu.memory_space<vmem>>, vector<32x128xf32>
    %cst_104 = arith.constant dense<0.000000e+00> : vector<8x128xf32>
    %266 = tpu.matmul %260, %265, %cst_104 {dimension_numbers = #tpu.dot_dimension_numbers<[1], [0], [0], [1], [0, 0, 1, 1], [], []>} : vector<8x32xf32>, vector<32x128xf32>, vector<8x128xf32> -> vector<8x128xf32>
    %267 = vector.broadcast %262 : vector<1x128xf32> to vector<8x128xf32>
    %268 = arith.addf %266, %267 : vector<8x128xf32>
    %c0_105 = arith.constant 0 : index
    %c0_106 = arith.constant 0 : index
    %c0_107 = arith.constant 0 : index
    %269 = vector.load %arg27[%c0_105, %c0_106, %c0_107] : memref<1x8x128xf32, #tpu.memory_space<vmem>>, vector<1x8x128xf32>
    %270 = vector.shape_cast %269 : vector<1x8x128xf32> to vector<8x128xf32>
    %271 = vector.shape_cast %268 : vector<8x128xf32> to vector<1x8x128xf32>
    tpu.vector_store %arg27[%c0_105, %c0_106, %c0_107], %271 {strides = array<i32>} : memref<1x8x128xf32, #tpu.memory_space<vmem>>, vector<1x8x128xf32>,
    %c0_108 = arith.constant 0 : index
    %c0_109 = arith.constant 0 : index
    %272 = vector.load %arg19[%c0_108, %c0_109] : memref<128x32xf32, #tpu.memory_space<vmem>>, vector<128x32xf32>
    %cst_110 = arith.constant dense<0.000000e+00> : vector<8x32xf32>
    %273 = tpu.matmul %268, %272, %cst_110 {dimension_numbers = #tpu.dot_dimension_numbers<[1], [0], [0], [1], [0, 0, 1, 1], [], []>} : vector<8x128xf32>, vector<128x32xf32>, vector<8x32xf32> -> vector<8x32xf32>
    %274 = vector.broadcast %263 : vector<1x32xf32> to vector<8x32xf32>
    %275 = arith.addf %273, %274 : vector<8x32xf32>
    %c0_111 = arith.constant 0 : index
    %c0_112 = arith.constant 0 : index
    %c0_113 = arith.constant 0 : index
    %276 = vector.load %arg20[%c0_111, %c0_112, %c0_113] : memref<1x32x96xf32, #tpu.memory_space<vmem>>, vector<1x32x96xf32>
    %277 = vector.shape_cast %276 : vector<1x32x96xf32> to vector<32x96xf32>
    %c0_114 = arith.constant 0 : index
    %c0_115 = arith.constant 0 : index
    %c0_116 = arith.constant 0 : index
    %278 = vector.load %arg21[%c0_114, %c0_115, %c0_116] : memref<1x32x32xf32, #tpu.memory_space<vmem>>, vector<1x32x32xf32>
    %279 = vector.shape_cast %278 : vector<1x32x32xf32> to vector<32x32xf32>
    %c0_117 = arith.constant 0 : index
    %c0_118 = arith.constant 0 : index
    %c0_119 = arith.constant 0 : index
    %280 = vector.load %arg22[%c0_117, %c0_118, %c0_119] : memref<1x32x64xf32, #tpu.memory_space<vmem>>, vector<1x32x64xf32>
    %281 = vector.shape_cast %280 : vector<1x32x64xf32> to vector<32x64xf32>
    %c0_120 = arith.constant 0 : index
    %c0_121 = arith.constant 0 : index
    %c0_122 = arith.constant 0 : index
    %282 = vector.load %arg23[%c0_120, %c0_121, %c0_122] : memref<1x64x32xf32, #tpu.memory_space<vmem>>, vector<1x64x32xf32>
    %283 = vector.shape_cast %282 : vector<1x64x32xf32> to vector<64x32xf32>
    %c0_123 = arith.constant 0 : index
    %c0_124 = arith.constant 0 : index
    %c0_125 = arith.constant 0 : index
    %284 = vector.load %arg24[%c0_123, %c0_124, %c0_125] : memref<1x8x128xf32, #tpu.memory_space<vmem>>, vector<1x8x128xf32>
    %285 = vector.shape_cast %284 : vector<1x8x128xf32> to vector<8x128xf32>
    %286 = vector.extract_strided_slice %285 {offsets = [0, 0], sizes = [1, 96], strides = [1, 1]} : vector<8x128xf32> to vector<1x96xf32>
    %287 = vector.extract_strided_slice %285 {offsets = [1, 0], sizes = [1, 32], strides = [1, 1]} : vector<8x128xf32> to vector<1x32xf32>
    %288 = vector.extract_strided_slice %285 {offsets = [2, 0], sizes = [1, 32], strides = [1, 1]} : vector<8x128xf32> to vector<1x32xf32>
    %289 = vector.extract_strided_slice %285 {offsets = [3, 0], sizes = [1, 32], strides = [1, 1]} : vector<8x128xf32> to vector<1x32xf32>
    %290 = vector.extract_strided_slice %285 {offsets = [4, 0], sizes = [1, 64], strides = [1, 1]} : vector<8x128xf32> to vector<1x64xf32>
    %291 = vector.extract_strided_slice %285 {offsets = [5, 0], sizes = [1, 32], strides = [1, 1]} : vector<8x128xf32> to vector<1x32xf32>
    %292 = vector.extract_strided_slice %285 {offsets = [6, 0], sizes = [1, 32], strides = [1, 1]} : vector<8x128xf32> to vector<1x32xf32>
    %293 = vector.extract_strided_slice %285 {offsets = [7, 0], sizes = [1, 32], strides = [1, 1]} : vector<8x128xf32> to vector<1x32xf32>
    %cst_126 = arith.constant dense<0.000000e+00> : vector<8x96xf32>
    %294 = tpu.matmul %275, %277, %cst_126 {dimension_numbers = #tpu.dot_dimension_numbers<[1], [0], [0], [1], [0, 0, 1, 1], [], []>} : vector<8x32xf32>, vector<32x96xf32>, vector<8x96xf32> -> vector<8x96xf32>
    %295 = vector.broadcast %286 : vector<1x96xf32> to vector<8x96xf32>
    %296 = arith.addf %294, %295 : vector<8x96xf32>
    %297 = vector.extract_strided_slice %296 {offsets = [0, 0], sizes = [8, 32], strides = [1, 1]} : vector<8x96xf32> to vector<8x32xf32>
    %298 = vector.extract_strided_slice %296 {offsets = [0, 32], sizes = [8, 32], strides = [1, 1]} : vector<8x96xf32> to vector<8x32xf32>
    %299 = vector.extract_strided_slice %296 {offsets = [0, 64], sizes = [8, 32], strides = [1, 1]} : vector<8x96xf32> to vector<8x32xf32>
    %300 = vector.shape_cast %297 : vector<8x32xf32> to vector<8x4x8xf32>
    %301 = vector.shape_cast %298 : vector<8x32xf32> to vector<8x4x8xf32>
    %302 = vector.shape_cast %299 : vector<8x32xf32> to vector<8x4x8xf32>
    "tpu.trace_start"() <{level = 10 : i32, message = "qhd,khd->hqk"}> : () -> ()
    %cst_127 = arith.constant dense<0.000000e+00> : vector<4x8x8xf32>
    %303 = tpu.matmul %300, %301, %cst_127 {dimension_numbers = #tpu.dot_dimension_numbers<[2], [2], [0], [0], [0, 1, 0, 0, 1, 0], [1], [1]>} : vector<8x4x8xf32>, vector<8x4x8xf32>, vector<4x8x8xf32> -> vector<4x8x8xf32>
    "tpu.trace_stop"() : () -> ()
    %cst_128 = arith.constant 0.353553385 : f32
    %304 = vector.broadcast %cst_128 : f32 to vector<4x8x8xf32>
    %305 = arith.mulf %303, %304 : vector<4x8x8xf32>
    %cst_129 = arith.constant dense<0xFF800000> : vector<4x8xf32>
    %306 = vector.multi_reduction <maximumf>, %305, %cst_129 [2] : vector<4x8x8xf32> to vector<4x8xf32>
    %307 = vector.shape_cast %306 : vector<4x8xf32> to vector<4x8x1xf32>
    %308 = vector.broadcast %307 : vector<4x8x1xf32> to vector<4x8x8xf32>
    %309 = arith.subf %305, %308 : vector<4x8x8xf32>
    %310 = math.exp %309 : vector<4x8x8xf32>
    %cst_130 = arith.constant dense<0.000000e+00> : vector<4x8xf32>
    %311 = vector.multi_reduction <add>, %310, %cst_130 [2] : vector<4x8x8xf32> to vector<4x8xf32>
    %312 = vector.shape_cast %311 : vector<4x8xf32> to vector<4x8x1xf32>
    %313 = tpu.reciprocal %312 {approx = true} : vector<4x8x1xf32> -> vector<4x8x1xf32>
    %314 = vector.broadcast %313 : vector<4x8x1xf32> to vector<4x8x8xf32>
    %315 = arith.mulf %310, %314 : vector<4x8x8xf32>
    "tpu.trace_start"() <{level = 10 : i32, message = "hqk,khd->qhd"}> : () -> ()
    %cst_131 = arith.constant dense<0.000000e+00> : vector<4x8x8xf32>
    %316 = tpu.matmul %302, %315, %cst_131 {dimension_numbers = #tpu.dot_dimension_numbers<[0], [2], [2], [1], [0, 1, 0, 2, 1, 1], [1], [0]>} : vector<8x4x8xf32>, vector<4x8x8xf32>, vector<4x8x8xf32> -> vector<4x8x8xf32>
    %317 = tpu.transpose %316, [2, 0, 1] : vector<4x8x8xf32> -> vector<8x4x8xf32>
    "tpu.trace_stop"() : () -> ()
    %318 = vector.shape_cast %317 : vector<8x4x8xf32> to vector<8x32xf32>
    %cst_132 = arith.constant dense<0.000000e+00> : vector<8x32xf32>
    %319 = tpu.matmul %318, %279, %cst_132 {dimension_numbers = #tpu.dot_dimension_numbers<[1], [0], [0], [1], [0, 0, 1, 1], [], []>} : vector<8x32xf32>, vector<32x32xf32>, vector<8x32xf32> -> vector<8x32xf32>
    %320 = vector.broadcast %287 : vector<1x32xf32> to vector<8x32xf32>
    %321 = arith.addf %319, %320 : vector<8x32xf32>
    %322 = arith.addf %275, %321 : vector<8x32xf32>
    %cst_133 = arith.constant dense<0.000000e+00> : vector<8xf32>
    %323 = vector.multi_reduction <add>, %322, %cst_133 [1] : vector<8x32xf32> to vector<8xf32>
    %324 = vector.shape_cast %323 : vector<8xf32> to vector<8x1xf32>
    %cst_134 = arith.constant 3.200000e+01 : f32
    %325 = vector.broadcast %cst_134 : f32 to vector<8x1xf32>
    %326 = arith.divf %324, %325 : vector<8x1xf32>
    %327 = vector.broadcast %326 : vector<8x1xf32> to vector<8x32xf32>
    %328 = arith.subf %322, %327 : vector<8x32xf32>
    %329 = arith.mulf %328, %328 : vector<8x32xf32>
    %cst_135 = arith.constant dense<0.000000e+00> : vector<8xf32>
    %330 = vector.multi_reduction <add>, %329, %cst_135 [1] : vector<8x32xf32> to vector<8xf32>
    %331 = vector.shape_cast %330 : vector<8xf32> to vector<8x1xf32>
    %cst_136 = arith.constant 3.200000e+01 : f32
    %332 = vector.broadcast %cst_136 : f32 to vector<8x1xf32>
    %333 = arith.divf %331, %332 : vector<8x1xf32>
    %cst_137 = arith.constant 9.99999974E-6 : f32
    %334 = vector.broadcast %cst_137 : f32 to vector<8x1xf32>
    %335 = arith.addf %333, %334 : vector<8x1xf32>
    %336 = math.rsqrt %335 : vector<8x1xf32>
    %337 = vector.broadcast %336 : vector<8x1xf32> to vector<8x32xf32>
    %338 = arith.mulf %328, %337 : vector<8x32xf32>
    %339 = vector.broadcast %288 : vector<1x32xf32> to vector<8x32xf32>
    %340 = arith.mulf %338, %339 : vector<8x32xf32>
    %341 = vector.broadcast %289 : vector<1x32xf32> to vector<8x32xf32>
    %342 = arith.addf %340, %341 : vector<8x32xf32>
    %cst_138 = arith.constant dense<0.000000e+00> : vector<8x64xf32>
    %343 = tpu.matmul %342, %281, %cst_138 {dimension_numbers = #tpu.dot_dimension_numbers<[1], [0], [0], [1], [0, 0, 1, 1], [], []>} : vector<8x32xf32>, vector<32x64xf32>, vector<8x64xf32> -> vector<8x64xf32>
    %344 = vector.broadcast %290 : vector<1x64xf32> to vector<8x64xf32>
    %345 = arith.addf %343, %344 : vector<8x64xf32>
    %cst_139 = arith.constant 0.000000e+00 : f32
    %346 = vector.broadcast %cst_139 : f32 to vector<8x64xf32>
    %347 = arith.maximumf %345, %346 : vector<8x64xf32>
    %cst_140 = arith.constant dense<0.000000e+00> : vector<8x32xf32>
    %348 = tpu.matmul %347, %283, %cst_140 {dimension_numbers = #tpu.dot_dimension_numbers<[1], [0], [0], [1], [0, 0, 1, 1], [], []>} : vector<8x64xf32>, vector<64x32xf32>, vector<8x32xf32> -> vector<8x32xf32>
    %349 = vector.broadcast %291 : vector<1x32xf32> to vector<8x32xf32>
    %350 = arith.addf %348, %349 : vector<8x32xf32>
    %351 = arith.addf %342, %350 : vector<8x32xf32>
    %cst_141 = arith.constant dense<0.000000e+00> : vector<8xf32>
    %352 = vector.multi_reduction <add>, %351, %cst_141 [1] : vector<8x32xf32> to vector<8xf32>
    %353 = vector.shape_cast %352 : vector<8xf32> to vector<8x1xf32>
    %cst_142 = arith.constant 3.200000e+01 : f32
    %354 = vector.broadcast %cst_142 : f32 to vector<8x1xf32>
    %355 = arith.divf %353, %354 : vector<8x1xf32>
    %356 = vector.broadcast %355 : vector<8x1xf32> to vector<8x32xf32>
    %357 = arith.subf %351, %356 : vector<8x32xf32>
    %358 = arith.mulf %357, %357 : vector<8x32xf32>
    %cst_143 = arith.constant dense<0.000000e+00> : vector<8xf32>
    %359 = vector.multi_reduction <add>, %358, %cst_143 [1] : vector<8x32xf32> to vector<8xf32>
    %360 = vector.shape_cast %359 : vector<8xf32> to vector<8x1xf32>
    %cst_144 = arith.constant 3.200000e+01 : f32
    %361 = vector.broadcast %cst_144 : f32 to vector<8x1xf32>
    %362 = arith.divf %360, %361 : vector<8x1xf32>
    %cst_145 = arith.constant 9.99999974E-6 : f32
    %363 = vector.broadcast %cst_145 : f32 to vector<8x1xf32>
    %364 = arith.addf %362, %363 : vector<8x1xf32>
    %365 = math.rsqrt %364 : vector<8x1xf32>
    %366 = vector.broadcast %365 : vector<8x1xf32> to vector<8x32xf32>
    %367 = arith.mulf %357, %366 : vector<8x32xf32>
    %368 = vector.broadcast %292 : vector<1x32xf32> to vector<8x32xf32>
    %369 = arith.mulf %367, %368 : vector<8x32xf32>
    %370 = vector.broadcast %293 : vector<1x32xf32> to vector<8x32xf32>
    %371 = arith.addf %369, %370 : vector<8x32xf32>
    %c0_146 = arith.constant 0 : index
    %c0_147 = arith.constant 0 : index
    %372 = vector.load %arg25[%c0_146, %c0_147] : memref<32x128xf32, #tpu.memory_space<vmem>>, vector<32x128xf32>
    %cst_148 = arith.constant dense<0.000000e+00> : vector<8x128xf32>
    %373 = tpu.matmul %371, %372, %cst_148 {dimension_numbers = #tpu.dot_dimension_numbers<[1], [0], [0], [1], [0, 0, 1, 1], [], []>} : vector<8x32xf32>, vector<32x128xf32>, vector<8x128xf32> -> vector<8x128xf32>
    %374 = vector.broadcast %264 : vector<1x128xf32> to vector<8x128xf32>
    %375 = arith.addf %373, %374 : vector<8x128xf32>
    %c0_149 = arith.constant 0 : index
    %c0_150 = arith.constant 0 : index
    %c0_151 = arith.constant 0 : index
    %376 = vector.load %arg28[%c0_149, %c0_150, %c0_151] : memref<1x8x128xf32, #tpu.memory_space<vmem>>, vector<1x8x128xf32>
    %377 = vector.shape_cast %376 : vector<1x8x128xf32> to vector<8x128xf32>
    %378 = vector.shape_cast %375 : vector<8x128xf32> to vector<1x8x128xf32>
    tpu.vector_store %arg28[%c0_149, %c0_150, %c0_151], %378 {strides = array<i32>} : memref<1x8x128xf32, #tpu.memory_space<vmem>>, vector<1x8x128xf32>,
    return
  }
  func.func @transform_0(%arg0: i32) -> (i32, i32, i32) {
    %c0_i32 = arith.constant 0 : i32
    %c0_i32_0 = arith.constant 0 : i32
    %c0_i32_1 = arith.constant 0 : i32
    return %arg0, %c0_i32, %c0_i32_0 : i32, i32, i32
  }
  func.func @transform_1(%arg0: i32) -> (i32, i32) {
    %c0_i32 = arith.constant 0 : i32
    %c0_i32_0 = arith.constant 0 : i32
    %c0_i32_1 = arith.constant 0 : i32
    return %c0_i32, %c0_i32_0 : i32, i32
  }
  func.func @transform_2(%arg0: i32) -> (i32, i32) {
    %c0_i32 = arith.constant 0 : i32
    %c0_i32_0 = arith.constant 0 : i32
    %c0_i32_1 = arith.constant 0 : i32
    return %c0_i32, %c0_i32_0 : i32, i32
  }
  func.func @transform_3(%arg0: i32) -> (i32, i32) {
    %c0_i32 = arith.constant 0 : i32
    %c0_i32_0 = arith.constant 0 : i32
    %c0_i32_1 = arith.constant 0 : i32
    return %c0_i32, %c0_i32_0 : i32, i32
  }
  func.func @transform_4(%arg0: i32) -> (i32, i32, i32) {
    %c0_i32 = arith.constant 0 : i32
    %c0_i32_0 = arith.constant 0 : i32
    %c0_i32_1 = arith.constant 0 : i32
    %c0_i32_2 = arith.constant 0 : i32
    return %c0_i32, %c0_i32_0, %c0_i32_1 : i32, i32, i32
  }
  func.func @transform_5(%arg0: i32) -> (i32, i32, i32) {
    %c0_i32 = arith.constant 0 : i32
    %c0_i32_0 = arith.constant 0 : i32
    %c0_i32_1 = arith.constant 0 : i32
    %c0_i32_2 = arith.constant 0 : i32
    return %c0_i32, %c0_i32_0, %c0_i32_1 : i32, i32, i32
  }
  func.func @transform_6(%arg0: i32) -> (i32, i32, i32) {
    %c0_i32 = arith.constant 0 : i32
    %c0_i32_0 = arith.constant 0 : i32
    %c0_i32_1 = arith.constant 0 : i32
    %c0_i32_2 = arith.constant 0 : i32
    return %c0_i32, %c0_i32_0, %c0_i32_1 : i32, i32, i32
  }
  func.func @transform_7(%arg0: i32) -> (i32, i32, i32) {
    %c0_i32 = arith.constant 0 : i32
    %c0_i32_0 = arith.constant 0 : i32
    %c0_i32_1 = arith.constant 0 : i32
    %c0_i32_2 = arith.constant 0 : i32
    return %c0_i32, %c0_i32_0, %c0_i32_1 : i32, i32, i32
  }
  func.func @transform_8(%arg0: i32) -> (i32, i32, i32) {
    %c0_i32 = arith.constant 0 : i32
    %c0_i32_0 = arith.constant 0 : i32
    %c0_i32_1 = arith.constant 0 : i32
    %c0_i32_2 = arith.constant 0 : i32
    return %c0_i32, %c0_i32_0, %c0_i32_1 : i32, i32, i32
  }
  func.func @transform_9(%arg0: i32) -> (i32, i32, i32) {
    %c0_i32 = arith.constant 0 : i32
    %c0_i32_0 = arith.constant 0 : i32
    %c0_i32_1 = arith.constant 0 : i32
    %c0_i32_2 = arith.constant 0 : i32
    return %c0_i32, %c0_i32_0, %c0_i32_1 : i32, i32, i32
  }
  func.func @transform_10(%arg0: i32) -> (i32, i32, i32) {
    %c0_i32 = arith.constant 0 : i32
    %c0_i32_0 = arith.constant 0 : i32
    %c0_i32_1 = arith.constant 0 : i32
    %c0_i32_2 = arith.constant 0 : i32
    return %c0_i32, %c0_i32_0, %c0_i32_1 : i32, i32, i32
  }
  func.func @transform_11(%arg0: i32) -> (i32, i32, i32) {
    %c0_i32 = arith.constant 0 : i32
    %c0_i32_0 = arith.constant 0 : i32
    %c0_i32_1 = arith.constant 0 : i32
    %c0_i32_2 = arith.constant 0 : i32
    return %c0_i32, %c0_i32_0, %c0_i32_1 : i32, i32, i32
  }
  func.func @transform_12(%arg0: i32) -> (i32, i32, i32) {
    %c0_i32 = arith.constant 0 : i32
    %c0_i32_0 = arith.constant 0 : i32
    %c0_i32_1 = arith.constant 0 : i32
    %c0_i32_2 = arith.constant 0 : i32
    return %c0_i32, %c0_i32_0, %c0_i32_1 : i32, i32, i32
  }
  func.func @transform_13(%arg0: i32) -> (i32, i32, i32) {
    %c0_i32 = arith.constant 0 : i32
    %c0_i32_0 = arith.constant 0 : i32
    %c0_i32_1 = arith.constant 0 : i32
    %c0_i32_2 = arith.constant 0 : i32
    return %c0_i32, %c0_i32_0, %c0_i32_1 : i32, i32, i32
  }
  func.func @transform_14(%arg0: i32) -> (i32, i32, i32) {
    %c0_i32 = arith.constant 0 : i32
    %c0_i32_0 = arith.constant 0 : i32
    %c0_i32_1 = arith.constant 0 : i32
    %c0_i32_2 = arith.constant 0 : i32
    return %c0_i32, %c0_i32_0, %c0_i32_1 : i32, i32, i32
  }
  func.func @transform_15(%arg0: i32) -> (i32, i32, i32) {
    %c0_i32 = arith.constant 0 : i32
    %c0_i32_0 = arith.constant 0 : i32
    %c0_i32_1 = arith.constant 0 : i32
    %c0_i32_2 = arith.constant 0 : i32
    return %c0_i32, %c0_i32_0, %c0_i32_1 : i32, i32, i32
  }
  func.func @transform_16(%arg0: i32) -> (i32, i32, i32) {
    %c0_i32 = arith.constant 0 : i32
    %c0_i32_0 = arith.constant 0 : i32
    %c0_i32_1 = arith.constant 0 : i32
    %c0_i32_2 = arith.constant 0 : i32
    return %c0_i32, %c0_i32_0, %c0_i32_1 : i32, i32, i32
  }
  func.func @transform_17(%arg0: i32) -> (i32, i32) {
    %c0_i32 = arith.constant 0 : i32
    %c0_i32_0 = arith.constant 0 : i32
    %c0_i32_1 = arith.constant 0 : i32
    return %c0_i32, %c0_i32_0 : i32, i32
  }
  func.func @transform_18(%arg0: i32) -> (i32, i32) {
    %c0_i32 = arith.constant 0 : i32
    %c0_i32_0 = arith.constant 0 : i32
    %c0_i32_1 = arith.constant 0 : i32
    return %c0_i32, %c0_i32_0 : i32, i32
  }
  func.func @transform_19(%arg0: i32) -> (i32, i32, i32) {
    %c0_i32 = arith.constant 0 : i32
    %c0_i32_0 = arith.constant 0 : i32
    %c0_i32_1 = arith.constant 0 : i32
    %c0_i32_2 = arith.constant 0 : i32
    return %c0_i32, %c0_i32_0, %c0_i32_1 : i32, i32, i32
  }
  func.func @transform_20(%arg0: i32) -> (i32, i32, i32) {
    %c0_i32 = arith.constant 0 : i32
    %c0_i32_0 = arith.constant 0 : i32
    %c0_i32_1 = arith.constant 0 : i32
    %c0_i32_2 = arith.constant 0 : i32
    return %c0_i32, %c0_i32_0, %c0_i32_1 : i32, i32, i32
  }
  func.func @transform_21(%arg0: i32) -> (i32, i32, i32) {
    %c0_i32 = arith.constant 0 : i32
    %c0_i32_0 = arith.constant 0 : i32
    %c0_i32_1 = arith.constant 0 : i32
    %c0_i32_2 = arith.constant 0 : i32
    return %c0_i32, %c0_i32_0, %c0_i32_1 : i32, i32, i32
  }
  func.func @transform_22(%arg0: i32) -> (i32, i32, i32) {
    %c0_i32 = arith.constant 0 : i32
    %c0_i32_0 = arith.constant 0 : i32
    %c0_i32_1 = arith.constant 0 : i32
    %c0_i32_2 = arith.constant 0 : i32
    return %c0_i32, %c0_i32_0, %c0_i32_1 : i32, i32, i32
  }
  func.func @transform_23(%arg0: i32) -> (i32, i32, i32) {
    %c0_i32 = arith.constant 0 : i32
    %c0_i32_0 = arith.constant 0 : i32
    %c0_i32_1 = arith.constant 0 : i32
    %c0_i32_2 = arith.constant 0 : i32
    return %c0_i32, %c0_i32_0, %c0_i32_1 : i32, i32, i32
  }
  func.func @transform_24(%arg0: i32) -> (i32, i32) {
    %c0_i32 = arith.constant 0 : i32
    %c0_i32_0 = arith.constant 0 : i32
    %c0_i32_1 = arith.constant 0 : i32
    return %c0_i32, %c0_i32_0 : i32, i32
  }
  func.func @transform_25(%arg0: i32) -> (i32, i32) {
    %c0_i32 = arith.constant 0 : i32
    %c0_i32_0 = arith.constant 0 : i32
    %c0_i32_1 = arith.constant 0 : i32
    return %c0_i32, %c0_i32_0 : i32, i32
  }
  func.func @transform_26(%arg0: i32) -> (i32, i32, i32) {
    %c0_i32 = arith.constant 0 : i32
    %c0_i32_0 = arith.constant 0 : i32
    %c0_i32_1 = arith.constant 0 : i32
    return %arg0, %c0_i32, %c0_i32_0 : i32, i32, i32
  }
  func.func @transform_27(%arg0: i32) -> (i32, i32, i32) {
    %c0_i32 = arith.constant 0 : i32
    %c0_i32_0 = arith.constant 0 : i32
    %c0_i32_1 = arith.constant 0 : i32
    return %arg0, %c0_i32, %c0_i32_0 : i32, i32, i32
  }
}

</mosaic_0001>

<bundles_post_ra>
// kernel: i2c2w_forward.1
= control target key start
LH: loop header
LB: loop body
LE: loop exit
PB: predicated region body
PF: predicated region fallthrough
CT: control target
= control target key end

     0   :  { %s20066_s0 = inlined_call_operand.vmem [shape: f32[2,128,3], index: 0, kind: input, shape index: {}]   ;;  %s20067_s1 = inlined_call_operand.vmem [shape: f32[3,32], index: 1, kind: input, shape index: {}]   ;;  %s20068_s2 = inlined_call_operand.vmem [shape: f32[128,32], index: 2, kind: input, shape index: {}]   ;;  %s20069_s3 = inlined_call_operand.vmem [shape: f32[8,32], index: 3, kind: input, shape index: {}]   ;;  %s20070_s4 = inlined_call_operand.vmem [shape: f32[1,32,96], index: 4, kind: input, shape index: {}]   ;;  %s20071_s5 = inlined_call_operand.vmem [shape: f32[1,32,32], index: 5, kind: input, shape index: {}]   ;;  %s20072_s6 = inlined_call_operand.vmem [shape: f32[1,32,64], index: 6, kind: input, shape index: {}]   ;;  %s20073_s7 = inlined_call_operand.vmem [shape: f32[1,64,32], index: 7, kind: input, shape index: {}]   ;;  %s20074_s8 = inlined_call_operand.vmem [shape: f32[1,8,128], index: 8, kind: input, shape index: {}]   ;;  %s20075_s9 = inlined_call_operand.vmem [shape: f32[1,32,96], index: 9, kind: input, shape index: {}]   ;;  %s20076_s10 = inlined_call_operand.vmem [shape: f32[1,32,32], index: 10, kind: input, shape index: {}]   ;;  %s20077_s11 = inlined_call_operand.vmem [shape: f32[1,32,32], index: 11, kind: input, shape index: {}]   ;;  %s20078_s12 = inlined_call_operand.vmem [shape: f32[1,32,64], index: 12, kind: input, shape index: {}]   ;;  %s20079_s13 = inlined_call_operand.vmem [shape: f32[1,32,32], index: 13, kind: input, shape index: {}]   ;;  %s20080_s14 = inlined_call_operand.vmem [shape: f32[1,32,64], index: 14, kind: input, shape index: {}]   ;;  %s20081_s15 = inlined_call_operand.vmem [shape: f32[1,64,32], index: 15, kind: input, shape index: {}]   ;;  %s20082_s16 = inlined_call_operand.vmem [shape: f32[1,16,128], index: 16, kind: input, shape index: {}]   ;;  %s20083_s17 = inlined_call_operand.vmem [shape: f32[32,128], index: 17, kind: input, shape index: {}]   ;;  %s20084_s18 = inlined_call_operand.vmem [shape: f32[128,32], index: 18, kind: input, shape index: {}]   ;;  %s20085_s19 = inlined_call_operand.vmem [shape: f32[1,32,96], index: 19, kind: input, shape index: {}]   ;;  %s20086_s20 = inlined_call_operand.vmem [shape: f32[1,32,32], index: 20, kind: input, shape index: {}]   ;;  %s20087_s21 = inlined_call_operand.vmem [shape: f32[1,32,64], index: 21, kind: input, shape index: {}]   ;;  %s20088_s22 = inlined_call_operand.vmem [shape: f32[1,64,32], index: 22, kind: input, shape index: {}]   ;;  %s20089_s23 = inlined_call_operand.vmem [shape: f32[1,8,128], index: 23, kind: input, shape index: {}]   ;;  %s20090_s24 = inlined_call_operand.vmem [shape: f32[32,128], index: 24, kind: input, shape index: {}]   ;;  %s20091_s25 = inlined_call_operand.vmem [shape: f32[8,128], index: 25, kind: input, shape index: {}]   ;;  %s20092_s26 = inlined_call_operand.vmem [shape: f32[2,8,128], index: 26, kind: output, shape index: {0}]   ;;  %s20093_s27 = inlined_call_operand.hbm [shape: f32[2,8,128], index: 27, kind: output, shape index: {1}]  }
   0x1   :  { %20299 = sst [smem:[#allocation112_spill]] %s20066_s0 }
   0x2   :  { %20300 = sst [smem:[#allocation113_spill]] %s20067_s1 }
   0x3   :  { %20301 = sst [smem:[#allocation114_spill]] %s20068_s2 }
   0x4   :  { %20302 = sst [smem:[#allocation115_spill]] %s20069_s3 }
   0x5   :  { %20303 = sst [smem:[#allocation116_spill]] %s20070_s4 }
   0x6   :  { %20304 = sst [smem:[#allocation117_spill]] %s20071_s5 }
   0x7   :  { %20305 = sst [smem:[#allocation118_spill]] %s20072_s6 }
   0x8   :  { %20306 = sst [smem:[#allocation119_spill]] %s20073_s7 }
   0x9   :  { %20307 = sst [smem:[#allocation120_spill]] %s20074_s8 }
   0xa   :  { %20308 = sst [smem:[#allocation121_spill]] %s20075_s9 }
   0xb   :  { %20309 = sst [smem:[#allocation122_spill]] %s20076_s10 }
   0xc   :  { %20310 = sst [smem:[#allocation123_spill]] %s20077_s11 }
   0xd   :  { %20311 = sst [smem:[#allocation124_spill]] %s20090_s24 }
   0xe   :  { %20312 = sst [smem:[#allocation125_spill]] %s20093_s27 }
   0xf   :  { %33 = vsyncpa [#allocation3], 0 }
  0x10   :  { %35 = vsyncpa [#allocation3 + $0x1], 0  ;;  %s15259_s7 = smov 0   ;;  %s15261_s4 = smov 0  }
  0x11   :  { %s15263_s8 = smov 0   ;;  %s15265_s30 = smov 0  }
  0x12 LB: > { %20313 = sst [smem:[#allocation5_spill]] %s15092_s7  ;;  %s15280_s9 = sadd.s32 4294967295, %s15104_s30   ;;  %s15104_s30 = sphi %s15265_s30, %s20695_s30   ;;  %s15100_s8 = sphi %s15263_s8, %s20698_s8   ;;  %s15096_s4 = sphi %s15261_s4, %s20697_s4   ;;  %s15092_s7 = sphi %s15259_s7, %s20696_s7  }
  0x13   : > { %20314 = sst [smem:[#allocation6_spill]] %s15096_s4  ;;  %s12760_s5 = sadd.s32 4294967294, %s15104_s30  }
  0x14   : > { %20315 = sst [smem:[#allocation7_spill]] %s15100_s8  ;;  %s15284_s28 = sadd.s32 1, %s15104_s30  }
  0x15   : > { %20316 = sst [smem:[#allocation8_spill]] %s15104_s30  ;;  %s625_s0 = sadd.s32 1, %s15100_s8 }
  0x16   : > { %20317 = sst [smem:[#allocation9_spill]] %s15280_s9  ;;  %s622_s10 = ssub.s32 %s15104_s30, %s15284_s28 }
  0x17   : > { %20318 = sst [smem:[#allocation10_spill]] %s15284_s28  ;;  %p635_p0 = scmp.ne.s32.totalorder %s15100_s8, %s15096_s4 }
  0x18   : > { %p623_p1 = scmp.eq.s32.totalorder %s622_s10, 0  ;;  %p636_p2 = scmp.eq.s32.totalorder %s15280_s9, 1 }
  0x19   : > { %p641_p3 = scmp.ne.s32.totalorder %s15096_s4, %s15092_s7  ;;  %p642_p4 = scmp.eq.s32.totalorder %s12760_s5, 1 }
  0x1a   : > { %s15295_s29 = scalar_select %p623_p1, %s15100_s8, %s625_s0  }
  0x1b   : > { %p15297_p5 = por %p636_p2, %p635_p0  ;;  %p15301_p6 = por %p642_p4, %p641_p3 }
  0x1c   : > { %20319 = sst [smem:[#allocation11_spill]] %s15295_s29  ;;  %p12763_p7 = scmp.ge.s32.totalorder %s15104_s30, 1 }
  0x1d   : > { %s20320_s1 = scalar_select %p15297_p5, 1, 0 }
  0x1e   : > { %s20322_s6 = scalar_select %p15301_p6, 1, 0 }
  0x1f   : > { %20321 = sst [smem:[#allocation12_spill]] %s20320_s1  ;;  %p743_p8 = scmp.lt.s32.totalorder %s15104_s30, 3 }
  0x20   : > { %20323 = sst [smem:[#allocation13_spill]] %s20322_s6 }
  0x21   : > { %p744_p9 = pnand %p12763_p7, %p743_p8 }
  0x23   : > { %747 = sbr.rel (%p744_p9) target bundleno = 11491 (0x2ce3), region = 124 }
  0x28   : > { %s20324_s3 = sld [smem:[#allocation113_spill]]  ;;  %vm910_vm0 = vcmask 1042432   ;;  %p819_p10 = scmp.lt.s32.totalorder %s15280_s9, 1  ;;  %vm861_vm1 = vcmask 23552   ;;  %vm1084_vm2 = vcmask 261120   ;;  %vm1710_vm3 = vcmask 64512  }
  0x29   : > { %s20325_s10 = sld [smem:[#allocation116_spill]]  ;;  %s20237_s28 = smov 64   ;;  %vm15112_vm4 = vmmov 0   ;;  %vm6171_vm5 = vcmask 130048   ;;  %vm6188_vm6 = vcmask 195584   ;;  %vm6884_vm7 = vcmask 523264  }
  0x2a   : > { %s15315_s29 = scalar_select %p819_p10, %s15280_s9, 1 }
  0x2b   : > { %s20326_s2 = sld [smem:[#allocation112_spill]]  ;;  %s15118_s24 = smov [#allocation2]  }
  0x2c   : > { %s13011_s8 = sshll.u32 %s15315_s29, 7  ;;  %s20327_s7 = sld [smem:[#allocation114_spill]] }
  0x2d   : > { %s20347_s11 = sld [smem:[#allocation120_spill]]  ;;  %s15048_s4 = sshll.u32 %s15118_s24, 4  ;;  %s15049_s4 = int_to_ptr.vmem [resolvable:$false] %s15048_s4 }
  0x2e   : > { %v844_v0 = vld [vmem:[%s20324_s3] sm:$0x7]  ;;  %s20254_s3 = smov 8   ;;  %s20641_s5 = sld [smem:[#allocation118_spill]] }
  0x2f   : > { %v1062_v1 = vld [vmem:[%s20325_s10 + $0x18] sm:$0xff]  ;;  %13402 = vmatprep.subr.msk.mxu0 %vm910_vm0, %v844_v0  ;;  %v1061_v18 = vld [vmem:[%s20325_s10 + $0x10] sm:$0xff]  ;;  %v1060_v19 = vld [vmem:[%s20325_s10 + $0x8] sm:$0xff]  ;;  %s20644_s0 = sld [smem:[#allocation119_spill]] }
  0x30   : > { %13428 = vmatprep.subr.mxu1 %v1062_v1  ;;  %13403 = vmatpush3.msk.msra.mxu0 %vm910_vm0, %v844_v0  ;;  %v1059_v20 = vld [vmem:[%s20325_s10] sm:$0xff]  ;;  %s20663_s1 = sld [smem:[#allocation123_spill]]  ;;  %s12767_s10 = sshll.u32 %s15315_s29, 3 }
  0x31   : > { %13429 = vmatpush3.msra.mxu1 %v1062_v1  ;;  %s15321_s6 = scalar_lea.vmem %s20326_s2, %s13011_s8  ;;  %s20239_s2 = smov 96  }
  0x32   : > { %v828_v2 = vld [vmem:[%s15321_s6] sm:$0xff]  ;;  %v829_v3 = vld [vmem:[%s15321_s6 + $0x8] sm:$0xff]  ;;  %v830_v4 = vld [vmem:[%s15321_s6 + $0x10] sm:$0xff]  ;;  %13430 = vmatprep.subr.mxu1 %v1061_v18  ;;  %s20328_s27 = smov %s20327_s7  ;;  %s20258_s8 = smov 112  }
  0x33   : > { %13404 = vmatprep.mubr.msk.f32.mxu0 %vm861_vm1, %v828_v2  ;;  %v831_v5 = vld [vmem:[%s15321_s6 + $0x18] sm:$0xff]  ;;  %v832_v6 = vld [vmem:[%s15321_s6 + $0x20] sm:$0xff]  ;;  %v833_v7 = vld [vmem:[%s15321_s6 + $0x28] sm:$0xff]  ;;  %13431 = vmatpush3.msra.mxu1 %v1061_v18  ;;  %s827_s30 = scalar_lea.vmem %s20092_s26, %s12767_s10 }
  0x34   : > { %13405 = vmatmul.mubr.msk.f32.vlgmr.msra.gmra.mxu0 %vm861_vm1, %v829_v3  ;;  %v834_v8 = vld [vmem:[%s15321_s6 + $0x30] sm:$0xff]  ;;  %v835_v9 = vld [vmem:[%s15321_s6 + $0x38] sm:$0xff]  ;;  %v836_v10 = vld [vmem:[%s15321_s6 + $0x40] sm:$0xff]  ;;  %13432 = vmatprep.subr.mxu1 %v1060_v19 }
  0x35   : > { %13407 = vmatprep.mubr.msk.f32.mxu0 %vm861_vm1, %v830_v4  ;;  %v837_v11 = vld [vmem:[%s15321_s6 + $0x48] sm:$0xff]  ;;  %v838_v12 = vld [vmem:[%s15321_s6 + $0x50] sm:$0xff]  ;;  %v839_v13 = vld [vmem:[%s15321_s6 + $0x58] sm:$0xff]  ;;  %13433 = vmatpush3.msra.mxu1 %v1060_v19 }
  0x36   : > { %v840_v14 = vld [vmem:[%s15321_s6 + $0x60] sm:$0xff]  ;;  %v841_v15 = vld [vmem:[%s15321_s6 + $0x68] sm:$0xff]  ;;  %v842_v16 = vld [vmem:[%s15321_s6 + $0x70] sm:$0xff]  ;;  %13434 = vmatprep.subr.mxu1 %v1059_v20 }
  0x37   : > { %v843_v17 = vld [vmem:[%s15321_s6 + $0x78] sm:$0xff]  ;;  %13435 = vmatpush3.msra.mxu1 %v1059_v20  ;;  %v845_v22 = vld [vmem:[%s20327_s7] sm:$0xff]  ;;  %v846_v23 = vld [vmem:[%s20328_s27 + $0x8] sm:$0xff]  ;;  %s20241_s7 = smov 104   ;;  %s20243_s6 = smov 120  }
  0x38   : > { %13408 = vmatmul.mubr.msk.f32.gmra.mxu0 %vm861_vm1, %v831_v5  ;;  %v848_v26 = vld [vmem:[%s20328_s27 + $0x18] sm:$0xff]  ;;  %v847_v29 = vld [vmem:[%s20328_s27 + $0x10] sm:$0xff]  ;;  %v850_v33 = vld [vmem:[%s20328_s27 + $0x28] sm:$0xff]  ;;  %v1080_v5 = vlaneseq }
  0x39   : > { %13410 = vmatprep.mubr.msk.f32.mxu0 %vm861_vm1, %v832_v6  ;;  %v849_v35 = vld [vmem:[%s20328_s27 + $0x20] sm:$0xff]  ;;  %v852_v39 = vld [vmem:[%s20328_s27 + $0x38] sm:$0xff]  ;;  %v851_v41 = vld [vmem:[%s20328_s27 + $0x30] sm:$0xff] }
  0x3a   : > { %v854_v45 = vld [vmem:[%s20328_s27 + $0x48] sm:$0xff]  ;;  %v853_v47 = vld [vmem:[%s20328_s27 + $0x40] sm:$0xff]  ;;  %v856_v51 = vld [vmem:[%s20328_s27 + $0x58] sm:$0xff]  ;;  %v15476_v6 = vshrl.u32 %v1080_v5, 7 }
  0x3b   : > { %v855_v53 = vld [vmem:[%s20328_s27 + $0x50] sm:$0xff]  ;;  %v858_v57 = vld [vmem:[%s20328_s27 + $0x68] sm:$0xff]  ;;  %v857_v59 = vld [vmem:[%s20328_s27 + $0x60] sm:$0xff] }
  0x3c   : > { %13411 = vmatmul.mubr.msk.f32.gmra.mxu0 %vm861_vm1, %v833_v7  ;;  %v860_v63 = vld [vmem:[%s20328_s27 + $0x78] sm:$0xff]  ;;  %v859_v1 = vld [vmem:[%s20328_s27 + $0x70] sm:$0xff]  ;;  %20345 = vst [vmem:[#allocation30_spill] sm:$0xff] %v15476_v6  ;;  %v15479_v7 = vsub.s32 0, %v15476_v6  ;;  %s20656_s27 = smov 16  }
  0x3d   : > { %13413 = vmatprep.mubr.msk.f32.mxu0 %vm861_vm1, %v834_v8  ;;  %v1079_v8 = vld [vmem:[%s20347_s11] sm:$0xff] }
  0x3e   : > { %20346 = vst [vmem:[#allocation31_spill] sm:$0xff] %v15479_v7 }
  0x40   : > { %13414 = vmatmul.mubr.msk.f32.gmra.mxu0 %vm861_vm1, %v835_v9  ;;  %v15485_v9 = vrot.slane %v1079_v8, %v15479_v7 }
  0x41   : > { %13416 = vmatprep.mubr.msk.f32.mxu0 %vm861_vm1, %v836_v10 }
  0x44   : > { %13417 = vmatmul.mubr.msk.f32.gmra.mxu0 %vm861_vm1, %v837_v11 }
  0x45   : > { %13419 = vmatprep.mubr.msk.f32.mxu0 %vm861_vm1, %v838_v12 }
  0x48   : > { %13420 = vmatmul.mubr.msk.f32.gmra.mxu0 %vm861_vm1, %v839_v13 }
  0x49   : > { %13422 = vmatprep.mubr.msk.f32.mxu0 %vm861_vm1, %v840_v14 }
  0x4c   : > { %13423 = vmatmul.mubr.msk.f32.gmra.mxu0 %vm861_vm1, %v841_v15 }
  0x4d   : > { %13425 = vmatprep.mubr.msk.f32.mxu0 %vm861_vm1, %v842_v16 }
  0x50   : > { %13426 = vmatmul.mubr.msk.f32.gmra.mxu0 %vm861_vm1, %v843_v17 }
  0xf4   : > { %v13406_v21 = vpop.f32.mrf.mxu0 }
  0xf5   : > { %v15375_v27 = vadd.f32 %v13406_v21, %v846_v23 }
  0xf6   : > { %v980_v24 = vpop.f32.mrf.mxu0 }
  0xf7   : > { %v15370_v25 = vadd.f32 %v980_v24, %v845_v22  ;;  %20330 = vst [vmem:[#allocation15_spill] sm:$0xff] %v15375_v27 }
  0xf8   : > { %v13409_v28 = vpop.f32.mrf.mxu0 }
  0xf9   : > { %20329 = vst [vmem:[#allocation14_spill] sm:$0xff] %v15370_v25  ;;  %13436 = vmatprep.mubr.msk.f32.mxu1 %vm1084_vm2, %v15370_v25  ;;  %v15384_v30 = vadd.f32 %v13409_v28, %v848_v26 }
  0xfa   : > { %13437 = vmatmul.mubr.msk.f32.vlgmr.msra.gmra.mxu1 %vm1084_vm2, %v15375_v27  ;;  %v990_v31 = vpop.f32.mrf.mxu0 }
  0xfb   : > { %20331 = vst [vmem:[#allocation16_spill] sm:$0xff] %v15384_v30  ;;  %v15386_v32 = vadd.f32 %v990_v31, %v847_v29 }
  0xfc   : > { %v13412_v34 = vpop.f32.mrf.mxu0 }
  0xfd   : > { %20332 = vst [vmem:[#allocation17_spill] sm:$0xff] %v15386_v32  ;;  %13439 = vmatprep.mubr.msk.f32.mxu1 %vm1084_vm2, %v15386_v32  ;;  %v15398_v36 = vadd.f32 %v13412_v34, %v850_v33 }
  0xfe   : > { %13440 = vmatmul.mubr.msk.f32.gmra.mxu1 %vm1084_vm2, %v15384_v30  ;;  %v1000_v37 = vpop.f32.mrf.mxu0 }
  0xff   : > { %20333 = vst [vmem:[#allocation18_spill] sm:$0xff] %v15398_v36  ;;  %v15400_v38 = vadd.f32 %v1000_v37, %v849_v35 }
 0x100   : > { %v13415_v40 = vpop.f32.mrf.mxu0 }
 0x101   : > { %20334 = vst [vmem:[#allocation19_spill] sm:$0xff] %v15400_v38  ;;  %13442 = vmatprep.mubr.msk.f32.mxu1 %vm1084_vm2, %v15400_v38  ;;  %v15412_v42 = vadd.f32 %v13415_v40, %v852_v39 }
 0x102   : > { %13443 = vmatmul.mubr.msk.f32.gmra.mxu1 %vm1084_vm2, %v15398_v36  ;;  %v1010_v43 = vpop.f32.mrf.mxu0 }
 0x103   : > { %20335 = vst [vmem:[#allocation20_spill] sm:$0xff] %v15412_v42  ;;  %v15414_v44 = vadd.f32 %v1010_v43, %v851_v41 }
 0x104   : > { %v13418_v46 = vpop.f32.mrf.mxu0 }
 0x105   : > { %20336 = vst [vmem:[#allocation21_spill] sm:$0xff] %v15414_v44  ;;  %13445 = vmatprep.mubr.msk.f32.mxu1 %vm1084_vm2, %v15414_v44  ;;  %v15426_v48 = vadd.f32 %v13418_v46, %v854_v45 }
 0x106   : > { %13446 = vmatmul.mubr.msk.f32.gmra.mxu1 %vm1084_vm2, %v15412_v42  ;;  %v1020_v49 = vpop.f32.mrf.mxu0 }
 0x107   : > { %20337 = vst [vmem:[#allocation22_spill] sm:$0xff] %v15426_v48  ;;  %v15428_v50 = vadd.f32 %v1020_v49, %v853_v47 }
 0x108   : > { %v13421_v52 = vpop.f32.mrf.mxu0 }
 0x109   : > { %20338 = vst [vmem:[#allocation23_spill] sm:$0xff] %v15428_v50  ;;  %13448 = vmatprep.mubr.msk.f32.mxu1 %vm1084_vm2, %v15428_v50  ;;  %v15440_v54 = vadd.f32 %v13421_v52, %v856_v51 }
 0x10a   : > { %13449 = vmatmul.mubr.msk.f32.gmra.mxu1 %vm1084_vm2, %v15426_v48  ;;  %v1030_v55 = vpop.f32.mrf.mxu0 }
 0x10b   : > { %20339 = vst [vmem:[#allocation24_spill] sm:$0xff] %v15440_v54  ;;  %v15442_v56 = vadd.f32 %v1030_v55, %v855_v53 }
 0x10c   : > { %v13424_v58 = vpop.f32.mrf.mxu0 }
 0x10d   : > { %20340 = vst [vmem:[#allocation25_spill] sm:$0xff] %v15442_v56  ;;  %13451 = vmatprep.mubr.msk.f32.mxu1 %vm1084_vm2, %v15442_v56  ;;  %v15454_v60 = vadd.f32 %v13424_v58, %v858_v57 }
 0x10e   : > { %13452 = vmatmul.mubr.msk.f32.gmra.mxu1 %vm1084_vm2, %v15440_v54  ;;  %v1040_v61 = vpop.f32.mrf.mxu0 }
 0x10f   : > { %20341 = vst [vmem:[#allocation26_spill] sm:$0xff] %v15454_v60  ;;  %v15456_v62 = vadd.f32 %v1040_v61, %v857_v59 }
 0x110   : > { %v13427_v0 = vpop.f32.mrf.mxu0 }
 0x111   : > { %20342 = vst [vmem:[#allocation27_spill] sm:$0xff] %v15456_v62  ;;  %13454 = vmatprep.mubr.msk.f32.mxu1 %vm1084_vm2, %v15456_v62  ;;  %v15468_v2 = vadd.f32 %v13427_v0, %v860_v63 }
 0x112   : > { %13455 = vmatmul.mubr.msk.f32.gmra.mxu1 %vm1084_vm2, %v15454_v60  ;;  %v1050_v3 = vpop.f32.mrf.mxu0 }
 0x113   : > { %20343 = vst [vmem:[#allocation28_spill] sm:$0xff] %v15468_v2  ;;  %v15470_v4 = vadd.f32 %v1050_v3, %v859_v1 }
 0x115   : > { %20344 = vst [vmem:[#allocation29_spill] sm:$0xff] %v15470_v4  ;;  %13457 = vmatprep.mubr.msk.f32.mxu1 %vm1084_vm2, %v15470_v4 }
 0x116   : > { %13458 = vmatmul.mubr.msk.f32.gmra.mxu1 %vm1084_vm2, %v15468_v2 }
 0x1ba   : > { %v13438_v10 = vpop.f32.mrf.mxu1 }
 0x1bb   : > { %v15488_v11 = vadd.f32 %v13438_v10, %v15485_v9 }
 0x1bc   : > { %v1199_v12 = vpop.f32.mrf.mxu1 }
 0x1bd   : > { %v15491_v13 = vadd.f32 %v1199_v12, %v15485_v9  ;;  %1360 = vrot.lane.b32.xlu1 %v15488_v11, %s20241_s7  ;;  %1296 = vrot.lane.b32.xlu0 %v15488_v11, %s20243_s6 }
 0x1be   : > { %v13441_v14 = vpop.f32.mrf.mxu1 }
 0x1bf   : > { %13462 = vmatprep.mubr.msk.f32.mxu0 %vm1710_vm3, %v15491_v13  ;;  %v15504_v15 = vadd.f32 %v13441_v14, %v15485_v9 }
 0x1c0   : > { %v1209_v16 = vpop.f32.mrf.mxu1 }
 0x1c1   : > { %1392 = vrot.lane.b32.xlu0 %v15488_v11, %s20239_s2  ;;  %1358 = vrot.lane.b32.xlu1 %v15491_v13, %s20241_s7  ;;  %v15515_v17 = vadd.f32 %v1209_v16, %v15485_v9 }
 0x1c2   : > { %v13444_v18 = vpop.f32.mrf.mxu1 }
 0x1c3   : > { %v15526_v19 = vadd.f32 %v13444_v18, %v15485_v9 }
 0x1c4   : > { %v1219_v20 = vpop.f32.mrf.mxu1 }
 0x1c5   : > { %1328 = vrot.lane.b32.xlu0 %v15488_v11, %s20258_s8  ;;  %1300 = vrot.lane.b32.xlu1 %v15504_v15, %s20243_s6  ;;  %v15537_v21 = vadd.f32 %v1219_v20, %v15485_v9 }
 0x1c6   : > { %v13447_v22 = vpop.f32.mrf.mxu1 }
 0x1c7   : > { %v15544_v23 = vadd.f32 %v13447_v22, %v15485_v9 }
 0x1c8   : > { %v1229_v24 = vpop.f32.mrf.mxu1 }
 0x1c9   : > { %1364 = vrot.lane.b32.xlu1 %v15504_v15, %s20241_s7  ;;  %1294 = vrot.lane.b32.xlu0 %v15491_v13, %s20243_s6  ;;  %v15555_v26 = vadd.f32 %v1229_v24, %v15485_v9 }
 0x1ca   : > { %v13450_v28 = vpop.f32.mrf.mxu1 }
 0x1cb   : > { %v15562_v29 = vadd.f32 %v13450_v28, %v15485_v9 }
 0x1cc   : > { %v1239_v31 = vpop.f32.mrf.mxu1 }
 0x1cd   : > { %1298 = vrot.lane.b32.xlu1 %v15515_v17, %s20243_s6  ;;  %1390 = vrot.lane.b32.xlu0 %v15491_v13, %s20239_s2  ;;  %v15573_v33 = vadd.f32 %v1239_v31, %v15485_v9 }
 0x1ce   : > { %v13453_v34 = vpop.f32.mrf.mxu1 }
 0x1cf   : > { %v15580_v35 = vadd.f32 %v13453_v34, %v15485_v9 }
 0x1d0   : > { %v1249_v37 = vpop.f32.mrf.mxu1 }
 0x1d1   : > { %1362 = vrot.lane.b32.xlu1 %v15515_v17, %s20241_s7  ;;  %1326 = vrot.lane.b32.xlu0 %v15491_v13, %s20258_s8  ;;  %v15591_v39 = vadd.f32 %v1249_v37, %v15485_v9 }
 0x1d2   : > { %v13456_v40 = vpop.f32.mrf.mxu1 }
 0x1d3   : > { %v15598_v41 = vadd.f32 %v13456_v40, %v15485_v9 }
 0x1d4   : > { %v1259_v43 = vpop.f32.mrf.mxu1 }
 0x1d5   : > { %1304 = vrot.lane.b32.xlu1 %v15526_v19, %s20243_s6  ;;  %1396 = vrot.lane.b32.xlu0 %v15504_v15, %s20239_s2  ;;  %v15609_v45 = vadd.f32 %v1259_v43, %v15485_v9 }
 0x1d6   : > { %v13459_v46 = vpop.f32.mrf.mxu1 }
 0x1d7   : > { %v15616_v47 = vadd.f32 %v13459_v46, %v15485_v9 }
 0x1d8   : > { %v1269_v49 = vpop.f32.mrf.mxu1 }
 0x1d9   : > { %1368 = vrot.lane.b32.xlu1 %v15526_v19, %s20241_s7  ;;  %1332 = vrot.lane.b32.xlu0 %v15504_v15, %s20258_s8  ;;  %v15627_v51 = vadd.f32 %v1269_v49, %v15485_v9 }
 0x1dd   : > { %1366 = vrot.lane.b32.xlu1 %v15537_v21, %s20241_s7  ;;  %1394 = vrot.lane.b32.xlu0 %v15515_v17, %s20239_s2 }
 0x1e1   : > { %1308 = vrot.lane.b32.xlu1 %v15544_v23, %s20243_s6  ;;  %1330 = vrot.lane.b32.xlu0 %v15515_v17, %s20258_s8 }
 0x1e5   : > { %1372 = vrot.lane.b32.xlu1 %v15544_v23, %s20241_s7  ;;  %1400 = vrot.lane.b32.xlu0 %v15526_v19, %s20239_s2 }
 0x1e9   : > { %1370 = vrot.lane.b32.xlu1 %v15555_v26, %s20241_s7  ;;  %1336 = vrot.lane.b32.xlu0 %v15526_v19, %s20258_s8 }
 0x1ed   : > { %1312 = vrot.lane.b32.xlu1 %v15562_v29, %s20243_s6  ;;  %1302 = vrot.lane.b32.xlu0 %v15537_v21, %s20243_s6 }
 0x1f1   : > { %1376 = vrot.lane.b32.xlu1 %v15562_v29, %s20241_s7  ;;  %1398 = vrot.lane.b32.xlu0 %v15537_v21, %s20239_s2 }
 0x1f5   : > { %1374 = vrot.lane.b32.xlu1 %v15573_v33, %s20241_s7  ;;  %1334 = vrot.lane.b32.xlu0 %v15537_v21, %s20258_s8 }
 0x1f9   : > { %1316 = vrot.lane.b32.xlu1 %v15580_v35, %s20243_s6  ;;  %1404 = vrot.lane.b32.xlu0 %v15544_v23, %s20239_s2 }
 0x1fd   : > { %1380 = vrot.lane.b32.xlu1 %v15580_v35, %s20241_s7  ;;  %1340 = vrot.lane.b32.xlu0 %v15544_v23, %s20258_s8 }
 0x201   : > { %1378 = vrot.lane.b32.xlu1 %v15591_v39, %s20241_s7  ;;  %1306 = vrot.lane.b32.xlu0 %v15555_v26, %s20243_s6 }
 0x205   : > { %1320 = vrot.lane.b32.xlu1 %v15598_v41, %s20243_s6  ;;  %1402 = vrot.lane.b32.xlu0 %v15555_v26, %s20239_s2 }
 0x209   : > { %1384 = vrot.lane.b32.xlu1 %v15598_v41, %s20241_s7  ;;  %1338 = vrot.lane.b32.xlu0 %v15555_v26, %s20258_s8 }
 0x20d   : > { %1382 = vrot.lane.b32.xlu1 %v15609_v45, %s20241_s7  ;;  %1408 = vrot.lane.b32.xlu0 %v15562_v29, %s20239_s2 }
 0x211   : > { %1324 = vrot.lane.b32.xlu1 %v15616_v47, %s20243_s6  ;;  %1344 = vrot.lane.b32.xlu0 %v15562_v29, %s20258_s8 }
 0x215   : > { %1310 = vrot.lane.b32.xlu0 %v15573_v33, %s20243_s6  ;;  %1388 = vrot.lane.b32.xlu1 %v15616_v47, %s20241_s7 }
 0x219   : > { %1406 = vrot.lane.b32.xlu0 %v15573_v33, %s20239_s2  ;;  %1386 = vrot.lane.b32.xlu1 %v15627_v51, %s20241_s7  ;;  %s20252_s7 = smov 24  }
 0x21d   : > { %1342 = vrot.lane.b32.xlu0 %v15573_v33, %s20258_s8 }
 0x221   : > { %1412 = vrot.lane.b32.xlu0 %v15580_v35, %s20239_s2 }
 0x225   : > { %1348 = vrot.lane.b32.xlu0 %v15580_v35, %s20258_s8 }
 0x229   : > { %1314 = vrot.lane.b32.xlu0 %v15591_v39, %s20243_s6 }
 0x22d   : > { %1410 = vrot.lane.b32.xlu0 %v15591_v39, %s20239_s2 }
 0x22f   : > { %v15643_v52 = vpop.permute.xlu1 %1360  ;;  %v15645_v53 = vpop.permute.xlu0 %1296 }
 0x230   : > { %20348 = vst [vmem:[#allocation32_spill] sm:$0xff] %v15643_v52  ;;  %1424 = vrot.lane.b32.xlu1 %v15645_v53, %s20239_s2  ;;  %v14194_v43 = vpack.i.bf16 %v15645_v53, %v15488_v11 }
 0x231   : > { %1346 = vrot.lane.b32.xlu0 %v15591_v39, %s20258_s8 }
 0x233   : > { %v15651_v55 = vpop.permute.xlu0 %1392  ;;  %v15653_v57 = vpop.permute.xlu1 %1358 }
 0x234   : > { %20349 = vst [vmem:[#allocation33_spill] sm:$0xff] %v15653_v57  ;;  %1488 = vrot.lane.b32.xlu1 %v15643_v52, %s20239_s2 }
 0x235   : > { %1416 = vrot.lane.b32.xlu0 %v15598_v41, %s20239_s2 }
 0x237   : > { %v15659_v58 = vpop.permute.xlu0 %1328  ;;  %v15661_v59 = vpop.permute.xlu1 %1300 }
 0x238   : > { %20350 = vst [vmem:[#allocation34_spill] sm:$0xff] %v15659_v58  ;;  %v14204_v7 = vpack.i.bf16 %v15661_v59, %v15504_v15 }
 0x239   : > { %1352 = vrot.lane.b32.xlu0 %v15598_v41, %s20258_s8 }
 0x23b   : > { %v15665_v61 = vpop.permute.xlu1 %1364  ;;  %v1295_v63 = vpop.permute.xlu0 %1294 }
 0x23c   : > { %20351 = vst [vmem:[#allocation35_spill] sm:$0xff] %v15665_v61  ;;  %13488 = vmatprep.mubr.msk.f32.mxu1 %vm1710_vm3, %v1295_v63  ;;  %1422 = vrot.lane.b32.xlu1 %v1295_v63, %s20239_s2  ;;  %v14199_v3 = vpack.i.bf16 %v1295_v63, %v15491_v13 }
 0x23d   : > { %1318 = vrot.lane.b32.xlu0 %v15609_v45, %s20243_s6 }
 0x23f   : > { %v15671_v0 = vpop.permute.xlu1 %1298  ;;  %v15673_v1 = vpop.permute.xlu0 %1390 }
 0x240   : > { %1486 = vrot.lane.b32.xlu1 %v15653_v57, %s20239_s2  ;;  %v14209_v22 = vpack.i.bf16 %v15671_v0, %v15515_v17 }
 0x241   : > { %1414 = vrot.lane.b32.xlu0 %v15609_v45, %s20239_s2 }
 0x243   : > { %v15680_v5 = vpop.permute.xlu1 %1362  ;;  %v15682_v8 = vpop.permute.xlu0 %1326 }
 0x244   : > { %20352 = vst [vmem:[#allocation36_spill] sm:$0xff] %v15680_v5  ;;  %14200 = vrot.lane.b32.xlu1 %v14199_v3, %s20237_s28 }
 0x245   : > { %1350 = vrot.lane.b32.xlu0 %v15609_v45, %s20258_s8 }
 0x247   : > { %v15687_v9 = vpop.permute.xlu1 %1304  ;;  %v15689_v10 = vpop.permute.xlu0 %1396 }
 0x248   : > { %1428 = vrot.lane.b32.xlu1 %v15661_v59, %s20239_s2  ;;  %v14214_v60 = vpack.i.bf16 %v15687_v9, %v15526_v19 }
 0x249   : > { %1420 = vrot.lane.b32.xlu0 %v15616_v47, %s20239_s2 }
 0x24b   : > { %v15695_v12 = vpop.permute.xlu1 %1368  ;;  %v15697_v13 = vpop.permute.xlu0 %1332 }
 0x24c   : > { %20353 = vst [vmem:[#allocation37_spill] sm:$0xff] %v15695_v12  ;;  %20354 = vst [vmem:[#allocation38_spill] sm:$0xff] %v15697_v13  ;;  %1492 = vrot.lane.b32.xlu1 %v15665_v61, %s20239_s2 }
 0x24d   : > { %1356 = vrot.lane.b32.xlu0 %v15616_v47, %s20258_s8 }
 0x24f   : > { %v15703_v14 = vpop.permute.xlu1 %1366  ;;  %v15705_v16 = vpop.permute.xlu0 %1394 }
 0x250   : > { %20355 = vst [vmem:[#allocation39_spill] sm:$0xff] %v15703_v14  ;;  %1426 = vrot.lane.b32.xlu1 %v15671_v0, %s20239_s2 }
 0x251   : > { %1322 = vrot.lane.b32.xlu0 %v15627_v51, %s20243_s6  ;;  %s20256_s6 = smov 16  }
 0x253   : > { %v15711_v18 = vpop.permute.xlu1 %1308  ;;  %v15713_v20 = vpop.permute.xlu0 %1330 }
 0x254   : > { %20356 = vst [vmem:[#allocation40_spill] sm:$0xff] %v15713_v20  ;;  %1490 = vrot.lane.b32.xlu1 %v15680_v5, %s20239_s2  ;;  %v14224_v44 = vpack.i.bf16 %v15711_v18, %v15544_v23 }
 0x255   : > { %1418 = vrot.lane.b32.xlu0 %v15627_v51, %s20239_s2 }
 0x257   : > { %v15721_v24 = vpop.permute.xlu1 %1372  ;;  %v15723_v28 = vpop.permute.xlu0 %1400 }
 0x258   : > { %20357 = vst [vmem:[#allocation41_spill] sm:$0xff] %v15721_v24  ;;  %14210 = vrot.lane.b32.xlu1 %v14209_v22, %s20237_s28 }
 0x259   : > { %1354 = vrot.lane.b32.xlu0 %v15627_v51, %s20258_s8  ;;  %s20647_s8 = sld [smem:[#allocation115_spill]] }
 0x25b   : > { %v15728_v31 = vpop.permute.xlu1 %1370  ;;  %v15730_v34 = vpop.permute.xlu0 %1336 }
 0x25c   : > { %20358 = vst [vmem:[#allocation42_spill] sm:$0xff] %v15728_v31  ;;  %20359 = vst [vmem:[#allocation43_spill] sm:$0xff] %v15730_v34  ;;  %1432 = vrot.lane.b32.xlu1 %v15687_v9, %s20239_s2 }
 0x25d   : > { %1456 = vrot.lane.b32.xlu0 %v15659_v58, %s20239_s2 }
 0x25f   : > { %v15736_v37 = vpop.permute.xlu1 %1312  ;;  %v15738_v40 = vpop.permute.xlu0 %1302 }
 0x260   : > { %1496 = vrot.lane.b32.xlu1 %v15695_v12, %s20239_s2  ;;  %v14219_v22 = vpack.i.bf16 %v15738_v40, %v15537_v21 }
 0x261   : > { %14195 = vrot.lane.b32.xlu0 %v14194_v43, %s20237_s28 }
 0x263   : > { %v15745_v46 = vpop.permute.xlu0 %1398  ;;  %v15747_v49 = vpop.permute.xlu1 %1376 }
 0x264   : > { %20360 = vst [vmem:[#allocation44_spill] sm:$0xff] %v15747_v49  ;;  %1430 = vrot.lane.b32.xlu1 %v15738_v40, %s20239_s2 }
 0x265   : > { %1454 = vrot.lane.b32.xlu0 %v15682_v8, %s20239_s2 }
 0x267   : > { %v15753_v63 = vpop.permute.xlu0 %1334  ;;  %v15759_v3 = vpop.permute.xlu1 %1374 }
 0x268   : > { %20361 = vst [vmem:[#allocation45_spill] sm:$0xff] %v15753_v63  ;;  %1494 = vrot.lane.b32.xlu1 %v15703_v14, %s20239_s2  ;;  %20362 = vst [vmem:[#allocation46_spill] sm:$0xff] %v15759_v3 }
 0x269   : > { %1460 = vrot.lane.b32.xlu0 %v15697_v13, %s20239_s2 }
 0x26b   : > { %v15763_v43 = vpop.permute.xlu0 %1404  ;;  %v15771_v2 = vpop.permute.xlu1 %1316 }
 0x26c   : > { %14220 = vrot.lane.b32.xlu1 %v14219_v22, %s20237_s28  ;;  %20364 = vst [vmem:[#allocation48_spill] sm:$0xff] %v15771_v2 }
 0x26d   : > { %14205 = vrot.lane.b32.xlu0 %v14204_v7, %s20237_s28 }
 0x26f   : > { %v15769_v4 = vpop.permute.xlu0 %1340  ;;  %v15783_v22 = vpop.permute.xlu1 %1380 }
 0x270   : > { %20363 = vst [vmem:[#allocation47_spill] sm:$0xff] %v15769_v4  ;;  %1436 = vrot.lane.b32.xlu1 %v15711_v18, %s20239_s2  ;;  %20365 = vst [vmem:[#allocation49_spill] sm:$0xff] %v15783_v22 }
 0x271   : > { %1458 = vrot.lane.b32.xlu0 %v15713_v20, %s20239_s2 }
 0x273   : > { %v15777_v62 = vpop.permute.xlu0 %1306  ;;  %v15794_v54 = vpop.permute.xlu1 %1378 }
 0x274   : > { %1500 = vrot.lane.b32.xlu1 %v15721_v24, %s20239_s2  ;;  %20367 = vst [vmem:[#allocation51_spill] sm:$0xff] %v15794_v54  ;;  %v14229_v50 = vpack.i.bf16 %v15777_v62, %v15555_v26 }
 0x275   : > { %1464 = vrot.lane.b32.xlu0 %v15730_v34, %s20239_s2 }
 0x277   : > { %v15785_v7 = vpop.permute.xlu0 %1402 }
 0x278   : > { %1434 = vrot.lane.b32.xlu1 %v15777_v62, %s20239_s2 }
 0x279   : > { %14215 = vrot.lane.b32.xlu0 %v14214_v60, %s20237_s28  ;;  %v15807_v60 = vpop.permute.xlu1 %1320 }
 0x27a   : > { %20368 = vst [vmem:[#allocation52_spill] sm:$0xff] %v15807_v60 }
 0x27b   : > { %v15792_v56 = vpop.permute.xlu0 %1338 }
 0x27c   : > { %20366 = vst [vmem:[#allocation50_spill] sm:$0xff] %v15792_v56  ;;  %1498 = vrot.lane.b32.xlu1 %v15728_v31, %s20239_s2 }
 0x27d   : > { %1462 = vrot.lane.b32.xlu0 %v15753_v63, %s20239_s2  ;;  %v15818_v36 = vpop.permute.xlu1 %1384 }
 0x27e   : > { %20370 = vst [vmem:[#allocation54_spill] sm:$0xff] %v15818_v36 }
 0x27f   : > { %v15802_v48 = vpop.permute.xlu0 %1408 }
 0x280   : > { %14230 = vrot.lane.b32.xlu1 %v14229_v50, %s20237_s28 }
 0x281   : > { %1468 = vrot.lane.b32.xlu0 %v15769_v4, %s20239_s2  ;;  %v15830_v30 = vpop.permute.xlu1 %1382 }
 0x282   : > { %20371 = vst [vmem:[#allocation55_spill] sm:$0xff] %v15830_v30 }
 0x283   : > { %v15811_v42 = vpop.permute.xlu0 %1344 }
 0x284   : > { %20369 = vst [vmem:[#allocation53_spill] sm:$0xff] %v15811_v42  ;;  %1440 = vrot.lane.b32.xlu1 %v15736_v37, %s20239_s2 }
 0x285   : > { %14225 = vrot.lane.b32.xlu0 %v14224_v44, %s20237_s28  ;;  %v14234_v44 = vpack.i.bf16 %v15736_v37, %v15562_v29  ;;  %v15843_v6 = vpop.permute.xlu1 %1324 }
 0x286   : > { %20373 = vst [vmem:[#allocation57_spill] sm:$0xff] %v15843_v6 }
 0x287   : > { %v15816_v38 = vpop.permute.xlu0 %1310 }
 0x288   : > { %1504 = vrot.lane.b32.xlu1 %v15747_v49, %s20239_s2  ;;  %v14239_v25 = vpack.i.bf16 %v15816_v38, %v15573_v33 }
 0x289   : > { %1466 = vrot.lane.b32.xlu0 %v15792_v56, %s20239_s2 }
 0x28b   : > { %v15824_v50 = vpop.permute.xlu0 %1406 }
 0x28c   : > { %1438 = vrot.lane.b32.xlu1 %v15816_v38, %s20239_s2 }
 0x28d   : > { %1472 = vrot.lane.b32.xlu0 %v15811_v42, %s20239_s2 }
 0x28f   : > { %v15834_v32 = vpop.permute.xlu0 %1342 }
 0x290   : > { %20372 = vst [vmem:[#allocation56_spill] sm:$0xff] %v15834_v32  ;;  %1502 = vrot.lane.b32.xlu1 %v15759_v3, %s20239_s2  ;;  %v15852_v3 = vpop.permute.xlu1 %1388 }
 0x291   : > { %14235 = vrot.lane.b32.xlu0 %v14234_v44, %s20237_s28  ;;  %20375 = vst [vmem:[#allocation59_spill] sm:$0xff] %v15852_v3  ;;  %v14244_v44 = vpack.i.bf16 %v15771_v2, %v15580_v35 }
 0x293   : > { %v15841_v27 = vpop.permute.xlu0 %1412 }
 0x294   : > { %14240 = vrot.lane.b32.xlu1 %v14239_v25, %s20237_s28  ;;  %v15863_v25 = vpop.permute.xlu1 %1386 }
 0x295   : > { %1470 = vrot.lane.b32.xlu0 %v15834_v32, %s20239_s2  ;;  %20377 = vst [vmem:[#allocation61_spill] sm:$0xff] %v15863_v25 }
 0x297   : > { %v15848_v49 = vpop.permute.xlu0 %1348 }
 0x298   : > { %20374 = vst [vmem:[#allocation58_spill] sm:$0xff] %v15848_v49  ;;  %1444 = vrot.lane.b32.xlu1 %v15771_v2, %s20239_s2 }
 0x299   : > { %1476 = vrot.lane.b32.xlu0 %v15848_v49, %s20239_s2 }
 0x29b   : > { %v15858_v24 = vpop.permute.xlu0 %1314 }
 0x29c   : > { %20376 = vst [vmem:[#allocation60_spill] sm:$0xff] %v15858_v24  ;;  %1508 = vrot.lane.b32.xlu1 %v15783_v22, %s20239_s2  ;;  %v14249_v22 = vpack.i.bf16 %v15858_v24, %v15591_v39 }
 0x29d   : > { %14245 = vrot.lane.b32.xlu0 %v14244_v44, %s20237_s28 }
 0x29f   : > { %v15865_v31 = vpop.permute.xlu0 %1410 }
 0x2a0   : > { %1442 = vrot.lane.b32.xlu1 %v15858_v24, %s20239_s2 }
 0x2a2   : > { %v1425_v14 = vpop.permute.xlu1 %1424 }
 0x2a3   : > { %v15869_v12 = vpop.permute.xlu0 %1346 }
 0x2a4   : > { %20378 = vst [vmem:[#allocation62_spill] sm:$0xff] %v15869_v12  ;;  %1506 = vrot.lane.b32.xlu1 %v15794_v54, %s20239_s2  ;;  %1474 = vrot.lane.b32.xlu0 %v15869_v12, %s20239_s2  ;;  %v14254_v54 = vpack.i.bf16 %v15807_v60, %v15598_v41 }
 0x2a6   : > { %v15880_v61 = vpop.permute.xlu1 %1488 }
 0x2a7   : > { %v15877_v44 = vpop.permute.xlu0 %1416 }
 0x2a8   : > { %14250 = vrot.lane.b32.xlu1 %v14249_v22, %s20237_s28 }
 0x2ab   : > { %v15882_v5 = vpop.permute.xlu0 %1352 }
 0x2ac   : > { %20379 = vst [vmem:[#allocation63_spill] sm:$0xff] %v15882_v5  ;;  %1448 = vrot.lane.b32.xlu1 %v15807_v60, %s20239_s2  ;;  %1480 = vrot.lane.b32.xlu0 %v15882_v5, %s20239_s2 }
 0x2ae   : > { %v1423_v52 = vpop.permute.xlu1 %1422 }
 0x2af   : > { %v15890_v49 = vpop.permute.xlu0 %1318 }
 0x2b0   : > { %20380 = vst [vmem:[#allocation64_spill] sm:$0xff] %v15890_v49  ;;  %1512 = vrot.lane.b32.xlu1 %v15818_v36, %s20239_s2  ;;  %14255 = vrot.lane.b32.xlu0 %v14254_v54, %s20237_s28  ;;  %v14259_v54 = vpack.i.bf16 %v15890_v49, %v15609_v45 }
 0x2b2   : > { %v15895_v22 = vpop.permute.xlu1 %1486 }
 0x2b3   : > { %v15897_v12 = vpop.permute.xlu0 %1414 }
 0x2b4   : > { %1446 = vrot.lane.b32.xlu1 %v15890_v49, %s20239_s2 }
 0x2b6   : > { %v15901_v42 = vpop.permute.xlu1 %14200 }
 0x2b7   : > { %20381 = vst [vmem:[#allocation65_spill] sm:$0xff] %v15901_v42  ;;  %v15903_v5 = vpop.permute.xlu0 %1350 }
 0x2b8   : > { %20382 = vst [vmem:[#allocation66_spill] sm:$0xff] %v15903_v5  ;;  %1510 = vrot.lane.b32.xlu1 %v15830_v30, %s20239_s2  ;;  %1478 = vrot.lane.b32.xlu0 %v15903_v5, %s20239_s2 }
 0x2ba   : > { %v1429_v36 = vpop.permute.xlu1 %1428 }
 0x2bb   : > { %v15911_v32 = vpop.permute.xlu0 %1420 }
 0x2bc   : > { %14260 = vrot.lane.b32.xlu1 %v14259_v54, %s20237_s28 }
 0x2be   : > { %v15914_v4 = vpop.permute.xlu1 %1492 }
 0x2bf   : > { %v15916_v56 = vpop.permute.xlu0 %1356 }
 0x2c0   : > { %20383 = vst [vmem:[#allocation67_spill] sm:$0xff] %v15916_v56  ;;  %1452 = vrot.lane.b32.xlu1 %v15843_v6, %s20239_s2  ;;  %1484 = vrot.lane.b32.xlu0 %v15916_v56, %s20239_s2 }
 0x2c2   : > { %v1427_v42 = vpop.permute.xlu1 %1426 }
 0x2c3   : > { %v15922_v30 = vpop.permute.xlu0 %1322 }
 0x2c4   : > { %20384 = vst [vmem:[#allocation68_spill] sm:$0xff] %v15922_v30  ;;  %1516 = vrot.lane.b32.xlu1 %v15852_v3, %s20239_s2 }
 0x2c6   : > { %v15926_v5 = vpop.permute.xlu1 %1490 }
 0x2c7   : > { %v15928_v34 = vpop.permute.xlu0 %1418 }
 0x2c8   : > { %1450 = vrot.lane.b32.xlu1 %v15922_v30, %s20239_s2 }
 0x2ca   : > { %v15932_v54 = vpop.permute.xlu1 %14210 }
 0x2cb   : > { %20385 = vst [vmem:[#allocation69_spill] sm:$0xff] %v15932_v54  ;;  %v15934_v63 = vpop.permute.xlu0 %1354 }
 0x2cc   : > { %20386 = vst [vmem:[#allocation70_spill] sm:$0xff] %v15934_v63  ;;  %1514 = vrot.lane.b32.xlu1 %v15863_v25, %s20239_s2  ;;  %1482 = vrot.lane.b32.xlu0 %v15934_v63, %s20239_s2  ;;  %s20646_s2 = sld [smem:[#allocation121_spill]] }
 0x2ce   : > { %v1433_v56 = vpop.permute.xlu1 %1432 }
 0x2cf   : > { %v1457_v54 = vpop.permute.xlu0 %1456 }
 0x2d2   : > { %v15940_v13 = vpop.permute.xlu1 %1496 }
 0x2d3   : > { %v15949_v60 = vpop.permute.xlu0 %14195 }
 0x2d4   : > { %20388 = vst [vmem:[#allocation72_spill] sm:$0xff] %v15949_v60 }
 0x2d6   : > { %v1431_v3 = vpop.permute.xlu1 %1430 }
 0x2d7   : > { %v1455_v49 = vpop.permute.xlu0 %1454 }
 0x2da   : > { %v15942_v20 = vpop.permute.xlu1 %1494 }
 0x2db   : > { %v1461_v2 = vpop.permute.xlu0 %1460 }
 0x2de   : > { %v15944_v58 = vpop.permute.xlu1 %14220 }
 0x2df   : > { %20387 = vst [vmem:[#allocation71_spill] sm:$0xff] %v15944_v58 }
 0x2e2   : > { %v1437_v57 = vpop.permute.xlu1 %1436 }
 0x2e6   : > { %v15946_v6 = vpop.permute.xlu1 %1500 }
 0x2ea   : > { %v1435_v30 = vpop.permute.xlu1 %1434  ;;  %1582 = vxpose.xlu0.b32.start [1/16] (narrow) %v15673_v1, 8 }
 0x2ee   : > { %v15951_v25 = vpop.permute.xlu1 %1498  ;;  %1583 = vxpose.xlu0.b32.cont [2/16] (narrow) %v15651_v55, 8  ;;  %v15962_v55 = vpop.permute.xlu0 %14205 }
 0x2ef   : > { %20390 = vst [vmem:[#allocation74_spill] sm:$0xff] %v15962_v55 }
 0x2f2   : > { %v15954_v63 = vpop.permute.xlu1 %14230  ;;  %1584 = vxpose.xlu0.b32.cont [3/16] (narrow) %v15705_v16, 8 }
 0x2f3   : > { %20389 = vst [vmem:[#allocation73_spill] sm:$0xff] %v15954_v63 }
 0x2f5   : > { %1614 = vxpose.xlu1.b32.start [1/16] (narrow) %v1423_v52, 8  ;;  %v1459_v52 = vpop.permute.xlu0 %1458 }
 0x2f6   : > { %v1441_v58 = vpop.permute.xlu1 %1440  ;;  %1585 = vxpose.xlu0.b32.cont [4/16] (narrow) %v15689_v10, 8 }
 0x2f9   : > { %1615 = vxpose.xlu1.b32.cont [2/16] (narrow) %v1425_v14, 8 }
 0x2fa   : > { %v15958_v24 = vpop.permute.xlu1 %1504  ;;  %1586 = vxpose.xlu0.b32.cont [5/16] (narrow) %v15745_v46, 8 }
 0x2fd   : > { %1616 = vxpose.xlu1.b32.cont [3/16] (narrow) %v1427_v42, 8  ;;  %v1465_v42 = vpop.permute.xlu0 %1464 }
 0x2fe   : > { %v1439_v1 = vpop.permute.xlu1 %1438  ;;  %1587 = vxpose.xlu0.b32.cont [6/16] (narrow) %v15723_v28, 8 }
 0x301   : > { %1617 = vxpose.xlu1.b32.cont [4/16] (narrow) %v1429_v36, 8  ;;  %v15974_v36 = vpop.permute.xlu0 %14215 }
 0x302   : > { %v15964_v63 = vpop.permute.xlu1 %1502  ;;  %1588 = vxpose.xlu0.b32.cont [7/16] (narrow) %v15785_v7, 8  ;;  %20392 = vst [vmem:[#allocation76_spill] sm:$0xff] %v15974_v36 }
 0x305   : > { %1618 = vxpose.xlu1.b32.cont [5/16] (narrow) %v1431_v3, 8 }
 0x306   : > { %v15967_v10 = vpop.permute.xlu1 %14240  ;;  %1589 = vxpose.xlu0.b32.cont [8/16] (narrow) %v15763_v43, 8 }
 0x307   : > { %20391 = vst [vmem:[#allocation75_spill] sm:$0xff] %v15967_v10 }
 0x309   : > { %1619 = vxpose.xlu1.b32.cont [6/16] (narrow) %v1433_v56, 8  ;;  %v1463_v56 = vpop.permute.xlu0 %1462 }
 0x30a   : > { %v1445_v14 = vpop.permute.xlu1 %1444  ;;  %1590 = vxpose.xlu0.b32.cont [9/16] (narrow) %v15824_v50, 8 }
 0x30d   : > { %1620 = vxpose.xlu1.b32.cont [7/16] (narrow) %v1435_v30, 8  ;;  %v1469_v30 = vpop.permute.xlu0 %1468 }
 0x30e   : > { %v15971_v16 = vpop.permute.xlu1 %1508  ;;  %1591 = vxpose.xlu0.b32.cont [10/16] (narrow) %v15802_v48, 8 }
 0x311   : > { %1621 = vxpose.xlu1.b32.cont [8/16] (narrow) %v1437_v57, 8 }
 0x312   : > { %v1443_v28 = vpop.permute.xlu1 %1442  ;;  %1592 = vxpose.xlu0.b32.cont [11/16] (narrow) %v15865_v31, 8  ;;  %v15987_v31 = vpop.permute.xlu0 %14225 }
 0x313   : > { %20394 = vst [vmem:[#allocation78_spill] sm:$0xff] %v15987_v31 }
 0x315   : > { %1622 = vxpose.xlu1.b32.cont [9/16] (narrow) %v1439_v1, 8 }
 0x316   : > { %v15977_v46 = vpop.permute.xlu1 %1506  ;;  %1593 = vxpose.xlu0.b32.cont [12/16] (narrow) %v15841_v27, 8  ;;  %v1467_v27 = vpop.permute.xlu0 %1466 }
 0x319   : > { %1623 = vxpose.xlu1.b32.cont [10/16] (narrow) %v1441_v58, 8 }
 0x31a   : > { %v15980_v3 = vpop.permute.xlu1 %14250  ;;  %1594 = vxpose.xlu0.b32.cont [13/16] (narrow) %v15897_v12, 8  ;;  %v1473_v7 = vpop.permute.xlu0 %1472 }
 0x31b   : > { %20393 = vst [vmem:[#allocation77_spill] sm:$0xff] %v15980_v3 }
 0x31d   : > { %1624 = vxpose.xlu1.b32.cont [11/16] (narrow) %v1443_v28, 8  ;;  %v20425_v28 = vld [vmem:[#allocation37_spill] sm:$0xff] }
 0x31e   : > { %v1449_v48 = vpop.permute.xlu1 %1448  ;;  %1595 = vxpose.xlu0.b32.cont [14/16] (narrow) %v15877_v44, 8  ;;  %v15992_v44 = vpop.permute.xlu0 %14235 }
 0x31f   : > { %20396 = vst [vmem:[#allocation80_spill] sm:$0xff] %v15992_v44 }
 0x321   : > { %1625 = vxpose.xlu1.b32.cont [12/16] (narrow) %v1445_v14, 8 }
 0x322   : > { %v15984_v57 = vpop.permute.xlu1 %1512  ;;  %1596 = vxpose.xlu0.b32.cont [15/16] (narrow) %v15928_v34, 8  ;;  %v1471_v14 = vpop.permute.xlu0 %1470 }
 0x326   : > { %v1447_v43 = vpop.permute.xlu1 %1446  ;;  %1597 = vxpose.xlu0.b32.end [16/16] (narrow) %v15911_v32, 8  ;;  %v1477_v32 = vpop.permute.xlu0 %1476 }
 0x327   : > { %1626 = vxpose.xlu1.b32.cont [13/16] (narrow) %v1447_v43, 8  ;;  %v20431_v43 = vld [vmem:[#allocation49_spill] sm:$0xff] }
 0x32a   : > { %v1511_v58 = vpop.permute.xlu1 %1510  ;;  %1646 = vxpose.xlu0.b32.start [1/16] (narrow) %v1455_v49, 8  ;;  %v15995_v49 = vpop.permute.xlu0 %14245 }
 0x32b   : > { %1627 = vxpose.xlu1.b32.cont [14/16] (narrow) %v1449_v48, 8  ;;  %20397 = vst [vmem:[#allocation81_spill] sm:$0xff] %v15995_v49  ;;  %v20429_v48 = vld [vmem:[#allocation44_spill] sm:$0xff] }
 0x32e   : > { %v15990_v12 = vpop.permute.xlu1 %14260  ;;  %1647 = vxpose.xlu0.b32.cont [2/16] (narrow) %v1457_v54, 8  ;;  %v1475_v54 = vpop.permute.xlu0 %1474 }
 0x32f   : > { %20395 = vst [vmem:[#allocation79_spill] sm:$0xff] %v15990_v12 }
 0x332   : > { %v1453_v50 = vpop.permute.xlu1 %1452  ;;  %1648 = vxpose.xlu0.b32.cont [3/16] (narrow) %v1459_v52, 8 }
 0x336   : > { %v1517_v1 = vpop.permute.xlu1 %1516  ;;  %1649 = vxpose.xlu0.b32.cont [4/16] (narrow) %v1461_v2, 8  ;;  %v1481_v2 = vpop.permute.xlu0 %1480 }
 0x33a   : > { %v1451_v34 = vpop.permute.xlu1 %1450  ;;  %1650 = vxpose.xlu0.b32.cont [5/16] (narrow) %v1463_v56, 8  ;;  %v16001_v52 = vpop.permute.xlu0 %14255  ;;  %v20427_v56 = vld [vmem:[#allocation41_spill] sm:$0xff] }
 0x33b   : > { %1628 = vxpose.xlu1.b32.cont [15/16] (narrow) %v1451_v34, 8  ;;  %20398 = vst [vmem:[#allocation82_spill] sm:$0xff] %v16001_v52 }
 0x33e   : > { %1651 = vxpose.xlu0.b32.cont [6/16] (narrow) %v1465_v42, 8  ;;  %v20423_v42 = vld [vmem:[#allocation35_spill] sm:$0xff] }
 0x33f   : > { %1629 = vxpose.xlu1.b32.end [16/16] (narrow) %v1453_v50, 8  ;;  %v20435_v50 = vld [vmem:[#allocation59_spill] sm:$0xff] }
 0x342   : > { %1652 = vxpose.xlu0.b32.cont [7/16] (narrow) %v1467_v27, 8  ;;  %v20432_v27 = vld [vmem:[#allocation55_spill] sm:$0xff] }
 0x343   : > { %1678 = vxpose.xlu1.b32.start [1/16] (narrow) %v15895_v22, 8  ;;  %v1479_v22 = vpop.permute.xlu0 %1478 }
 0x346   : > { %1653 = vxpose.xlu0.b32.cont [8/16] (narrow) %v1469_v30, 8  ;;  %v20428_v30 = vld [vmem:[#allocation46_spill] sm:$0xff] }
 0x347   : > { %1679 = vxpose.xlu1.b32.cont [2/16] (narrow) %v15880_v61, 8  ;;  %v1485_v61 = vpop.permute.xlu0 %1484 }
 0x34a   : > { %1654 = vxpose.xlu0.b32.cont [9/16] (narrow) %v1471_v14, 8 }
 0x34b   : > { %1680 = vxpose.xlu1.b32.cont [3/16] (narrow) %v15926_v5, 8  ;;  %v1483_v5 = vpop.permute.xlu0 %1482 }
 0x34e   : > { %1655 = vxpose.xlu0.b32.cont [10/16] (narrow) %v1473_v7, 8  ;;  %v20434_v7 = vld [vmem:[#allocation61_spill] sm:$0xff] }
 0x34f   : > { %1681 = vxpose.xlu1.b32.cont [4/16] (narrow) %v15914_v4, 8 }
 0x352   : > { %1656 = vxpose.xlu0.b32.cont [11/16] (narrow) %v1475_v54, 8 }
 0x353   : > { %1682 = vxpose.xlu1.b32.cont [5/16] (narrow) %v15942_v20, 8 }
 0x356   : > { %1657 = vxpose.xlu0.b32.cont [12/16] (narrow) %v1477_v32, 8 }
 0x357   : > { %1683 = vxpose.xlu1.b32.cont [6/16] (narrow) %v15940_v13, 8  ;;  %v20416_v13 = vld [vmem:[#allocation58_spill] sm:$0xff] }
 0x35a   : > { %1658 = vxpose.xlu0.b32.cont [13/16] (narrow) %v1479_v22, 8 }
 0x35b   : > { %1684 = vxpose.xlu1.b32.cont [7/16] (narrow) %v15951_v25, 8  ;;  %v20422_v25 = vld [vmem:[#allocation67_spill] sm:$0xff] }
 0x35e   : > { %1659 = vxpose.xlu0.b32.cont [14/16] (narrow) %v1481_v2, 8 }
 0x35f   : > { %1685 = vxpose.xlu1.b32.cont [8/16] (narrow) %v15946_v6, 8  ;;  %v1515_v6 = vpop.permute.xlu1 %1514 }
 0x362   : > { %1660 = vxpose.xlu0.b32.cont [15/16] (narrow) %v1483_v5, 8 }
 0x363   : > { %1686 = vxpose.xlu1.b32.cont [9/16] (narrow) %v15964_v63, 8  ;;  %v20421_v63 = vld [vmem:[#allocation36_spill] sm:$0xff] }
 0x366   : > { %1661 = vxpose.xlu0.b32.end [16/16] (narrow) %v1485_v61, 8  ;;  %v1598_v4 = vpop.trf.xlu0 }
 0x367   : > { %1687 = vxpose.xlu1.b32.cont [10/16] (narrow) %v15958_v24, 8  ;;  %13460 = vmatprep.subr.mxu0 %v1598_v4  ;;  %v20418_v24 = vld [vmem:[#allocation63_spill] sm:$0xff] }
 0x368   : > { %13461 = vmatpush3.msra.mxu0 %v1598_v4 }
 0x369   : > { %13463 = vmatmul.mubr.msk.f32.vlgmr.msra.gmra.mxu0 %vm1710_vm3, %v15488_v11 }
 0x36a   : > { %13465 = vmatprep.mubr.msk.f32.mxu0 %vm1710_vm3, %v15515_v17  ;;  %v20400_v17 = vld [vmem:[#allocation48_spill] sm:$0xff] }
 0x36b   : > { %1688 = vxpose.xlu1.b32.cont [11/16] (narrow) %v15977_v46, 8  ;;  %v20426_v46 = vld [vmem:[#allocation42_spill] sm:$0xff] }
 0x36d   : > { %13466 = vmatmul.mubr.msk.f32.gmra.mxu0 %vm1710_vm3, %v15504_v15  ;;  %v20399_v15 = vld [vmem:[#allocation60_spill] sm:$0xff] }
 0x36e   : > { %13468 = vmatprep.mubr.msk.f32.mxu0 %vm1710_vm3, %v15537_v21  ;;  %v20402_v21 = vld [vmem:[#allocation52_spill] sm:$0xff] }
 0x36f   : > { %1689 = vxpose.xlu1.b32.cont [12/16] (narrow) %v15971_v16, 8  ;;  %v20424_v16 = vld [vmem:[#allocation39_spill] sm:$0xff] }
 0x371   : > { %13469 = vmatmul.mubr.msk.f32.gmra.mxu0 %vm1710_vm3, %v15526_v19  ;;  %v20401_v19 = vld [vmem:[#allocation64_spill] sm:$0xff] }
 0x372   : > { %13471 = vmatprep.mubr.msk.f32.mxu0 %vm1710_vm3, %v15555_v26 }
 0x373   : > { %1690 = vxpose.xlu1.b32.cont [13/16] (narrow) %v1511_v58, 8  ;;  %v20433_v58 = vld [vmem:[#allocation54_spill] sm:$0xff] }
 0x375   : > { %13472 = vmatmul.mubr.msk.f32.gmra.mxu0 %vm1710_vm3, %v15544_v23  ;;  %v20404_v23 = vld [vmem:[#allocation57_spill] sm:$0xff] }
 0x376   : > { %13474 = vmatprep.mubr.msk.f32.mxu0 %vm1710_vm3, %v15573_v33  ;;  %v20407_v33 = vld [vmem:[#allocation40_spill] sm:$0xff] }
 0x377   : > { %1691 = vxpose.xlu1.b32.cont [14/16] (narrow) %v15984_v57, 8  ;;  %v20430_v57 = vld [vmem:[#allocation51_spill] sm:$0xff] }
 0x379   : > { %13475 = vmatmul.mubr.msk.f32.gmra.mxu0 %vm1710_vm3, %v15562_v29  ;;  %v20406_v29 = vld [vmem:[#allocation34_spill] sm:$0xff] }
 0x37a   : > { %13477 = vmatprep.mubr.msk.f32.mxu0 %vm1710_vm3, %v15591_v39  ;;  %v20409_v39 = vld [vmem:[#allocation45_spill] sm:$0xff] }
 0x37b   : > { %1692 = vxpose.xlu1.b32.cont [15/16] (narrow) %v1515_v6, 8 }
 0x37d   : > { %13478 = vmatmul.mubr.msk.f32.gmra.mxu0 %vm1710_vm3, %v15580_v35  ;;  %v20408_v35 = vld [vmem:[#allocation38_spill] sm:$0xff] }
 0x37e   : > { %13480 = vmatprep.mubr.msk.f32.mxu0 %vm1710_vm3, %v15609_v45  ;;  %v20411_v45 = vld [vmem:[#allocation50_spill] sm:$0xff] }
 0x37f   : > { %1693 = vxpose.xlu1.b32.end [16/16] (narrow) %v1517_v1, 8  ;;  %v1630_v11 = vpop.trf.xlu1 }
 0x380   : > { %13486 = vmatprep.subr.mxu1 %v1630_v11 }
 0x381   : > { %13481 = vmatmul.mubr.msk.f32.gmra.mxu0 %vm1710_vm3, %v15598_v41  ;;  %13487 = vmatpush3.msra.mxu1 %v1630_v11  ;;  %v20410_v41 = vld [vmem:[#allocation43_spill] sm:$0xff] }
 0x382   : > { %13483 = vmatprep.mubr.msk.f32.mxu0 %vm1710_vm3, %v15627_v51  ;;  %13489 = vmatmul.mubr.msk.f32.vlgmr.msra.gmra.mxu1 %vm1710_vm3, %v15645_v53  ;;  %v20412_v53 = vld [vmem:[#allocation47_spill] sm:$0xff] }
 0x383   : > { %13491 = vmatprep.mubr.msk.f32.mxu1 %vm1710_vm3, %v15671_v0  ;;  %v20414_v0 = vld [vmem:[#allocation53_spill] sm:$0xff] }
 0x385   : > { %13484 = vmatmul.mubr.msk.f32.gmra.mxu0 %vm1710_vm3, %v15616_v47 }
 0x386   : > { %13492 = vmatmul.mubr.msk.f32.gmra.mxu1 %vm1710_vm3, %v15661_v59  ;;  %13514 = vmatprep.mubr.msk.f32.mxu0 %vm1710_vm3, %v15682_v8  ;;  %v20413_v59 = vld [vmem:[#allocation56_spill] sm:$0xff] }
 0x387   : > { %13494 = vmatprep.mubr.msk.f32.mxu1 %vm1710_vm3, %v15738_v40  ;;  %v20420_v40 = vld [vmem:[#allocation32_spill] sm:$0xff] }
 0x38a   : > { %13495 = vmatmul.mubr.msk.f32.gmra.mxu1 %vm1710_vm3, %v15687_v9  ;;  %v20415_v9 = vld [vmem:[#allocation62_spill] sm:$0xff] }
 0x38b   : > { %13497 = vmatprep.mubr.msk.f32.mxu1 %vm1710_vm3, %v15777_v62  ;;  %v20403_v62 = vld [vmem:[#allocation68_spill] sm:$0xff] }
 0x38e   : > { %13498 = vmatmul.mubr.msk.f32.gmra.mxu1 %vm1710_vm3, %v15711_v18  ;;  %v20417_v18 = vld [vmem:[#allocation66_spill] sm:$0xff] }
 0x38f   : > { %13500 = vmatprep.mubr.msk.f32.mxu1 %vm1710_vm3, %v15816_v38  ;;  %v20405_v38 = vld [vmem:[#allocation33_spill] sm:$0xff] }
 0x392   : > { %13501 = vmatmul.mubr.msk.f32.gmra.mxu1 %vm1710_vm3, %v15736_v37  ;;  %v20419_v37 = vld [vmem:[#allocation70_spill] sm:$0xff] }
 0x393   : > { %13503 = vmatprep.mubr.msk.f32.mxu1 %vm1710_vm3, %v20399_v15 }
 0x396   : > { %13504 = vmatmul.mubr.msk.f32.gmra.mxu1 %vm1710_vm3, %v20400_v17 }
 0x397   : > { %13506 = vmatprep.mubr.msk.f32.mxu1 %vm1710_vm3, %v20401_v19 }
 0x39a   : > { %13507 = vmatmul.mubr.msk.f32.gmra.mxu1 %vm1710_vm3, %v20402_v21 }
 0x39b   : > { %13509 = vmatprep.mubr.msk.f32.mxu1 %vm1710_vm3, %v20403_v62 }
 0x39e   : > { %13510 = vmatmul.mubr.msk.f32.gmra.mxu1 %vm1710_vm3, %v20404_v23 }
 0x39f   : > { %13540 = vmatprep.mubr.msk.f32.mxu1 %vm1710_vm3, %v20405_v38 }
 0x3a6   : > { %v1662_v26 = vpop.trf.xlu0 }
 0x3a7   : > { %13512 = vmatprep.subr.mxu0 %v1662_v26 }
 0x3a8   : > { %13513 = vmatpush3.msra.mxu0 %v1662_v26 }
 0x3a9   : > { %13515 = vmatmul.mubr.msk.f32.vlgmr.msra.gmra.mxu0 %vm1710_vm3, %v20406_v29 }
 0x3aa   : > { %13517 = vmatprep.mubr.msk.f32.mxu0 %vm1710_vm3, %v20407_v33 }
 0x3ad   : > { %13518 = vmatmul.mubr.msk.f32.gmra.mxu0 %vm1710_vm3, %v20408_v35 }
 0x3ae   : > { %13520 = vmatprep.mubr.msk.f32.mxu0 %vm1710_vm3, %v20409_v39 }
 0x3b1   : > { %13521 = vmatmul.mubr.msk.f32.gmra.mxu0 %vm1710_vm3, %v20410_v41 }
 0x3b2   : > { %13523 = vmatprep.mubr.msk.f32.mxu0 %vm1710_vm3, %v20411_v45 }
 0x3b5   : > { %13524 = vmatmul.mubr.msk.f32.gmra.mxu0 %vm1710_vm3, %v20412_v53 }
 0x3b6   : > { %13526 = vmatprep.mubr.msk.f32.mxu0 %vm1710_vm3, %v20413_v59 }
 0x3b9   : > { %13527 = vmatmul.mubr.msk.f32.gmra.mxu0 %vm1710_vm3, %v20414_v0 }
 0x3ba   : > { %13529 = vmatprep.mubr.msk.f32.mxu0 %vm1710_vm3, %v20415_v9 }
 0x3bd   : > { %13530 = vmatmul.mubr.msk.f32.gmra.mxu0 %vm1710_vm3, %v20416_v13 }
 0x3be   : > { %13532 = vmatprep.mubr.msk.f32.mxu0 %vm1710_vm3, %v20417_v18 }
 0x3bf   : > { %v1694_v20 = vpop.trf.xlu1 }
 0x3c0   : > { %13538 = vmatprep.subr.mxu1 %v1694_v20 }
 0x3c1   : > { %13533 = vmatmul.mubr.msk.f32.gmra.mxu0 %vm1710_vm3, %v20418_v24  ;;  %13539 = vmatpush3.msra.mxu1 %v1694_v20 }
 0x3c2   : > { %13535 = vmatprep.mubr.msk.f32.mxu0 %vm1710_vm3, %v20419_v37  ;;  %13541 = vmatmul.mubr.msk.f32.vlgmr.msra.gmra.mxu1 %vm1710_vm3, %v20420_v40 }
 0x3c3   : > { %13543 = vmatprep.mubr.msk.f32.mxu1 %vm1710_vm3, %v20421_v63 }
 0x3c5   : > { %13536 = vmatmul.mubr.msk.f32.gmra.mxu0 %vm1710_vm3, %v20422_v25 }
 0x3c6   : > { %13544 = vmatmul.mubr.msk.f32.gmra.mxu1 %vm1710_vm3, %v20423_v42 }
 0x3c7   : > { %13546 = vmatprep.mubr.msk.f32.mxu1 %vm1710_vm3, %v20424_v16 }
 0x3ca   : > { %13547 = vmatmul.mubr.msk.f32.gmra.mxu1 %vm1710_vm3, %v20425_v28 }
 0x3cb   : > { %13549 = vmatprep.mubr.msk.f32.mxu1 %vm1710_vm3, %v20426_v46 }
 0x3ce   : > { %13550 = vmatmul.mubr.msk.f32.gmra.mxu1 %vm1710_vm3, %v20427_v56 }
 0x3cf   : > { %13552 = vmatprep.mubr.msk.f32.mxu1 %vm1710_vm3, %v20428_v30 }
 0x3d2   : > { %13553 = vmatmul.mubr.msk.f32.gmra.mxu1 %vm1710_vm3, %v20429_v48 }
 0x3d3   : > { %13555 = vmatprep.mubr.msk.f32.mxu1 %vm1710_vm3, %v20430_v57 }
 0x3d6   : > { %13556 = vmatmul.mubr.msk.f32.gmra.mxu1 %vm1710_vm3, %v20431_v43 }
 0x3d7   : > { %13558 = vmatprep.mubr.msk.f32.mxu1 %vm1710_vm3, %v20432_v27 }
 0x3da   : > { %13559 = vmatmul.mubr.msk.f32.gmra.mxu1 %vm1710_vm3, %v20433_v58 }
 0x3db   : > { %13561 = vmatprep.mubr.msk.f32.mxu1 %vm1710_vm3, %v20434_v7 }
 0x3de   : > { %13562 = vmatmul.mubr.msk.f32.gmra.mxu1 %vm1710_vm3, %v20435_v50 }
 0x429   : > { %v13464_v1 = vpop.f32.mrf.mxu0 }
 0x42a   : > { %v16135_v34 = vmul.f32 0.35355338, %v13464_v1 }
 0x42b   : > { %v1809_v14 = vpop.f32.mrf.mxu0 }
 0x42c   : > { %2485 = vmax.xlane.f32.xlu1 %v16135_v34  ;;  %v16138_v54 = vmul.f32 0.35355338, %v1809_v14 }
 0x42d   : > { %v13467_v32 = vpop.f32.mrf.mxu0 }
 0x42e   : > { %v16141_v61 = vmul.f32 0.35355338, %v13467_v32 }
 0x42f   : > { %v1819_v2 = vpop.f32.mrf.mxu0 }
 0x430   : > { %2483 = vmax.xlane.f32.xlu1 %v16138_v54  ;;  %v16144_v6 = vmul.f32 0.35355338, %v1819_v2 }
 0x431   : > { %v13470_v22 = vpop.f32.mrf.mxu0 }
 0x432   : > { %v16147_v17 = vmul.f32 0.35355338, %v13470_v22 }
 0x433   : > { %v1829_v5 = vpop.f32.mrf.mxu0 }
 0x434   : > { %2489 = vmax.xlane.f32.xlu1 %v16141_v61  ;;  %v16150_v26 = vmul.f32 0.35355338, %v1829_v5 }
 0x435   : > { %v13473_v4 = vpop.f32.mrf.mxu0 }
 0x436   : > { %v16153_v14 = vmul.f32 0.35355338, %v13473_v4 }
 0x437   : > { %v1839_v11 = vpop.f32.mrf.mxu0 }
 0x438   : > { %2487 = vmax.xlane.f32.xlu1 %v16144_v6  ;;  %v16156_v50 = vmul.f32 0.35355338, %v1839_v11 }
 0x439   : > { %v13476_v15 = vpop.f32.mrf.mxu0 }
 0x43a   : > { %v16162_v5 = vmul.f32 0.35355338, %v13476_v15 }
 0x43b   : > { %v1849_v19 = vpop.f32.mrf.mxu0 }
 0x43c   : > { %2493 = vmax.xlane.f32.xlu1 %v16147_v17  ;;  %v16168_v52 = vmul.f32 0.35355338, %v1849_v19 }
 0x43d   : > { %v13479_v21 = vpop.f32.mrf.mxu0 }
 0x43e   : > { %v16174_v12 = vmul.f32 0.35355338, %v13479_v21 }
 0x43f   : > { %v1859_v20 = vpop.f32.mrf.mxu0 }
 0x440   : > { %2491 = vmax.xlane.f32.xlu1 %v16150_v26  ;;  %v16180_v49 = vmul.f32 0.35355338, %v1859_v20 }
 0x441   : > { %v13482_v1 = vpop.f32.mrf.mxu0 }
 0x442   : > { %v13490_v25 = vpop.f32.mrf.mxu1  ;;  %v16186_v3 = vmul.f32 0.35355338, %v13482_v1 }
 0x443   : > { %v1869_v32 = vpop.f32.mrf.mxu0  ;;  %v16170_v11 = vmul.f32 0.35355338, %v13490_v25 }
 0x444   : > { %2497 = vmax.xlane.f32.xlu1 %v16153_v14  ;;  %v1986_v4 = vpop.f32.mrf.mxu1  ;;  %v16192_v44 = vmul.f32 0.35355338, %v1869_v32 }
 0x445   : > { %v13485_v2 = vpop.f32.mrf.mxu0  ;;  %v16176_v15 = vmul.f32 0.35355338, %v1986_v4 }
 0x446   : > { %v16158_v22 = vmul.f32 0.35355338, %v13485_v2  ;;  %v13493_v2 = vpop.f32.mrf.mxu1 }
 0x447   : > { %v1879_v7 = vpop.f32.mrf.mxu0  ;;  %v16182_v19 = vmul.f32 0.35355338, %v13493_v2 }
 0x448   : > { %2495 = vmax.xlane.f32.xlu1 %v16156_v50  ;;  %2513 = vmax.xlane.f32.xlu0 %v16158_v22  ;;  %v16164_v37 = vmul.f32 0.35355338, %v1879_v7  ;;  %v1996_v7 = vpop.f32.mrf.mxu1 }
 0x449   : > { %v16188_v21 = vmul.f32 0.35355338, %v1996_v7 }
 0x44a   : > { %v13496_v25 = vpop.f32.mrf.mxu1 }
 0x44b   : > { %v16194_v20 = vmul.f32 0.35355338, %v13496_v25 }
 0x44c   : > { %2501 = vmax.xlane.f32.xlu1 %v16162_v5  ;;  %2511 = vmax.xlane.f32.xlu0 %v16164_v37  ;;  %v2006_v4 = vpop.f32.mrf.mxu1 }
 0x44d   : > { %v16198_v10 = vmul.f32 0.35355338, %v2006_v4 }
 0x44e   : > { %v13499_v2 = vpop.f32.mrf.mxu1 }
 0x44f   : > { %v16201_v7 = vmul.f32 0.35355338, %v13499_v2 }
 0x450   : > { %2499 = vmax.xlane.f32.xlu1 %v16168_v52  ;;  %2517 = vmax.xlane.f32.xlu0 %v16170_v11  ;;  %v2016_v1 = vpop.f32.mrf.mxu1 }
 0x451   : > { %v16204_v32 = vmul.f32 0.35355338, %v2016_v1 }
 0x452   : > { %v13502_v31 = vpop.f32.mrf.mxu1 }
 0x453   : > { %v16210_v4 = vmul.f32 0.35355338, %v13502_v31 }
 0x454   : > { %2505 = vmax.xlane.f32.xlu1 %v16174_v12  ;;  %2515 = vmax.xlane.f32.xlu0 %v16176_v15  ;;  %v2026_v55 = vpop.f32.mrf.mxu1 }
 0x455   : > { %v16216_v1 = vmul.f32 0.35355338, %v2026_v55 }
 0x456   : > { %v13505_v2 = vpop.f32.mrf.mxu1 }
 0x457   : > { %v16222_v31 = vmul.f32 0.35355338, %v13505_v2 }
 0x458   : > { %2503 = vmax.xlane.f32.xlu1 %v16180_v49  ;;  %2521 = vmax.xlane.f32.xlu0 %v16182_v19  ;;  %v2036_v18 = vpop.f32.mrf.mxu1 }
 0x459   : > { %v16228_v55 = vmul.f32 0.35355338, %v2036_v18 }
 0x45c   : > { %2509 = vmax.xlane.f32.xlu1 %v16186_v3  ;;  %2519 = vmax.xlane.f32.xlu0 %v16188_v21 }
 0x460   : > { %2507 = vmax.xlane.f32.xlu1 %v16192_v44  ;;  %2525 = vmax.xlane.f32.xlu0 %v16194_v20 }
 0x464   : > { %2523 = vmax.xlane.f32.xlu0 %v16198_v10 }
 0x468   : > { %2529 = vmax.xlane.f32.xlu0 %v16201_v7 }
 0x469   : > { %v13516_v36 = vpop.f32.mrf.mxu0 }
 0x46a   : > { %v16206_v25 = vmul.f32 0.35355338, %v13516_v36 }
 0x46b   : > { %v2163_v58 = vpop.f32.mrf.mxu0 }
 0x46c   : > { %20436 = vst [vmem:[#allocation60_spill] sm:$0xff] %v16206_v25  ;;  %2527 = vmax.xlane.f32.xlu0 %v16204_v32  ;;  %2549 = vmax.xlane.f32.xlu1 %v16206_v25  ;;  %v16212_v24 = vmul.f32 0.35355338, %v2163_v58  ;;  %v13508_v25 = vpop.f32.mrf.mxu1 }
 0x46d   : > { %v13519_v27 = vpop.f32.mrf.mxu0  ;;  %v16234_v2 = vmul.f32 0.35355338, %v13508_v25 }
 0x46e   : > { %20437 = vst [vmem:[#allocation48_spill] sm:$0xff] %v16212_v24  ;;  %v16218_v36 = vmul.f32 0.35355338, %v13519_v27 }
 0x46f   : > { %v2173_v60 = vpop.f32.mrf.mxu0 }
 0x470   : > { %2533 = vmax.xlane.f32.xlu0 %v16210_v4  ;;  %2547 = vmax.xlane.f32.xlu1 %v16212_v24  ;;  %20438 = vst [vmem:[#allocation64_spill] sm:$0xff] %v16218_v36  ;;  %v16224_v58 = vmul.f32 0.35355338, %v2173_v60  ;;  %v2046_v24 = vpop.f32.mrf.mxu1 }
 0x471   : > { %v13522_v57 = vpop.f32.mrf.mxu0  ;;  %v16240_v18 = vmul.f32 0.35355338, %v2046_v24 }
 0x472   : > { %20439 = vst [vmem:[#allocation52_spill] sm:$0xff] %v16224_v58  ;;  %v16230_v27 = vmul.f32 0.35355338, %v13522_v57  ;;  %v13511_v43 = vpop.f32.mrf.mxu1 }
 0x473   : > { %v2183_v9 = vpop.f32.mrf.mxu0 }
 0x474   : > { %2531 = vmax.xlane.f32.xlu0 %v16216_v1  ;;  %2553 = vmax.xlane.f32.xlu1 %v16218_v36  ;;  %20440 = vst [vmem:[#allocation68_spill] sm:$0xff] %v16230_v27  ;;  %v16236_v60 = vmul.f32 0.35355338, %v2183_v9 }
 0x475   : > { %v13525_v13 = vpop.f32.mrf.mxu0 }
 0x476   : > { %20441 = vst [vmem:[#allocation57_spill] sm:$0xff] %v16236_v60  ;;  %v16242_v57 = vmul.f32 0.35355338, %v13525_v13 }
 0x477   : > { %v2193_v36 = vpop.f32.mrf.mxu0 }
 0x478   : > { %2537 = vmax.xlane.f32.xlu0 %v16222_v31  ;;  %2551 = vmax.xlane.f32.xlu1 %v16224_v58  ;;  %20442 = vst [vmem:[#allocation33_spill] sm:$0xff] %v16242_v57  ;;  %v2056_v58 = vpop.f32.mrf.mxu1  ;;  %v16248_v9 = vmul.f32 0.35355338, %v2193_v36 }
 0x479   : > { %v16246_v25 = vmul.f32 0.35355338, %v2056_v58  ;;  %v13528_v30 = vpop.f32.mrf.mxu0 }
 0x47a   : > { %20443 = vst [vmem:[#allocation34_spill] sm:$0xff] %v16248_v9  ;;  %v16252_v24 = vmul.f32 0.35355338, %v13528_v30 }
 0x47b   : > { %v2203_v48 = vpop.f32.mrf.mxu0 }
 0x47c   : > { %2535 = vmax.xlane.f32.xlu0 %v16228_v55  ;;  %2557 = vmax.xlane.f32.xlu1 %v16230_v27  ;;  %v16258_v58 = vmul.f32 0.35355338, %v2203_v48 }
 0x480   : > { %2541 = vmax.xlane.f32.xlu0 %v16234_v2  ;;  %2555 = vmax.xlane.f32.xlu1 %v16236_v60  ;;  %v13531_v60 = vpop.f32.mrf.mxu0 }
 0x481   : > { %v16264_v30 = vmul.f32 0.35355338, %v13531_v60 }
 0x482   : > { %v13542_v59 = vpop.f32.mrf.mxu1  ;;  %v2213_v45 = vpop.f32.mrf.mxu0 }
 0x483   : > { %v16254_v13 = vmul.f32 0.35355338, %v13542_v59  ;;  %v16270_v48 = vmul.f32 0.35355338, %v2213_v45 }
 0x484   : > { %2539 = vmax.xlane.f32.xlu0 %v16240_v18  ;;  %2561 = vmax.xlane.f32.xlu1 %v16242_v57  ;;  %v2340_v0 = vpop.f32.mrf.mxu1 }
 0x485   : > { %20444 = vst [vmem:[#allocation38_spill] sm:$0xff] %v16254_v13  ;;  %v16260_v36 = vmul.f32 0.35355338, %v2340_v0 }
 0x486   : > { %v13545_v46 = vpop.f32.mrf.mxu1 }
 0x487   : > { %20445 = vst [vmem:[#allocation32_spill] sm:$0xff] %v16260_v36  ;;  %v16266_v59 = vmul.f32 0.35355338, %v13545_v46 }
 0x488   : > { %2543 = vmax.xlane.f32.xlu0 %v16246_v25  ;;  %2559 = vmax.xlane.f32.xlu1 %v16248_v9  ;;  %v2350_v56 = vpop.f32.mrf.mxu1 }
 0x489   : > { %20446 = vst [vmem:[#allocation35_spill] sm:$0xff] %v16266_v59  ;;  %v16272_v0 = vmul.f32 0.35355338, %v2350_v56 }
 0x48a   : > { %v13548_v53 = vpop.f32.mrf.mxu1 }
 0x48b   : > { %20447 = vst [vmem:[#allocation83_spill] sm:$0xff] %v16272_v0  ;;  %v16278_v46 = vmul.f32 0.35355338, %v13548_v53 }
 0x48c   : > { %2581 = vmax.xlane.f32.xlu0 %v16254_v13  ;;  %2565 = vmax.xlane.f32.xlu1 %v16252_v24  ;;  %v13534_v13 = vpop.f32.mrf.mxu0  ;;  %v2360_v27 = vpop.f32.mrf.mxu1 }
 0x48d   : > { %v16276_v60 = vmul.f32 0.35355338, %v13534_v13  ;;  %20448 = vst [vmem:[#allocation84_spill] sm:$0xff] %v16278_v46  ;;  %v16284_v56 = vmul.f32 0.35355338, %v2360_v27 }
 0x48f   : > { %20449 = vst [vmem:[#allocation85_spill] sm:$0xff] %v16284_v56 }
 0x490   : > { %2579 = vmax.xlane.f32.xlu0 %v16260_v36  ;;  %2563 = vmax.xlane.f32.xlu1 %v16258_v58  ;;  %v2223_v36 = vpop.f32.mrf.mxu0 }
 0x491   : > { %v16282_v45 = vmul.f32 0.35355338, %v2223_v36 }
 0x492   : > { %v13537_v53 = vpop.f32.mrf.mxu0 }
 0x493   : > { %v16294_v39 = vmul.f32 0.35355338, %v13537_v53 }
 0x494   : > { %2585 = vmax.xlane.f32.xlu0 %v16266_v59  ;;  %2569 = vmax.xlane.f32.xlu1 %v16264_v30  ;;  %v13551_v59 = vpop.f32.mrf.mxu1  ;;  %v2233_v27 = vpop.f32.mrf.mxu0 }
 0x495   : > { %v16290_v13 = vmul.f32 0.35355338, %v13551_v59  ;;  %20450 = vst [vmem:[#allocation86_spill] sm:$0xff] %v16294_v39 }
 0x496   : > { %v2370_v16 = vpop.f32.mrf.mxu1 }
 0x497   : > { %v16296_v36 = vmul.f32 0.35355338, %v2370_v16 }
 0x498   : > { %2583 = vmax.xlane.f32.xlu0 %v16272_v0  ;;  %2567 = vmax.xlane.f32.xlu1 %v16270_v48  ;;  %v16288_v0 = vmul.f32 0.35355338, %v13511_v43  ;;  %v16300_v43 = vmul.f32 0.35355338, %v2233_v27 }
 0x499   : > { %20451 = vst [vmem:[#allocation87_spill] sm:$0xff] %v16296_v36 }
 0x49a   : > { %20452 = vst [vmem:[#allocation88_spill] sm:$0xff] %v16300_v43 }
 0x49c   : > { %2589 = vmax.xlane.f32.xlu0 %v16278_v46  ;;  %2573 = vmax.xlane.f32.xlu1 %v16276_v60  ;;  %v13554_v46 = vpop.f32.mrf.mxu1 }
 0x49d   : > { %v16302_v59 = vmul.f32 0.35355338, %v13554_v46 }
 0x4a0   : > { %2587 = vmax.xlane.f32.xlu0 %v16284_v56  ;;  %2571 = vmax.xlane.f32.xlu1 %v16282_v45  ;;  %v2380_v56 = vpop.f32.mrf.mxu1 }
 0x4a1   : > { %v16306_v28 = vmul.f32 0.35355338, %v2380_v56 }
 0x4a2   : > { %v13557_v53 = vpop.f32.mrf.mxu1 }
 0x4a3   : > { %v16309_v16 = vmul.f32 0.35355338, %v13557_v53 }
 0x4a4   : > { %2593 = vmax.xlane.f32.xlu0 %v16290_v13  ;;  %2545 = vmax.xlane.f32.xlu1 %v16288_v0  ;;  %v2390_v41 = vpop.f32.mrf.mxu1 }
 0x4a5   : > { %20453 = vst [vmem:[#allocation89_spill] sm:$0xff] %v16309_v16  ;;  %v16312_v27 = vmul.f32 0.35355338, %v2390_v41 }
 0x4a6   : > { %v13560_v63 = vpop.f32.mrf.mxu1 }
 0x4a7   : > { %20454 = vst [vmem:[#allocation90_spill] sm:$0xff] %v16312_v27  ;;  %v16318_v56 = vmul.f32 0.35355338, %v13560_v63 }
 0x4a8   : > { %2591 = vmax.xlane.f32.xlu0 %v16296_v36  ;;  %2577 = vmax.xlane.f32.xlu1 %v16294_v39  ;;  %v2400_v57 = vpop.f32.mrf.mxu1 }
 0x4a9   : > { %20455 = vst [vmem:[#allocation91_spill] sm:$0xff] %v16318_v56 }
 0x4ac   : > { %2597 = vmax.xlane.f32.xlu0 %v16302_v59  ;;  %2575 = vmax.xlane.f32.xlu1 %v16300_v43  ;;  %v16321_v43 = vmul.f32 0.35355338, %v2400_v57 }
 0x4b0   : > { %2595 = vmax.xlane.f32.xlu0 %v16306_v28 }
 0x4b4   : > { %2601 = vmax.xlane.f32.xlu0 %v16309_v16  ;;  %v13563_v16 = vpop.f32.mrf.mxu1 }
 0x4b5   : > { %v2486_v9 = vpop.xlane.xlu1 %2485 }
 0x4b6   : > { %v2612_v46 = vsub.f32 %v16135_v34, %v2486_v9  ;;  %v16325_v9 = vmul.f32 0.35355338, %v13563_v16 }
 0x4b8   : > { %v2677_v33 = vmul.f32 1.442695, %v2612_v46  ;;  %2599 = vmax.xlane.f32.xlu0 %v16312_v27  ;;  %v2410_v46 = vpop.f32.mrf.mxu1 }
 0x4b9   : > { %v16316_v36 = vpop.xlane.xlu1 %2483  ;;  %v16329_v27 = vmul.f32 0.35355338, %v2410_v46 }
 0x4ba   : > { %14662 = vpow2.f32 %v2677_v33 }
 0x4bc   : > { %2605 = vmax.xlane.f32.xlu0 %v16318_v56 }
 0x4bd   : > { %v2490_v53 = vpop.xlane.xlu1 %2489 }
 0x4be   : > { %v2614_v41 = vsub.f32 %v16141_v61, %v2490_v53 }
 0x4c0   : > { %v2681_v39 = vmul.f32 1.442695, %v2614_v41  ;;  %2603 = vmax.xlane.f32.xlu0 %v16321_v43 }
 0x4c1   : > { %v2488_v34 = vpop.xlane.xlu1 %2487 }
 0x4c2   : > { %14664 = vpow2.f32 %v2681_v39  ;;  %v2613_v63 = vsub.f32 %v16144_v6, %v2488_v34 }
 0x4c4   : > { %v2679_v33 = vmul.f32 1.442695, %v2613_v63  ;;  %2609 = vmax.xlane.f32.xlu0 %v16325_v9 }
 0x4c5   : > { %v2494_v56 = vpop.xlane.xlu1 %2493 }
 0x4c6   : > { %14666 = vpow2.f32 %v2679_v33  ;;  %v2616_v61 = vsub.f32 %v16147_v17, %v2494_v56 }
 0x4c7   : > { %v16332_v57 = vpop.eup %14662 }
 0x4c8   : > { %20456 = vst [vmem:[#allocation92_spill] sm:$0xff] %v16332_v57  ;;  %v2685_v53 = vmul.f32 1.442695, %v2616_v61  ;;  %2607 = vmax.xlane.f32.xlu0 %v16329_v27  ;;  %2805 = vadd.xlane.f32.xlu1 %v16332_v57 }
 0x4c9   : > { %v2492_v39 = vpop.xlane.xlu1 %2491 }
 0x4ca   : > { %14668 = vpow2.f32 %v2685_v53  ;;  %v2615_v6 = vsub.f32 %v16150_v26, %v2492_v39 }
 0x4cc   : > { %v2683_v16 = vmul.f32 1.442695, %v2615_v6 }
 0x4cd   : > { %v2498_v41 = vpop.xlane.xlu1 %2497 }
 0x4ce   : > { %14670 = vpow2.f32 %v2683_v16  ;;  %v2618_v34 = vsub.f32 %v16153_v14, %v2498_v41 }
 0x4cf   : > { %v16338_v63 = vpop.eup %14664 }
 0x4d0   : > { %v2689_v46 = vmul.f32 1.442695, %v2618_v34  ;;  %2809 = vadd.xlane.f32.xlu1 %v16338_v63 }
 0x4d1   : > { %v2496_v17 = vpop.xlane.xlu1 %2495  ;;  %v2514_v56 = vpop.xlane.xlu0 %2513 }
 0x4d2   : > { %14672 = vpow2.f32 %v2689_v46  ;;  %v2617_v33 = vsub.f32 %v16156_v50, %v2496_v17  ;;  %v14269_v17 = vpack.i.bf16 %v20404_v23, %v15616_v47 }
 0x4d3   : > { %v16342_v61 = vpop.eup %14666 }
 0x4d4   : > { %20457 = vst [vmem:[#allocation93_spill] sm:$0xff] %v16342_v61  ;;  %v2687_v53 = vmul.f32 1.442695, %v2617_v33  ;;  %2807 = vadd.xlane.f32.xlu1 %v16342_v61 }
 0x4d5   : > { %v2502_v26 = vpop.xlane.xlu1 %2501  ;;  %v2512_v39 = vpop.xlane.xlu0 %2511 }
 0x4d6   : > { %14674 = vpow2.f32 %v2687_v53  ;;  %v2620_v14 = vsub.f32 %v16162_v5, %v2502_v26 }
 0x4d7   : > { %v16346_v6 = vpop.eup %14668 }
 0x4d8   : > { %v2693_v16 = vmul.f32 1.442695, %v2620_v14  ;;  %2813 = vadd.xlane.f32.xlu1 %v16346_v6 }
 0x4d9   : > { %v2500_v41 = vpop.xlane.xlu1 %2499  ;;  %v2518_v34 = vpop.xlane.xlu0 %2517 }
 0x4da   : > { %14676 = vpow2.f32 %v2693_v16  ;;  %v2619_v50 = vsub.f32 %v16168_v52, %v2500_v41  ;;  %v14279_v52 = vpack.i.bf16 %v20420_v40, %v20406_v29 }
 0x4db   : > { %v16350_v46 = vpop.eup %14670 }
 0x4dc   : > { %v2691_v33 = vmul.f32 1.442695, %v2619_v50  ;;  %2811 = vadd.xlane.f32.xlu1 %v16350_v46 }
 0x4dd   : > { %v2506_v53 = vpop.xlane.xlu1 %2505  ;;  %v2516_v5 = vpop.xlane.xlu0 %2515 }
 0x4de   : > { %14678 = vpow2.f32 %v2691_v33  ;;  %v2622_v26 = vsub.f32 %v16174_v12, %v2506_v53  ;;  %14270 = vrot.lane.b32.xlu0 %v14269_v17, %s20237_s28 }
 0x4df   : > { %v16357_v14 = vpop.eup %14672 }
 0x4e0   : > { %v2697_v16 = vmul.f32 1.442695, %v2622_v26  ;;  %2817 = vadd.xlane.f32.xlu1 %v16357_v14 }
 0x4e1   : > { %v2504_v41 = vpop.xlane.xlu1 %2503  ;;  %v2522_v47 = vpop.xlane.xlu0 %2521 }
 0x4e2   : > { %14680 = vpow2.f32 %v2697_v16  ;;  %v2621_v23 = vsub.f32 %v16180_v49, %v2504_v41  ;;  %14280 = vrot.lane.b32.xlu0 %v14279_v52, %s20237_s28  ;;  %v2626_v49 = vsub.f32 %v16158_v22, %v2514_v56  ;;  %v2627_v22 = vsub.f32 %v16176_v15, %v2516_v5 }
 0x4e3   : > { %v16364_v50 = vpop.eup %14674 }
 0x4e4   : > { %v2695_v12 = vmul.f32 1.442695, %v2621_v23  ;;  %2815 = vadd.xlane.f32.xlu1 %v16364_v50  ;;  %v2628_v23 = vsub.f32 %v16170_v11, %v2518_v34  ;;  %v2707_v11 = vmul.f32 1.442695, %v2627_v22  ;;  %v2630_v34 = vsub.f32 %v16182_v19, %v2522_v47 }
 0x4e5   : > { %v2510_v17 = vpop.xlane.xlu1 %2509  ;;  %v2520_v33 = vpop.xlane.xlu0 %2519 }
 0x4e6   : > { %14682 = vpow2.f32 %v2695_v12  ;;  %v2624_v29 = vsub.f32 %v16186_v3, %v2510_v17  ;;  %v2705_v12 = vmul.f32 1.442695, %v2626_v49  ;;  %v2625_v17 = vsub.f32 %v16164_v37, %v2512_v39 }
 0x4e7   : > { %v16368_v40 = vpop.eup %14676  ;;  %v2709_v61 = vmul.f32 1.442695, %v2628_v23  ;;  %v2713_v15 = vmul.f32 1.442695, %v2630_v34  ;;  %v2629_v5 = vsub.f32 %v16188_v21, %v2520_v33 }
 0x4e8   : > { %v2701_v53 = vmul.f32 1.442695, %v2624_v29  ;;  %2821 = vadd.xlane.f32.xlu1 %v16368_v40  ;;  %v2703_v56 = vmul.f32 1.442695, %v2625_v17 }
 0x4e9   : > { %v2508_v26 = vpop.xlane.xlu1 %2507  ;;  %v2526_v16 = vpop.xlane.xlu0 %2525  ;;  %v2711_v19 = vmul.f32 1.442695, %v2629_v5 }
 0x4ea   : > { %14684 = vpow2.f32 %v2701_v53  ;;  %v2623_v52 = vsub.f32 %v16192_v44, %v2508_v26  ;;  %v2632_v47 = vsub.f32 %v16194_v20, %v2526_v16 }
 0x4eb   : > { %v16373_v41 = vpop.eup %14678 }
 0x4ec   : > { %v2699_v57 = vmul.f32 1.442695, %v2623_v52  ;;  %2819 = vadd.xlane.f32.xlu1 %v16373_v41  ;;  %v2717_v21 = vmul.f32 1.442695, %v2632_v47 }
 0x4ed   : > { %v2524_v3 = vpop.xlane.xlu0 %2523 }
 0x4ee   : > { %14686 = vpow2.f32 %v2699_v57  ;;  %v2631_v33 = vsub.f32 %v16198_v10, %v2524_v3 }
 0x4ef   : > { %v16378_v29 = vpop.eup %14680  ;;  %14688 = vpow2.f32 %v2705_v12 }
 0x4f0   : > { %2825 = vadd.xlane.f32.xlu1 %v16378_v29  ;;  %14690 = vpow2.f32 %v2709_v61 }
 0x4f1   : > { %v2530_v44 = vpop.xlane.xlu0 %2529  ;;  %14692 = vpow2.f32 %v2703_v56  ;;  %v2715_v56 = vmul.f32 1.442695, %v2631_v33 }
 0x4f2   : > { %14694 = vpow2.f32 %v2707_v11  ;;  %v2634_v11 = vsub.f32 %v16201_v7, %v2530_v44 }
 0x4f3   : > { %v16382_v53 = vpop.eup %14682  ;;  %14696 = vpow2.f32 %v2713_v15 }
 0x4f4   : > { %2823 = vadd.xlane.f32.xlu1 %v16382_v53  ;;  %14698 = vpow2.f32 %v2711_v19  ;;  %v2721_v3 = vmul.f32 1.442695, %v2634_v11 }
 0x4f5   : > { %v2528_v37 = vpop.xlane.xlu0 %2527  ;;  %v16386_v57 = vpop.xlane.xlu1 %2549  ;;  %14700 = vpow2.f32 %v2717_v21 }
 0x4f6   : > { %20458 = vst [vmem:[#allocation94_spill] sm:$0xff] %v16386_v57  ;;  %14702 = vpow2.f32 %v2715_v56  ;;  %v2633_v15 = vsub.f32 %v16204_v32, %v2528_v37 }
 0x4f7   : > { %v16388_v39 = vpop.eup %14684  ;;  %14704 = vpow2.f32 %v2721_v3 }
 0x4f8   : > { %2829 = vadd.xlane.f32.xlu1 %v16388_v39  ;;  %v2719_v7 = vmul.f32 1.442695, %v2633_v15 }
 0x4f9   : > { %v2534_v26 = vpop.xlane.xlu0 %2533  ;;  %v16392_v49 = vpop.xlane.xlu1 %2547 }
 0x4fa   : > { %20459 = vst [vmem:[#allocation95_spill] sm:$0xff] %v16392_v49  ;;  %v2636_v44 = vsub.f32 %v16210_v4, %v2534_v26  ;;  %14706 = vpow2.f32 %v2719_v7  ;;  %v14264_v4 = vpack.i.bf16 %v20403_v62, %v15627_v51  ;;  %v20221_v51 = vmov 0.0  }
 0x4fb   : > { %v16394_v61 = vpop.eup %14686  ;;  %13564 = vmatprep.subr.mxu0 %v20221_v51  ;;  %13599 = vmatprep.subr.mxu1 %v20221_v51 }
 0x4fc   : > { %2827 = vadd.xlane.f32.xlu1 %v16394_v61  ;;  %v16400_v12 = vpop.eup %14688  ;;  %v2725_v32 = vmul.f32 1.442695, %v2636_v44 }
 0x4fd   : > { %v2532_v52 = vpop.xlane.xlu0 %2531  ;;  %v16398_v23 = vpop.xlane.xlu1 %2553 }
 0x4fe   : > { %20460 = vst [vmem:[#allocation96_spill] sm:$0xff] %v16398_v23  ;;  %v16403_v17 = vpop.eup %14690  ;;  %v2635_v37 = vsub.f32 %v16216_v1, %v2532_v52  ;;  %14708 = vpow2.f32 %v2725_v32 }
 0x4ff   : > { %20461 = vst [vmem:[#allocation97_spill] sm:$0xff] %v16403_v17  ;;  %v16409_v16 = vpop.eup %14692 }
 0x500   : > { %2833 = vadd.xlane.f32.xlu1 %v16400_v12  ;;  %v16412_v34 = vpop.eup %14694  ;;  %v2723_v26 = vmul.f32 1.442695, %v2635_v37 }
 0x501   : > { %2837 = vadd.xlane.f32.xlu0 %v16403_v17  ;;  %v16407_v22 = vpop.xlane.xlu1 %2551  ;;  %v2538_v20 = vpop.xlane.xlu0 %2537  ;;  %20463 = vst [vmem:[#allocation99_spill] sm:$0xff] %v16412_v34 }
 0x502   : > { %20462 = vst [vmem:[#allocation98_spill] sm:$0xff] %v16407_v22  ;;  %v16419_v5 = vpop.eup %14696  ;;  %v2638_v3 = vsub.f32 %v16222_v31, %v2538_v20  ;;  %14710 = vpow2.f32 %v2723_v26 }
 0x503   : > { %20464 = vst [vmem:[#allocation100_spill] sm:$0xff] %v16419_v5  ;;  %v16425_v21 = vpop.eup %14698 }
 0x504   : > { %2831 = vadd.xlane.f32.xlu1 %v16409_v16  ;;  %20466 = vst [vmem:[#allocation102_spill] sm:$0xff] %v16425_v21  ;;  %v16431_v11 = vpop.eup %14700  ;;  %v2729_v1 = vmul.f32 1.442695, %v2638_v3 }
 0x505   : > { %2835 = vadd.xlane.f32.xlu0 %v16412_v34  ;;  %v16416_v10 = vpop.xlane.xlu1 %2557  ;;  %v2536_v19 = vpop.xlane.xlu0 %2535  ;;  %20467 = vst [vmem:[#allocation103_spill] sm:$0xff] %v16431_v11 }
 0x506   : > { %v16439_v15 = vpop.eup %14702  ;;  %v2637_v52 = vsub.f32 %v16228_v55, %v2536_v19  ;;  %14712 = vpow2.f32 %v2729_v1 }
 0x507   : > { %20468 = vst [vmem:[#allocation104_spill] sm:$0xff] %v16439_v15  ;;  %v16446_v44 = vpop.eup %14704 }
 0x508   : > { %20469 = vst [vmem:[#allocation105_spill] sm:$0xff] %v16446_v44  ;;  %v2727_v20 = vmul.f32 1.442695, %v2637_v52  ;;  %v16454_v37 = vpop.eup %14706 }
 0x509   : > { %2841 = vadd.xlane.f32.xlu0 %v16419_v5  ;;  %v16422_v47 = vpop.xlane.xlu1 %2555  ;;  %v2542_v56 = vpop.xlane.xlu0 %2541  ;;  %20470 = vst [vmem:[#allocation106_spill] sm:$0xff] %v16454_v37 }
 0x50a   : > { %20465 = vst [vmem:[#allocation101_spill] sm:$0xff] %v16422_v47  ;;  %v2640_v32 = vsub.f32 %v16234_v2, %v2542_v56  ;;  %14714 = vpow2.f32 %v2727_v20  ;;  %v2611_v2 = vsub.f32 %v16138_v54, %v16316_v36 }
 0x50b   : > { %v16460_v26 = vpop.eup %14708 }
 0x50c   : > { %v2733_v19 = vmul.f32 1.442695, %v2640_v32 }
 0x50d   : > { %2839 = vadd.xlane.f32.xlu0 %v16425_v21  ;;  %v16428_v33 = vpop.xlane.xlu1 %2561  ;;  %v2540_v57 = vpop.xlane.xlu0 %2539  ;;  %v14289_v21 = vpack.i.bf16 %v20423_v42, %v20408_v35 }
 0x50e   : > { %14716 = vpow2.f32 %v2733_v19 }
 0x50f   : > { %v16469_v52 = vpop.eup %14710 }
 0x511   : > { %2845 = vadd.xlane.f32.xlu0 %v16431_v11  ;;  %v16434_v49 = vpop.xlane.xlu1 %2559  ;;  %v2544_v31 = vpop.xlane.xlu0 %2543 }
 0x513   : > { %v16476_v32 = vpop.eup %14712 }
 0x515   : > { %2843 = vadd.xlane.f32.xlu0 %v16439_v15  ;;  %v16442_v7 = vpop.xlane.xlu1 %2565  ;;  %14265 = vrot.lane.b32.xlu1 %v14264_v4, %s20237_s28  ;;  %v2639_v4 = vsub.f32 %v16240_v18, %v2540_v57  ;;  %v16462_v3 = vpop.xlane.xlu0 %2581  ;;  %v2675_v57 = vmul.f32 1.442695, %v2611_v2 }
 0x516   : > { %20471 = vst [vmem:[#allocation107_spill] sm:$0xff] %v16462_v3  ;;  %v2652_v17 = vsub.f32 %v16252_v24, %v16442_v7 }
 0x517   : > { %v2731_v56 = vmul.f32 1.442695, %v2639_v4  ;;  %v16481_v54 = vpop.eup %14714 }
 0x519   : > { %2849 = vadd.xlane.f32.xlu0 %v16446_v44  ;;  %v16451_v62 = vpop.xlane.xlu1 %2563  ;;  %v16474_v18 = vpop.xlane.xlu0 %2579  ;;  %14718 = vpow2.f32 %v2731_v56 }
 0x51a   : > { %20472 = vst [vmem:[#allocation108_spill] sm:$0xff] %v16474_v18  ;;  %14720 = vpow2.f32 %v2675_v57  ;;  %v2641_v18 = vsub.f32 %v16246_v25, %v2544_v31 }
 0x51b   : > { %v16488_v2 = vpop.eup %14716 }
 0x51c   : > { %v2735_v22 = vmul.f32 1.442695, %v2641_v18 }
 0x51d   : > { %2847 = vadd.xlane.f32.xlu0 %v16454_v37  ;;  %v16457_v55 = vpop.xlane.xlu1 %2569  ;;  %v16483_v36 = vpop.xlane.xlu0 %2585 }
 0x51e   : > { %20473 = vst [vmem:[#allocation109_spill] sm:$0xff] %v16483_v36  ;;  %v2654_v37 = vsub.f32 %v16264_v30, %v16457_v55 }
 0x520   : > { %v2761_v42 = vmul.f32 1.442695, %v2654_v37 }
 0x521   : > { %2853 = vadd.xlane.f32.xlu0 %v16460_v26  ;;  %v16465_v1 = vpop.xlane.xlu1 %2567  ;;  %v16491_v3 = vpop.xlane.xlu0 %2583 }
 0x522   : > { %20474 = vst [vmem:[#allocation110_spill] sm:$0xff] %v16491_v3  ;;  %v2653_v35 = vsub.f32 %v16270_v48, %v16465_v1 }
 0x525   : > { %2851 = vadd.xlane.f32.xlu0 %v16469_v52  ;;  %v16472_v20 = vpop.xlane.xlu1 %2573  ;;  %v16498_v36 = vpop.xlane.xlu0 %2589 }
 0x526   : > { %v16493_v57 = vpop.eup %14718 }
 0x527   : > { %v16496_v23 = vpop.eup %14720 }
 0x529   : > { %2857 = vadd.xlane.f32.xlu0 %v16476_v32  ;;  %v16479_v51 = vpop.xlane.xlu1 %2571  ;;  %v16501_v25 = vpop.xlane.xlu0 %2587 }
 0x52a   : > { %v2655_v48 = vsub.f32 %v16282_v45, %v16479_v51 }
 0x52d   : > { %2855 = vadd.xlane.f32.xlu0 %v16481_v54  ;;  %v2546_v19 = vpop.xlane.xlu1 %2545  ;;  %v2594_v18 = vpop.xlane.xlu0 %2593 }
 0x52e   : > { %v2642_v4 = vsub.f32 %v16288_v0, %v2546_v19 }
 0x530   : > { %v2737_v56 = vmul.f32 1.442695, %v2642_v4 }
 0x531   : > { %2861 = vadd.xlane.f32.xlu0 %v16488_v2  ;;  %v16511_v19 = vpop.xlane.xlu0 %2591  ;;  %v2578_v4 = vpop.xlane.xlu1 %2577 }
 0x532   : > { %14722 = vpow2.f32 %v2737_v56 }
 0x533   : > { %14724 = vpow2.f32 %v2735_v22  ;;  %v14274_v22 = vpack.i.bf16 %v20405_v38, %v15682_v8  ;;  %v2757_v8 = vmul.f32 1.442695, %v2652_v17  ;;  %v2651_v38 = vsub.f32 %v16258_v58, %v16451_v62 }
 0x534   : > { %v2666_v17 = vsub.f32 %v16290_v13, %v2594_v18  ;;  %v2759_v58 = vmul.f32 1.442695, %v2653_v35  ;;  %v2656_v62 = vsub.f32 %v16276_v60, %v16472_v20  ;;  %v20476_v20 = vld [vmem:[#allocation86_spill] sm:$0xff]  ;;  %v20477_v35 = vld [vmem:[#allocation89_spill] sm:$0xff] }
 0x535   : > { %2859 = vadd.xlane.f32.xlu0 %v16493_v57  ;;  %v2598_v56 = vpop.xlane.xlu0 %2597  ;;  %v2576_v3 = vpop.xlane.xlu1 %2575  ;;  %14726 = vpow2.f32 %v2757_v8  ;;  %v2755_v11 = vmul.f32 1.442695, %v2651_v38  ;;  %v2658_v18 = vsub.f32 %v20476_v20, %v2578_v4 }
 0x536   : > { %v2785_v8 = vmul.f32 1.442695, %v2666_v17  ;;  %v2668_v30 = vsub.f32 %v16302_v59, %v2598_v56  ;;  %v2765_v44 = vmul.f32 1.442695, %v2656_v62  ;;  %v2763_v59 = vmul.f32 1.442695, %v2655_v48 }
 0x537   : > { %14728 = vpow2.f32 %v2755_v11 }
 0x538   : > { %14730 = vpow2.f32 %v2761_v42  ;;  %v2789_v13 = vmul.f32 1.442695, %v2668_v30 }
 0x539   : > { %2803 = vadd.xlane.f32.xlu1 %v16496_v23  ;;  %v2596_v34 = vpop.xlane.xlu0 %2595  ;;  %14732 = vpow2.f32 %v2759_v58 }
 0x53a   : > { %14734 = vpow2.f32 %v2785_v8  ;;  %v2667_v11 = vsub.f32 %v16306_v28, %v2596_v34  ;;  %v2769_v28 = vmul.f32 1.442695, %v2658_v18  ;;  %v20479_v34 = vld [vmem:[#allocation88_spill] sm:$0xff] }
 0x53b   : > { %14736 = vpow2.f32 %v2765_v44  ;;  %v2657_v17 = vsub.f32 %v20479_v34, %v2576_v3  ;;  %v20480_v44 = vld [vmem:[#allocation90_spill] sm:$0xff] }
 0x53c   : > { %14738 = vpow2.f32 %v2789_v13  ;;  %v2787_v56 = vmul.f32 1.442695, %v2667_v11 }
 0x53d   : > { %14740 = vpow2.f32 %v2763_v59  ;;  %v2767_v13 = vmul.f32 1.442695, %v2657_v17  ;;  %v20482_v59 = vld [vmem:[#allocation91_spill] sm:$0xff] }
 0x53e   : > { %14742 = vpow2.f32 %v2787_v56 }
 0x53f   : > { %v16503_v0 = vpop.eup %14722  ;;  %14744 = vpow2.f32 %v2769_v28 }
 0x540   : > { %2865 = vadd.xlane.f32.xlu0 %v16503_v0  ;;  %v16506_v31 = vpop.eup %14724 }
 0x542   : > { %v16544_v37 = vpop.eup %14726 }
 0x543   : > { %20475 = vst [vmem:[#allocation111_spill] sm:$0xff] %v16544_v37 }
 0x544   : > { %2863 = vadd.xlane.f32.xlu0 %v16506_v31  ;;  %v16551_v45 = vpop.eup %14728 }
 0x545   : > { %20478 = vst [vmem:[#allocation86_spill] sm:$0xff] %v16551_v45  ;;  %v16558_v4 = vpop.eup %14730 }
 0x546   : > { %v16565_v11 = vpop.eup %14732 }
 0x547   : > { %v16568_v18 = vpop.eup %14734 }
 0x548   : > { %20483 = vst [vmem:[#allocation89_spill] sm:$0xff] %v16568_v18 }
 0x54a   : > { %14275 = vrot.lane.b32.xlu1 %v14274_v22, %s20237_s28  ;;  %v2602_v22 = vpop.xlane.xlu0 %2601 }
 0x54b   : > { %v2670_v42 = vsub.f32 %v20477_v35, %v2602_v22  ;;  %v20481_v22 = vld [vmem:[#allocation33_spill] sm:$0xff] }
 0x54c   : > { %v2650_v48 = vsub.f32 %v20481_v22, %v16428_v33 }
 0x54d   : > { %v2793_v58 = vmul.f32 1.442695, %v2670_v42  ;;  %v16572_v42 = vpop.eup %14736 }
 0x54e   : > { %v2600_v7 = vpop.xlane.xlu0 %2599  ;;  %v2753_v35 = vmul.f32 1.442695, %v2650_v48  ;;  %v16575_v34 = vpop.eup %14738 }
 0x54f   : > { %v2669_v62 = vsub.f32 %v20480_v44, %v2600_v7  ;;  %14746 = vpow2.f32 %v2793_v58  ;;  %20484 = vst [vmem:[#allocation88_spill] sm:$0xff] %v16575_v34 }
 0x550   : > { %14748 = vpow2.f32 %v2767_v13 }
 0x551   : > { %v16514_v47 = vpop.xlane.xlu1 %2805  ;;  %v2791_v3 = vmul.f32 1.442695, %v2669_v62 }
 0x552   : > { %v2606_v55 = vpop.xlane.xlu0 %2605 }
 0x553   : > { %v2672_v20 = vsub.f32 %v20482_v59, %v2606_v55  ;;  %14750 = vpow2.f32 %v2791_v3  ;;  %v16579_v55 = vpop.eup %14740 }
 0x554   : > { %14752 = vpow2.f32 %v2753_v35  ;;  %v16584_v22 = vpop.eup %14742 }
 0x555   : > { %v2797_v33 = vmul.f32 1.442695, %v2672_v20  ;;  %20485 = vst [vmem:[#allocation90_spill] sm:$0xff] %v16584_v22 }
 0x556   : > { %v2604_v60 = vpop.xlane.xlu0 %2603 }
 0x557   : > { %v2671_v28 = vsub.f32 %v16321_v43, %v2604_v60  ;;  %14754 = vpow2.f32 %v2797_v33  ;;  %v16588_v43 = vpop.eup %14744 }
 0x559   : > { %v16520_v5 = vpop.xlane.xlu1 %2809  ;;  %v2795_v58 = vmul.f32 1.442695, %v2671_v28 }
 0x55a   : > { %14290 = vrot.lane.b32.xlu0 %v14289_v21, %s20237_s28  ;;  %v2610_v8 = vpop.xlane.xlu0 %2609 }
 0x55b   : > { %v2674_v44 = vsub.f32 %v16325_v9, %v2610_v8  ;;  %14756 = vpow2.f32 %v2795_v58  ;;  %v20487_v9 = vld [vmem:[#allocation87_spill] sm:$0xff] }
 0x55c   : > { %v16591_v3 = vpop.eup %14746  ;;  %v2665_v8 = vsub.f32 %v20487_v9, %v16511_v19 }
 0x55d   : > { %v16525_v15 = vpop.xlane.xlu1 %2807  ;;  %v2801_v60 = vmul.f32 1.442695, %v2674_v44  ;;  %v16599_v35 = vpop.eup %14748 }
 0x55e   : > { %v2608_v56 = vpop.xlane.xlu0 %2607 }
 0x55f   : > { %v2673_v13 = vsub.f32 %v16329_v27, %v2608_v56  ;;  %14758 = vpow2.f32 %v2801_v60  ;;  %v2783_v56 = vmul.f32 1.442695, %v2665_v8 }
 0x560   : > { %v16601_v28 = vpop.eup %14750 }
 0x561   : > { %v16529_v24 = vpop.xlane.xlu1 %2813  ;;  %v2799_v33 = vmul.f32 1.442695, %v2673_v13  ;;  %v16607_v44 = vpop.eup %14752 }
 0x562   : > { %v16582_v62 = vpop.permute.xlu0 %14270  ;;  %20488 = vst [vmem:[#allocation91_spill] sm:$0xff] %v16607_v44 }
 0x565   : > { %v16534_v21 = vpop.xlane.xlu1 %2811 }
 0x566   : > { %v16593_v20 = vpop.permute.xlu0 %14280 }
 0x567   : > { %20486 = vst [vmem:[#allocation33_spill] sm:$0xff] %v16593_v20  ;;  %v16609_v20 = vpop.eup %14754 }
 0x568   : > { %v16615_v13 = vpop.eup %14756 }
 0x569   : > { %v16539_v38 = vpop.xlane.xlu1 %2817 }
 0x56c   : > { %v16620_v8 = vpop.eup %14758 }
 0x56d   : > { %v16546_v1 = vpop.xlane.xlu1 %2815 }
 0x56e   : > { %2885 = vadd.xlane.f32.xlu1 %v16544_v37 }
 0x571   : > { %v16553_v51 = vpop.xlane.xlu1 %2821 }
 0x572   : > { %2883 = vadd.xlane.f32.xlu1 %v16551_v45 }
 0x575   : > { %v16560_v30 = vpop.xlane.xlu1 %2819 }
 0x576   : > { %2889 = vadd.xlane.f32.xlu1 %v16558_v4 }
 0x579   : > { %v2826_v7 = vpop.xlane.xlu1 %2825  ;;  %2913 = vadd.xlane.f32.xlu0 %v16568_v18 }
 0x57a   : > { %2887 = vadd.xlane.f32.xlu1 %v16565_v11 }
 0x57d   : > { %v2824_v17 = vpop.xlane.xlu1 %2823  ;;  %2917 = vadd.xlane.f32.xlu0 %v16575_v34  ;;  %v20490_v34 = vld [vmem:[#allocation40_spill] sm:$0xff] }
 0x57e   : > { %2893 = vadd.xlane.f32.xlu1 %v16572_v42 }
 0x581   : > { %v2830_v48 = vpop.xlane.xlu1 %2829  ;;  %2915 = vadd.xlane.f32.xlu0 %v16584_v22 }
 0x582   : > { %2891 = vadd.xlane.f32.xlu1 %v16579_v55 }
 0x585   : > { %v2828_v59 = vpop.xlane.xlu1 %2827  ;;  %2921 = vadd.xlane.f32.xlu0 %v16591_v3 }
 0x586   : > { %2897 = vadd.xlane.f32.xlu1 %v16588_v43 }
 0x589   : > { %v2834_v58 = vpop.xlane.xlu1 %2833  ;;  %2919 = vadd.xlane.f32.xlu0 %v16601_v28 }
 0x58a   : > { %14760 = vrcp.f32 %v2834_v58  ;;  %v16604_v27 = vpop.xlane.xlu0 %2837  ;;  %2895 = vadd.xlane.f32.xlu1 %v16599_v35 }
 0x58b   : > { %14762 = vpow2.f32 %v2799_v33 }
 0x58d   : > { %v2832_v19 = vpop.xlane.xlu1 %2831  ;;  %2925 = vadd.xlane.f32.xlu0 %v16609_v20 }
 0x58e   : > { %14764 = vrcp.f32 %v2832_v19  ;;  %v16612_v60 = vpop.xlane.xlu0 %2835  ;;  %2881 = vadd.xlane.f32.xlu1 %v16607_v44  ;;  %v20489_v44 = vmov 0.0  }
 0x58f   : > { %14766 = vpow2.f32 %v2783_v56  ;;  %13596 = vmatprep.mubr.msk.f32.mxu0 %vm15112_vm4, %v20489_v44  ;;  %13631 = vmatprep.mubr.msk.f32.mxu1 %vm15112_vm4, %v20489_v44 }
 0x590   : > { %14768 = vrcp.f32 %v2830_v48 }
 0x591   : > { %2923 = vadd.xlane.f32.xlu0 %v16615_v13  ;;  %14770 = vrcp.f32 %v2828_v59 }
 0x592   : > { %v16618_v9 = vpop.xlane.xlu0 %2841  ;;  %14772 = vrcp.f32 %v2826_v7  ;;  %v20491_v7 = vld [vmem:[#allocation36_spill] sm:$0xff] }
 0x593   : > { %14774 = vrcp.f32 %v2824_v17  ;;  %v14284_v37 = vpack.i.bf16 %v20491_v7, %v20490_v34 }
 0x594   : > { %14776 = vrcp.f32 %v16553_v51 }
 0x595   : > { %2929 = vadd.xlane.f32.xlu0 %v16620_v8  ;;  %14778 = vrcp.f32 %v16560_v30  ;;  %v20492_v30 = vld [vmem:[#allocation34_spill] sm:$0xff] }
 0x596   : > { %v16623_v33 = vpop.xlane.xlu0 %2839  ;;  %14780 = vrcp.f32 %v16539_v38 }
 0x597   : > { %v14761_v58 = vpop.eup %14760  ;;  %14782 = vrcp.f32 %v16546_v1 }
 0x598   : > { %v3010_v19 = vmul.f32 %v14761_v58, %v16400_v12  ;;  %v16626_v18 = vpop.eup %14762  ;;  %14784 = vrcp.f32 %v16529_v24 }
 0x599   : > { %2927 = vadd.xlane.f32.xlu0 %v16626_v18  ;;  %14786 = vrcp.f32 %v16534_v21 }
 0x59a   : > { %v16629_v48 = vpop.xlane.xlu0 %2845  ;;  %13565 = vmatpush3.xpose.msra.mxu0 %v3010_v19 }
 0x59b   : > { %v14765_v56 = vpop.eup %14764  ;;  %13566 = vmatprep.subr.mxu0 %v20489_v44 }
 0x59c   : > { %v16632_v59 = vpop.eup %14766  ;;  %v3009_v22 = vmul.f32 %v14765_v56, %v16409_v16  ;;  %v2649_v56 = vsub.f32 %v20492_v30, %v16434_v49 }
 0x59d   : > { %v14769_v45 = vpop.eup %14768  ;;  %2911 = vadd.xlane.f32.xlu0 %v16632_v59 }
 0x59e   : > { %v16638_v12 = vpop.xlane.xlu0 %2843  ;;  %13567 = vmatpush3.xpose.msra.mxu0 %v3009_v22  ;;  %v3008_v58 = vmul.f32 %v14769_v45, %v16388_v39  ;;  %v14771_v17 = vpop.eup %14770 }
 0x59f   : > { %14285 = vrot.lane.b32.xlu1 %v14284_v37, %s20237_s28  ;;  %13568 = vmatprep.subr.mxu0 %v20489_v44  ;;  %v3007_v16 = vmul.f32 %v14771_v17, %v16394_v61  ;;  %v14773_v34 = vpop.eup %14772  ;;  %v20493_v17 = vld [vmem:[#allocation43_spill] sm:$0xff] }
 0x5a0   : > { %v3006_v39 = vmul.f32 %v14773_v34, %v16378_v29  ;;  %v14775_v37 = vpop.eup %14774 }
 0x5a1   : > { %v3005_v61 = vmul.f32 %v14775_v37, %v16382_v53  ;;  %v14777_v51 = vpop.eup %14776 }
 0x5a2   : > { %v16644_v19 = vpop.xlane.xlu0 %2849  ;;  %13569 = vmatpush3.xpose.msra.mxu0 %v3008_v58  ;;  %v3004_v29 = vmul.f32 %v14777_v51, %v16368_v40  ;;  %v14779_v38 = vpop.eup %14778  ;;  %v2751_v58 = vmul.f32 1.442695, %v2649_v56 }
 0x5a3   : > { %13570 = vmatprep.subr.mxu0 %v20489_v44  ;;  %v3003_v49 = vmul.f32 %v14779_v38, %v16373_v41  ;;  %v14781_v34 = vpop.eup %14780  ;;  %v20495_v41 = vld [vmem:[#allocation84_spill] sm:$0xff]  ;;  %v16680_v51 = vpop.permute.xlu1 %14265 }
 0x5a4   : > { %14788 = vpow2.f32 %v2751_v58  ;;  %v3002_v40 = vmul.f32 %v14781_v34, %v16357_v14  ;;  %v14783_v24 = vpop.eup %14782 }
 0x5a5   : > { %14790 = vrcp.f32 %v16520_v5  ;;  %v3001_v21 = vmul.f32 %v14783_v24, %v16364_v50  ;;  %v14785_v37 = vpop.eup %14784 }
 0x5a6   : > { %v16649_v22 = vpop.xlane.xlu0 %2847  ;;  %13571 = vmatpush3.xpose.msra.mxu0 %v3007_v16  ;;  %v20494_v16 = vld [vmem:[#allocation37_spill] sm:$0xff]  ;;  %14792 = vrcp.f32 %v16525_v15  ;;  %v3000_v5 = vmul.f32 %v14785_v37, %v16346_v6  ;;  %v14787_v30 = vpop.eup %14786 }
 0x5a7   : > { %13572 = vmatprep.subr.mxu0 %v20489_v44  ;;  %v14299_v1 = vpack.i.bf16 %v20494_v16, %v20493_v17  ;;  %14794 = vrcp.f32 %v16514_v47  ;;  %v2999_v15 = vmul.f32 %v14787_v30, %v16350_v46  ;;  %v20496_v17 = vld [vmem:[#allocation93_spill] sm:$0xff]  ;;  %v20497_v46 = vld [vmem:[#allocation92_spill] sm:$0xff] }
 0x5aa   : > { %v16654_v45 = vpop.xlane.xlu0 %2853  ;;  %13573 = vmatpush3.xpose.msra.mxu0 %v3006_v39 }
 0x5ab   : > { %13574 = vmatprep.subr.mxu0 %v20489_v44 }
 0x5ae   : > { %v16661_v7 = vpop.xlane.xlu0 %2851  ;;  %13575 = vmatpush3.xpose.msra.mxu0 %v3005_v61  ;;  %v2664_v61 = vsub.f32 %v20495_v41, %v16498_v36 }
 0x5af   : > { %13576 = vmatprep.subr.mxu0 %v20489_v44 }
 0x5b0   : > { %v2781_v56 = vmul.f32 1.442695, %v2664_v61 }
 0x5b2   : > { %13577 = vmatpush3.xpose.msra.mxu0 %v3004_v29  ;;  %v2858_v53 = vpop.xlane.xlu0 %2857  ;;  %v16685_v29 = vpop.eup %14788 }
 0x5b3   : > { %13578 = vmatprep.subr.mxu0 %v20489_v44  ;;  %14300 = vrot.lane.b32.xlu0 %v14299_v1, %s20237_s28  ;;  %v14791_v36 = vpop.eup %14790 }
 0x5b4   : > { %v2998_v6 = vmul.f32 %v14791_v36, %v16338_v63  ;;  %v14793_v47 = vpop.eup %14792  ;;  %v20498_v63 = vld [vmem:[#allocation45_spill] sm:$0xff]  ;;  %v20501_v36 = vld [vmem:[#allocation47_spill] sm:$0xff] }
 0x5b5   : > { %v2997_v16 = vmul.f32 %v14793_v47, %v20496_v17  ;;  %v14795_v1 = vpop.eup %14794 }
 0x5b6   : > { %13579 = vmatpush3.xpose.msra.mxu0 %v3003_v49  ;;  %v2856_v39 = vpop.xlane.xlu0 %2855  ;;  %v2996_v34 = vmul.f32 %v14795_v1, %v20497_v46  ;;  %v20506_v1 = vld [vmem:[#allocation103_spill] sm:$0xff]  ;;  %v20507_v46 = vld [vmem:[#allocation104_spill] sm:$0xff] }
 0x5b7   : > { %13580 = vmatprep.subr.mxu0 %v20489_v44 }
 0x5ba   : > { %13581 = vmatpush3.xpose.msra.mxu0 %v3002_v40  ;;  %v2862_v14 = vpop.xlane.xlu0 %2861 }
 0x5bb   : > { %13582 = vmatprep.subr.mxu0 %v20489_v44 }
 0x5be   : > { %13583 = vmatpush3.xpose.msra.mxu0 %v3001_v21  ;;  %v2860_v38 = vpop.xlane.xlu0 %2859  ;;  %v20499_v21 = vld [vmem:[#allocation39_spill] sm:$0xff] }
 0x5bf   : > { %13584 = vmatprep.subr.mxu0 %v20489_v44  ;;  %v14294_v37 = vpack.i.bf16 %v20499_v21, %v20498_v63  ;;  %v20508_v63 = vld [vmem:[#allocation50_spill] sm:$0xff] }
 0x5c0   : > { %v20509_v21 = vld [vmem:[#allocation42_spill] sm:$0xff] }
 0x5c2   : > { %13585 = vmatpush3.xpose.msra.mxu0 %v3000_v5  ;;  %v2804_v50 = vpop.xlane.xlu1 %2803 }
 0x5c3   : > { %2879 = vadd.xlane.f32.xlu1 %v16685_v29  ;;  %13586 = vmatprep.subr.mxu0 %v20489_v44  ;;  %14796 = vrcp.f32 %v2804_v50 }
 0x5c4   : > { %14798 = vpow2.f32 %v2781_v56 }
 0x5c6   : > { %13587 = vmatpush3.xpose.msra.mxu0 %v2999_v15 }
 0x5c7   : > { %13588 = vmatprep.subr.mxu0 %v20489_v44 }
 0x5c9   : > { %v2866_v58 = vpop.xlane.xlu0 %2865 }
 0x5ca   : > { %13589 = vmatpush3.xpose.msra.mxu0 %v2998_v6  ;;  %14800 = vrcp.f32 %v2866_v58 }
 0x5cb   : > { %13590 = vmatprep.subr.mxu0 %v20489_v44 }
 0x5cd   : > { %v2864_v49 = vpop.xlane.xlu0 %2863 }
 0x5ce   : > { %13591 = vmatpush3.xpose.msra.mxu0 %v2997_v16  ;;  %14802 = vrcp.f32 %v2864_v49 }
 0x5cf   : > { %13592 = vmatprep.subr.mxu0 %v20489_v44  ;;  %14804 = vrcp.f32 %v2862_v14 }
 0x5d0   : > { %v14797_v40 = vpop.eup %14796  ;;  %14806 = vrcp.f32 %v2860_v38  ;;  %v20502_v38 = vld [vmem:[#allocation41_spill] sm:$0xff] }
 0x5d1   : > { %v16696_v24 = vpop.eup %14798  ;;  %v2995_v41 = vmul.f32 %v14797_v40, %v16496_v23  ;;  %14808 = vrcp.f32 %v2858_v53  ;;  %v20500_v53 = vld [vmem:[#allocation68_spill] sm:$0xff]  ;;  %v14309_v6 = vpack.i.bf16 %v20502_v38, %v20501_v36  ;;  %v20516_v36 = vld [vmem:[#allocation53_spill] sm:$0xff] }
 0x5d2   : > { %13593 = vmatpush3.xpose.msra.mxu0 %v2996_v34  ;;  %2909 = vadd.xlane.f32.xlu0 %v16696_v24  ;;  %14810 = vrcp.f32 %v2856_v39  ;;  %v2648_v15 = vsub.f32 %v20500_v53, %v16416_v10  ;;  %v20517_v38 = vld [vmem:[#allocation44_spill] sm:$0xff] }
 0x5d3   : > { %13594 = vmatprep.subr.mxu0 %v20489_v44  ;;  %14812 = vrcp.f32 %v16654_v45 }
 0x5d4   : > { %14295 = vrot.lane.b32.xlu1 %v14294_v37, %s20237_s28  ;;  %14814 = vrcp.f32 %v16661_v7  ;;  %v2749_v39 = vmul.f32 1.442695, %v2648_v15  ;;  %v14304_v37 = vpack.i.bf16 %v20509_v21, %v20508_v63  ;;  %v20514_v15 = vld [vmem:[#allocation101_spill] sm:$0xff]  ;;  %v20529_v63 = vld [vmem:[#allocation51_spill] sm:$0xff] }
 0x5d5   : > { %14816 = vrcp.f32 %v16644_v19 }
 0x5d6   : > { %13595 = vmatpush3.xpose.msra.mxu0 %v2995_v41  ;;  %14818 = vpow2.f32 %v2749_v39 }
 0x5d7   : > { %13634 = vmatprep.subr.mxu0 %v20489_v44  ;;  %v14801_v61 = vpop.eup %14800  ;;  %14820 = vrcp.f32 %v16649_v22 }
 0x5d8   : > { %v3026_v14 = vmul.f32 %v14801_v61, %v16503_v0  ;;  %14822 = vrcp.f32 %v16629_v48 }
 0x5d9   : > { %14824 = vrcp.f32 %v16638_v12 }
 0x5da   : > { %13600 = vmatpush3.xpose.msra.mxu1 %v3026_v14  ;;  %14826 = vrcp.f32 %v16618_v9 }
 0x5db   : > { %v14803_v5 = vpop.eup %14802  ;;  %13601 = vmatprep.subr.mxu1 %v20489_v44 }
 0x5dc   : > { %v3025_v30 = vmul.f32 %v14803_v5, %v16506_v31  ;;  %v14805_v56 = vpop.eup %14804 }
 0x5dd   : > { %v3024_v23 = vmul.f32 %v14805_v56, %v16488_v2  ;;  %v14807_v50 = vpop.eup %14806 }
 0x5de   : > { %13602 = vmatpush3.xpose.msra.mxu1 %v3025_v30  ;;  %v3023_v0 = vmul.f32 %v14807_v50, %v16493_v57  ;;  %v14809_v31 = vpop.eup %14808  ;;  %v20512_v30 = vld [vmem:[#allocation97_spill] sm:$0xff]  ;;  %v20513_v50 = vld [vmem:[#allocation99_spill] sm:$0xff] }
 0x5df   : > { %13603 = vmatprep.subr.mxu1 %v20489_v44  ;;  %v3022_v10 = vmul.f32 %v14809_v31, %v16476_v32  ;;  %v14811_v2 = vpop.eup %14810  ;;  %v20503_v32 = vld [vmem:[#allocation85_spill] sm:$0xff] }
 0x5e0   : > { %v3021_v57 = vmul.f32 %v14811_v2, %v16481_v54  ;;  %v14813_v45 = vpop.eup %14812  ;;  %v2663_v47 = vsub.f32 %v20503_v32, %v16501_v25  ;;  %v20519_v2 = vld [vmem:[#allocation35_spill] sm:$0xff]  ;;  %v20520_v32 = vld [vmem:[#allocation56_spill] sm:$0xff] }
 0x5e1   : > { %v3020_v19 = vmul.f32 %v14813_v45, %v16460_v26  ;;  %v14815_v7 = vpop.eup %14814  ;;  %v20504_v26 = vld [vmem:[#allocation105_spill] sm:$0xff] }
 0x5e2   : > { %13604 = vmatpush3.xpose.msra.mxu1 %v3024_v23  ;;  %v3019_v22 = vmul.f32 %v14815_v7, %v16469_v52  ;;  %v14817_v54 = vpop.eup %14816  ;;  %v2779_v58 = vmul.f32 1.442695, %v2663_v47  ;;  %v20505_v52 = vld [vmem:[#allocation106_spill] sm:$0xff] }
 0x5e3   : > { %13605 = vmatprep.subr.mxu1 %v20489_v44  ;;  %v16733_v17 = vpop.eup %14818  ;;  %v3018_v25 = vmul.f32 %v14817_v54, %v20504_v26  ;;  %v20521_v47 = vld [vmem:[#allocation46_spill] sm:$0xff]  ;;  %v20522_v54 = vld [vmem:[#allocation96_spill] sm:$0xff] }
 0x5e4   : > { %v14821_v48 = vpop.eup %14820  ;;  %14828 = vpow2.f32 %v2779_v58  ;;  %v20523_v58 = vld [vmem:[#allocation64_spill] sm:$0xff] }
 0x5e5   : > { %14830 = vrcp.f32 %v16623_v33  ;;  %v3017_v12 = vmul.f32 %v14821_v48, %v20505_v52  ;;  %v14823_v16 = vpop.eup %14822  ;;  %v2646_v26 = vsub.f32 %v20523_v58, %v20522_v54  ;;  %v20524_v48 = vld [vmem:[#allocation58_spill] sm:$0xff]  ;;  %v20525_v52 = vld [vmem:[#allocation49_spill] sm:$0xff] }
 0x5e6   : > { %13606 = vmatpush3.xpose.msra.mxu1 %v3023_v0  ;;  %14832 = vrcp.f32 %v16604_v27  ;;  %v3016_v49 = vmul.f32 %v14823_v16, %v20506_v1  ;;  %v14825_v9 = vpop.eup %14824  ;;  %v20510_v27 = vld [vmem:[#allocation100_spill] sm:$0xff]  ;;  %v20515_v0 = vld [vmem:[#allocation57_spill] sm:$0xff]  ;;  %v20526_v16 = vld [vmem:[#allocation110_spill] sm:$0xff] }
 0x5e7   : > { %13607 = vmatprep.subr.mxu1 %v20489_v44  ;;  %14834 = vrcp.f32 %v16612_v60  ;;  %v3015_v34 = vmul.f32 %v14825_v9, %v20507_v46  ;;  %v14827_v40 = vpop.eup %14826  ;;  %v20511_v60 = vld [vmem:[#allocation102_spill] sm:$0xff]  ;;  %v2647_v31 = vsub.f32 %v20515_v0, %v20514_v15  ;;  %v20527_v1 = vld [vmem:[#allocation83_spill] sm:$0xff] }
 0x5e8   : > { %14310 = vrot.lane.b32.xlu0 %v14309_v6, %s20237_s28  ;;  %v3014_v41 = vmul.f32 %v14827_v40, %v20510_v27  ;;  %v14319_v6 = vpack.i.bf16 %v20517_v38, %v20516_v36  ;;  %v20528_v40 = vld [vmem:[#allocation62_spill] sm:$0xff]  ;;  %v20531_v27 = vld [vmem:[#allocation52_spill] sm:$0xff]  ;;  %v16816_v38 = vpop.permute.xlu0 %14290 }
 0x5e9   : > { %v2747_v39 = vmul.f32 1.442695, %v2647_v31  ;;  %v14324_v21 = vpack.i.bf16 %v20529_v63, %v20528_v40  ;;  %v20538_v15 = vld [vmem:[#allocation54_spill] sm:$0xff]  ;;  %v20541_v36 = vld [vmem:[#allocation76_spill] sm:$0xff]  ;;  %v20552_v40 = vld [vmem:[#allocation79_spill] sm:$0xff] }
 0x5ea   : > { %13608 = vmatpush3.xpose.msra.mxu1 %v3022_v10  ;;  %v20518_v10 = vld [vmem:[#allocation109_spill] sm:$0xff]  ;;  %v20539_v31 = vld [vmem:[#allocation74_spill] sm:$0xff] }
 0x5eb   : > { %13609 = vmatprep.subr.mxu1 %v20489_v44  ;;  %14836 = vpow2.f32 %v2747_v39  ;;  %v20540_v39 = vld [vmem:[#allocation71_spill] sm:$0xff]  ;;  %v20547_v54 = vld [vmem:[#allocation38_spill] sm:$0xff] }
 0x5ee   : > { %13610 = vmatpush3.xpose.msra.mxu1 %v3021_v57  ;;  %v2662_v57 = vsub.f32 %v20519_v2, %v20518_v10  ;;  %v20543_v2 = vld [vmem:[#allocation94_spill] sm:$0xff] }
 0x5ef   : > { %13611 = vmatprep.subr.mxu1 %v20489_v44 }
 0x5f0   : > { %v2777_v45 = vmul.f32 1.442695, %v2662_v57  ;;  %v20544_v57 = vld [vmem:[#allocation60_spill] sm:$0xff] }
 0x5f1   : > { %v16748_v33 = vpop.eup %14828 }
 0x5f2   : > { %13612 = vmatpush3.xpose.msra.mxu1 %v3020_v19  ;;  %v14831_v61 = vpop.eup %14830  ;;  %14838 = vpow2.f32 %v2777_v45  ;;  %v2644_v45 = vsub.f32 %v20544_v57, %v20543_v2 }
 0x5f3   : > { %13613 = vmatprep.subr.mxu1 %v20489_v44  ;;  %v3013_v14 = vmul.f32 %v14831_v61, %v20511_v60  ;;  %v14833_v5 = vpop.eup %14832 }
 0x5f4   : > { %v3012_v56 = vmul.f32 %v14833_v5, %v20512_v30  ;;  %v14835_v23 = vpop.eup %14834  ;;  %v20533_v5 = vld [vmem:[#allocation72_spill] sm:$0xff]  ;;  %v20534_v30 = vld [vmem:[#allocation66_spill] sm:$0xff] }
 0x5f5   : > { %v3011_v53 = vmul.f32 %v14835_v23, %v20513_v50  ;;  %v20536_v50 = vld [vmem:[#allocation69_spill] sm:$0xff] }
 0x5f6   : > { %13614 = vmatpush3.xpose.msra.mxu1 %v3019_v22  ;;  %v14314_v22 = vpack.i.bf16 %v20521_v47, %v20520_v32  ;;  %v20545_v32 = vld [vmem:[#allocation78_spill] sm:$0xff]  ;;  %v2741_v47 = vmul.f32 1.442695, %v2644_v45 }
 0x5f7   : > { %13615 = vmatprep.subr.mxu1 %v20489_v44 }
 0x5f8   : > { %2877 = vadd.xlane.f32.xlu1 %v16733_v17  ;;  %v16770_v19 = vpop.eup %14836 }
 0x5fa   : > { %13616 = vmatpush3.xpose.msra.mxu1 %v3018_v25  ;;  %v2745_v25 = vmul.f32 1.442695, %v2646_v26 }
 0x5fb   : > { %13617 = vmatprep.subr.mxu1 %v20489_v44 }
 0x5fc   : > { %14840 = vpow2.f32 %v2745_v25  ;;  %v20548_v25 = vld [vmem:[#allocation75_spill] sm:$0xff] }
 0x5fe   : > { %13618 = vmatpush3.xpose.msra.mxu1 %v3017_v12  ;;  %v14329_v12 = vpack.i.bf16 %v20525_v52, %v20524_v48  ;;  %v20549_v52 = vld [vmem:[#allocation80_spill] sm:$0xff] }
 0x5ff   : > { %13619 = vmatprep.subr.mxu1 %v20489_v44  ;;  %v16773_v7 = vpop.eup %14838 }
 0x602   : > { %13620 = vmatpush3.xpose.msra.mxu1 %v3016_v49  ;;  %v2661_v49 = vsub.f32 %v20527_v1, %v20526_v16  ;;  %v16819_v10 = vpop.xlane.xlu0 %2913  ;;  %v20550_v16 = vld [vmem:[#allocation77_spill] sm:$0xff] }
 0x603   : > { %13621 = vmatprep.subr.mxu1 %v20489_v44 }
 0x604   : > { %v2775_v9 = vmul.f32 1.442695, %v2661_v49  ;;  %v20551_v49 = vld [vmem:[#allocation81_spill] sm:$0xff] }
 0x606   : > { %13622 = vmatpush3.xpose.msra.mxu1 %v3015_v34  ;;  %14842 = vpow2.f32 %v2775_v9  ;;  %v16826_v26 = vpop.xlane.xlu0 %2917 }
 0x607   : > { %2907 = vadd.xlane.f32.xlu0 %v16748_v33  ;;  %13623 = vmatprep.subr.mxu1 %v20489_v44 }
 0x609   : > { %14305 = vrot.lane.b32.xlu1 %v14304_v37, %s20237_s28  ;;  %v16786_v46 = vpop.eup %14840  ;;  %v20530_v37 = vld [vmem:[#allocation98_spill] sm:$0xff] }
 0x60a   : > { %13624 = vmatpush3.xpose.msra.mxu1 %v3014_v41  ;;  %v2645_v41 = vsub.f32 %v20531_v27, %v20530_v37  ;;  %v20553_v37 = vld [vmem:[#allocation82_spill] sm:$0xff] }
 0x60b   : > { %13625 = vmatprep.subr.mxu1 %v20489_v44 }
 0x60c   : > { %v2743_v61 = vmul.f32 1.442695, %v2645_v41  ;;  %v16847_v41 = vpop.permute.xlu1 %14275 }
 0x60e   : > { %13626 = vmatpush3.xpose.msra.mxu1 %v3013_v14  ;;  %14844 = vpow2.f32 %v2743_v61  ;;  %v20532_v14 = vld [vmem:[#allocation65_spill] sm:$0xff] }
 0x60f   : > { %13627 = vmatprep.subr.mxu1 %v20489_v44  ;;  %14846 = vpow2.f32 %v2741_v47  ;;  %v20560_v47 = vld [vmem:[#allocation95_spill] sm:$0xff] }
 0x610   : > { %v16850_v61 = vpop.xlane.xlu1 %2885 }
 0x612   : > { %13628 = vmatpush3.xpose.msra.mxu1 %v3012_v56  ;;  %v20535_v56 = vld [vmem:[#allocation55_spill] sm:$0xff] }
 0x613   : > { %13629 = vmatprep.subr.mxu1 %v20489_v44  ;;  %v16789_v34 = vpop.eup %14842  ;;  %v14334_v23 = vpack.i.bf16 %v20535_v56, %v20534_v30  ;;  %v20554_v30 = vld [vmem:[#allocation70_spill] sm:$0xff]  ;;  %v20555_v56 = vld [vmem:[#allocation61_spill] sm:$0xff] }
 0x616   : > { %13630 = vmatpush3.xpose.msra.mxu1 %v3011_v53  ;;  %v20537_v53 = vld [vmem:[#allocation63_spill] sm:$0xff] }
 0x617   : > { %13669 = vmatprep.subr.mxu1 %v20489_v44  ;;  %v14376_v0 = vpack.i.bf16 %v20538_v15, %v20537_v53  ;;  %v20556_v53 = vld [vmem:[#allocation67_spill] sm:$0xff] }
 0x618   : > { %v20557_v15 = vld [vmem:[#allocation59_spill] sm:$0xff] }
 0x61b   : > { %v16797_v60 = vpop.eup %14844 }
 0x61c   : > { %v16836_v9 = vpop.eup %14846 }
 0x61d   : > { %14320 = vrot.lane.b32.xlu0 %v14319_v6, %s20237_s28  ;;  %v20542_v6 = vld [vmem:[#allocation73_spill] sm:$0xff] }
 0x62d   : > { %2875 = vadd.xlane.f32.xlu1 %v16770_v19 }
 0x63c   : > { %2905 = vadd.xlane.f32.xlu0 %v16773_v7 }
 0x63e   : > { %14315 = vrot.lane.b32.xlu1 %v14314_v22, %s20237_s28  ;;  %v20546_v22 = vld [vmem:[#allocation107_spill] sm:$0xff] }
 0x63f   : > { %v2660_v58 = vsub.f32 %v20547_v54, %v20546_v22  ;;  %v20561_v22 = vld [vmem:[#allocation48_spill] sm:$0xff] }
 0x640   : > { %v2643_v54 = vsub.f32 %v20561_v22, %v20560_v47 }
 0x641   : > { %v2773_v48 = vmul.f32 1.442695, %v2660_v58 }
 0x643   : > { %14848 = vpow2.f32 %v2773_v48  ;;  %v2739_v48 = vmul.f32 1.442695, %v2643_v54 }
 0x652   : > { %14330 = vrot.lane.b32.xlu0 %v14329_v12, %s20237_s28  ;;  %v16830_v12 = vpop.xlane.xlu0 %2915 }
 0x656   : > { %v16833_v1 = vpop.xlane.xlu0 %2921 }
 0x65a   : > { %v16840_v63 = vpop.xlane.xlu0 %2919 }
 0x65e   : > { %v2926_v27 = vpop.xlane.xlu0 %2925 }
 0x662   : > { %2873 = vadd.xlane.f32.xlu1 %v16786_v46 }
 0x671   : > { %2903 = vadd.xlane.f32.xlu0 %v16789_v34 }
 0x673   : > { %14325 = vrot.lane.b32.xlu1 %v14324_v21, %s20237_s28  ;;  %v16842_v21 = vpop.eup %14848 }
 0x697   : > { %2871 = vadd.xlane.f32.xlu1 %v16797_v60 }
 0x69e   : > { %14340 = vxpose.xlu0.b32.start [1/16] (narrow) %v20532_v14, 8  ;;  %v2924_v14 = vpop.xlane.xlu0 %2923 }
 0x6a2   : > { %14342 = vxpose.xlu0.b32.cont [2/16] (narrow) %v20533_v5, 8  ;;  %v16852_v5 = vpop.xlane.xlu1 %2883 }
 0x6a6   : > { %14344 = vxpose.xlu0.b32.cont [3/16] (narrow) %v20536_v50, 8  ;;  %v2930_v50 = vpop.xlane.xlu0 %2929 }
 0x6a8   : > { %14335 = vrot.lane.b32.xlu1 %v14334_v23, %s20237_s28  ;;  %v14381_v23 = vpack.i.bf16 %v20555_v56, %v20554_v30 }
 0x6aa   : > { %14346 = vxpose.xlu0.b32.cont [4/16] (narrow) %v20539_v31, 8  ;;  %v2890_v31 = vpop.xlane.xlu1 %2889 }
 0x6ac   : > { %14377 = vrot.lane.b32.xlu1 %v14376_v0, %s20237_s28  ;;  %v14386_v0 = vpack.i.bf16 %v20557_v15, %v20556_v53 }
 0x6ae   : > { %14348 = vxpose.xlu0.b32.cont [5/16] (narrow) %v20540_v39, 8  ;;  %v2888_v39 = vpop.xlane.xlu1 %2887 }
 0x6b2   : > { %14350 = vxpose.xlu0.b32.cont [6/16] (narrow) %v20541_v36, 8  ;;  %v20558_v36 = vld [vmem:[#allocation108_spill] sm:$0xff]  ;;  %v2894_v57 = vpop.xlane.xlu1 %2893 }
 0x6b6   : > { %14352 = vxpose.xlu0.b32.cont [7/16] (narrow) %v20542_v6, 8  ;;  %v20559_v6 = vld [vmem:[#allocation32_spill] sm:$0xff] }
 0x6b7   : > { %v2659_v2 = vsub.f32 %v20559_v6, %v20558_v36 }
 0x6ba   : > { %14354 = vxpose.xlu0.b32.cont [8/16] (narrow) %v20545_v32, 8  ;;  %v2771_v32 = vmul.f32 1.442695, %v2659_v2 }
 0x6bc   : > { %14850 = vpow2.f32 %v2771_v32 }
 0x6bd   : > { %14852 = vpow2.f32 %v2739_v48 }
 0x6be   : > { %14356 = vxpose.xlu0.b32.cont [9/16] (narrow) %v20548_v25, 8  ;;  %v2892_v25 = vpop.xlane.xlu1 %2891 }
 0x6c2   : > { %14358 = vxpose.xlu0.b32.cont [10/16] (narrow) %v20549_v52, 8 }
 0x6c6   : > { %14360 = vxpose.xlu0.b32.cont [11/16] (narrow) %v20550_v16, 8  ;;  %v2898_v16 = vpop.xlane.xlu1 %2897 }
 0x6c7   : > { %14854 = vrcp.f32 %v2898_v16 }
 0x6c8   : > { %14856 = vrcp.f32 %v2930_v50 }
 0x6ca   : > { %14362 = vxpose.xlu0.b32.cont [12/16] (narrow) %v20551_v49, 8 }
 0x6ce   : > { %14364 = vxpose.xlu0.b32.cont [13/16] (narrow) %v20552_v40, 8  ;;  %v2896_v40 = vpop.xlane.xlu1 %2895 }
 0x6cf   : > { %14858 = vrcp.f32 %v2896_v40 }
 0x6d0   : > { %2869 = vadd.xlane.f32.xlu1 %v16836_v9 }
 0x6d2   : > { %14366 = vxpose.xlu0.b32.cont [14/16] (narrow) %v20553_v37, 8  ;;  %v16874_v37 = vpop.eup %14850 }
 0x6d3   : > { %v16879_v56 = vpop.eup %14852 }
 0x6d4   : > { %2901 = vadd.xlane.f32.xlu1 %v16842_v21  ;;  %v14855_v2 = vpop.eup %14854 }
 0x6d5   : > { %v14857_v50 = vpop.eup %14856 }
 0x6d6   : > { %14368 = vxpose.xlu0.b32.cont [15/16] (narrow) %v16680_v51, 8  ;;  %v2928_v51 = vpop.xlane.xlu0 %2927 }
 0x6d7   : > { %14860 = vrcp.f32 %v2928_v51 }
 0x6d8   : > { %14862 = vrcp.f32 %v2894_v57  ;;  %v3042_v57 = vmul.f32 %v14855_v2, %v16588_v43 }
 0x6d9   : > { %14864 = vrcp.f32 %v2926_v27  ;;  %v3058_v27 = vmul.f32 %v14857_v50, %v16620_v8  ;;  %v20562_v50 = vld [vmem:[#allocation111_spill] sm:$0xff] }
 0x6da   : > { %14370 = vxpose.xlu0.b32.end [16/16] (narrow) %v16582_v62, 8  ;;  %v16860_v62 = vpop.xlane.xlu0 %2911  ;;  %14866 = vrcp.f32 %v2892_v25 }
 0x6db   : > { %14868 = vrcp.f32 %v2924_v14 }
 0x6dc   : > { %14870 = vrcp.f32 %v2890_v31  ;;  %v14859_v54 = vpop.eup %14858 }
 0x6dd   : > { %14872 = vrcp.f32 %v16833_v1  ;;  %v3041_v1 = vmul.f32 %v14859_v54, %v16599_v35  ;;  %v20565_v54 = vld [vmem:[#allocation90_spill] sm:$0xff] }
 0x6de   : > { %v16864_v45 = vpop.permute.xlu0 %14300  ;;  %14874 = vrcp.f32 %v2888_v39 }
 0x6df   : > { %14876 = vrcp.f32 %v16840_v63 }
 0x6e0   : > { %14878 = vrcp.f32 %v16850_v61 }
 0x6e1   : > { %14880 = vrcp.f32 %v16826_v26 }
 0x6e2   : > { %v16868_v58 = vpop.xlane.xlu0 %2909  ;;  %14882 = vrcp.f32 %v16852_v5 }
 0x6e3   : > { %14884 = vrcp.f32 %v16830_v12 }
 0x6e4   : > { %v14861_v48 = vpop.eup %14860  ;;  %14886 = vrcp.f32 %v16819_v10 }
 0x6e5   : > { %14382 = vrot.lane.b32.xlu1 %v14381_v23, %s20237_s28  ;;  %v16881_v23 = vpop.xlane.xlu1 %2881  ;;  %v14863_v31 = vpop.eup %14862  ;;  %v3057_v43 = vmul.f32 %v14861_v48, %v16626_v18 }
 0x6e6   : > { %v16870_v52 = vpop.permute.xlu0 %14310  ;;  %v14865_v8 = vpop.eup %14864  ;;  %v3040_v18 = vmul.f32 %v14863_v31, %v16572_v42  ;;  %14888 = vrcp.f32 %v16881_v23 }
 0x6e7   : > { %v14867_v63 = vpop.eup %14866  ;;  %v3056_v35 = vmul.f32 %v14865_v8, %v16609_v20  ;;  %14890 = vrcp.f32 %v16860_v62 }
 0x6e8   : > { %v14869_v39 = vpop.eup %14868  ;;  %v3039_v26 = vmul.f32 %v14867_v63, %v16579_v55 }
 0x6e9   : > { %14387 = vrot.lane.b32.xlu1 %v14386_v0, %s20237_s28  ;;  %v16886_v15 = vpop.permute.xlu1 %14285  ;;  %v14871_v16 = vpop.eup %14870  ;;  %v3055_v42 = vmul.f32 %v14869_v39, %v16615_v13  ;;  %s20573_s28 = sld [smem:[#allocation117_spill]] }
 0x6ea   : > { %v16872_v49 = vpop.xlane.xlu0 %2907  ;;  %v14873_v61 = vpop.eup %14872  ;;  %v3038_v40 = vmul.f32 %v14871_v16, %v16558_v4  ;;  %v20568_v16 = vld [vmem:[#allocation33_spill] sm:$0xff] }
 0x6eb   : > { %v14875_v5 = vpop.eup %14874  ;;  %v3054_v12 = vmul.f32 %v14873_v61, %v16591_v3 }
 0x6ec   : > { %v14877_v55 = vpop.eup %14876  ;;  %v3037_v23 = vmul.f32 %v14875_v5, %v16565_v11 }
 0x6ed   : > { %v16890_v36 = vpop.xlane.xlu1 %2879  ;;  %v14879_v10 = vpop.eup %14878  ;;  %v3053_v4 = vmul.f32 %v14877_v55, %v16601_v28  ;;  %v20564_v28 = vld [vmem:[#allocation86_spill] sm:$0xff] }
 0x6ee   : > { %v16877_v30 = vpop.permute.xlu0 %14320  ;;  %14892 = vrcp.f32 %v16890_v36  ;;  %v14881_v2 = vpop.eup %14880 }
 0x6ef   : > { %14894 = vrcp.f32 %v16868_v58  ;;  %v14883_v62 = vpop.eup %14882 }
 0x6f0   : > { %v3035_v58 = vmul.f32 %v14883_v62, %v20564_v28 }
 0x6f1   : > { %v16894_v47 = vpop.permute.xlu1 %14295 }
 0x6f2   : > { %v16883_v53 = vpop.xlane.xlu0 %2905 }
 0x6f5   : > { %v2878_v14 = vpop.xlane.xlu1 %2877 }
 0x6f6   : > { %v16888_v0 = vpop.permute.xlu0 %14330  ;;  %14896 = vrcp.f32 %v2878_v14  ;;  %v20566_v14 = vld [vmem:[#allocation91_spill] sm:$0xff] }
 0x6f7   : > { %14898 = vrcp.f32 %v16872_v49 }
 0x6f9   : > { %v16914_v25 = vpop.permute.xlu1 %14305 }
 0x6fa   : > { %v16892_v6 = vpop.xlane.xlu0 %2903 }
 0x6fd   : > { %v2876_v20 = vpop.xlane.xlu1 %2875 }
 0x6fe   : > { %14900 = vrcp.f32 %v2876_v20 }
 0x6ff   : > { %14902 = vrcp.f32 %v16883_v53 }
 0x701   : > { %v16929_v13 = vpop.permute.xlu1 %14315 }
 0x705   : > { %v2874_v3 = vpop.xlane.xlu1 %2873 }
 0x706   : > { %14904 = vrcp.f32 %v2874_v3 }
 0x707   : > { %2899 = vadd.xlane.f32.xlu0 %v16874_v37  ;;  %14906 = vrcp.f32 %v16892_v6 }
 0x709   : > { %v16946_v48 = vpop.permute.xlu1 %14325 }
 0x70d   : > { %2867 = vadd.xlane.f32.xlu1 %v16879_v56 }
 0x71a   : > { %v14371_v32 = vpop.trf.xlu0 }
 0x71b   : > { %v14375_v22 = vunpack.i.h.bf16 %v14371_v32  ;;  %v14372_v51 = vunpack.i.l.bf16 %v14371_v32  ;;  %v3036_v32 = vmul.f32 %v14879_v10, %v20562_v50 }
 0x71d   : > { %13597 = vmatmul.mubr.f32.vlgmr.msra.gmra.mxu0 %v14372_v51  ;;  %13632 = vmatmul.mubr.f32.vlgmr.msra.gmra.mxu1 %v14375_v22  ;;  %v20563_v22 = vld [vmem:[#allocation88_spill] sm:$0xff]  ;;  %v14885_v51 = vpop.eup %14884 }
 0x71e   : > { %13635 = vmatpush3.xpose.msra.mxu0 %v3042_v57  ;;  %13670 = vmatpush3.xpose.msra.mxu1 %v3058_v27  ;;  %v3052_v36 = vmul.f32 %v14881_v2, %v20563_v22  ;;  %v14887_v11 = vpop.eup %14886  ;;  %v3051_v57 = vmul.f32 %v14885_v51, %v20565_v54 }
 0x71f   : > { %13636 = vmatprep.subr.mxu0 %v20489_v44  ;;  %13671 = vmatprep.subr.mxu1 %v20489_v44  ;;  %v14889_v27 = vpop.eup %14888 }
 0x720   : > { %13666 = vmatprep.mubr.msk.f32.mxu0 %vm15112_vm4, %v20489_v44  ;;  %13701 = vmatprep.mubr.msk.f32.mxu1 %vm15112_vm4, %v20489_v44  ;;  %v14891_v49 = vpop.eup %14890  ;;  %v3034_v31 = vmul.f32 %v14889_v27, %v20566_v14  ;;  %v2872_v63 = vpop.xlane.xlu1 %2871 }
 0x721   : > { %v14893_v8 = vpop.eup %14892  ;;  %14908 = vrcp.f32 %v2872_v63 }
 0x722   : > { %13637 = vmatpush3.xpose.msra.mxu0 %v3041_v1  ;;  %13672 = vmatpush3.xpose.msra.mxu1 %v3057_v43  ;;  %v20567_v1 = vld [vmem:[#allocation89_spill] sm:$0xff]  ;;  %v14895_v53 = vpop.eup %14894 }
 0x723   : > { %13638 = vmatprep.subr.mxu0 %v20489_v44  ;;  %13673 = vmatprep.subr.mxu1 %v20489_v44  ;;  %v3050_v43 = vmul.f32 %v14887_v11, %v20567_v1  ;;  %v14897_v39 = vpop.eup %14896 }
 0x724   : > { %v14899_v6 = vpop.eup %14898 }
 0x725   : > { %v3047_v61 = vmul.f32 %v14899_v6, %v16748_v33 }
 0x726   : > { %13639 = vmatpush3.xpose.msra.mxu0 %v3040_v18  ;;  %13674 = vmatpush3.xpose.msra.mxu1 %v3056_v35  ;;  %v3033_v18 = vmul.f32 %v14893_v8, %v16685_v29  ;;  %v3049_v35 = vmul.f32 %v14891_v49, %v16632_v59 }
 0x727   : > { %13640 = vmatprep.subr.mxu0 %v20489_v44  ;;  %13675 = vmatprep.subr.mxu1 %v20489_v44 }
 0x72a   : > { %13641 = vmatpush3.xpose.msra.mxu0 %v3039_v26  ;;  %13676 = vmatpush3.xpose.msra.mxu1 %v3055_v42  ;;  %v3048_v26 = vmul.f32 %v14895_v53, %v16696_v24  ;;  %v14901_v42 = vpop.eup %14900 }
 0x72b   : > { %13642 = vmatprep.subr.mxu0 %v20489_v44  ;;  %13677 = vmatprep.subr.mxu1 %v20489_v44  ;;  %v14903_v59 = vpop.eup %14902  ;;  %v3031_v29 = vmul.f32 %v14901_v42, %v16770_v19 }
 0x72c   : > { %v14905_v20 = vpop.eup %14904 }
 0x72d   : > { %v14907_v24 = vpop.eup %14906 }
 0x72e   : > { %13643 = vmatpush3.xpose.msra.mxu0 %v3038_v40  ;;  %13678 = vmatpush3.xpose.msra.mxu1 %v3054_v12  ;;  %v14909_v5 = vpop.eup %14908  ;;  %v14336_v40 = vpop.permute.xlu1 %14335  ;;  %v3045_v19 = vmul.f32 %v14907_v24, %v16789_v34 }
 0x72f   : > { %13644 = vmatprep.subr.mxu0 %v20489_v44  ;;  %13679 = vmatprep.subr.mxu1 %v20489_v44  ;;  %v3029_v33 = vmul.f32 %v14909_v5, %v16797_v60 }
 0x732   : > { %13645 = vmatpush3.xpose.msra.mxu0 %v3037_v23  ;;  %13680 = vmatpush3.xpose.msra.mxu1 %v3053_v4 }
 0x733   : > { %13646 = vmatprep.subr.mxu0 %v20489_v44  ;;  %13681 = vmatprep.subr.mxu1 %v20489_v44 }
 0x736   : > { %13647 = vmatpush3.xpose.msra.mxu0 %v3036_v32  ;;  %13682 = vmatpush3.xpose.msra.mxu1 %v3052_v36 }
 0x737   : > { %13648 = vmatprep.subr.mxu0 %v20489_v44  ;;  %13683 = vmatprep.subr.mxu1 %v20489_v44 }
 0x73a   : > { %13649 = vmatpush3.xpose.msra.mxu0 %v3035_v58  ;;  %13684 = vmatpush3.xpose.msra.mxu1 %v3051_v57 }
 0x73b   : > { %13650 = vmatprep.subr.mxu0 %v20489_v44  ;;  %13685 = vmatprep.subr.mxu1 %v20489_v44 }
 0x73e   : > { %13651 = vmatpush3.xpose.msra.mxu0 %v3034_v31  ;;  %13686 = vmatpush3.xpose.msra.mxu1 %v3050_v43 }
 0x73f   : > { %13652 = vmatprep.subr.mxu0 %v20489_v44  ;;  %13687 = vmatprep.subr.mxu1 %v20489_v44 }
 0x740   : > { %14392 = vxpose.xlu1.b32.start [1/16] (narrow) %v16847_v41, 8  ;;  %v3032_v41 = vmul.f32 %v14897_v39, %v16733_v17  ;;  %v3030_v17 = vmul.f32 %v14905_v20, %v16786_v46 }
 0x742   : > { %13653 = vmatpush3.xpose.msra.mxu0 %v3033_v18  ;;  %13688 = vmatpush3.xpose.msra.mxu1 %v3049_v35 }
 0x743   : > { %13654 = vmatprep.subr.mxu0 %v20489_v44  ;;  %13689 = vmatprep.subr.mxu1 %v20489_v44 }
 0x744   : > { %14394 = vxpose.xlu1.b32.cont [2/16] (narrow) %v20568_v16, 8 }
 0x746   : > { %13655 = vmatpush3.xpose.msra.mxu0 %v3032_v41  ;;  %13690 = vmatpush3.xpose.msra.mxu1 %v3048_v26 }
 0x747   : > { %13656 = vmatprep.subr.mxu0 %v20489_v44  ;;  %13691 = vmatprep.subr.mxu1 %v20489_v44 }
 0x748   : > { %14396 = vxpose.xlu1.b32.cont [3/16] (narrow) %v16886_v15, 8  ;;  %v3046_v15 = vmul.f32 %v14903_v59, %v16773_v7  ;;  %v14378_v7 = vpop.permute.xlu1 %14377 }
 0x74a   : > { %13657 = vmatpush3.xpose.msra.mxu0 %v3031_v29  ;;  %13692 = vmatpush3.xpose.msra.mxu1 %v3047_v61  ;;  %v15113_v29 = vmov 1983009808  }
 0x74b   : > { %13658 = vmatprep.subr.mxu0 %v20489_v44  ;;  %13693 = vmatprep.subr.mxu1 %v20489_v44  ;;  %v3790_v61 = vunpack.c.l.s4 %v15113_v29 }
 0x74c   : > { %14398 = vxpose.xlu1.b32.cont [4/16] (narrow) %v16816_v38, 8 }
 0x74d   : > { %v3791_v5 = vunpack.c.0.s8 %v3790_v61 }
 0x74e   : > { %13659 = vmatpush3.xpose.msra.mxu0 %v3030_v17  ;;  %13694 = vmatpush3.xpose.msra.mxu1 %v3046_v15  ;;  %v15114_v17 = vmov 1934713408  }
 0x74f   : > { %13660 = vmatprep.subr.mxu0 %v20489_v44  ;;  %13695 = vmatprep.subr.mxu1 %v20489_v44  ;;  %v3822_v15 = vunpack.c.l.s4 %v15114_v17 }
 0x750   : > { %14400 = vxpose.xlu1.b32.cont [5/16] (narrow) %v16894_v47, 8 }
 0x752   : > { %13661 = vmatpush3.xpose.msra.mxu0 %v3029_v33  ;;  %13696 = vmatpush3.xpose.msra.mxu1 %v3045_v19  ;;  %v3823_v33 = vunpack.c.0.s8 %v3822_v15  ;;  %v20569_v19 = vld [vmem:[#allocation30_spill] sm:$0xff] }
 0x753   : > { %13662 = vmatprep.subr.mxu0 %v20489_v44  ;;  %13697 = vmatprep.subr.mxu1 %v20489_v44 }
 0x754   : > { %14402 = vxpose.xlu1.b32.cont [6/16] (narrow) %v16864_v45, 8 }
 0x758   : > { %14404 = vxpose.xlu1.b32.cont [7/16] (narrow) %v16914_v25, 8 }
 0x759   : > { %v2870_v46 = vpop.xlane.xlu1 %2869 }
 0x75a   : > { %14910 = vrcp.f32 %v2870_v46 }
 0x75c   : > { %14406 = vxpose.xlu1.b32.cont [8/16] (narrow) %v16870_v52, 8 }
 0x75d   : > { %v2902_v38 = vpop.xlane.xlu1 %2901 }
 0x75e   : > { %14912 = vrcp.f32 %v2902_v38 }
 0x760   : > { %14408 = vxpose.xlu1.b32.cont [9/16] (narrow) %v16929_v13, 8 }
 0x761   : > { %v14383_v52 = vpop.permute.xlu1 %14382 }
 0x764   : > { %14410 = vxpose.xlu1.b32.cont [10/16] (narrow) %v16877_v30, 8 }
 0x765   : > { %v14388_v25 = vpop.permute.xlu1 %14387 }
 0x767   : > { %v14911_v34 = vpop.eup %14910 }
 0x768   : > { %14412 = vxpose.xlu1.b32.cont [11/16] (narrow) %v16946_v48, 8  ;;  %v3028_v60 = vmul.f32 %v14911_v34, %v16836_v9 }
 0x76a   : > { %13663 = vmatpush3.xpose.msra.mxu0 %v3028_v60 }
 0x76b   : > { %v14913_v45 = vpop.eup %14912  ;;  %13664 = vmatprep.subr.mxu0 %v20489_v44 }
 0x76c   : > { %14414 = vxpose.xlu1.b32.cont [12/16] (narrow) %v16888_v0, 8  ;;  %v3044_v47 = vmul.f32 %v14913_v45, %v16842_v21 }
 0x76e   : > { %13698 = vmatpush3.xpose.msra.mxu1 %v3044_v47 }
 0x76f   : > { %13699 = vmatprep.subr.mxu1 %v20489_v44 }
 0x770   : > { %14416 = vxpose.xlu1.b32.cont [13/16] (narrow) %v14336_v40, 8 }
 0x774   : > { %14418 = vxpose.xlu1.b32.cont [14/16] (narrow) %v14378_v7, 8  ;;  %v17033_v7 = vsub.s32 %v3791_v5, %v20569_v19 }
 0x776   : > { %20570 = vst [vmem:[#allocation87_spill] sm:$0xff] %v17033_v7 }
 0x778   : > { %14420 = vxpose.xlu1.b32.cont [15/16] (narrow) %v14383_v52, 8  ;;  %v17038_v52 = vsub.s32 %v3823_v33, %v20569_v19 }
 0x77a   : > { %20571 = vst [vmem:[#allocation40_spill] sm:$0xff] %v17038_v52 }
 0x77c   : > { %14422 = vxpose.xlu1.b32.end [16/16] (narrow) %v14388_v25, 8 }
 0x790   : > { %v2900_v30 = vpop.xlane.xlu0 %2899 }
 0x791   : > { %14914 = vrcp.f32 %v2900_v30 }
 0x796   : > { %v2868_v9 = vpop.xlane.xlu1 %2867 }
 0x797   : > { %14916 = vrcp.f32 %v2868_v9 }
 0x79e   : > { %v14915_v12 = vpop.eup %14914 }
 0x79f   : > { %v3043_v55 = vmul.f32 %v14915_v12, %v16874_v37 }
 0x7a1   : > { %13700 = vmatpush3.xpose.msra.mxu1 %v3043_v55 }
 0x7a4   : > { %v14917_v0 = vpop.eup %14916 }
 0x7a5   : > { %v3027_v21 = vmul.f32 %v14917_v0, %v16879_v56 }
 0x7a7   : > { %13665 = vmatpush3.xpose.msra.mxu0 %v3027_v21 }
 0x7bc   : > { %v14423_v13 = vpop.trf.xlu1 }
 0x7bd   : > { %v14424_v10 = vunpack.i.l.bf16 %v14423_v13  ;;  %v14427_v23 = vunpack.i.h.bf16 %v14423_v13 }
 0x7bf   : > { %13667 = vmatmul.mubr.f32.vlgmr.msra.gmra.mxu0 %v14424_v10  ;;  %13702 = vmatmul.mubr.f32.vlgmr.msra.gmra.mxu1 %v14427_v23 }
 0x7dd   : > { %v3445_v4 = vpop.f32.mrf.mxu0  ;;  %v3515_v2 = vpop.f32.mrf.mxu1 }
 0x7de   : > { %3659 = vxpose.xlu0.b32.start.end [1/1] (short) %v3445_v4, 128 }
 0x7df   : > { %v13598_v3 = vpop.f32.mrf.mxu0  ;;  %v13633_v62 = vpop.f32.mrf.mxu1 }
 0x81b   : > { %3691 = vxpose.xlu0.b32.start.end [1/1] (short) %v3515_v2, 128 }
 0x85a   : > { %v3675_v36 = vpop.trf.xlu0 }
 0x85e   : > { %v3676_v56 = vpop.trf.xlu0 }
 0x862   : > { %v3677_v51 = vpop.trf.xlu0 }
 0x866   : > { %v16994_v11 = vpop.trf.xlu0 }
 0x86a   : > { %v16996_v28 = vpop.trf.xlu0 }
 0x86e   : > { %v16998_v58 = vpop.trf.xlu0 }
 0x872   : > { %v17000_v54 = vpop.trf.xlu0 }
 0x876   : > { %v17002_v27 = vpop.trf.xlu0 }
 0x87a   : > { %v17004_v14 = vpop.trf.xlu0 }
 0x87e   : > { %v17006_v1 = vpop.trf.xlu0 }
 0x87f   : > { %v3585_v50 = vpop.f32.mrf.mxu0  ;;  %v3655_v32 = vpop.f32.mrf.mxu1 }
 0x880   : > { %3723 = vxpose.xlu1.b32.start.end [1/1] (short) %v3585_v50, 128 }
 0x881   : > { %v13668_v37 = vpop.f32.mrf.mxu0  ;;  %v13703_v22 = vpop.f32.mrf.mxu1 }
 0x882   : > { %v17008_v63 = vpop.trf.xlu0 }
 0x886   : > { %v17010_v18 = vpop.trf.xlu0 }
 0x88a   : > { %v17014_v16 = vpop.trf.xlu0 }
 0x88e   : > { %v17018_v41 = vpop.trf.xlu0 }
 0x892   : > { %v17024_v59 = vpop.trf.xlu0 }
 0x896   : > { %v17028_v24 = vpop.trf.xlu0 }
 0x89a   : > { %v3707_v60 = vpop.trf.xlu0 }
 0x8bd   : > { %3755 = vxpose.xlu1.b32.start.end [1/1] (short) %v3655_v32, 128  ;;  %v3708_v32 = vpop.trf.xlu0 }
 0x8fc   : > { %v3739_v57 = vpop.trf.xlu1 }
 0x8fd   : > { %v3787_v46 = vcombine.low %v3675_v36, %v3739_v57  ;;  %v3788_v38 = vcombine.high %v3675_v36, %v3739_v57 }
 0x8ff   : > { %v3795_v9 = vrot.slane %v3787_v46, %v17033_v7  ;;  %v3802_v12 = vrot.slane %v3788_v38, %v17033_v7  ;;  %v3709_v46 = vpop.trf.xlu0 }
 0x900   : > { %v3740_v48 = vpop.trf.xlu1 }
 0x901   : > { %v3855_v45 = vcombine.low %v3676_v56, %v3740_v48  ;;  %v3856_v47 = vcombine.high %v3676_v56, %v3740_v48 }
 0x903   : > { %v17047_v13 = vrot.slane %v3855_v45, %v17033_v7  ;;  %v17050_v10 = vrot.slane %v3856_v47, %v17033_v7 }
 0x904   : > { %v3741_v49 = vpop.trf.xlu1 }
 0x905   : > { %v3923_v25 = vcombine.low %v3677_v51, %v3741_v49  ;;  %v3924_v30 = vcombine.high %v3677_v51, %v3741_v49 }
 0x907   : > { %v17059_v37 = vrot.slane %v3923_v25, %v17033_v7  ;;  %v17062_v22 = vrot.slane %v3924_v30, %v17033_v7 }
 0x908   : > { %v3742_v31 = vpop.trf.xlu1 }
 0x909   : > { %v3991_v55 = vcombine.low %v16994_v11, %v3742_v31  ;;  %v3992_v0 = vcombine.high %v16994_v11, %v3742_v31 }
 0x90b   : > { %v17067_v51 = vrot.slane %v3991_v55, %v17033_v7  ;;  %v17070_v11 = vrot.slane %v3992_v0, %v17033_v7 }
 0x90c   : > { %v3743_v43 = vpop.trf.xlu1 }
 0x90d   : > { %v4059_v23 = vcombine.low %v16996_v28, %v3743_v43  ;;  %v4060_v4 = vcombine.high %v16996_v28, %v3743_v43 }
 0x90f   : > { %v17077_v57 = vrot.slane %v4059_v23, %v17033_v7  ;;  %v17080_v48 = vrot.slane %v4060_v4, %v17033_v7 }
 0x910   : > { %v3744_v8 = vpop.trf.xlu1 }
 0x911   : > { %v4127_v2 = vcombine.low %v16998_v58, %v3744_v8  ;;  %v4128_v3 = vcombine.high %v16998_v58, %v3744_v8 }
 0x913   : > { %v17083_v31 = vrot.slane %v4127_v2, %v17033_v7  ;;  %v17086_v43 = vrot.slane %v4128_v3, %v17033_v7 }
 0x914   : > { %v3745_v53 = vpop.trf.xlu1 }
 0x915   : > { %v4195_v62 = vcombine.low %v17000_v54, %v3745_v53  ;;  %v4196_v50 = vcombine.high %v17000_v54, %v3745_v53 }
 0x917   : > { %v17089_v8 = vrot.slane %v4195_v62, %v17033_v7 }
 0x918   : > { %v3746_v35 = vpop.trf.xlu1 }
 0x919   : > { %v4263_v36 = vcombine.low %v17002_v27, %v3746_v35  ;;  %v4264_v56 = vcombine.high %v17002_v27, %v3746_v35 }
 0x91b   : > { %v17095_v53 = vrot.slane %v4263_v36, %v17033_v7  ;;  %v17098_v35 = vrot.slane %v4264_v56, %v17033_v7 }
 0x91c   : > { %v17012_v39 = vpop.trf.xlu1 }
 0x91d   : > { %v4331_v28 = vcombine.low %v17004_v14, %v17012_v39  ;;  %v4332_v58 = vcombine.high %v17004_v14, %v17012_v39  ;;  %v17092_v14 = vrot.slane %v4196_v50, %v17033_v7  ;;  %v3710_v50 = vpop.trf.xlu0 }
 0x91f   : > { %v17103_v61 = vrot.slane %v4331_v28, %v17033_v7  ;;  %v17106_v17 = vrot.slane %v4332_v58, %v17033_v7 }
 0x920   : > { %v17016_v6 = vpop.trf.xlu1 }
 0x921   : > { %v4399_v15 = vcombine.low %v17006_v1, %v17016_v6  ;;  %v4400_v5 = vcombine.high %v17006_v1, %v17016_v6 }
 0x924   : > { %v17020_v26 = vpop.trf.xlu1 }
 0x925   : > { %v4467_v25 = vcombine.low %v17008_v63, %v17020_v26  ;;  %v4468_v30 = vcombine.high %v17008_v63, %v17020_v26 }
 0x927   : > { %v17139_v3 = vrot.slane %v4467_v25, %v17033_v7 }
 0x928   : > { %v17022_v42 = vpop.trf.xlu1 }
 0x929   : > { %v4535_v55 = vcombine.low %v17010_v18, %v17022_v42  ;;  %v4536_v23 = vcombine.high %v17010_v18, %v17022_v42  ;;  %v17131_v18 = vrot.slane %v4399_v15, %v17033_v7  ;;  %v17134_v42 = vrot.slane %v4400_v5, %v17033_v7 }
 0x92c   : > { %v17026_v20 = vpop.trf.xlu1 }
 0x92d   : > { %v4603_v1 = vcombine.low %v17014_v16, %v17026_v20  ;;  %v4604_v6 = vcombine.high %v17014_v16, %v17026_v20 }
 0x92f   : > { %v17152_v36 = vrot.slane %v4603_v1, %v17033_v7  ;;  %v17155_v56 = vrot.slane %v4604_v6, %v17033_v7  ;;  %v3711_v6 = vpop.trf.xlu0 }
 0x930   : > { %v17030_v40 = vpop.trf.xlu1 }
 0x934   : > { %v17035_v34 = vpop.trf.xlu1 }
 0x935   : > { %v4740_v25 = vcombine.high %v17024_v59, %v17035_v34 }
 0x938   : > { %v17044_v21 = vpop.trf.xlu1 }
 0x93c   : > { %v3771_v54 = vpop.trf.xlu1 }
 0x93d   : > { %v3803_v27 = vcombine.low %v3707_v60, %v3771_v54  ;;  %v3804_v49 = vcombine.high %v3707_v60, %v3771_v54 }
 0x93f   : > { %v3811_v39 = vrot.slane %v3803_v27, %v17033_v7  ;;  %v3818_v29 = vrot.slane %v3804_v49, %v17033_v7 }
 0x940   : > { %v3772_v33 = vpop.trf.xlu1 }
 0x941   : > { %v3819_v38 = vcombine.low %v3795_v9, %v3811_v39  ;;  %v3820_v60 = vcombine.high %v3795_v9, %v3811_v39  ;;  %v3835_v45 = vcombine.low %v3802_v12, %v3818_v29  ;;  %v3836_v47 = vcombine.high %v3802_v12, %v3818_v29 }
 0x942   : > { %v3871_v0 = vcombine.low %v3708_v32, %v3772_v33  ;;  %v4671_v9 = vcombine.low %v17018_v41, %v17030_v40  ;;  %v4672_v12 = vcombine.high %v17018_v41, %v17030_v40  ;;  %v3872_v4 = vcombine.high %v3708_v32, %v3772_v33 }
 0x943   : > { %v3827_v63 = vrot.slane %v3819_v38, %v17038_v52  ;;  %v3834_v26 = vrot.slane %v3820_v60, %v17038_v52  ;;  %v3843_v16 = vrot.slane %v3835_v45, %v17038_v52  ;;  %v3850_v20 = vrot.slane %v3836_v47, %v17038_v52 }
 0x944   : > { %v3773_v2 = vpop.trf.xlu1  ;;  %v17142_v41 = vrot.slane %v4468_v30, %v17033_v7  ;;  %v17145_v40 = vrot.slane %v4535_v55, %v17033_v7  ;;  %v3879_v62 = vrot.slane %v3871_v0, %v17033_v7  ;;  %v17149_v32 = vrot.slane %v4536_v23, %v17033_v7 }
 0x945   : > { %v3939_v28 = vcombine.low %v3709_v46, %v3773_v2  ;;  %v17158_v58 = vrot.slane %v4671_v9, %v17033_v7  ;;  %v17161_v54 = vrot.slane %v4672_v12, %v17033_v7  ;;  %v4875_v27 = vcombine.low %v3827_v63, %v3834_v26 }
 0x946   : > { %v3886_v49 = vrot.slane %v3872_v4, %v17033_v7  ;;  %v12865_v29 = vcombine.high %v3827_v63, %v3834_v26  ;;  %v4891_v15 = vcombine.low %v3843_v16, %v3850_v20  ;;  %v12866_v5 = vcombine.high %v3843_v16, %v3850_v20 }
 0x947   : > { %v3940_v33 = vcombine.high %v3709_v46, %v3773_v2  ;;  %v4739_v38 = vcombine.low %v17024_v59, %v17035_v34  ;;  %v3887_v60 = vcombine.low %v17047_v13, %v3879_v62  ;;  %v3888_v45 = vcombine.high %v17047_v13, %v3879_v62 }
 0x948   : > { %v3774_v39 = vpop.trf.xlu1  ;;  %v4807_v30 = vcombine.low %v17028_v24, %v17044_v21  ;;  %v4808_v55 = vcombine.high %v17028_v24, %v17044_v21  ;;  %v3947_v0 = vrot.slane %v3939_v28, %v17033_v7  ;;  %v3903_v46 = vcombine.low %v17050_v10, %v3886_v49 }
 0x949   : > { %v4007_v47 = vcombine.low %v3710_v50, %v3774_v39  ;;  %v3904_v23 = vcombine.high %v17050_v10, %v3886_v49  ;;  %v4008_v1 = vcombine.high %v3710_v50, %v3774_v39  ;;  %v4882_v13 = vrot.slane %v4875_v27, %v17033_v7 }
 0x94a   : > { %v3954_v12 = vrot.slane %v3940_v33, %v17033_v7  ;;  %v4890_v59 = vrot.slane %v12865_v29, %v17033_v7  ;;  %v4898_v34 = vrot.slane %v4891_v15, %v17033_v7  ;;  %v4906_v63 = vrot.slane %v12866_v5, %v17033_v7 }
 0x94b   : > { %v17183_v24 = vrot.slane %v4739_v38, %v17033_v7  ;;  %v3895_v21 = vrot.slane %v3887_v60, %v17038_v52  ;;  %v3902_v10 = vrot.slane %v3888_v45, %v17038_v52  ;;  %v4015_v26 = vrot.slane %v4007_v47, %v17033_v7  ;;  %v3712_v60 = vpop.trf.xlu0 }
 0x94c   : > { %v3775_v9 = vpop.trf.xlu1  ;;  %v17189_v4 = vrot.slane %v4740_v25, %v17033_v7  ;;  %v17192_v2 = vrot.slane %v4807_v30, %v17033_v7  ;;  %v3955_v16 = vcombine.low %v17059_v37, %v3947_v0  ;;  %v3956_v20 = vcombine.high %v17059_v37, %v3947_v0 }
 0x94d   : > { %v17197_v62 = vrot.slane %v4808_v55, %v17033_v7  ;;  %v3911_v50 = vrot.slane %v3903_v46, %v17038_v52  ;;  %v3918_v28 = vrot.slane %v3904_v23, %v17038_v52  ;;  %v4022_v27 = vrot.slane %v4008_v1, %v17033_v7 }
 0x94e   : > { %v3971_v49 = vcombine.low %v17062_v22, %v3954_v12  ;;  %v3972_v39 = vcombine.high %v17062_v22, %v3954_v12  ;;  %v4907_v29 = vcombine.low %v4882_v13, %v4890_v59  ;;  %v4923_v15 = vcombine.low %v4898_v34, %v4906_v63 }
 0x94f   : > { %v4943_v5 = vcombine.low %v3895_v21, %v3902_v10  ;;  %v4023_v33 = vcombine.low %v17067_v51, %v4015_v26  ;;  %v4024_v37 = vcombine.high %v17067_v51, %v4015_v26  ;;  %v4075_v38 = vcombine.low %v3711_v6, %v3775_v9 }
 0x950   : > { %v3776_v45 = vpop.trf.xlu1  ;;  %v17207_v47 = vrot.slane %v3955_v16, %v17038_v52  ;;  %v17210_v25 = vrot.slane %v3956_v20, %v17038_v52  ;;  %v17213_v30 = vrot.slane %v4907_v29, %v17038_v52  ;;  %v17216_v22 = vrot.slane %v4923_v15, %v17038_v52 }
 0x951   : > { %v12867_v55 = vcombine.high %v3895_v21, %v3902_v10  ;;  %v4039_v0 = vcombine.low %v17070_v11, %v4022_v27  ;;  %v4040_v51 = vcombine.high %v17070_v11, %v4022_v27  ;;  %v4076_v46 = vcombine.high %v3711_v6, %v3775_v9 }
 0x952   : > { %20572 = vst [vmem:[#allocation36_spill] sm:$0xff] %v17213_v30  ;;  %v4959_v23 = vcombine.low %v3911_v50, %v3918_v28  ;;  %v17221_v1 = vrot.slane %v3971_v49, %v17038_v52  ;;  %v17224_v12 = vrot.slane %v3972_v39, %v17038_v52  ;;  %v4908_v26 = vcombine.high %v4882_v13, %v4890_v59 }
 0x953   : > { %v17227_v16 = vrot.slane %v4023_v33, %v17038_v52  ;;  %v17230_v20 = vrot.slane %v4024_v37, %v17038_v52  ;;  %v4083_v21 = vrot.slane %v4075_v38, %v17033_v7  ;;  %v4940_v11 = vcombine.high %v17213_v30, %v17216_v22 }
 0x954   : > { %v12868_v6 = vcombine.high %v3911_v50, %v3918_v28  ;;  %v4924_v27 = vcombine.high %v4898_v34, %v4906_v63  ;;  %v17240_v13 = vrot.slane %v4039_v0, %v17038_v52  ;;  %v17243_v59 = vrot.slane %v4040_v51, %v17038_v52  ;;  %v3713_v50 = vpop.trf.xlu0  ;;  %v3777_v28 = vpop.trf.xlu1 }
 0x955   : > { %v4090_v49 = vrot.slane %v4076_v46, %v17033_v7  ;;  %5979 = vrot.lane.b32.xlu0 %v4940_v11, %s20254_s3  ;;  %v4143_v39 = vcombine.low %v3712_v60, %v3776_v45  ;;  %v4144_v63 = vcombine.high %v3712_v60, %v3776_v45  ;;  %v17252_v15 = vrot.slane %v4908_v26, %v17038_v52 }
 0x956   : > { %v4091_v38 = vcombine.low %v17077_v57, %v4083_v21  ;;  %v4092_v0 = vcombine.high %v17077_v57, %v4083_v21  ;;  %v17261_v51 = vrot.slane %v4924_v27, %v17038_v52  ;;  %v4950_v46 = vrot.slane %v4943_v5, %v17033_v7 }
 0x957   : > { %v4958_v60 = vrot.slane %v12867_v55, %v17033_v7  ;;  %v4966_v45 = vrot.slane %v4959_v23, %v17033_v7  ;;  %v4107_v11 = vcombine.low %v17080_v48, %v4090_v49  ;;  %v4108_v34 = vcombine.high %v17080_v48, %v4090_v49  ;;  %v1066_v23 = vld [vmem:[%s20573_s28 + $0x18] sm:$0xff] }
 0x958   : > { %v4151_v29 = vrot.slane %v4143_v39, %v17033_v7  ;;  %v17272_v57 = vrot.slane %v4144_v63, %v17033_v7  ;;  %v4941_v21 = vcombine.low %v17252_v15, %v17261_v51  ;;  %v4974_v5 = vrot.slane %v12868_v6, %v17033_v7  ;;  %v3714_v63 = vpop.trf.xlu0  ;;  %v3778_v10 = vpop.trf.xlu1  ;;  %13704 = vmatprep.subr.mxu0 %v1066_v23  ;;  %v1065_v6 = vld [vmem:[%s20573_s28 + $0x10] sm:$0xff] }
 0x959   : > { %v4975_v55 = vcombine.low %v4950_v46, %v4958_v60  ;;  %v17281_v27 = vrot.slane %v4091_v38, %v17038_v52  ;;  %v17284_v48 = vrot.slane %v4092_v0, %v17038_v52  ;;  %v4211_v49 = vcombine.low %v3713_v50, %v3777_v28  ;;  %13705 = vmatpush3.msra.mxu0 %v1066_v23  ;;  %v1064_v23 = vld [vmem:[%s20573_s28 + $0x8] sm:$0xff] }
 0x95a   : > { %v4976_v39 = vcombine.high %v4950_v46, %v4958_v60  ;;  %6043 = vrot.lane.b32.xlu0 %v4941_v21, %s20256_s6  ;;  %v4991_v38 = vcombine.low %v4966_v45, %v4974_v5  ;;  %v4212_v26 = vcombine.high %v3713_v50, %v3777_v28  ;;  %v4992_v37 = vcombine.high %v4966_v45, %v4974_v5 }
 0x95b   : > { %v17291_v9 = vrot.slane %v4975_v55, %v17038_v52  ;;  %v17294_v0 = vrot.slane %v4107_v11, %v17038_v52  ;;  %v17297_v46 = vrot.slane %v4108_v34, %v17038_v52  ;;  %v4159_v60 = vcombine.low %v17083_v31, %v4151_v29  ;;  %13706 = vmatprep.subr.mxu0 %v1065_v6 }
 0x95c   : > { %v17301_v33 = vrot.slane %v4976_v39, %v17038_v52  ;;  %v17304_v21 = vrot.slane %v4991_v38, %v17038_v52  ;;  %v17307_v55 = vrot.slane %v4992_v37, %v17038_v52  ;;  %v4279_v50 = vcombine.low %v3714_v63, %v3778_v10  ;;  %13707 = vmatpush3.msra.mxu0 %v1065_v6 }
 0x95d   : > { %20574 = vst [vmem:[#allocation34_spill] sm:$0xff] %v17291_v9  ;;  %v4280_v28 = vcombine.high %v3714_v63, %v3778_v10  ;;  %v12872_v45 = vcombine.high %v17240_v13, %v17243_v59  ;;  %v4160_v34 = vcombine.high %v17083_v31, %v4151_v29  ;;  %v4175_v11 = vcombine.low %v17086_v43, %v17272_v57  ;;  %v1063_v29 = vld [vmem:[%s20573_s28] sm:$0xff]  ;;  %s20657_s28 = smov 8  }
 0x95e   : > { %20575 = vst [vmem:[#allocation43_spill] sm:$0xff] %v17304_v21  ;;  %v4219_v5 = vrot.slane %v4211_v49, %v17033_v7  ;;  %v4176_v37 = vcombine.high %v17086_v43, %v17272_v57  ;;  %v5008_v10 = vcombine.high %v17291_v9, %v17304_v21  ;;  %v4226_v39 = vrot.slane %v4212_v26, %v17033_v7  ;;  %v3779_v49 = vpop.trf.xlu1 }
 0x95f   : > { %v5009_v31 = vcombine.low %v17301_v33, %v17307_v55  ;;  %13708 = vmatprep.subr.mxu0 %v1064_v23  ;;  %v17337_v57 = vrot.slane %v4159_v60, %v17038_v52  ;;  %v4287_v6 = vrot.slane %v4279_v50, %v17033_v7  ;;  %v4294_v38 = vrot.slane %v4280_v28, %v17033_v7  ;;  %v3715_v60 = vpop.trf.xlu0 }
 0x960   : > { %13709 = vmatpush3.msra.mxu0 %v1064_v23  ;;  %5981 = vrot.lane.b32.xlu1 %v5008_v10, %s20254_s3  ;;  %v17344_v63 = vrot.slane %v4160_v34, %v17038_v52  ;;  %v17347_v43 = vrot.slane %v4175_v11, %v17038_v52  ;;  %v4227_v26 = vcombine.low %v17089_v8, %v4219_v5 }
 0x961   : > { %6045 = vrot.lane.b32.xlu0 %v5009_v31, %s20256_s6  ;;  %v4228_v23 = vcombine.high %v17089_v8, %v4219_v5  ;;  %13710 = vmatprep.subr.mxu0 %v1063_v29  ;;  %v4243_v10 = vcombine.low %v17092_v14, %v4226_v39  ;;  %v4244_v31 = vcombine.high %v17092_v14, %v4226_v39 }
 0x962   : > { %v4942_v50 = vcombine.high %v17252_v15, %v17261_v51  ;;  %v20576_v28 = vcombine.low %v17227_v16, %v17230_v20  ;;  %13711 = vmatpush3.msra.mxu0 %v1063_v29  ;;  %v17362_v11 = vrot.slane %v4176_v37, %v17038_v52  ;;  %v20577_v8 = vcombine.high %v17227_v16, %v17230_v20  ;;  %v3780_v44 = vpop.trf.xlu1 }
 0x963   : > { %v20578_v14 = vcombine.low %v17240_v13, %v17243_v59  ;;  %v17377_v51 = vrot.slane %v12872_v45, %v17033_v7  ;;  %v4295_v39 = vcombine.low %v17095_v53, %v4287_v6  ;;  %v4296_v37 = vcombine.high %v17095_v53, %v4287_v6 }
 0x964   : > { %v17359_v34 = vrot.slane %v20576_v28, %v17033_v7  ;;  %v17368_v5 = vrot.slane %v20577_v8, %v17033_v7  ;;  %v4311_v29 = vcombine.low %v17098_v35, %v4294_v38  ;;  %v4312_v28 = vcombine.high %v17098_v35, %v4294_v38 }
 0x965   : > { %v17374_v15 = vrot.slane %v20578_v14, %v17033_v7  ;;  %6107 = vrot.lane.b32.xlu0 %v4942_v50, %s20252_s7  ;;  %v5215_v16 = vcombine.low %v17337_v57, %v17344_v63  ;;  %v17387_v20 = vrot.slane %v4227_v26, %v17038_v52  ;;  %v17394_v53 = vrot.slane %v4228_v23, %v17038_v52  ;;  %v3716_v14 = vpop.trf.xlu0 }
 0x966   : > { %v5112_v13 = vcombine.high %v17359_v34, %v17368_v5  ;;  %v17397_v35 = vrot.slane %v4243_v10, %v17038_v52  ;;  %v17400_v45 = vrot.slane %v4244_v31, %v17038_v52  ;;  %v5010_v6 = vcombine.high %v17301_v33, %v17307_v55 }
 0x967   : > { %v5128_v59 = vcombine.high %v17374_v15, %v17377_v51  ;;  %v4347_v50 = vcombine.low %v3715_v60, %v3779_v49  ;;  %v4348_v8 = vcombine.high %v3715_v60, %v3779_v49  ;;  %v17407_v23 = vrot.slane %v4295_v39, %v17038_v52 }
 0x968   : > { %v5126_v26 = vrot.slane %v5112_v13, %v17038_v52  ;;  %v17410_v10 = vrot.slane %v4296_v37, %v17038_v52  ;;  %v17413_v31 = vrot.slane %v4311_v29, %v17038_v52  ;;  %v17416_v19 = vrot.slane %v4312_v28, %v17038_v52  ;;  %v3781_v37 = vpop.trf.xlu1 }
 0x969   : > { %v5142_v38 = vrot.slane %v5128_v59, %v17038_v52  ;;  %6109 = vrot.lane.b32.xlu0 %v5010_v6, %s20252_s7  ;;  %v12875_v33 = vcombine.high %v17337_v57, %v17344_v63  ;;  %v5231_v55 = vcombine.low %v17347_v43, %v17362_v11  ;;  %v12876_v49 = vcombine.high %v17347_v43, %v17362_v11  ;;  %v3717_v6 = vpop.trf.xlu0 }
 0x96a   : > { %v20579_v29 = vcombine.low %v17207_v47, %v17210_v25  ;;  %v20580_v63 = vcombine.high %v17207_v47, %v17210_v25  ;;  %v4355_v11 = vrot.slane %v4347_v50, %v17033_v7  ;;  %v4362_v13 = vrot.slane %v4348_v8, %v17033_v7 }
 0x96b   : > { %v5145_v60 = vcombine.low %v5126_v26, %v5142_v38  ;;  %v4415_v59 = vcombine.low %v3716_v14, %v3780_v44  ;;  %v4416_v50 = vcombine.high %v3716_v14, %v3780_v44  ;;  %v20581_v8 = vcombine.low %v17221_v1, %v17224_v12 }
 0x96c   : > { %v17433_v28 = vrot.slane %v20579_v29, %v17033_v7  ;;  %v17439_v57 = vrot.slane %v20580_v63, %v17033_v7  ;;  %v5146_v63 = vcombine.high %v5126_v26, %v5142_v38  ;;  %v20582_v39 = vcombine.high %v17221_v1, %v17224_v12  ;;  %v3782_v30 = vpop.trf.xlu1 }
 0x96d   : > { %6049 = vrot.lane.b32.xlu1 %v5145_v60, %s20256_s6  ;;  %v17460_v43 = vrot.slane %v20581_v8, %v17033_v7  ;;  %v5222_v26 = vrot.slane %v5215_v16, %v17033_v7  ;;  %v5230_v44 = vrot.slane %v12875_v33, %v17033_v7  ;;  %v4363_v38 = vcombine.low %v17103_v61, %v4355_v11 }
 0x96e   : > { %v17466_v47 = vrot.slane %v20582_v39, %v17033_v7  ;;  %v5043_v25 = vcombine.low %v17433_v28, %v17439_v57  ;;  %v4364_v14 = vcombine.high %v17103_v61, %v4355_v11  ;;  %v4379_v8 = vcombine.low %v17106_v17, %v4362_v13 }
 0x96f   : > { %v4423_v60 = vrot.slane %v4415_v59, %v17033_v7  ;;  %v5238_v16 = vrot.slane %v5231_v55, %v17033_v7  ;;  %v5246_v33 = vrot.slane %v12876_v49, %v17033_v7  ;;  %v5247_v39 = vcombine.low %v5222_v26, %v5230_v44 }
 0x970   : > { %v17478_v1 = vrot.slane %v5043_v25, %v17038_v52  ;;  %v5059_v12 = vcombine.low %v17460_v43, %v17466_v47  ;;  %v4483_v29 = vcombine.low %v3717_v6, %v3781_v37  ;;  %v4484_v9 = vcombine.high %v3717_v6, %v3781_v37  ;;  %v3718_v6 = vpop.trf.xlu0 }
 0x971   : > { %6113 = vrot.lane.b32.xlu1 %v5146_v63, %s20252_s7  ;;  %v5111_v61 = vcombine.low %v17359_v34, %v17368_v5  ;;  %v5263_v59 = vcombine.low %v5238_v16, %v5246_v33  ;;  %v5127_v25 = vcombine.low %v17374_v15, %v17377_v51  ;;  %v5248_v63 = vcombine.high %v5222_v26, %v5230_v44 }
 0x972   : > { %v17487_v11 = vrot.slane %v5059_v12, %v17038_v52  ;;  %v4380_v21 = vcombine.high %v17106_v17, %v4362_v13  ;;  %v4430_v55 = vrot.slane %v4416_v50, %v17033_v7  ;;  %v17494_v49 = vrot.slane %v5247_v39, %v17038_v52 }
 0x973   : > { %v4491_v37 = vrot.slane %v4483_v29, %v17033_v7  ;;  %v17500_v5 = vrot.slane %v5263_v59, %v17038_v52  ;;  %v17503_v15 = vrot.slane %v5111_v61, %v17038_v52  ;;  %v17506_v17 = vrot.slane %v5127_v25, %v17038_v52 }
 0x974   : > { %20583 = vst [vmem:[#allocation37_spill] sm:$0xff] %v17494_v49  ;;  %v5076_v34 = vcombine.high %v17478_v1, %v17487_v11  ;;  %v17509_v51 = vrot.slane %v4363_v38, %v17038_v52  ;;  %v17512_v13 = vrot.slane %v4364_v14, %v17038_v52  ;;  %v4431_v29 = vcombine.low %v17131_v18, %v4423_v60 }
 0x975   : > { %20584 = vst [vmem:[#allocation84_spill] sm:$0xff] %v17500_v5  ;;  %v4432_v50 = vcombine.high %v17131_v18, %v4423_v60  ;;  %v5280_v26 = vcombine.high %v17494_v49, %v17500_v5  ;;  %v4498_v44 = vrot.slane %v4484_v9, %v17033_v7  ;;  %v5262_v12 = vrot.slane %v5248_v63, %v17038_v52  ;;  %v3719_v63 = vpop.trf.xlu0 }
 0x976   : > { %5983 = vrot.lane.b32.xlu0 %v5076_v34, %s20254_s3  ;;  %v5264_v39 = vcombine.high %v5238_v16, %v5246_v33  ;;  %v17522_v38 = vrot.slane %v4379_v8, %v17038_v52  ;;  %v4447_v14 = vcombine.low %v17134_v42, %v4430_v55  ;;  %v4448_v61 = vcombine.high %v17134_v42, %v4430_v55 }
 0x977   : > { %v4499_v59 = vcombine.low %v17139_v3, %v4491_v37  ;;  %5989 = vrot.lane.b32.xlu1 %v5280_v26, %s20254_s3  ;;  %v4500_v18 = vcombine.high %v17139_v3, %v4491_v37  ;;  %v5144_v60 = vcombine.high %v17503_v15, %v17506_v17  ;;  %v5044_v16 = vcombine.high %v17433_v28, %v17439_v57  ;;  %v3783_v3 = vpop.trf.xlu1 }
 0x978   : > { %v5278_v9 = vrot.slane %v5264_v39, %v17038_v52  ;;  %v17535_v8 = vrot.slane %v4380_v21, %v17038_v52  ;;  %v17540_v33 = vrot.slane %v4431_v29, %v17038_v52  ;;  %v4551_v25 = vcombine.low %v3718_v6, %v3782_v30 }
 0x979   : > { %v17545_v37 = vrot.slane %v4432_v50, %v17038_v52  ;;  %v4515_v28 = vcombine.low %v17142_v41, %v4498_v44  ;;  %v4516_v57 = vcombine.high %v17142_v41, %v4498_v44  ;;  %v4552_v34 = vcombine.high %v3718_v6, %v3782_v30 }
 0x97a   : > { %5985 = vrot.lane.b32.xlu0 %v5144_v60, %s20254_s3  ;;  %v5281_v21 = vcombine.low %v5262_v12, %v5278_v9  ;;  %v5058_v29 = vrot.slane %v5044_v16, %v17038_v52  ;;  %v5060_v26 = vcombine.high %v17460_v43, %v17466_v47  ;;  %v17554_v39 = vrot.slane %v4447_v14, %v17038_v52 }
 0x97b   : > { %v17557_v55 = vrot.slane %v4448_v61, %v17038_v52  ;;  %v17560_v50 = vrot.slane %v4499_v59, %v17038_v52  ;;  %v17563_v60 = vrot.slane %v4500_v18, %v17038_v52  ;;  %v4559_v43 = vrot.slane %v4551_v25, %v17033_v7  ;;  %v3784_v30 = vpop.trf.xlu1 }
 0x97c   : > { %6053 = vrot.lane.b32.xlu1 %v5281_v21, %s20256_s6  ;;  %v5074_v47 = vrot.slane %v5060_v26, %v17038_v52  ;;  %v5282_v14 = vcombine.high %v5262_v12, %v5278_v9  ;;  %v20585_v61 = vcombine.low %v17407_v23, %v17410_v10  ;;  %v17581_v18 = vrot.slane %v4515_v28, %v17038_v52  ;;  %v3720_v26 = vpop.trf.xlu0 }
 0x97d   : > { %v17584_v16 = vrot.slane %v4516_v57, %v17038_v52  ;;  %v4566_v25 = vrot.slane %v4552_v34, %v17033_v7  ;;  %v20586_v28 = vcombine.high %v17407_v23, %v17410_v10  ;;  %v4619_v42 = vcombine.low %v3719_v63, %v3783_v3 }
 0x97e   : > { %v5358_v59 = vrot.slane %v20585_v61, %v17033_v7  ;;  %v5077_v21 = vcombine.low %v5058_v29, %v5074_v47  ;;  %v4567_v61 = vcombine.low %v17145_v40, %v4559_v43  ;;  %v4620_v41 = vcombine.high %v3719_v63, %v3783_v3 }
 0x97f   : > { %v5366_v57 = vrot.slane %v20586_v28, %v17033_v7  ;;  %v20587_v9 = vcombine.low %v17413_v31, %v17416_v19  ;;  %v4687_v28 = vcombine.low %v3720_v26, %v3784_v30  ;;  %v4568_v44 = vcombine.high %v17145_v40, %v4559_v43 }
 0x980   : > { %6117 = vrot.lane.b32.xlu1 %v5282_v14, %s20252_s7  ;;  %6047 = vrot.lane.b32.xlu0 %v5077_v21, %s20256_s6  ;;  %v20588_v14 = vcombine.high %v17413_v31, %v17416_v19  ;;  %v4583_v21 = vcombine.low %v17149_v32, %v4566_v25  ;;  %v5078_v63 = vcombine.high %v5058_v29, %v5074_v47 }
 0x981   : > { %v5374_v12 = vrot.slane %v20587_v9, %v17033_v7  ;;  %v5383_v10 = vcombine.low %v5358_v59, %v5366_v57  ;;  %v4584_v3 = vcombine.high %v17149_v32, %v4566_v25  ;;  %v4688_v49 = vcombine.high %v3720_v26, %v3784_v30 }
 0x982   : > { %v5382_v23 = vrot.slane %v20588_v14, %v17033_v7  ;;  %v17619_v19 = vrot.slane %v4567_v61, %v17038_v52  ;;  %v4627_v31 = vrot.slane %v4619_v42, %v17033_v7  ;;  %v20589_v40 = vcombine.low %v17281_v27, %v17284_v48 }
 0x983   : > { %v17616_v6 = vrot.slane %v5383_v10, %v17038_v52  ;;  %v20590_v32 = vcombine.high %v17281_v27, %v17284_v48  ;;  %v4634_v47 = vrot.slane %v4620_v41, %v17033_v7  ;;  %v4695_v25 = vrot.slane %v4687_v28, %v17033_v7 }
 0x984   : > { %v5399_v9 = vcombine.low %v5374_v12, %v5382_v23  ;;  %6111 = vrot.lane.b32.xlu0 %v5078_v63, %s20252_s7  ;;  %v5154_v43 = vrot.slane %v20589_v40, %v17033_v7  ;;  %v4702_v42 = vrot.slane %v4688_v49, %v17033_v7  ;;  %v20591_v26 = vcombine.low %v17294_v0, %v17297_v46 }
 0x985   : > { %v5162_v29 = vrot.slane %v20590_v32, %v17033_v7  ;;  %v20592_v14 = vcombine.high %v17294_v0, %v17297_v46  ;;  %v5384_v10 = vcombine.high %v5358_v59, %v5366_v57  ;;  %v17646_v41 = vrot.slane %v4568_v44, %v17038_v52  ;;  %v3785_v32 = vpop.trf.xlu1 }
 0x986   : > { %v17633_v30 = vrot.slane %v5399_v9, %v17038_v52  ;;  %v5170_v61 = vrot.slane %v20591_v26, %v17033_v7  ;;  %v17649_v63 = vrot.slane %v4583_v21, %v17038_v52  ;;  %v17652_v49 = vrot.slane %v4584_v3, %v17038_v52  ;;  %v3721_v3 = vpop.trf.xlu0 }
 0x987   : > { %v5178_v27 = vrot.slane %v20592_v14, %v17033_v7  ;;  %v5179_v48 = vcombine.low %v5154_v43, %v5162_v29  ;;  %v4635_v9 = vcombine.low %v17152_v36, %v4627_v31  ;;  %v4636_v40 = vcombine.high %v17152_v36, %v4627_v31 }
 0x988   : > { %v5416_v28 = vcombine.high %v17616_v6, %v17633_v30  ;;  %v4651_v44 = vcombine.low %v17155_v56, %v4634_v47  ;;  %v4652_v59 = vcombine.high %v17155_v56, %v4634_v47  ;;  %v5398_v57 = vrot.slane %v5384_v10, %v17038_v52 }
 0x989   : > { %v17659_v0 = vrot.slane %v5179_v48, %v17038_v52  ;;  %v5195_v46 = vcombine.low %v5170_v61, %v5178_v27  ;;  %v5400_v21 = vcombine.high %v5374_v12, %v5382_v23  ;;  %v4703_v26 = vcombine.low %v17158_v58, %v4695_v25 }
 0x98a   : > { %5993 = vrot.lane.b32.xlu1 %v5416_v28, %s20254_s3  ;;  %v4704_v14 = vcombine.high %v17158_v58, %v4695_v25  ;;  %v4719_v36 = vcombine.low %v17161_v54, %v4702_v42  ;;  %v4720_v48 = vcombine.high %v17161_v54, %v4702_v42  ;;  %v5180_v47 = vcombine.high %v5154_v43, %v5162_v29 }
 0x98b   : > { %v17669_v31 = vrot.slane %v5195_v46, %v17038_v52  ;;  %v5414_v56 = vrot.slane %v5400_v21, %v17038_v52  ;;  %v5196_v28 = vcombine.high %v5170_v61, %v5178_v27  ;;  %v17674_v10 = vrot.slane %v4635_v9, %v17038_v52 }
 0x98c   : > { %v17677_v12 = vrot.slane %v4636_v40, %v17038_v52  ;;  %v4755_v23 = vcombine.low %v3721_v3, %v3785_v32  ;;  %v17682_v25 = vrot.slane %v4651_v44, %v17038_v52  ;;  %v5194_v54 = vrot.slane %v5180_v47, %v17038_v52  ;;  %v3786_v47 = vpop.trf.xlu1 }
 0x98d   : > { %v5212_v58 = vcombine.high %v17659_v0, %v17669_v31  ;;  %v5417_v46 = vcombine.low %v5398_v57, %v5414_v56  ;;  %v5210_v42 = vrot.slane %v5196_v28, %v17038_v52  ;;  %v17687_v43 = vrot.slane %v4652_v59, %v17038_v52 }
 0x98e   : > { %v17690_v29 = vrot.slane %v4703_v26, %v17038_v52  ;;  %v17693_v61 = vrot.slane %v4704_v14, %v17038_v52  ;;  %v4756_v27 = vcombine.high %v3721_v3, %v3785_v32  ;;  %v5623_v40 = vcombine.low %v17619_v19, %v17646_v41  ;;  %v3722_v14 = vpop.trf.xlu0 }
 0x98f   : > { %5987 = vrot.lane.b32.xlu0 %v5212_v58, %s20254_s3  ;;  %v17701_v44 = vrot.slane %v4719_v36, %v17038_v52  ;;  %v17704_v59 = vrot.slane %v4720_v48, %v17038_v52  ;;  %6057 = vrot.lane.b32.xlu1 %v5417_v46, %s20256_s6  ;;  %v12887_v21 = vcombine.high %v17619_v19, %v17646_v41 }
 0x990   : > { %v5639_v3 = vcombine.low %v17649_v63, %v17652_v49  ;;  %v17712_v32 = vrot.slane %v4755_v23, %v17033_v7  ;;  %v5213_v26 = vcombine.low %v5194_v54, %v5210_v42  ;;  %v12888_v36 = vcombine.high %v17649_v63, %v17652_v49 }
 0x991   : > { %v5418_v58 = vcombine.high %v5398_v57, %v5414_v56  ;;  %v17727_v46 = vrot.slane %v4756_v27, %v17033_v7  ;;  %v4823_v56 = vcombine.low %v3722_v14, %v3786_v47  ;;  %v5214_v19 = vcombine.high %v5194_v54, %v5210_v42 }
 0x992   : > { %v4771_v41 = vcombine.low %v17183_v24, %v17712_v32  ;;  %v20593_v27 = vcombine.low %v17540_v33, %v17545_v37  ;;  %v20594_v28 = vcombine.high %v17540_v33, %v17545_v37  ;;  %v4772_v9 = vcombine.high %v17183_v24, %v17712_v32 }
 0x993   : > { %6051 = vrot.lane.b32.xlu0 %v5213_v26, %s20256_s6  ;;  %6121 = vrot.lane.b32.xlu1 %v5418_v58, %s20252_s7  ;;  %v4824_v34 = vcombine.high %v3722_v14, %v3786_v47  ;;  %v20595_v58 = vcombine.low %v17554_v39, %v17557_v55  ;;  %v20596_v54 = vcombine.high %v17554_v39, %v17557_v55 }
 0x994   : > { %v5494_v26 = vrot.slane %v20593_v27, %v17033_v7  ;;  %v5502_v48 = vrot.slane %v20594_v28, %v17033_v7  ;;  %v4787_v27 = vcombine.low %v17189_v4, %v17727_v46  ;;  %v20597_v37 = vcombine.low %v17387_v20, %v17394_v53 }
 0x995   : > { %v5510_v57 = vrot.slane %v20595_v58, %v17033_v7  ;;  %v5518_v42 = vrot.slane %v20596_v54, %v17033_v7  ;;  %v20598_v55 = vcombine.high %v17387_v20, %v17394_v53  ;;  %v20599_v47 = vcombine.low %v17397_v35, %v17400_v45 }
 0x996   : > { %v5519_v24 = vcombine.low %v5494_v26, %v5502_v48  ;;  %v5290_v32 = vrot.slane %v20597_v37, %v17033_v7  ;;  %v4831_v54 = vrot.slane %v4823_v56, %v17033_v7  ;;  %v5520_v49 = vcombine.high %v5494_v26, %v5502_v48 }
 0x997   : > { %6115 = vrot.lane.b32.xlu0 %v5214_v19, %s20252_s7  ;;  %v5535_v14 = vcombine.low %v5510_v57, %v5518_v42  ;;  %v5298_v39 = vrot.slane %v20598_v55, %v17033_v7  ;;  %v5306_v28 = vrot.slane %v20599_v47, %v17033_v7  ;;  %v20600_v19 = vcombine.high %v17397_v35, %v17400_v45 }
 0x998   : > { %v17780_v37 = vrot.slane %v5519_v24, %v17038_v52  ;;  %v5536_v33 = vcombine.high %v5510_v57, %v5518_v42  ;;  %v5534_v47 = vrot.slane %v5520_v49, %v17038_v52  ;;  %v5630_v5 = vrot.slane %v5623_v40, %v17033_v7 }
 0x999   : > { %v5314_v58 = vrot.slane %v20600_v19, %v17033_v7  ;;  %v17783_v20 = vrot.slane %v5535_v14, %v17038_v52  ;;  %v5315_v53 = vcombine.low %v5290_v32, %v5298_v39  ;;  %v5316_v63 = vcombine.high %v5290_v32, %v5298_v39 }
 0x99a   : > { %v5638_v35 = vrot.slane %v12887_v21, %v17033_v7  ;;  %v5550_v57 = vrot.slane %v5536_v33, %v17038_v52  ;;  %v4838_v26 = vrot.slane %v4824_v34, %v17033_v7  ;;  %v4839_v49 = vcombine.low %v17192_v2, %v4831_v54 }
 0x99b   : > { %v5331_v55 = vcombine.low %v5306_v28, %v5314_v58  ;;  %v5332_v23 = vcombine.high %v5306_v28, %v5314_v58  ;;  %v5552_v45 = vcombine.high %v17780_v37, %v17783_v20  ;;  %v17791_v56 = vrot.slane %v5315_v53, %v17038_v52 }
 0x99c   : > { %v5330_v42 = vrot.slane %v5316_v63, %v17038_v52  ;;  %v5646_v40 = vrot.slane %v5639_v3, %v17033_v7  ;;  %v5654_v32 = vrot.slane %v12888_v36, %v17033_v7  ;;  %v20601_v33 = vcombine.low %v17509_v51, %v17512_v13 }
 0x99d   : > { %v17794_v48 = vrot.slane %v5331_v55, %v17038_v52  ;;  %5997 = vrot.lane.b32.xlu1 %v5552_v45, %s20254_s3  ;;  %v5346_v24 = vrot.slane %v5332_v23, %v17038_v52  ;;  %v4840_v14 = vcombine.high %v17192_v2, %v4831_v54  ;;  %v5655_v39 = vcombine.low %v5630_v5, %v5638_v35 }
 0x99e   : > { %v5426_v34 = vrot.slane %v20601_v33, %v17033_v7  ;;  %v20602_v3 = vcombine.high %v17509_v51, %v17512_v13  ;;  %v20603_v28 = vcombine.low %v17522_v38, %v17535_v8  ;;  %v17820_v36 = vrot.slane %v4771_v41, %v17038_v52 }
 0x99f   : > { %v5348_v21 = vcombine.high %v17791_v56, %v17794_v48  ;;  %v5553_v19 = vcombine.low %v5534_v47, %v5550_v57  ;;  %v5671_v58 = vcombine.low %v5646_v40, %v5654_v32  ;;  %v20604_v2 = vcombine.high %v17522_v38, %v17535_v8 }
 0x9a0   : > { %v5434_v63 = vrot.slane %v20602_v3, %v17033_v7  ;;  %v5442_v23 = vrot.slane %v20603_v28, %v17033_v7  ;;  %v17828_v51 = vrot.slane %v4772_v9, %v17038_v52  ;;  %v17831_v13 = vrot.slane %v4787_v27, %v17038_v52 }
 0x9a1   : > { %5991 = vrot.lane.b32.xlu0 %v5348_v21, %s20254_s3  ;;  %v5450_v54 = vrot.slane %v20604_v2, %v17033_v7  ;;  %v4855_v53 = vcombine.low %v17197_v62, %v4838_v26  ;;  %v4847_v41 = vrot.slane %v4839_v49, %v17038_v52  ;;  %v4856_v45 = vcombine.high %v17197_v62, %v4838_v26 }
 0x9a2   : > { %v5451_v55 = vcombine.low %v5426_v34, %v5434_v63  ;;  %6061 = vrot.lane.b32.xlu1 %v5553_v19, %s20256_s6  ;;  %v5349_v21 = vcombine.low %v5330_v42, %v5346_v24  ;;  %v4854_v38 = vrot.slane %v4840_v14, %v17038_v52  ;;  %v5554_v8 = vcombine.high %v5534_v47, %v5550_v57 }
 0x9a3   : > { %v5467_v33 = vcombine.low %v5442_v23, %v5450_v54  ;;  %v17839_v9 = vrot.slane %v5655_v39, %v17038_v52  ;;  %v5656_v3 = vcombine.high %v5630_v5, %v5638_v35  ;;  %v17843_v27 = vrot.slane %v5671_v58, %v17038_v52 }
 0x9a4   : > { %v5672_v28 = vcombine.high %v5646_v40, %v5654_v32  ;;  %v5452_v49 = vcombine.high %v5426_v34, %v5434_v63  ;;  %v20605_v62 = vcombine.low %v17690_v29, %v17693_v61  ;;  %v17850_v19 = vrot.slane %v5451_v55, %v17038_v52 }
 0x9a5   : > { %6055 = vrot.lane.b32.xlu0 %v5349_v21, %s20256_s6  ;;  %v17853_v47 = vrot.slane %v5467_v33, %v17038_v52  ;;  %v5468_v57 = vcombine.high %v5442_v23, %v5450_v54  ;;  %v20606_v5 = vcombine.high %v17690_v29, %v17693_v61  ;;  %v20607_v40 = vcombine.high %v17189_v4, %v17727_v46 }
 0x9a6   : > { %v5766_v26 = vrot.slane %v20605_v62, %v17033_v7  ;;  %6125 = vrot.lane.b32.xlu1 %v5554_v8, %s20252_s7  ;;  %v5350_v34 = vcombine.high %v5330_v42, %v5346_v24  ;;  %v20608_v14 = vcombine.low %v17701_v44, %v17704_v59  ;;  %v20609_v63 = vcombine.high %v17701_v44, %v17704_v59 }
 0x9a7   : > { %v5774_v35 = vrot.slane %v20606_v5, %v17033_v7  ;;  %v17863_v32 = vrot.slane %v20607_v40, %v17038_v52  ;;  %v5827_v61 = vcombine.low %v17820_v36, %v17828_v51  ;;  %v4863_v4 = vrot.slane %v4855_v53, %v17038_v52 }
 0x9a8   : > { %v5782_v39 = vrot.slane %v20608_v14, %v17033_v7  ;;  %v5790_v29 = vrot.slane %v20609_v63, %v17033_v7  ;;  %v4870_v46 = vrot.slane %v4856_v45, %v17038_v52  ;;  %v5895_v23 = vcombine.low %v4847_v41, %v4854_v38 }
 0x9a9   : > { %6119 = vrot.lane.b32.xlu0 %v5350_v34, %s20252_s7  ;;  %v5688_v42 = vcombine.high %v17839_v9, %v17843_v27  ;;  %v5670_v24 = vrot.slane %v5656_v3, %v17038_v52  ;;  %v5686_v58 = vrot.slane %v5672_v28, %v17038_v52  ;;  %v5466_v44 = vrot.slane %v5452_v49, %v17038_v52 }
 0x9aa   : > { %v5484_v59 = vcombine.high %v17850_v19, %v17853_v47  ;;  %v5482_v2 = vrot.slane %v5468_v57, %v17038_v52  ;;  %v5791_v54 = vcombine.low %v5766_v26, %v5774_v35  ;;  %v20610_v53 = vcombine.low %v17560_v50, %v17563_v60 }
 0x9ab   : > { %6001 = vrot.lane.b32.xlu1 %v5688_v42, %s20254_s3  ;;  %v5807_v45 = vcombine.low %v5782_v39, %v5790_v29  ;;  %v20611_v21 = vcombine.high %v17560_v50, %v17563_v60  ;;  %v20612_v8 = vcombine.low %v17581_v18, %v17584_v16  ;;  %v20613_v28 = vcombine.high %v17581_v18, %v17584_v16 }
 0x9ac   : > { %v5562_v55 = vrot.slane %v20610_v53, %v17033_v7  ;;  %v12893_v62 = vcombine.high %v17820_v36, %v17828_v51  ;;  %v12895_v57 = vcombine.high %v4847_v41, %v4854_v38  ;;  %v5911_v5 = vcombine.low %v4863_v4, %v4870_v46 }
 0x9ad   : > { %v5570_v33 = vrot.slane %v20611_v21, %v17033_v7  ;;  %v5578_v3 = vrot.slane %v20612_v8, %v17033_v7  ;;  %v5586_v49 = vrot.slane %v20613_v28, %v17033_v7  ;;  %v12896_v40 = vcombine.high %v4863_v4, %v4870_v46  ;;  %5995 = vrot.lane.b32.xlu0 %v5484_v59, %s20254_s3 }
 0x9ae   : > { %v5843_v50 = vcombine.low %v17831_v13, %v17863_v32  ;;  %v12894_v60 = vcombine.high %v17831_v13, %v17863_v32  ;;  %v5689_v34 = vcombine.low %v5670_v24, %v5686_v58  ;;  %v5690_v14 = vcombine.high %v5670_v24, %v5686_v58 }
 0x9af   : > { %v5485_v63 = vcombine.low %v5466_v44, %v5482_v2  ;;  %v17912_v18 = vrot.slane %v5791_v54, %v17038_v52  ;;  %v5792_v16 = vcombine.high %v5766_v26, %v5774_v35  ;;  %v5808_v42 = vcombine.high %v5782_v39, %v5790_v29 }
 0x9b0   : > { %6065 = vrot.lane.b32.xlu1 %v5689_v34, %s20256_s6  ;;  %v17916_v36 = vrot.slane %v5807_v45, %v17038_v52  ;;  %v5587_v51 = vcombine.low %v5562_v55, %v5570_v33  ;;  %v5603_v41 = vcombine.low %v5578_v3, %v5586_v49  ;;  %v17919_v38 = vrot.slane %v5895_v23, %v17033_v7 }
 0x9b1   : > { %v17922_v13 = vrot.slane %v12895_v57, %v17033_v7  ;;  %v17925_v32 = vrot.slane %v5911_v5, %v17033_v7  ;;  %v17928_v4 = vrot.slane %v12896_v40, %v17033_v7  ;;  %v20614_v26 = vcombine.low %v17674_v10, %v17677_v12  ;;  %6059 = vrot.lane.b32.xlu0 %v5485_v63, %s20256_s6 }
 0x9b2   : > { %v20615_v39 = vcombine.high %v17674_v10, %v17677_v12  ;;  %v20616_v46 = vcombine.low %v17682_v25, %v17687_v43  ;;  %v20617_v24 = vcombine.high %v17682_v25, %v17687_v43  ;;  %v17954_v59 = vrot.slane %v5827_v61, %v17033_v7 }
 0x9b3   : > { %v17934_v35 = vrot.slane %v20614_v26, %v17033_v7  ;;  %v5486_v54 = vcombine.high %v5466_v44, %v5482_v2  ;;  %v5806_v53 = vrot.slane %v5792_v16, %v17038_v52  ;;  %v5822_v10 = vrot.slane %v5808_v42, %v17038_v52 }
 0x9b4   : > { %v17941_v29 = vrot.slane %v20615_v39, %v17033_v7  ;;  %v17947_v23 = vrot.slane %v20616_v46, %v17033_v7  ;;  %v5722_v58 = vrot.slane %v20617_v24, %v17033_v7  ;;  %v5588_v12 = vcombine.high %v5562_v55, %v5570_v33  ;;  %6129 = vrot.lane.b32.xlu1 %v5690_v14, %s20252_s7 }
 0x9b5   : > { %v17960_v45 = vrot.slane %v5587_v51, %v17038_v52  ;;  %v17963_v21 = vrot.slane %v5603_v41, %v17038_v52  ;;  %v5604_v8 = vcombine.high %v5578_v3, %v5586_v49  ;;  %v17966_v25 = vrot.slane %v12893_v62, %v17033_v7  ;;  %6123 = vrot.lane.b32.xlu0 %v5486_v54, %s20252_s7 }
 0x9b6   : > { %v5824_v43 = vcombine.high %v17912_v18, %v17916_v36  ;;  %v5927_v61 = vcombine.low %v17919_v38, %v17922_v13  ;;  %v5943_v44 = vcombine.low %v17925_v32, %v17928_v4  ;;  %v17975_v2 = vrot.slane %v5843_v50, %v17033_v7 }
 0x9b7   : > { %v5723_v55 = vcombine.low %v17934_v35, %v17941_v29  ;;  %v5739_v33 = vcombine.low %v17947_v23, %v5722_v58  ;;  %v5858_v3 = vrot.slane %v12894_v60, %v17033_v7  ;;  %v5859_v28 = vcombine.low %v17954_v59, %v17966_v25 }
 0x9b8   : > { %6005 = vrot.lane.b32.xlu1 %v5824_v43, %s20254_s3  ;;  %v5620_v49 = vcombine.high %v17960_v45, %v17963_v21  ;;  %v5602_v62 = vrot.slane %v5588_v12, %v17038_v52  ;;  %v5618_v57 = vrot.slane %v5604_v8, %v17038_v52  ;;  %v5825_v40 = vcombine.low %v5806_v53, %v5822_v10 }
 0x9b9   : > { %v5875_v5 = vcombine.low %v17975_v2, %v5858_v3  ;;  %v17991_v50 = vrot.slane %v5927_v61, %v17038_v52  ;;  %v17994_v60 = vrot.slane %v5943_v44, %v17038_v52  ;;  %v17998_v34 = vrot.slane %v5723_v55, %v17038_v52 }
 0x9ba   : > { %5999 = vrot.lane.b32.xlu0 %v5620_v49, %s20254_s3  ;;  %v18001_v14 = vrot.slane %v5739_v33, %v17038_v52  ;;  %v18004_v63 = vrot.slane %v5859_v28, %v17038_v52  ;;  %v5415_v42 = vcombine.low %v17616_v6, %v17633_v30  ;;  %v5211_v51 = vcombine.low %v17659_v0, %v17669_v31 }
 0x9bb   : > { %v18007_v16 = vrot.slane %v5875_v5, %v17038_v52  ;;  %v5551_v41 = vcombine.low %v17780_v37, %v17783_v20  ;;  %v5347_v26 = vcombine.low %v17791_v56, %v17794_v48  ;;  %v5621_v39 = vcombine.low %v5602_v62, %v5618_v57 }
 0x9bc   : > { %6069 = vrot.lane.b32.xlu1 %v5825_v40, %s20256_s6  ;;  %v5826_v46 = vcombine.high %v5806_v53, %v5822_v10  ;;  %v5687_v24 = vcombine.low %v17839_v9, %v17843_v27  ;;  %v5483_v54 = vcombine.low %v17850_v19, %v17853_v47  ;;  %v5823_v12 = vcombine.low %v17912_v18, %v17916_v36 }
 0x9bd   : > { %v5619_v8 = vcombine.low %v17960_v45, %v17963_v21  ;;  %v5959_v43 = vcombine.low %v17991_v50, %v17994_v60  ;;  %v5928_v53 = vcombine.high %v17919_v38, %v17922_v13  ;;  %v5944_v10 = vcombine.high %v17925_v32, %v17928_v4 }
 0x9be   : > { %6063 = vrot.lane.b32.xlu0 %v5621_v39, %s20256_s6  ;;  %v5755_v61 = vcombine.low %v17998_v34, %v18001_v14  ;;  %v5891_v44 = vcombine.low %v18004_v63, %v18007_v16  ;;  %v5622_v55 = vcombine.high %v5602_v62, %v5618_v57  ;;  %v5724_v33 = vcombine.high %v17934_v35, %v17941_v29 }
 0x9bf   : > { %v5740_v28 = vcombine.high %v17947_v23, %v5722_v58  ;;  %v5960_v38 = vcombine.high %v17991_v50, %v17994_v60  ;;  %v5942_v13 = vrot.slane %v5928_v53, %v17038_v52  ;;  %v5958_v32 = vrot.slane %v5944_v10, %v17038_v52  ;;  %v18179_v50 = vld [vmem:[%s20347_s11] sm:$0xff] }
 0x9c0   : > { %6133 = vrot.lane.b32.xlu1 %v5826_v46, %s20252_s7  ;;  %v5756_v4 = vcombine.high %v17998_v34, %v18001_v14  ;;  %v5738_v49 = vrot.slane %v5724_v33, %v17038_v52  ;;  %v5860_v5 = vcombine.high %v17954_v59, %v17966_v25  ;;  %v5876_v40 = vcombine.high %v17975_v2, %v5858_v3 }
 0x9c1   : > { %v5754_v35 = vrot.slane %v5740_v28, %v17038_v52  ;;  %v5961_v29 = vcombine.low %v5942_v13, %v5958_v32  ;;  %v5962_v62 = vcombine.high %v5942_v13, %v5958_v32  ;;  %v5892_v46 = vcombine.high %v18004_v63, %v18007_v16  ;;  %v20618_v28 = vld [vmem:[#allocation36_spill] sm:$0xff]  ;;  %v20619_v32 = vld [vmem:[#allocation43_spill] sm:$0xff]  ;;  %v20623_v63 = vld [vmem:[#allocation30_spill] sm:$0xff] }
 0x9c2   : > { %6127 = vrot.lane.b32.xlu0 %v5622_v55, %s20252_s7  ;;  %v5874_v53 = vrot.slane %v5860_v5, %v17038_v52  ;;  %v5890_v10 = vrot.slane %v5876_v40, %v17038_v52  ;;  %v18174_v16 = vsub.s32 1, %v20623_v63 }
 0x9c3   : > { %v5757_v23 = vcombine.low %v5738_v49, %v5754_v35  ;;  %v5758_v57 = vcombine.high %v5738_v49, %v5754_v35 }
 0x9c4   : > { %6009 = vrot.lane.b32.xlu1 %v5960_v38, %s20254_s3  ;;  %v5893_v55 = vcombine.low %v5874_v53, %v5890_v10  ;;  %v4939_v38 = vcombine.low %v20618_v28, %v17216_v22  ;;  %v5894_v25 = vcombine.high %v5874_v53, %v5890_v10  ;;  %20624 = vst [vmem:[#allocation93_spill] sm:$0xff] %v18174_v16 }
 0x9c5   : > { %v18183_v60 = vrot.slane %v18179_v50, %v18174_v16 }
 0x9c6   : > { %6003 = vrot.lane.b32.xlu0 %v5756_v4, %s20254_s3  ;;  %v20620_v4 = vld [vmem:[#allocation34_spill] sm:$0xff] }
 0x9c7   : > { %v5980_v58 = vpop.permute.xlu0 %5979  ;;  %v5007_v49 = vcombine.low %v20620_v4, %v20619_v32  ;;  %v20622_v4 = vld [vmem:[#allocation37_spill] sm:$0xff] }
 0x9c8   : > { %6073 = vrot.lane.b32.xlu1 %v5961_v29, %s20256_s6  ;;  %v6155_v59 = vsel %vm1710_vm3, %v4939_v38, %v5980_v58 }
 0x9ca   : > { %6067 = vrot.lane.b32.xlu0 %v5757_v23, %s20256_s6 }
 0x9cc   : > { %6137 = vrot.lane.b32.xlu1 %v5962_v62, %s20252_s7  ;;  %v6044_v39 = vpop.permute.xlu0 %6043 }
 0x9cd   : > { %v6172_v2 = vsel %vm6171_vm5, %v6155_v59, %v6044_v39 }
 0x9ce   : > { %6131 = vrot.lane.b32.xlu0 %v5758_v57, %s20252_s7 }
 0x9d2   : > { %6007 = vrot.lane.b32.xlu0 %v5892_v46, %s20254_s3  ;;  %v5982_v3 = vpop.permute.xlu1 %5981  ;;  %v5143_v46 = vcombine.low %v17503_v15, %v17506_v17  ;;  %s20650_s3 = smov 112  }
 0x9d3   : > { %v6046_v33 = vpop.permute.xlu0 %6045  ;;  %v6156_v22 = vsel %vm1710_vm3, %v5007_v49, %v5982_v3 }
 0x9d4   : > { %v6173_v29 = vsel %vm6171_vm5, %v6156_v22, %v6046_v33  ;;  %v5075_v33 = vcombine.low %v17478_v1, %v17487_v11  ;;  %v20621_v11 = vld [vmem:[#allocation84_spill] sm:$0xff] }
 0x9d5   : > { %v5279_v49 = vcombine.low %v20622_v4, %v20621_v11 }
 0x9d6   : > { %6071 = vrot.lane.b32.xlu0 %v5893_v55, %s20256_s6  ;;  %s20651_s6 = smov 120  }
 0x9d7   : > { %v6108_v13 = vpop.permute.xlu0 %6107 }
 0x9d8   : > { %v6189_v35 = vsel %vm6188_vm6, %v6172_v2, %v6108_v13 }
 0x9d9   : > { %13712 = vmatprep.mubr.msk.f32.mxu0 %vm1084_vm2, %v6189_v35 }
 0x9da   : > { %6135 = vrot.lane.b32.xlu0 %v5894_v25, %s20252_s7  ;;  %s20652_s7 = smov 104  }
 0x9db   : > { %v6110_v23 = vpop.permute.xlu0 %6109 }
 0x9dc   : > { %v6190_v58 = vsel %vm6188_vm6, %v6173_v29, %v6110_v23 }
 0x9dd   : > { %13713 = vmatmul.mubr.msk.f32.vlgmr.msra.gmra.mxu0 %vm1084_vm2, %v6190_v58 }
 0x9df   : > { %v6050_v62 = vpop.permute.xlu1 %6049 }
 0x9e3   : > { %v6114_v57 = vpop.permute.xlu1 %6113 }
 0x9e8   : > { %v5984_v5 = vpop.permute.xlu0 %5983 }
 0x9e9   : > { %v5990_v40 = vpop.permute.xlu1 %5989  ;;  %v6157_v28 = vsel %vm1710_vm3, %v5075_v33, %v5984_v5 }
 0x9ea   : > { %v6160_v22 = vsel %vm1710_vm3, %v5279_v49, %v5990_v40 }
 0x9ec   : > { %v5986_v39 = vpop.permute.xlu0 %5985 }
 0x9ed   : > { %v6158_v10 = vsel %vm1710_vm3, %v5143_v46, %v5986_v39 }
 0x9ee   : > { %v6054_v53 = vpop.permute.xlu1 %6053  ;;  %v6175_v38 = vsel %vm6171_vm5, %v6158_v10, %v6050_v62 }
 0x9ef   : > { %v6192_v15 = vsel %vm6188_vm6, %v6175_v38, %v6114_v57  ;;  %v6177_v58 = vsel %vm6171_vm5, %v6160_v22, %v6054_v53 }
 0x9f2   : > { %v6048_v55 = vpop.permute.xlu0 %6047  ;;  %v6118_v2 = vpop.permute.xlu1 %6117 }
 0x9f3   : > { %v6174_v59 = vsel %vm6171_vm5, %v6157_v28, %v6048_v55  ;;  %v6194_v5 = vsel %vm6188_vm6, %v6177_v58, %v6118_v2 }
 0x9f6   : > { %v6112_v25 = vpop.permute.xlu0 %6111 }
 0x9f7   : > { %v6191_v3 = vsel %vm6188_vm6, %v6174_v59, %v6112_v25 }
 0x9f8   : > { %13715 = vmatprep.mubr.msk.f32.mxu0 %vm1084_vm2, %v6191_v3 }
 0x9f9   : > { %13716 = vmatmul.mubr.msk.f32.gmra.mxu0 %vm1084_vm2, %v6192_v15 }
 0x9fc   : > { %v5994_v17 = vpop.permute.xlu1 %5993 }
 0x9fd   : > { %v6162_v53 = vsel %vm1710_vm3, %v5415_v42, %v5994_v17 }
 0xa01   : > { %v5988_v13 = vpop.permute.xlu0 %5987  ;;  %v6058_v32 = vpop.permute.xlu1 %6057 }
 0xa02   : > { %v6159_v35 = vsel %vm1710_vm3, %v5211_v51, %v5988_v13  ;;  %v6179_v33 = vsel %vm6171_vm5, %v6162_v53, %v6058_v32 }
 0xa05   : > { %v6052_v1 = vpop.permute.xlu0 %6051  ;;  %v6122_v62 = vpop.permute.xlu1 %6121 }
 0xa06   : > { %v6176_v29 = vsel %vm6171_vm5, %v6159_v35, %v6052_v1  ;;  %v6196_v38 = vsel %vm6188_vm6, %v6179_v33, %v6122_v62 }
 0xa09   : > { %v6116_v23 = vpop.permute.xlu0 %6115 }
 0xa0a   : > { %v6193_v57 = vsel %vm6188_vm6, %v6176_v29, %v6116_v23 }
 0xa0b   : > { %13718 = vmatprep.mubr.msk.f32.mxu0 %vm1084_vm2, %v6193_v57 }
 0xa0c   : > { %13719 = vmatmul.mubr.msk.f32.gmra.mxu0 %vm1084_vm2, %v6194_v5 }
 0xa0f   : > { %v5998_v39 = vpop.permute.xlu1 %5997 }
 0xa10   : > { %v6164_v42 = vsel %vm1710_vm3, %v5551_v41, %v5998_v39 }
 0xa13   : > { %v5992_v0 = vpop.permute.xlu0 %5991 }
 0xa14   : > { %v6062_v31 = vpop.permute.xlu1 %6061  ;;  %v6161_v40 = vsel %vm1710_vm3, %v5347_v26, %v5992_v0 }
 0xa15   : > { %v6181_v3 = vsel %vm6171_vm5, %v6164_v42, %v6062_v31  ;;  %v20625_v31 = vld [vmem:[#allocation15_spill] sm:$0xff] }
 0xa17   : > { %v6056_v51 = vpop.permute.xlu0 %6055 }
 0xa18   : > { %v6126_v46 = vpop.permute.xlu1 %6125  ;;  %v6178_v10 = vsel %vm6171_vm5, %v6161_v40, %v6056_v51  ;;  %v20626_v40 = vld [vmem:[#allocation14_spill] sm:$0xff] }
 0xa19   : > { %v6198_v17 = vsel %vm6188_vm6, %v6181_v3, %v6126_v46 }
 0xa1b   : > { %v6120_v55 = vpop.permute.xlu0 %6119 }
 0xa1c   : > { %v6195_v28 = vsel %vm6188_vm6, %v6178_v10, %v6120_v55 }
 0xa1d   : > { %v6002_v59 = vpop.permute.xlu1 %6001  ;;  %13721 = vmatprep.mubr.msk.f32.mxu0 %vm1084_vm2, %v6195_v28 }
 0xa1e   : > { %13722 = vmatmul.mubr.msk.f32.gmra.mxu0 %vm1084_vm2, %v6196_v38  ;;  %v6166_v41 = vsel %vm1710_vm3, %v5687_v24, %v6002_v59 }
 0xa1f   : > { %v5996_v56 = vpop.permute.xlu0 %5995 }
 0xa20   : > { %v6163_v6 = vsel %vm1710_vm3, %v5483_v54, %v5996_v56  ;;  %v20627_v56 = vld [vmem:[#allocation17_spill] sm:$0xff] }
 0xa22   : > { %v6066_v48 = vpop.permute.xlu1 %6065 }
 0xa23   : > { %v6060_v26 = vpop.permute.xlu0 %6059  ;;  %v6183_v1 = vsel %vm6171_vm5, %v6166_v41, %v6066_v48 }
 0xa24   : > { %v6180_v25 = vsel %vm6171_vm5, %v6163_v6, %v6060_v26  ;;  %v20628_v26 = vld [vmem:[#allocation16_spill] sm:$0xff] }
 0xa26   : > { %v6130_v30 = vpop.permute.xlu1 %6129 }
 0xa27   : > { %v6124_v2 = vpop.permute.xlu0 %6123  ;;  %v6200_v4 = vsel %vm6188_vm6, %v6183_v1, %v6130_v30  ;;  %v20631_v1 = vld [vmem:[#allocation20_spill] sm:$0xff] }
 0xa28   : > { %v6197_v15 = vsel %vm6188_vm6, %v6180_v25, %v6124_v2 }
 0xa29   : > { %13724 = vmatprep.mubr.msk.f32.mxu0 %vm1084_vm2, %v6197_v15  ;;  %v20629_v15 = vld [vmem:[#allocation18_spill] sm:$0xff] }
 0xa2a   : > { %13725 = vmatmul.mubr.msk.f32.gmra.mxu0 %vm1084_vm2, %v6198_v17  ;;  %v6006_v47 = vpop.permute.xlu1 %6005 }
 0xa2b   : > { %v6168_v27 = vsel %vm1710_vm3, %v5823_v12, %v6006_v47  ;;  %v20630_v47 = vld [vmem:[#allocation19_spill] sm:$0xff] }
 0xa2c   : > { %v6000_v19 = vpop.permute.xlu0 %5999 }
 0xa2d   : > { %v6165_v37 = vsel %vm1710_vm3, %v5619_v8, %v6000_v19 }
 0xa2e   : > { %v6070_v20 = vpop.permute.xlu1 %6069 }
 0xa2f   : > { %v6185_v22 = vsel %vm6171_vm5, %v6168_v27, %v6070_v20 }
 0xa30   : > { %v6064_v54 = vpop.permute.xlu0 %6063 }
 0xa31   : > { %v6182_v13 = vsel %vm6171_vm5, %v6165_v37, %v6064_v54 }
 0xa32   : > { %v6134_v21 = vpop.permute.xlu1 %6133 }
 0xa33   : > { %v6202_v23 = vsel %vm6188_vm6, %v6185_v22, %v6134_v21 }
 0xa34   : > { %v6128_v32 = vpop.permute.xlu0 %6127 }
 0xa35   : > { %v6199_v11 = vsel %vm6188_vm6, %v6182_v13, %v6128_v32 }
 0xa36   : > { %13727 = vmatprep.mubr.msk.f32.mxu0 %vm1084_vm2, %v6199_v11  ;;  %v6010_v49 = vpop.permute.xlu1 %6009 }
 0xa37   : > { %13728 = vmatmul.mubr.msk.f32.gmra.mxu0 %vm1084_vm2, %v6200_v4  ;;  %v6170_v36 = vsel %vm1710_vm3, %v5959_v43, %v6010_v49 }
 0xa38   : > { %v6004_v45 = vpop.permute.xlu0 %6003 }
 0xa39   : > { %v6167_v9 = vsel %vm1710_vm3, %v5755_v61, %v6004_v45  ;;  %v20632_v45 = vld [vmem:[#allocation21_spill] sm:$0xff] }
 0xa3a   : > { %v6074_v14 = vpop.permute.xlu1 %6073 }
 0xa3b   : > { %v6187_v57 = vsel %vm6171_vm5, %v6170_v36, %v6074_v14 }
 0xa3c   : > { %v6068_v8 = vpop.permute.xlu0 %6067 }
 0xa3d   : > { %v6184_v24 = vsel %vm6171_vm5, %v6167_v9, %v6068_v8 }
 0xa3e   : > { %v6138_v58 = vpop.permute.xlu1 %6137 }
 0xa3f   : > { %v6204_v39 = vsel %vm6188_vm6, %v6187_v57, %v6138_v58 }
 0xa40   : > { %v6132_v35 = vpop.permute.xlu0 %6131 }
 0xa41   : > { %v6201_v29 = vsel %vm6188_vm6, %v6184_v24, %v6132_v35  ;;  %v20633_v35 = vld [vmem:[#allocation22_spill] sm:$0xff] }
 0xa42   : > { %13730 = vmatprep.mubr.msk.f32.mxu0 %vm1084_vm2, %v6201_v29 }
 0xa43   : > { %13731 = vmatmul.mubr.msk.f32.gmra.mxu0 %vm1084_vm2, %v6202_v23  ;;  %v20634_v23 = vld [vmem:[#allocation23_spill] sm:$0xff] }
 0xa44   : > { %v6008_v34 = vpop.permute.xlu0 %6007 }
 0xa45   : > { %v6169_v18 = vsel %vm1710_vm3, %v5891_v44, %v6008_v34 }
 0xa48   : > { %v6072_v61 = vpop.permute.xlu0 %6071 }
 0xa49   : > { %v6186_v12 = vsel %vm6171_vm5, %v6169_v18, %v6072_v61 }
 0xa4c   : > { %v6136_v62 = vpop.permute.xlu0 %6135 }
 0xa4d   : > { %v6203_v5 = vsel %vm6188_vm6, %v6186_v12, %v6136_v62  ;;  %v20635_v12 = vld [vmem:[#allocation24_spill] sm:$0xff] }
 0xa4e   : > { %13733 = vmatprep.mubr.msk.f32.mxu0 %vm1084_vm2, %v6203_v5  ;;  %v20636_v5 = vld [vmem:[#allocation25_spill] sm:$0xff] }
 0xa4f   : > { %13734 = vmatmul.mubr.msk.f32.gmra.mxu0 %vm1084_vm2, %v6204_v39 }
 0xa9d   : > { %v13714_v43 = vpop.f32.mrf.mxu0 }
 0xa9e   : > { %v6329_v44 = vadd.f32 %v13714_v43, %v18183_v60 }
 0xa9f   : > { %v6323_v0 = vpop.f32.mrf.mxu0 }
 0xaa0   : > { %v18187_v51 = vadd.f32 %v6329_v44, %v20625_v31  ;;  %v6324_v46 = vadd.f32 %v6323_v0, %v18183_v60 }
 0xaa2   : > { %v18191_v53 = vadd.f32 %v6324_v46, %v20626_v40  ;;  %v6421_v10 = vsel %vm1084_vm2, %v18187_v51, 0.0  ;;  %v20637_v40 = vld [vmem:[#allocation26_spill] sm:$0xff] }
 0xaa3   : > { %6422 = vadd.xlane.f32.xlu1 %v6421_v10 }
 0xaa4   : > { %v6418_v55 = vsel %vm1084_vm2, %v18191_v53, 0.0 }
 0xaa5   : > { %6419 = vadd.xlane.f32.xlu0 %v6418_v55 }
 0xab9   : > { %v13717_v33 = vpop.f32.mrf.mxu0 }
 0xaba   : > { %v6339_v38 = vadd.f32 %v13717_v33, %v18183_v60  ;;  %v20638_v33 = vld [vmem:[#allocation27_spill] sm:$0xff] }
 0xabb   : > { %v6333_v28 = vpop.f32.mrf.mxu0 }
 0xabc   : > { %v6334_v59 = vadd.f32 %v6333_v28, %v18183_v60  ;;  %v18203_v6 = vadd.f32 %v6339_v38, %v20628_v26 }
 0xabe   : > { %v18200_v48 = vadd.f32 %v6334_v59, %v20627_v56  ;;  %v6427_v42 = vsel %vm1084_vm2, %v18203_v6, 0.0 }
 0xac0   : > { %v6424_v30 = vsel %vm1084_vm2, %v18200_v48, 0.0 }
 0xac1   : > { %6425 = vadd.xlane.f32.xlu0 %v6424_v30 }
 0xac5   : > { %6428 = vadd.xlane.f32.xlu0 %v6427_v42  ;;  %v20639_v42 = vld [vmem:[#allocation28_spill] sm:$0xff] }
 0xacc   : > { %v13720_v25 = vpop.f32.mrf.mxu0 }
 0xacd   : > { %v6349_v2 = vadd.f32 %v13720_v25, %v18183_v60 }
 0xace   : > { %v6343_v3 = vpop.f32.mrf.mxu0 }
 0xacf   : > { %v18211_v17 = vadd.f32 %v6349_v2, %v20629_v15  ;;  %v6344_v19 = vadd.f32 %v6343_v3, %v18183_v60  ;;  %v20640_v3 = vld [vmem:[#allocation29_spill] sm:$0xff] }
 0xad1   : > { %v18215_v54 = vadd.f32 %v6344_v19, %v20630_v47  ;;  %v6433_v37 = vsel %vm1084_vm2, %v18211_v17, 0.0 }
 0xad2   : > { %6434 = vadd.xlane.f32.xlu0 %v6433_v37 }
 0xad3   : > { %v6430_v20 = vsel %vm1084_vm2, %v18215_v54, 0.0 }
 0xad4   : > { %6431 = vadd.xlane.f32.xlu1 %v6430_v20 }
 0xade   : > { %v13723_v41 = vpop.f32.mrf.mxu0 }
 0xadf   : > { %v6359_v13 = vadd.f32 %v13723_v41, %v18183_v60 }
 0xae0   : > { %v6353_v32 = vpop.f32.mrf.mxu0 }
 0xae1   : > { %v18223_v11 = vadd.f32 %v6359_v13, %v20631_v1  ;;  %v6354_v4 = vadd.f32 %v6353_v32, %v18183_v60 }
 0xae3   : > { %v18227_v21 = vadd.f32 %v6354_v4, %v20632_v45  ;;  %v6439_v8 = vsel %vm1084_vm2, %v18223_v11, 0.0 }
 0xae4   : > { %6440 = vadd.xlane.f32.xlu0 %v6439_v8 }
 0xae5   : > { %v6436_v49 = vsel %vm1084_vm2, %v18227_v21, 0.0 }
 0xae6   : > { %6437 = vadd.xlane.f32.xlu1 %v6436_v49 }
 0xaea   : > { %v13726_v9 = vpop.f32.mrf.mxu0 }
 0xaeb   : > { %v6369_v27 = vadd.f32 %v13726_v9, %v18183_v60 }
 0xaec   : > { %v6363_v24 = vpop.f32.mrf.mxu0 }
 0xaed   : > { %v18235_v22 = vadd.f32 %v6369_v27, %v20633_v35  ;;  %v6364_v29 = vadd.f32 %v6363_v24, %v18183_v60 }
 0xaef   : > { %v18239_v34 = vadd.f32 %v6364_v29, %v20634_v23  ;;  %v6445_v14 = vsel %vm1084_vm2, %v18235_v22, 0.0 }
 0xaf0   : > { %6446 = vadd.xlane.f32.xlu0 %v6445_v14 }
 0xaf1   : > { %v6442_v61 = vsel %vm1084_vm2, %v18239_v34, 0.0 }
 0xaf2   : > { %6443 = vadd.xlane.f32.xlu1 %v6442_v61 }
 0xaf7   : > { %v13729_v58 = vpop.f32.mrf.mxu0 }
 0xaf8   : > { %v6379_v18 = vadd.f32 %v13729_v58, %v18183_v60 }
 0xaf9   : > { %v6373_v36 = vpop.f32.mrf.mxu0 }
 0xafa   : > { %v18247_v62 = vadd.f32 %v6379_v18, %v20635_v12  ;;  %v6374_v57 = vadd.f32 %v6373_v36, %v18183_v60 }
 0xafc   : > { %v18251_v39 = vadd.f32 %v6374_v57, %v20636_v5  ;;  %v6451_v43 = vsel %vm1084_vm2, %v18247_v62, 0.0  ;;  %v1070_v57 = vld [vmem:[%s20641_s5 + $0x18] sm:$0xff]  ;;  %v1069_v5 = vld [vmem:[%s20641_s5 + $0x10] sm:$0xff] }
 0xafd   : > { %6452 = vadd.xlane.f32.xlu0 %v6451_v43  ;;  %13736 = vmatprep.subr.mxu1 %v1070_v57 }
 0xafe   : > { %v6448_v44 = vsel %vm1084_vm2, %v18251_v39, 0.0  ;;  %13737 = vmatpush3.msra.mxu1 %v1070_v57 }
 0xaff   : > { %6449 = vadd.xlane.f32.xlu1 %v6448_v44  ;;  %13738 = vmatprep.subr.mxu1 %v1069_v5  ;;  %v1068_v44 = vld [vmem:[%s20641_s5 + $0x8] sm:$0xff] }
 0xb00   : > { %13739 = vmatpush3.msra.mxu1 %v1069_v5 }
 0xb01   : > { %13740 = vmatprep.subr.mxu1 %v1068_v44 }
 0xb02   : > { %13741 = vmatpush3.msra.mxu1 %v1068_v44 }
 0xb03   : > { %v13732_v0 = vpop.f32.mrf.mxu0 }
 0xb04   : > { %v6389_v31 = vadd.f32 %v13732_v0, %v18183_v60  ;;  %v1067_v0 = vld [vmem:[%s20641_s5] sm:$0xff]  ;;  %s20654_s5 = smov 64  }
 0xb05   : > { %v6383_v46 = vpop.f32.mrf.mxu0  ;;  %13742 = vmatprep.subr.mxu1 %v1067_v0 }
 0xb06   : > { %v18259_v10 = vadd.f32 %v6389_v31, %v20637_v40  ;;  %v6384_v55 = vadd.f32 %v6383_v46, %v18183_v60  ;;  %13743 = vmatpush3.msra.mxu1 %v1067_v0  ;;  %v20642_v31 = vmov 0.0  }
 0xb07   : > { %13808 = vmatprep.subr.mxu1 %v20642_v31 }
 0xb08   : > { %v18263_v28 = vadd.f32 %v6384_v55, %v20638_v33  ;;  %v6457_v38 = vsel %vm1084_vm2, %v18259_v10, 0.0 }
 0xb09   : > { %6458 = vadd.xlane.f32.xlu0 %v6457_v38 }
 0xb0a   : > { %v6454_v59 = vsel %vm1084_vm2, %v18263_v28, 0.0 }
 0xb0b   : > { %6455 = vadd.xlane.f32.xlu1 %v6454_v59 }
 0xb0f   : > { %v13735_v56 = vpop.f32.mrf.mxu0 }
 0xb10   : > { %v6399_v26 = vadd.f32 %v13735_v56, %v18183_v60 }
 0xb11   : > { %v6393_v30 = vpop.f32.mrf.mxu0 }
 0xb12   : > { %v18271_v25 = vadd.f32 %v6399_v26, %v20639_v42  ;;  %v6394_v2 = vadd.f32 %v6393_v30, %v18183_v60 }
 0xb14   : > { %v18275_v15 = vadd.f32 %v6394_v2, %v20640_v3  ;;  %v6463_v19 = vsel %vm1084_vm2, %v18271_v25, 0.0 }
 0xb15   : > { %6464 = vadd.xlane.f32.xlu0 %v6463_v19 }
 0xb16   : > { %v6460_v47 = vsel %vm1084_vm2, %v18275_v15, 0.0 }
 0xb17   : > { %6461 = vadd.xlane.f32.xlu1 %v6460_v47 }
 0xb2c   : > { %v6423_v37 = vpop.xlane.xlu1 %6422 }
 0xb2d   : > { %v6468_v20 = vmul.f32 0.03125, %v6423_v37 }
 0xb2e   : > { %v6420_v41 = vpop.xlane.xlu0 %6419 }
 0xb2f   : > { %v18282_v13 = vsub.f32 %v18187_v51, %v6468_v20  ;;  %v6467_v32 = vmul.f32 0.03125, %v6420_v41 }
 0xb31   : > { %v18285_v60 = vsub.f32 %v18191_v53, %v6467_v32  ;;  %v6500_v1 = vmul.f32 %v18282_v13, %v18282_v13 }
 0xb33   : > { %v6518_v4 = vsel %vm1084_vm2, %v6500_v1, 0.0  ;;  %v6499_v45 = vmul.f32 %v18285_v60, %v18285_v60 }
 0xb34   : > { %6519 = vadd.xlane.f32.xlu0 %v6518_v4 }
 0xb35   : > { %v6515_v8 = vsel %vm1084_vm2, %v6499_v45, 0.0 }
 0xb36   : > { %6516 = vadd.xlane.f32.xlu1 %v6515_v8 }
 0xb4a   : > { %v6426_v49 = vpop.xlane.xlu0 %6425 }
 0xb4b   : > { %v6469_v9 = vmul.f32 0.03125, %v6426_v49 }
 0xb4d   : > { %v18294_v51 = vsub.f32 %v18200_v48, %v6469_v9 }
 0xb4e   : > { %v6429_v27 = vpop.xlane.xlu0 %6428 }
 0xb4f   : > { %v6470_v53 = vmul.f32 0.03125, %v6429_v27  ;;  %v6501_v24 = vmul.f32 %v18294_v51, %v18294_v51 }
 0xb51   : > { %v18299_v35 = vsub.f32 %v18203_v6, %v6470_v53  ;;  %v6521_v29 = vsel %vm1084_vm2, %v6501_v24, 0.0 }
 0xb52   : > { %6522 = vadd.xlane.f32.xlu1 %v6521_v29 }
 0xb53   : > { %v6502_v23 = vmul.f32 %v18299_v35, %v18299_v35 }
 0xb55   : > { %v6524_v14 = vsel %vm1084_vm2, %v6502_v23, 0.0 }
 0xb56   : > { %6525 = vadd.xlane.f32.xlu0 %v6524_v14 }
 0xb5b   : > { %v6435_v61 = vpop.xlane.xlu0 %6434 }
 0xb5c   : > { %v6472_v48 = vmul.f32 0.03125, %v6435_v61 }
 0xb5d   : > { %v6432_v58 = vpop.xlane.xlu1 %6431 }
 0xb5e   : > { %v18306_v18 = vsub.f32 %v18211_v17, %v6472_v48  ;;  %v6471_v36 = vmul.f32 0.03125, %v6432_v58 }
 0xb60   : > { %v18309_v12 = vsub.f32 %v18215_v54, %v6471_v36  ;;  %v6504_v6 = vmul.f32 %v18306_v18, %v18306_v18 }
 0xb62   : > { %v6530_v43 = vsel %vm1084_vm2, %v6504_v6, 0.0  ;;  %v6503_v17 = vmul.f32 %v18309_v12, %v18309_v12 }
 0xb63   : > { %6531 = vadd.xlane.f32.xlu0 %v6530_v43 }
 0xb64   : > { %v6527_v54 = vsel %vm1084_vm2, %v6503_v17, 0.0 }
 0xb65   : > { %6528 = vadd.xlane.f32.xlu1 %v6527_v54 }
 0xb6d   : > { %v6441_v46 = vpop.xlane.xlu0 %6440 }
 0xb6e   : > { %v6474_v40 = vmul.f32 0.03125, %v6441_v46 }
 0xb6f   : > { %v6438_v55 = vpop.xlane.xlu1 %6437 }
 0xb70   : > { %v18331_v33 = vsub.f32 %v18223_v11, %v6474_v40  ;;  %v6473_v38 = vmul.f32 0.03125, %v6438_v55 }
 0xb72   : > { %v18334_v59 = vsub.f32 %v18227_v21, %v6473_v38  ;;  %v6506_v56 = vmul.f32 %v18331_v33, %v18331_v33 }
 0xb74   : > { %v6536_v26 = vsel %vm1084_vm2, %v6506_v56, 0.0  ;;  %v6505_v30 = vmul.f32 %v18334_v59, %v18334_v59  ;;  %v18391_v56 = vsub.s32 2, %v20623_v63 }
 0xb75   : > { %6537 = vadd.xlane.f32.xlu0 %v6536_v26  ;;  %v1078_v26 = vld [vmem:[%s20644_s0 + $0x38] sm:$0xff] }
 0xb76   : > { %v6533_v42 = vsel %vm1084_vm2, %v6505_v30, 0.0  ;;  %20643 = vst [vmem:[#allocation92_spill] sm:$0xff] %v18391_v56  ;;  %v1077_v30 = vld [vmem:[%s20644_s0 + $0x30] sm:$0xff]  ;;  %13768 = vmatprep.subr.mxu0 %v1078_v26 }
 0xb77   : > { %6534 = vadd.xlane.f32.xlu1 %v6533_v42  ;;  %13769 = vmatpush3.msra.mxu0 %v1078_v26 }
 0xb78   : > { %13770 = vmatprep.subr.mxu0 %v1077_v30 }
 0xb79   : > { %v6447_v2 = vpop.xlane.xlu0 %6446  ;;  %13771 = vmatpush3.msra.mxu0 %v1077_v30 }
 0xb7a   : > { %v6476_v3 = vmul.f32 0.03125, %v6447_v2  ;;  %v18401_v2 = vrot.slane %v18179_v50, %v18391_v56 }
 0xb7b   : > { %v6444_v11 = vpop.xlane.xlu1 %6443 }
 0xb7c   : > { %v18343_v19 = vsub.f32 %v18235_v22, %v6476_v3  ;;  %v6475_v21 = vmul.f32 0.03125, %v6444_v11  ;;  %v18404_v3 = vsub.s32 3, %v20623_v63 }
 0xb7e   : > { %v18346_v47 = vsub.f32 %v18239_v34, %v6475_v21  ;;  %v6508_v37 = vmul.f32 %v18343_v19, %v18343_v19  ;;  %20645 = vst [vmem:[#allocation45_spill] sm:$0xff] %v18404_v3  ;;  %v1076_v21 = vld [vmem:[%s20644_s0 + $0x28] sm:$0xff] }
 0xb7f   : > { %13772 = vmatprep.subr.mxu0 %v1076_v21 }
 0xb80   : > { %v6542_v20 = vsel %vm1084_vm2, %v6508_v37, 0.0  ;;  %v6507_v41 = vmul.f32 %v18346_v47, %v18346_v47  ;;  %13773 = vmatpush3.msra.mxu0 %v1076_v21 }
 0xb81   : > { %6543 = vadd.xlane.f32.xlu0 %v6542_v20 }
 0xb82   : > { %v6539_v32 = vsel %vm1084_vm2, %v6507_v41, 0.0  ;;  %v1075_v41 = vld [vmem:[%s20644_s0 + $0x20] sm:$0xff] }
 0xb83   : > { %6540 = vadd.xlane.f32.xlu1 %v6539_v32  ;;  %v18416_v32 = vrot.slane %v18179_v50, %v18404_v3  ;;  %13774 = vmatprep.subr.mxu0 %v1075_v41 }
 0xb84   : > { %13775 = vmatpush3.msra.mxu0 %v1075_v41 }
 0xb86   : > { %v6453_v1 = vpop.xlane.xlu0 %6452 }
 0xb87   : > { %v6478_v4 = vmul.f32 0.03125, %v6453_v1 }
 0xb88   : > { %v6450_v22 = vpop.xlane.xlu1 %6449 }
 0xb89   : > { %v18355_v45 = vsub.f32 %v18247_v62, %v6478_v4  ;;  %v6477_v34 = vmul.f32 0.03125, %v6450_v22  ;;  %v7346_v22 = vld [vmem:[%s20646_s2 + $0x18] sm:$0xff] }
 0xb8b   : > { %v18358_v8 = vsub.f32 %v18251_v39, %v6477_v34  ;;  %v6510_v49 = vmul.f32 %v18355_v45, %v18355_v45  ;;  %v7345_v34 = vld [vmem:[%s20646_s2 + $0x10] sm:$0xff] }
 0xb8d   : > { %v6548_v9 = vsel %vm1084_vm2, %v6510_v49, 0.0  ;;  %v6509_v27 = vmul.f32 %v18358_v8, %v18358_v8  ;;  %v7344_v49 = vld [vmem:[%s20646_s2 + $0x8] sm:$0xff] }
 0xb8e   : > { %6549 = vadd.xlane.f32.xlu0 %v6548_v9 }
 0xb8f   : > { %v6545_v53 = vsel %vm1084_vm2, %v6509_v27, 0.0  ;;  %v7343_v27 = vld [vmem:[%s20646_s2] sm:$0xff]  ;;  %s20655_s2 = sld [smem:[#allocation122_spill]] }
 0xb90   : > { %6546 = vadd.xlane.f32.xlu1 %v6545_v53 }
 0xb92   : > { %v6459_v24 = vpop.xlane.xlu0 %6458 }
 0xb93   : > { %v6480_v29 = vmul.f32 0.03125, %v6459_v24 }
 0xb94   : > { %v6456_v62 = vpop.xlane.xlu1 %6455 }
 0xb95   : > { %v18367_v23 = vsub.f32 %v18259_v10, %v6480_v29  ;;  %v6479_v39 = vmul.f32 0.03125, %v6456_v62 }
 0xb97   : > { %v18370_v14 = vsub.f32 %v18263_v28, %v6479_v39  ;;  %v6512_v61 = vmul.f32 %v18367_v23, %v18367_v23 }
 0xb99   : > { %v6554_v48 = vsel %vm1084_vm2, %v6512_v61, 0.0  ;;  %v6511_v58 = vmul.f32 %v18370_v14, %v18370_v14 }
 0xb9a   : > { %6555 = vadd.xlane.f32.xlu0 %v6554_v48 }
 0xb9b   : > { %v6551_v36 = vsel %vm1084_vm2, %v6511_v58, 0.0 }
 0xb9c   : > { %6552 = vadd.xlane.f32.xlu1 %v6551_v36 }
 0xb9e   : > { %v6465_v6 = vpop.xlane.xlu0 %6464 }
 0xb9f   : > { %v6482_v57 = vmul.f32 0.03125, %v6465_v6 }
 0xba0   : > { %v6462_v10 = vpop.xlane.xlu1 %6461 }
 0xba1   : > { %v18379_v5 = vsub.f32 %v18271_v25, %v6482_v57  ;;  %v6481_v28 = vmul.f32 0.03125, %v6462_v10 }
 0xba3   : > { %v18382_v43 = vsub.f32 %v18275_v15, %v6481_v28  ;;  %v6514_v17 = vmul.f32 %v18379_v5, %v18379_v5 }
 0xba5   : > { %v6560_v54 = vsel %vm1084_vm2, %v6514_v17, 0.0  ;;  %v6513_v44 = vmul.f32 %v18382_v43, %v18382_v43 }
 0xba6   : > { %6561 = vadd.xlane.f32.xlu0 %v6560_v54 }
 0xba7   : > { %v6557_v0 = vsel %vm1084_vm2, %v6513_v44, 0.0 }
 0xba8   : > { %6558 = vadd.xlane.f32.xlu1 %v6557_v0 }
 0xbbd   : > { %v6520_v46 = vpop.xlane.xlu0 %6519 }
 0xbbe   : > { %v6564_v40 = vmul.f32 0.03125, %v6520_v46 }
 0xbbf   : > { %v6517_v25 = vpop.xlane.xlu1 %6516 }
 0xbc0   : > { %v6580_v55 = vadd.f32 1e-05, %v6564_v40  ;;  %v6563_v38 = vmul.f32 0.03125, %v6517_v25 }
 0xbc2   : > { %14918 = vrsqrt.f32 %v6580_v55  ;;  %v6579_v15 = vadd.f32 1e-05, %v6563_v38 }
 0xbc4   : > { %14920 = vrsqrt.f32 %v6579_v15 }
 0xbcf   : > { %v14919_v42 = vpop.eup %14918 }
 0xbd0   : > { %v6612_v11 = vmul.f32 %v14919_v42, %v18282_v13 }
 0xbd1   : > { %v14921_v37 = vpop.eup %14920 }
 0xbd2   : > { %v6611_v20 = vmul.f32 %v14921_v37, %v18285_v60  ;;  %v6632_v13 = vmul.f32 %v18401_v2, %v6612_v11 }
 0xbd4   : > { %v6631_v1 = vmul.f32 %v18401_v2, %v6611_v20  ;;  %v18424_v60 = vadd.f32 %v18416_v32, %v6632_v13 }
 0xbd6   : > { %v18421_v4 = vadd.f32 %v18416_v32, %v6631_v1 }
 0xbd8   : > { %13744 = vmatprep.mubr.msk.f32.mxu1 %vm1084_vm2, %v18421_v4 }
 0xbd9   : > { %13745 = vmatmul.mubr.msk.f32.vlgmr.msra.gmra.mxu1 %vm1084_vm2, %v18424_v60 }
 0xbda   : > { %13809 = vmatpush3.msra.mxu1 %v7346_v22 }
 0xbdb   : > { %13810 = vmatprep.subr.mxu1 %v20642_v31  ;;  %v6523_v9 = vpop.xlane.xlu1 %6522 }
 0xbdc   : > { %13811 = vmatpush3.msra.mxu1 %v7345_v34  ;;  %v6565_v53 = vmul.f32 0.03125, %v6523_v9 }
 0xbdd   : > { %13812 = vmatprep.subr.mxu1 %v20642_v31 }
 0xbde   : > { %13813 = vmatpush3.msra.mxu1 %v7344_v49  ;;  %v6581_v24 = vadd.f32 1e-05, %v6565_v53 }
 0xbdf   : > { %13814 = vmatprep.subr.mxu1 %v20642_v31  ;;  %v6526_v29 = vpop.xlane.xlu0 %6525 }
 0xbe0   : > { %13815 = vmatpush3.msra.mxu1 %v7343_v27  ;;  %14922 = vrsqrt.f32 %v6581_v24  ;;  %v6566_v62 = vmul.f32 0.03125, %v6526_v29 }
 0xbe1   : > { %13819 = vmatprep.subr.mxu1 %v20642_v31 }
 0xbe2   : > { %v6582_v39 = vadd.f32 1e-05, %v6566_v62 }
 0xbe4   : > { %14924 = vrsqrt.f32 %v6582_v39 }
 0xbec   : > { %v6532_v61 = vpop.xlane.xlu0 %6531 }
 0xbed   : > { %v6568_v48 = vmul.f32 0.03125, %v6532_v61  ;;  %v14923_v58 = vpop.eup %14922 }
 0xbee   : > { %v6529_v36 = vpop.xlane.xlu1 %6528  ;;  %v6613_v10 = vmul.f32 %v14923_v58, %v18294_v51 }
 0xbef   : > { %v6584_v6 = vadd.f32 1e-05, %v6568_v48  ;;  %v6567_v57 = vmul.f32 0.03125, %v6529_v36 }
 0xbf0   : > { %v6633_v17 = vmul.f32 %v18401_v2, %v6613_v10 }
 0xbf1   : > { %14926 = vrsqrt.f32 %v6584_v6  ;;  %v6583_v28 = vadd.f32 1e-05, %v6567_v57  ;;  %v14925_v54 = vpop.eup %14924  ;;  %v1074_v57 = vld [vmem:[%s20644_s0 + $0x18] sm:$0xff] }
 0xbf2   : > { %v18449_v44 = vadd.f32 %v18416_v32, %v6633_v17  ;;  %v6614_v0 = vmul.f32 %v14925_v54, %v18299_v35  ;;  %13776 = vmatprep.subr.mxu0 %v1074_v57  ;;  %v1073_v17 = vld [vmem:[%s20644_s0 + $0x10] sm:$0xff]  ;;  %v1072_v54 = vld [vmem:[%s20644_s0 + $0x8] sm:$0xff] }
 0xbf3   : > { %14928 = vrsqrt.f32 %v6583_v28  ;;  %13777 = vmatpush3.msra.mxu0 %v1074_v57 }
 0xbf4   : > { %13747 = vmatprep.mubr.msk.f32.mxu1 %vm1084_vm2, %v18449_v44  ;;  %v6634_v46 = vmul.f32 %v18401_v2, %v6614_v0  ;;  %13778 = vmatprep.subr.mxu0 %v1073_v17 }
 0xbf5   : > { %13779 = vmatpush3.msra.mxu0 %v1073_v17 }
 0xbf6   : > { %v18456_v40 = vadd.f32 %v18416_v32, %v6634_v46  ;;  %13780 = vmatprep.subr.mxu0 %v1072_v54 }
 0xbf7   : > { %13781 = vmatpush3.msra.mxu0 %v1072_v54 }
 0xbf8   : > { %13748 = vmatmul.mubr.msk.f32.gmra.mxu1 %vm1084_vm2, %v18456_v40 }
 0xbfe   : > { %v6538_v51 = vpop.xlane.xlu0 %6537  ;;  %v14927_v25 = vpop.eup %14926 }
 0xbff   : > { %v6570_v55 = vmul.f32 0.03125, %v6538_v51  ;;  %v6616_v15 = vmul.f32 %v14927_v25, %v18306_v18 }
 0xc00   : > { %v6535_v38 = vpop.xlane.xlu1 %6534  ;;  %v14929_v26 = vpop.eup %14928 }
 0xc01   : > { %v6586_v30 = vadd.f32 1e-05, %v6570_v55  ;;  %v6569_v35 = vmul.f32 0.03125, %v6535_v38  ;;  %v6615_v42 = vmul.f32 %v14929_v26, %v18309_v12  ;;  %v6636_v21 = vmul.f32 %v18401_v2, %v6616_v15 }
 0xc03   : > { %14930 = vrsqrt.f32 %v6586_v30  ;;  %v6585_v11 = vadd.f32 1e-05, %v6569_v35  ;;  %v6635_v37 = vmul.f32 %v18401_v2, %v6615_v42  ;;  %v18468_v41 = vadd.f32 %v18416_v32, %v6636_v21 }
 0xc05   : > { %14932 = vrsqrt.f32 %v6585_v11  ;;  %v18465_v20 = vadd.f32 %v18416_v32, %v6635_v37 }
 0xc07   : > { %13750 = vmatprep.mubr.msk.f32.mxu1 %vm1084_vm2, %v18465_v20 }
 0xc08   : > { %13751 = vmatmul.mubr.msk.f32.gmra.mxu1 %vm1084_vm2, %v18468_v41 }
 0xc0a   : > { %v6544_v18 = vpop.xlane.xlu0 %6543 }
 0xc0b   : > { %v6572_v12 = vmul.f32 0.03125, %v6544_v18 }
 0xc0c   : > { %v6541_v13 = vpop.xlane.xlu1 %6540 }
 0xc0d   : > { %v6588_v1 = vadd.f32 1e-05, %v6572_v12  ;;  %v6571_v22 = vmul.f32 0.03125, %v6541_v13 }
 0xc0f   : > { %14934 = vrsqrt.f32 %v6588_v1  ;;  %v6587_v34 = vadd.f32 1e-05, %v6571_v22 }
 0xc10   : > { %v14931_v49 = vpop.eup %14930 }
 0xc11   : > { %14936 = vrsqrt.f32 %v6587_v34  ;;  %v6618_v9 = vmul.f32 %v14931_v49, %v18331_v33 }
 0xc12   : > { %v14933_v27 = vpop.eup %14932 }
 0xc13   : > { %v6617_v53 = vmul.f32 %v14933_v27, %v18334_v59  ;;  %v6638_v24 = vmul.f32 %v18401_v2, %v6618_v9 }
 0xc15   : > { %v6637_v29 = vmul.f32 %v18401_v2, %v6617_v53  ;;  %v18482_v58 = vadd.f32 %v18416_v32, %v6638_v24 }
 0xc17   : > { %v6550_v62 = vpop.xlane.xlu0 %6549  ;;  %v18479_v61 = vadd.f32 %v18416_v32, %v6637_v29 }
 0xc18   : > { %v6574_v39 = vmul.f32 0.03125, %v6550_v62 }
 0xc19   : > { %v6547_v48 = vpop.xlane.xlu1 %6546  ;;  %13753 = vmatprep.mubr.msk.f32.mxu1 %vm1084_vm2, %v18479_v61 }
 0xc1a   : > { %v6590_v36 = vadd.f32 1e-05, %v6574_v39  ;;  %v6573_v6 = vmul.f32 0.03125, %v6547_v48  ;;  %13754 = vmatmul.mubr.msk.f32.gmra.mxu1 %vm1084_vm2, %v18482_v58 }
 0xc1c   : > { %14938 = vrsqrt.f32 %v6590_v36  ;;  %v6589_v33 = vadd.f32 1e-05, %v6573_v6  ;;  %v14935_v59 = vpop.eup %14934 }
 0xc1d   : > { %v6620_v10 = vmul.f32 %v14935_v59, %v18343_v19  ;;  %v1071_v19 = vld [vmem:[%s20644_s0] sm:$0xff]  ;;  %s20658_s0 = smov 24  }
 0xc1e   : > { %14940 = vrsqrt.f32 %v6589_v33  ;;  %v14937_v28 = vpop.eup %14936  ;;  %13782 = vmatprep.subr.mxu0 %v1071_v19 }
 0xc1f   : > { %v6619_v0 = vmul.f32 %v14937_v28, %v18346_v47  ;;  %v6640_v46 = vmul.f32 %v18401_v2, %v6620_v10  ;;  %13783 = vmatpush3.msra.mxu0 %v1071_v19 }
 0xc20   : > { %13859 = vmatprep.subr.mxu0 %v20642_v31 }
 0xc21   : > { %v6639_v51 = vmul.f32 %v18401_v2, %v6619_v0  ;;  %v18508_v47 = vadd.f32 %v18416_v32, %v6640_v46 }
 0xc23   : > { %v6556_v25 = vpop.xlane.xlu0 %6555  ;;  %v18505_v38 = vadd.f32 %v18416_v32, %v6639_v51 }
 0xc24   : > { %v6576_v55 = vmul.f32 0.03125, %v6556_v25 }
 0xc25   : > { %v6553_v15 = vpop.xlane.xlu1 %6552  ;;  %13756 = vmatprep.mubr.msk.f32.mxu1 %vm1084_vm2, %v18505_v38 }
 0xc26   : > { %v6592_v26 = vadd.f32 1e-05, %v6576_v55  ;;  %v6575_v30 = vmul.f32 0.03125, %v6553_v15  ;;  %13757 = vmatmul.mubr.msk.f32.gmra.mxu1 %vm1084_vm2, %v18508_v47 }
 0xc28   : > { %14942 = vrsqrt.f32 %v6592_v26  ;;  %v6591_v35 = vadd.f32 1e-05, %v6575_v30 }
 0xc29   : > { %v14939_v42 = vpop.eup %14938 }
 0xc2a   : > { %14944 = vrsqrt.f32 %v6591_v35  ;;  %v6622_v11 = vmul.f32 %v14939_v42, %v18355_v45 }
 0xc2b   : > { %v14941_v21 = vpop.eup %14940 }
 0xc2c   : > { %v6621_v37 = vmul.f32 %v14941_v21, %v18358_v8  ;;  %v6642_v18 = vmul.f32 %v18401_v2, %v6622_v11 }
 0xc2e   : > { %v6641_v12 = vmul.f32 %v18401_v2, %v6621_v37  ;;  %v18523_v49 = vadd.f32 %v18416_v32, %v6642_v18 }
 0xc2f   : > { %v6562_v13 = vpop.xlane.xlu0 %6561 }
 0xc30   : > { %v6578_v1 = vmul.f32 0.03125, %v6562_v13  ;;  %v18520_v22 = vadd.f32 %v18416_v32, %v6641_v12 }
 0xc31   : > { %v6559_v34 = vpop.xlane.xlu1 %6558 }
 0xc32   : > { %v6594_v9 = vadd.f32 1e-05, %v6578_v1  ;;  %v6577_v27 = vmul.f32 0.03125, %v6559_v34  ;;  %13759 = vmatprep.mubr.msk.f32.mxu1 %vm1084_vm2, %v18520_v22 }
 0xc33   : > { %13760 = vmatmul.mubr.msk.f32.gmra.mxu1 %vm1084_vm2, %v18523_v49 }
 0xc34   : > { %14946 = vrsqrt.f32 %v6594_v9  ;;  %v6593_v45 = vadd.f32 1e-05, %v6577_v27 }
 0xc35   : > { %v14943_v8 = vpop.eup %14942 }
 0xc36   : > { %14948 = vrsqrt.f32 %v6593_v45  ;;  %v6624_v53 = vmul.f32 %v14943_v8, %v18367_v23 }
 0xc37   : > { %v14945_v24 = vpop.eup %14944 }
 0xc38   : > { %v6623_v29 = vmul.f32 %v14945_v24, %v18370_v14  ;;  %v6644_v62 = vmul.f32 %v18401_v2, %v6624_v53 }
 0xc3a   : > { %v6643_v39 = vmul.f32 %v18401_v2, %v6623_v29  ;;  %v18537_v36 = vadd.f32 %v18416_v32, %v6644_v62 }
 0xc3c   : > { %v18534_v48 = vadd.f32 %v18416_v32, %v6643_v39 }
 0xc3e   : > { %13762 = vmatprep.mubr.msk.f32.mxu1 %vm1084_vm2, %v18534_v48 }
 0xc3f   : > { %13763 = vmatmul.mubr.msk.f32.gmra.mxu1 %vm1084_vm2, %v18537_v36 }
 0xc41   : > { %v14947_v23 = vpop.eup %14946 }
 0xc42   : > { %v6626_v6 = vmul.f32 %v14947_v23, %v18379_v5  ;;  %v18562_v5 = vld [vmem:[%s20647_s8] sm:$0xff]  ;;  %s20653_s8 = smov 96  }
 0xc43   : > { %v14949_v14 = vpop.eup %14948 }
 0xc44   : > { %v6625_v33 = vmul.f32 %v14949_v14, %v18382_v43  ;;  %v6646_v59 = vmul.f32 %v18401_v2, %v6626_v6  ;;  %v18569_v43 = vsub.s32 4, %v20623_v63 }
 0xc46   : > { %v6645_v57 = vmul.f32 %v18401_v2, %v6625_v33  ;;  %v18551_v28 = vadd.f32 %v18416_v32, %v6646_v59  ;;  %20648 = vst [vmem:[#allocation39_spill] sm:$0xff] %v18569_v43  ;;  %v18573_v2 = vrot.slane %v18179_v50, %v18569_v43 }
 0xc48   : > { %v18548_v10 = vadd.f32 %v18416_v32, %v6645_v57 }
 0xc4a   : > { %13765 = vmatprep.mubr.msk.f32.mxu1 %vm1084_vm2, %v18548_v10 }
 0xc4b   : > { %13766 = vmatmul.mubr.msk.f32.gmra.mxu1 %vm1084_vm2, %v18551_v28 }
 0xc4c   : > { %13816 = vmatprep.mubr.msk.f32.mxu1 %vm15112_vm4, %v20642_v31 }
 0xc4f   : > { %13817 = vmatmul.mubr.msk.f32.vlgmr.msra.gmra.mxu1 %vm1084_vm2, %v18562_v5 }
 0xc50   : > { %13821 = vmatprep.mubr.msk.f32.mxu1 %vm15112_vm4, %v20642_v31 }
 0xc99   : > { %v13746_v32 = vpop.f32.mrf.mxu1 }
 0xc9a   : > { %v6791_v17 = vadd.f32 %v13746_v32, %v18573_v2 }
 0xc9b   : > { %v6785_v54 = vpop.f32.mrf.mxu1 }
 0xc9c   : > { %v6786_v0 = vadd.f32 %v6785_v54, %v18573_v2  ;;  %v6865_v19 = vmax.f32 %v6791_v17, 0.0 }
 0xc9e   : > { %v6864_v46 = vmax.f32 %v6786_v0, 0.0 }
 0xca0   : > { %13784 = vmatprep.mubr.msk.f32.mxu0 %vm6884_vm7, %v6864_v46  ;;  %v18606_v46 = vld [vmem:[%s20082_s16] sm:$0xff] }
 0xca1   : > { %13785 = vmatmul.mubr.msk.f32.vlgmr.msra.gmra.mxu0 %vm6884_vm7, %v6865_v19 }
 0xcb8   : > { %v13749_v51 = vpop.f32.mrf.mxu1 }
 0xcb9   : > { %v6801_v25 = vadd.f32 %v13749_v51, %v18573_v2  ;;  %v20649_v51 = vld [vmem:[#allocation31_spill] sm:$0xff] }
 0xcba   : > { %v6795_v55 = vpop.f32.mrf.mxu1 }
 0xcbb   : > { %v6796_v50 = vadd.f32 %v6795_v55, %v18573_v2  ;;  %v6867_v26 = vmax.f32 %v6801_v25, 0.0  ;;  %v7380_v25 = vrot.slane %v18606_v46, %v20649_v51 }
 0xcbd   : > { %v6866_v15 = vmax.f32 %v6796_v50, 0.0 }
 0xcbf   : > { %13787 = vmatprep.mubr.msk.f32.mxu0 %vm6884_vm7, %v6866_v15 }
 0xcc0   : > { %13788 = vmatmul.mubr.msk.f32.gmra.mxu0 %vm6884_vm7, %v6867_v26 }
 0xcc8   : > { %v13752_v30 = vpop.f32.mrf.mxu1 }
 0xcc9   : > { %v6811_v35 = vadd.f32 %v13752_v30, %v18573_v2 }
 0xcca   : > { %v6805_v42 = vpop.f32.mrf.mxu1 }
 0xccb   : > { %v6806_v11 = vadd.f32 %v6805_v42, %v18573_v2  ;;  %v6869_v37 = vmax.f32 %v6811_v35, 0.0 }
 0xccd   : > { %v6868_v21 = vmax.f32 %v6806_v11, 0.0 }
 0xccf   : > { %13790 = vmatprep.mubr.msk.f32.mxu0 %vm6884_vm7, %v6868_v21 }
 0xcd0   : > { %13791 = vmatmul.mubr.msk.f32.gmra.mxu0 %vm6884_vm7, %v6869_v37 }
 0xcda   : > { %v13755_v18 = vpop.f32.mrf.mxu1 }
 0xcdb   : > { %v6821_v12 = vadd.f32 %v13755_v18, %v18573_v2 }
 0xcdc   : > { %v6815_v13 = vpop.f32.mrf.mxu1 }
 0xcdd   : > { %v6816_v1 = vadd.f32 %v6815_v13, %v18573_v2  ;;  %v6871_v9 = vmax.f32 %v6821_v12, 0.0 }
 0xcdf   : > { %v6870_v34 = vmax.f32 %v6816_v1, 0.0 }
 0xce1   : > { %13793 = vmatprep.mubr.msk.f32.mxu0 %vm6884_vm7, %v6870_v34 }
 0xce2   : > { %13794 = vmatmul.mubr.msk.f32.gmra.mxu0 %vm6884_vm7, %v6871_v9 }
 0xce6   : > { %v13758_v27 = vpop.f32.mrf.mxu1 }
 0xce7   : > { %v6831_v45 = vadd.f32 %v13758_v27, %v18573_v2 }
 0xce8   : > { %v6825_v8 = vpop.f32.mrf.mxu1 }
 0xce9   : > { %v6826_v53 = vadd.f32 %v6825_v8, %v18573_v2  ;;  %v6873_v29 = vmax.f32 %v6831_v45, 0.0 }
 0xceb   : > { %v6872_v24 = vmax.f32 %v6826_v53, 0.0 }
 0xced   : > { %13796 = vmatprep.mubr.msk.f32.mxu0 %vm6884_vm7, %v6872_v24 }
 0xcee   : > { %13797 = vmatmul.mubr.msk.f32.gmra.mxu0 %vm6884_vm7, %v6873_v29 }
 0xcf3   : > { %v13761_v62 = vpop.f32.mrf.mxu1 }
 0xcf4   : > { %v6841_v39 = vadd.f32 %v13761_v62, %v18573_v2 }
 0xcf5   : > { %v6835_v23 = vpop.f32.mrf.mxu1 }
 0xcf6   : > { %v6836_v6 = vadd.f32 %v6835_v23, %v18573_v2  ;;  %v6875_v33 = vmax.f32 %v6841_v39, 0.0 }
 0xcf8   : > { %v6874_v14 = vmax.f32 %v6836_v6, 0.0 }
 0xcfa   : > { %13799 = vmatprep.mubr.msk.f32.mxu0 %vm6884_vm7, %v6874_v14 }
 0xcfb   : > { %13800 = vmatmul.mubr.msk.f32.gmra.mxu0 %vm6884_vm7, %v6875_v33 }
 0xcff   : > { %v13764_v59 = vpop.f32.mrf.mxu1 }
 0xd00   : > { %v6851_v57 = vadd.f32 %v13764_v59, %v18573_v2 }
 0xd01   : > { %v6845_v32 = vpop.f32.mrf.mxu1 }
 0xd02   : > { %v6846_v17 = vadd.f32 %v6845_v32, %v18573_v2  ;;  %v6877_v0 = vmax.f32 %v6851_v57, 0.0 }
 0xd04   : > { %v6876_v54 = vmax.f32 %v6846_v17, 0.0 }
 0xd06   : > { %13802 = vmatprep.mubr.msk.f32.mxu0 %vm6884_vm7, %v6876_v54 }
 0xd07   : > { %13803 = vmatmul.mubr.msk.f32.gmra.mxu0 %vm6884_vm7, %v6877_v0 }
 0xd0b   : > { %v13767_v19 = vpop.f32.mrf.mxu1 }
 0xd0c   : > { %v6861_v50 = vadd.f32 %v13767_v19, %v18573_v2 }
 0xd0d   : > { %v6855_v55 = vpop.f32.mrf.mxu1 }
 0xd0e   : > { %v6856_v15 = vadd.f32 %v6855_v55, %v18573_v2  ;;  %v6879_v11 = vmax.f32 %v6861_v50, 0.0 }
 0xd0f   : > { %v7450_v26 = vpop.f32.mrf.mxu1 }
 0xd10   : > { %v6878_v30 = vmax.f32 %v6856_v15, 0.0  ;;  %v18612_v35 = vadd.f32 %v7450_v26, %v7380_v25 }
 0xd11   : > { %v13818_v42 = vpop.f32.mrf.mxu1 }
 0xd12   : > { %7457 = vrot.lane.b32.xlu0 %v18612_v35, %s20650_s3  ;;  %7455 = vrot.lane.b32.xlu1 %v18612_v35, %s20651_s6 }
 0xd13   : > { %13805 = vmatprep.mubr.msk.f32.mxu0 %vm6884_vm7, %v6878_v30 }
 0xd14   : > { %13806 = vmatmul.mubr.msk.f32.gmra.mxu0 %vm6884_vm7, %v6879_v11 }
 0xd15   : > { %13867 = vmatprep.mubr.msk.f32.mxu0 %vm15112_vm4, %v20642_v31 }
 0xd16   : > { %7459 = vrot.lane.b32.xlu1 %v18612_v35, %s20652_s7 }
 0xd1a   : > { %7461 = vrot.lane.b32.xlu1 %v18612_v35, %s20653_s8 }
 0xd84   : > { %v7458_v2 = vpop.permute.xlu0 %7457  ;;  %v7456_v21 = vpop.permute.xlu1 %7455 }
 0xd85   : > { %7465 = vrot.lane.b32.xlu1 %v7458_v2, %s20653_s8  ;;  %7463 = vrot.lane.b32.xlu0 %v7456_v21, %s20653_s8 }
 0xd88   : > { %v18628_v37 = vpop.permute.xlu1 %7459 }
 0xd89   : > { %7467 = vrot.lane.b32.xlu0 %v18628_v37, %s20653_s8 }
 0xd8c   : > { %v7462_v18 = vpop.permute.xlu1 %7461 }
 0xdae   : > { %7473 = vxpose.xlu1.b32.start.end [1/1] (short) (narrow) %v7462_v18, 8 }
 0xdf7   : > { %v7464_v12 = vpop.permute.xlu0 %7463  ;;  %v7466_v13 = vpop.permute.xlu1 %7465 }
 0xdf8   : > { %7505 = vxpose.xlu0.b32.start.end [1/1] (short) (narrow) %v7464_v12, 8 }
 0xdfb   : > { %v7468_v1 = vpop.permute.xlu0 %7467 }
 0xdfc   : > { %7537 = vxpose.xlu0.b32.start.end [1/1] (short) (narrow) %v7466_v13, 8 }
 0xe00   : > { %7569 = vxpose.xlu0.b32.start.end [1/1] (short) (narrow) %v7468_v1, 8 }
 0xe2a   : > { %v7489_v34 = vpop.trf.xlu1 }
 0xe2b   : > { %13820 = vmatpush3.msra.mxu1 %v7489_v34 }
 0xe2c   : > { %13822 = vmatmul.mubr.msk.f32.vlgmr.msra.gmra.mxu1 %vm1710_vm3, %v18612_v35  ;;  %13824 = vmatprep.subr.mxu1 %v20642_v31 }
 0xe2d   : > { %13826 = vmatprep.mubr.msk.f32.mxu1 %vm15112_vm4, %v20642_v31 }
 0xe74   : > { %v7521_v9 = vpop.trf.xlu0 }
 0xe75   : > { %13825 = vmatpush3.msra.mxu1 %v7521_v9 }
 0xe76   : > { %13827 = vmatmul.mubr.msk.f32.vlgmr.msra.gmra.mxu1 %vm1710_vm3, %v7456_v21  ;;  %13829 = vmatprep.subr.mxu1 %v20642_v31 }
 0xe77   : > { %13831 = vmatprep.mubr.msk.f32.mxu1 %vm15112_vm4, %v20642_v31 }
 0xe78   : > { %v7553_v27 = vpop.trf.xlu0 }
 0xe79   : > { %13830 = vmatpush3.msra.mxu1 %v7553_v27 }
 0xe7a   : > { %13832 = vmatmul.mubr.msk.f32.vlgmr.msra.gmra.mxu1 %vm1710_vm3, %v7458_v2  ;;  %13834 = vmatprep.subr.mxu1 %v20642_v31 }
 0xe7b   : > { %13836 = vmatprep.mubr.msk.f32.mxu1 %vm15112_vm4, %v20642_v31 }
 0xe7c   : > { %v7585_v45 = vpop.trf.xlu0 }
 0xe7d   : > { %13835 = vmatpush3.msra.mxu1 %v7585_v45 }
 0xe7e   : > { %13837 = vmatmul.mubr.msk.f32.vlgmr.msra.gmra.mxu1 %vm1710_vm3, %v18628_v37  ;;  %13839 = vmatprep.subr.mxu1 %v20642_v31 }
 0xe7f   : > { %13841 = vmatprep.mubr.msk.f32.mxu1 %vm15112_vm4, %v20642_v31 }
 0xeec   : > { %v7669_v8 = vpop.f32.mrf.mxu1 }
 0xeed   : > { %v7889_v53 = vmul.f32 0.35355338, %v7669_v8 }
 0xeee   : > { %v13823_v24 = vpop.f32.mrf.mxu1 }
 0xeef   : > { %v7893_v29 = vsel %vm1710_vm3, %v7889_v53, -inf }
 0xef0   : > { %7894 = vmax.xlane.f32.xlu1 %v7893_v29 }
 0xf36   : > { %v7741_v62 = vpop.f32.mrf.mxu1 }
 0xf37   : > { %v7890_v39 = vmul.f32 0.35355338, %v7741_v62 }
 0xf38   : > { %v13828_v23 = vpop.f32.mrf.mxu1 }
 0xf39   : > { %v7896_v6 = vsel %vm1710_vm3, %v7890_v39, -inf }
 0xf3a   : > { %7897 = vmax.xlane.f32.xlu0 %v7896_v6  ;;  %v7813_v14 = vpop.f32.mrf.mxu1 }
 0xf3b   : > { %v7891_v33 = vmul.f32 0.35355338, %v7813_v14 }
 0xf3c   : > { %v13833_v59 = vpop.f32.mrf.mxu1 }
 0xf3d   : > { %v7899_v57 = vsel %vm1710_vm3, %v7891_v33, -inf }
 0xf3e   : > { %7900 = vmax.xlane.f32.xlu1 %v7899_v57  ;;  %v7885_v32 = vpop.f32.mrf.mxu1 }
 0xf3f   : > { %v7892_v17 = vmul.f32 0.35355338, %v7885_v32 }
 0xf40   : > { %v13838_v54 = vpop.f32.mrf.mxu1 }
 0xf41   : > { %v7902_v0 = vsel %vm1710_vm3, %v7892_v17, -inf }
 0xf42   : > { %7903 = vmax.xlane.f32.xlu1 %v7902_v0 }
 0xf50   : > { %7937 = vrot.lane.b32.xlu0 %v18612_v35, %s20654_s5 }
 0xf53   : > { %7939 = vrot.lane.b32.xlu1 %v7456_v21, %s20654_s5 }
 0xf57   : > { %7941 = vrot.lane.b32.xlu1 %v7458_v2, %s20654_s5 }
 0xf79   : > { %v7895_v19 = vpop.xlane.xlu1 %7894 }
 0xf7a   : > { %v7905_v25 = vsub.f32 %v7889_v53, %v7895_v19 }
 0xf7c   : > { %v7909_v55 = vmul.f32 1.442695, %v7905_v25 }
 0xf7e   : > { %14950 = vpow2.f32 %v7909_v55 }
 0xf8b   : > { %v14951_v50 = vpop.eup %14950 }
 0xf8c   : > { %v7917_v15 = vsel %vm1710_vm3, %v14951_v50, 0.0 }
 0xf8d   : > { %7918 = vadd.xlane.f32.xlu1 %v7917_v15 }
 0xfc3   : > { %v7898_v26 = vpop.xlane.xlu0 %7897 }
 0xfc4   : > { %v7906_v30 = vsub.f32 %v7890_v39, %v7898_v26 }
 0xfc6   : > { %v7911_v42 = vmul.f32 1.442695, %v7906_v30 }
 0xfc7   : > { %v7901_v11 = vpop.xlane.xlu1 %7900  ;;  %v7938_v24 = vpop.permute.xlu0 %7937 }
 0xfc8   : > { %14952 = vpow2.f32 %v7911_v42  ;;  %v7907_v18 = vsub.f32 %v7891_v33, %v7901_v11 }
 0xfca   : > { %v7913_v12 = vmul.f32 1.442695, %v7907_v18 }
 0xfcb   : > { %v7904_v35 = vpop.xlane.xlu1 %7903 }
 0xfcc   : > { %14954 = vpow2.f32 %v7913_v12  ;;  %v7908_v21 = vsub.f32 %v7892_v17, %v7904_v35  ;;  %v7350_v35 = vld [vmem:[%s20655_s2 + $0x18] sm:$0xff] }
 0xfcd   : > { %13860 = vmatpush3.msra.mxu0 %v7350_v35 }
 0xfce   : > { %v7915_v13 = vmul.f32 1.442695, %v7908_v21  ;;  %13861 = vmatprep.subr.mxu0 %v20642_v31 }
 0xfcf   : > { %v7940_v8 = vpop.permute.xlu1 %7939 }
 0xfd0   : > { %14956 = vpow2.f32 %v7915_v13 }
 0xfd3   : > { %v7942_v53 = vpop.permute.xlu1 %7941 }
 0xfd5   : > { %v14953_v2 = vpop.eup %14952 }
 0xfd6   : > { %v7920_v1 = vsel %vm1710_vm3, %v14953_v2, 0.0 }
 0xfd7   : > { %7921 = vadd.xlane.f32.xlu0 %v7920_v1 }
 0xfd9   : > { %v14955_v34 = vpop.eup %14954 }
 0xfda   : > { %v7923_v9 = vsel %vm1710_vm3, %v14955_v34, 0.0 }
 0xfdb   : > { %7924 = vadd.xlane.f32.xlu1 %v7923_v9 }
 0xfdd   : > { %v14957_v27 = vpop.eup %14956 }
 0xfde   : > { %v7926_v45 = vsel %vm1710_vm3, %v14957_v27, 0.0 }
 0xfdf   : > { %7927 = vadd.xlane.f32.xlu1 %v7926_v45 }
 0xfed   : > { %7943 = vrot.lane.b32.xlu0 %v18628_v37, %s20654_s5 }
0x100b   : > { %7981 = vxpose.xlu0.b32.start.end [1/1] (short) (narrow) %v7940_v8, 8 }
0x100f   : > { %8013 = vxpose.xlu0.b32.start.end [1/1] (short) (narrow) %v7942_v53, 8 }
0x1012   : > { %7949 = vxpose.xlu1.b32.start.end [1/1] (short) (narrow) %v7938_v24, 8 }
0x1016   : > { %v7919_v29 = vpop.xlane.xlu1 %7918 }
0x1017   : > { %14958 = vrcp.f32 %v7919_v29 }
0x1024   : > { %v14959_v62 = vpop.eup %14958 }
0x1025   : > { %v7933_v39 = vmul.f32 %v14959_v62, %v14951_v50 }
0x1027   : > { %13840 = vmatpush3.xpose.msk.msra.mxu1 %vm1710_vm3, %v7933_v39 }
0x1028   : > { %13844 = vmatprep.subr.mxu1 %v20642_v31 }
0x1060   : > { %v7922_v23 = vpop.xlane.xlu0 %7921 }
0x1061   : > { %14960 = vrcp.f32 %v7922_v23 }
0x1064   : > { %v7944_v6 = vpop.permute.xlu0 %7943  ;;  %v7925_v14 = vpop.xlane.xlu1 %7924 }
0x1065   : > { %8045 = vxpose.xlu0.b32.start.end [1/1] (short) (narrow) %v7944_v6, 8  ;;  %14962 = vrcp.f32 %v7925_v14  ;;  %v7349_v14 = vld [vmem:[%s20655_s2 + $0x10] sm:$0xff] }
0x1066   : > { %13862 = vmatpush3.msra.mxu0 %v7349_v14 }
0x1067   : > { %13863 = vmatprep.subr.mxu0 %v20642_v31 }
0x1068   : > { %v7928_v37 = vpop.xlane.xlu1 %7927 }
0x1069   : > { %14964 = vrcp.f32 %v7928_v37 }
0x106e   : > { %v14961_v33 = vpop.eup %14960 }
0x106f   : > { %v7934_v57 = vmul.f32 %v14961_v33, %v14953_v2 }
0x1072   : > { %v14963_v17 = vpop.eup %14962 }
0x1073   : > { %v7935_v54 = vmul.f32 %v14963_v17, %v14955_v34 }
0x1076   : > { %v14965_v0 = vpop.eup %14964 }
0x1077   : > { %v7936_v25 = vmul.f32 %v14965_v0, %v14957_v27 }
0x1087   : > { %v7997_v32 = vpop.trf.xlu0 }
0x108b   : > { %v8029_v19 = vpop.trf.xlu0 }
0x108e   : > { %v7965_v59 = vpop.trf.xlu1 }
0x108f   : > { %13842 = vmatmul.mubr.msk.f32.vlgmr.msra.gmra.mxu1 %vm1710_vm3, %v7965_v59 }
0x1090   : > { %13845 = vmatpush3.xpose.msk.msra.mxu1 %vm1710_vm3, %v7934_v57  ;;  %13846 = vmatprep.mubr.msk.f32.mxu1 %vm15112_vm4, %v20642_v31 }
0x1091   : > { %13849 = vmatprep.subr.mxu1 %v20642_v31 }
0x1093   : > { %13847 = vmatmul.mubr.msk.f32.vlgmr.msra.gmra.mxu1 %vm1710_vm3, %v7997_v32  ;;  %v7348_v32 = vld [vmem:[%s20655_s2 + $0x8] sm:$0xff] }
0x1094   : > { %13850 = vmatpush3.xpose.msk.msra.mxu1 %vm1710_vm3, %v7935_v54  ;;  %13851 = vmatprep.mubr.msk.f32.mxu1 %vm15112_vm4, %v20642_v31 }
0x1095   : > { %13854 = vmatprep.subr.mxu1 %v20642_v31  ;;  %13864 = vmatpush3.msra.mxu0 %v7348_v32 }
0x1096   : > { %13865 = vmatprep.subr.mxu0 %v20642_v31 }
0x1097   : > { %13852 = vmatmul.mubr.msk.f32.vlgmr.msra.gmra.mxu1 %vm1710_vm3, %v8029_v19 }
0x1098   : > { %13855 = vmatpush3.xpose.msk.msra.mxu1 %vm1710_vm3, %v7936_v25  ;;  %13856 = vmatprep.mubr.msk.f32.mxu1 %vm15112_vm4, %v20642_v31  ;;  %v7347_v25 = vld [vmem:[%s20655_s2] sm:$0xff] }
0x1099   : > { %13870 = vmatprep.subr.mxu1 %v20642_v31  ;;  %13866 = vmatpush3.msra.mxu0 %v7347_v25 }
0x10e1   : > { %v8061_v55 = vpop.trf.xlu0 }
0x10e2   : > { %13857 = vmatmul.mubr.msk.f32.vlgmr.msra.gmra.mxu1 %vm1710_vm3, %v8061_v55 }
0x10e3   : > { %13878 = vmatprep.mubr.msk.f32.mxu1 %vm15112_vm4, %v20642_v31 }
0x114f   : > { %v8149_v50 = vpop.f32.mrf.mxu1 }
0x1150   : > { %8381 = vxpose.xlu0.b32.start.end [1/1] (short) (narrow) %v8149_v50, 8 }
0x1151   : > { %v13843_v15 = vpop.f32.mrf.mxu1 }
0x1153   : > { %v8225_v26 = vpop.f32.mrf.mxu1 }
0x1154   : > { %8413 = vxpose.xlu0.b32.start.end [1/1] (short) (narrow) %v8225_v26, 8 }
0x1155   : > { %v13848_v30 = vpop.f32.mrf.mxu1 }
0x1157   : > { %v8301_v42 = vpop.f32.mrf.mxu1 }
0x1158   : > { %8445 = vxpose.xlu1.b32.start.end [1/1] (short) (narrow) %v8301_v42, 8 }
0x1159   : > { %v13853_v11 = vpop.f32.mrf.mxu1 }
0x11a2   : > { %v8377_v18 = vpop.f32.mrf.mxu1 }
0x11a3   : > { %8477 = vxpose.xlu0.b32.start.end [1/1] (short) (narrow) %v8377_v18, 8 }
0x11a4   : > { %v13858_v12 = vpop.f32.mrf.mxu1 }
0x11cc   : > { %v8397_v21 = vpop.trf.xlu0 }
0x11d0   : > { %v8429_v13 = vpop.trf.xlu0 }
0x11d4   : > { %v8461_v2 = vpop.trf.xlu1 }
0x11d5   : > { %v8509_v1 = vcombine.low %v8397_v21, %v8461_v2  ;;  %v8510_v34 = vcombine.high %v8397_v21, %v8461_v2  ;;  %v13786_v2 = vpop.f32.mrf.mxu0 }
0x11d7   : > { %v8517_v8 = vrot.slane %v8509_v1, %v17033_v7  ;;  %v8524_v53 = vrot.slane %v8510_v34, %v17033_v7 }
0x121f   : > { %v8493_v9 = vpop.trf.xlu0 }
0x1220   : > { %v8525_v27 = vcombine.low %v8429_v13, %v8493_v9  ;;  %v8526_v45 = vcombine.high %v8429_v13, %v8493_v9 }
0x1222   : > { %v8533_v24 = vrot.slane %v8525_v27, %v17033_v7  ;;  %v8540_v29 = vrot.slane %v8526_v45, %v17033_v7  ;;  %v6999_v27 = vpop.f32.mrf.mxu0 }
0x1224   : > { %v8541_v62 = vcombine.low %v8517_v8, %v8533_v24  ;;  %v8542_v39 = vcombine.high %v8517_v8, %v8533_v24  ;;  %v8557_v23 = vcombine.low %v8524_v53, %v8540_v29  ;;  %v8558_v6 = vcombine.high %v8524_v53, %v8540_v29  ;;  %v13789_v8 = vpop.f32.mrf.mxu0 }
0x1226   : > { %v8549_v37 = vrot.slane %v8541_v62, %v17038_v52  ;;  %v8556_v33 = vrot.slane %v8542_v39, %v17038_v52  ;;  %v8565_v59 = vrot.slane %v8557_v23, %v17038_v52  ;;  %v8572_v57 = vrot.slane %v8558_v6, %v17038_v52  ;;  %v7009_v53 = vpop.f32.mrf.mxu0  ;;  %v18732_v23 = vld [vmem:[%s20347_s11] sm:$0xff] }
0x1227   : > { %v18727_v62 = vsub.s32 5, %v20623_v63 }
0x1228   : > { %v8577_v17 = vcombine.low %v8549_v37, %v8556_v33  ;;  %v12958_v54 = vcombine.high %v8549_v37, %v8556_v33  ;;  %v8593_v0 = vcombine.low %v8565_v59, %v8572_v57  ;;  %v12959_v19 = vcombine.high %v8565_v59, %v8572_v57  ;;  %v13792_v24 = vpop.f32.mrf.mxu0 }
0x1229   : > { %20659 = vst [vmem:[#allocation68_spill] sm:$0xff] %v18727_v62  ;;  %v18736_v6 = vrot.slane %v18732_v23, %v18727_v62 }
0x122a   : > { %v8584_v55 = vrot.slane %v8577_v17, %v17033_v7  ;;  %v8592_v50 = vrot.slane %v12958_v54, %v17033_v7  ;;  %v8600_v15 = vrot.slane %v8593_v0, %v17033_v7  ;;  %v8608_v26 = vrot.slane %v12959_v19, %v17033_v7  ;;  %v7019_v29 = vpop.f32.mrf.mxu0 }
0x122b   : > { %v7005_v33 = vadd.f32 %v13786_v2, %v18736_v6  ;;  %v7020_v32 = vadd.f32 %v7019_v29, %v18736_v6  ;;  %v7000_v25 = vadd.f32 %v6999_v27, %v18736_v6 }
0x122c   : > { %v8610_v30 = vcombine.high %v8584_v55, %v8592_v50  ;;  %v8626_v42 = vcombine.high %v8600_v15, %v8608_v26  ;;  %v8609_v11 = vcombine.low %v8584_v55, %v8592_v50  ;;  %v8625_v18 = vcombine.low %v8600_v15, %v8608_v26  ;;  %v13795_v39 = vpop.f32.mrf.mxu0 }
0x122d   : > { %v18740_v57 = vadd.f32 %v7005_v33, %v18424_v60  ;;  %v18744_v54 = vadd.f32 %v7020_v32, %v18465_v20  ;;  %v18757_v20 = vadd.f32 %v7000_v25, %v18421_v4 }
0x122e   : > { %v8624_v12 = vrot.slane %v8610_v30, %v17038_v52  ;;  %v8640_v35 = vrot.slane %v8626_v42, %v17038_v52  ;;  %v18714_v21 = vrot.slane %v8609_v11, %v17038_v52  ;;  %v18717_v13 = vrot.slane %v8625_v18, %v17038_v52  ;;  %v7029_v14 = vpop.f32.mrf.mxu0 }
0x122f   : > { %v7030_v0 = vadd.f32 %v7029_v14, %v18736_v6  ;;  %v7097_v19 = vsel %vm1084_vm2, %v18740_v57, 0.0  ;;  %v7106_v26 = vsel %vm1084_vm2, %v18744_v54, 0.0  ;;  %v7010_v30 = vadd.f32 %v7009_v53, %v18736_v6 }
0x1230   : > { %v8643_v1 = vcombine.low %v8624_v12, %v8640_v35  ;;  %v8642_v34 = vcombine.high %v18714_v21, %v18717_v13  ;;  %v8641_v9 = vcombine.low %v18714_v21, %v18717_v13  ;;  %v8644_v45 = vcombine.high %v8624_v12, %v8640_v35  ;;  %v13798_v37 = vpop.f32.mrf.mxu0 }
0x1231   : > { %v18751_v15 = vadd.f32 %v7030_v0, %v18479_v61  ;;  %v7015_v12 = vadd.f32 %v13789_v8, %v18736_v6  ;;  %v18768_v35 = vadd.f32 %v7010_v30, %v18449_v44  ;;  %v7094_v4 = vsel %vm1084_vm2, %v18757_v20, 0.0 }
0x1232   : > { %8650 = vrot.lane.b32.xlu0 %v8643_v1, %s20656_s27  ;;  %8646 = vrot.lane.b32.xlu1 %v8642_v34, %s20657_s28  ;;  %v7039_v59 = vpop.f32.mrf.mxu0  ;;  %v7025_v44 = vadd.f32 %v13792_v24, %v18736_v6  ;;  %v7045_v32 = vadd.f32 %v13798_v37, %v18736_v6 }
0x1233   : > { %v7040_v60 = vadd.f32 %v7039_v59, %v18736_v6  ;;  %v7112_v61 = vsel %vm1084_vm2, %v18751_v15, 0.0  ;;  %v18779_v27 = vadd.f32 %v7015_v12, %v18456_v40  ;;  %v7100_v8 = vsel %vm1084_vm2, %v18768_v35, 0.0 }
0x1234   : > { %v13801_v17 = vpop.f32.mrf.mxu0  ;;  %v18791_v14 = vadd.f32 %v7025_v44, %v18468_v41  ;;  %v7035_v40 = vadd.f32 %v13795_v39, %v18736_v6  ;;  %v18810_v0 = vadd.f32 %v7045_v32, %v18508_v47 }
0x1235   : > { %v18761_v11 = vadd.f32 %v7040_v60, %v18505_v38  ;;  %v7103_v24 = vsel %vm1084_vm2, %v18779_v27, 0.0 }
0x1236   : > { %8654 = vrot.lane.b32.xlu1 %v8644_v45, %s20658_s0  ;;  %v7049_v55 = vpop.f32.mrf.mxu0  ;;  %v18802_v59 = vadd.f32 %v7035_v40, %v18482_v58  ;;  %v7109_v41 = vsel %vm1084_vm2, %v18791_v14, 0.0  ;;  %v7121_v25 = vsel %vm1084_vm2, %v18810_v0, 0.0 }
0x1237   : > { %v7050_v18 = vadd.f32 %v7049_v55, %v18736_v6  ;;  %v7118_v34 = vsel %vm1084_vm2, %v18761_v11, 0.0 }
0x1238   : > { %v13804_v50 = vpop.f32.mrf.mxu0  ;;  %v7115_v58 = vsel %vm1084_vm2, %v18802_v59, 0.0 }
0x1239   : > { %v18773_v1 = vadd.f32 %v7050_v18, %v18520_v22 }
0x123a   : > { %v7059_v42 = vpop.f32.mrf.mxu0 }
0x123b   : > { %v7060_v38 = vadd.f32 %v7059_v42, %v18736_v6  ;;  %v7124_v29 = vsel %vm1084_vm2, %v18773_v1, 0.0 }
0x123c   : > { %v13807_v2 = vpop.f32.mrf.mxu0 }
0x123d   : > { %v18785_v53 = vadd.f32 %v7060_v38, %v18534_v48  ;;  %v7075_v47 = vadd.f32 %v13807_v2, %v18736_v6 }
0x123e   : > { %v7069_v45 = vpop.f32.mrf.mxu0 }
0x123f   : > { %v7070_v22 = vadd.f32 %v7069_v45, %v18736_v6  ;;  %v7130_v48 = vsel %vm1084_vm2, %v18785_v53, 0.0  ;;  %v18828_v60 = vadd.f32 %v7075_v47, %v18551_v28 }
0x1241   : > { %v18797_v33 = vadd.f32 %v7070_v22, %v18548_v10  ;;  %v7055_v10 = vadd.f32 %v13801_v17, %v18736_v6 }
0x1243   : > { %v7136_v39 = vsel %vm1084_vm2, %v18797_v33, 0.0  ;;  %v18816_v37 = vadd.f32 %v7055_v10, %v18523_v49 }
0x1245   : > { %v7127_v17 = vsel %vm1084_vm2, %v18816_v37, 0.0 }
0x1251   : > { %7098 = vadd.xlane.f32.xlu0 %v7097_v19  ;;  %v7065_v19 = vadd.f32 %v13804_v50, %v18736_v6  ;;  %v7139_v50 = vsel %vm1084_vm2, %v18828_v60, 0.0 }
0x1253   : > { %v18822_v55 = vadd.f32 %v7065_v19, %v18537_v36 }
0x1255   : > { %7107 = vadd.xlane.f32.xlu0 %v7106_v26  ;;  %v7133_v49 = vsel %vm1084_vm2, %v18822_v55, 0.0 }
0x1259   : > { %7113 = vadd.xlane.f32.xlu0 %v7112_v61 }
0x125a   : > { %7095 = vadd.xlane.f32.xlu1 %v7094_v4 }
0x125d   : > { %7119 = vadd.xlane.f32.xlu0 %v7118_v34 }
0x125e   : > { %7101 = vadd.xlane.f32.xlu1 %v7100_v8 }
0x1261   : > { %7125 = vadd.xlane.f32.xlu0 %v7124_v29 }
0x1262   : > { %7104 = vadd.xlane.f32.xlu1 %v7103_v24 }
0x1265   : > { %7131 = vadd.xlane.f32.xlu0 %v7130_v48 }
0x1266   : > { %7110 = vadd.xlane.f32.xlu1 %v7109_v41 }
0x1269   : > { %7137 = vadd.xlane.f32.xlu0 %v7136_v39 }
0x126a   : > { %7116 = vadd.xlane.f32.xlu1 %v7115_v58 }
0x126e   : > { %7122 = vadd.xlane.f32.xlu1 %v7121_v25 }
0x1272   : > { %7128 = vadd.xlane.f32.xlu1 %v7127_v17 }
0x1276   : > { %7134 = vadd.xlane.f32.xlu1 %v7133_v49 }
0x127a   : > { %7140 = vadd.xlane.f32.xlu1 %v7139_v50 }
0x12a4   : > { %v8647_v26 = vpop.permute.xlu1 %8646  ;;  %v8651_v6 = vpop.permute.xlu0 %8650 }
0x12a5   : > { %v8657_v36 = vsel %vm1710_vm3, %v8641_v9, %v8647_v26 }
0x12a6   : > { %v8658_v30 = vsel %vm6171_vm5, %v8657_v36, %v8651_v6 }
0x12a8   : > { %v8655_v42 = vpop.permute.xlu1 %8654 }
0x12a9   : > { %v8659_v28 = vsel %vm6188_vm6, %v8658_v30, %v8655_v42 }
0x12aa   : > { %13868 = vmatmul.mubr.msk.f32.vlgmr.msra.gmra.mxu0 %vm1084_vm2, %v8659_v28 }
0x12da   : > { %v7099_v18 = vpop.xlane.xlu0 %7098 }
0x12de   : > { %v7108_v61 = vpop.xlane.xlu0 %7107 }
0x12df   : > { %v7146_v38 = vmul.f32 0.03125, %v7108_v61 }
0x12e1   : > { %v18847_v45 = vsub.f32 %v18744_v54, %v7146_v38  ;;  %v8663_v38 = vrot.slane %v18606_v46, %v18174_v16 }
0x12e2   : > { %v7114_v12 = vpop.xlane.xlu0 %7113 }
0x12e3   : > { %v7096_v2 = vpop.xlane.xlu1 %7095  ;;  %v7148_v8 = vmul.f32 0.03125, %v7114_v12  ;;  %v7178_v54 = vmul.f32 %v18847_v45, %v18847_v45 }
0x12e4   : > { %v7142_v4 = vmul.f32 0.03125, %v7096_v2 }
0x12e5   : > { %v18856_v24 = vsub.f32 %v18751_v15, %v7148_v8  ;;  %v7202_v10 = vsel %vm1084_vm2, %v7178_v54, 0.0 }
0x12e6   : > { %v18842_v34 = vsub.f32 %v18757_v20, %v7142_v4  ;;  %v7120_v21 = vpop.xlane.xlu0 %7119  ;;  %v7143_v4 = vmul.f32 0.03125, %v7099_v18 }
0x12e7   : > { %v7102_v13 = vpop.xlane.xlu1 %7101  ;;  %v7150_v48 = vmul.f32 0.03125, %v7120_v21  ;;  %v7180_v58 = vmul.f32 %v18856_v24, %v18856_v24 }
0x12e8   : > { %v7144_v9 = vmul.f32 0.03125, %v7102_v13  ;;  %v7174_v44 = vmul.f32 %v18842_v34, %v18842_v34 }
0x12e9   : > { %v7208_v25 = vsel %vm1084_vm2, %v7180_v58, 0.0 }
0x12ea   : > { %v18850_v22 = vsub.f32 %v18768_v35, %v7144_v9  ;;  %v7190_v29 = vsel %vm1084_vm2, %v7174_v44, 0.0  ;;  %v7126_v40 = vpop.xlane.xlu0 %7125  ;;  %v18862_v35 = vsub.f32 %v18761_v11, %v7150_v48  ;;  %v18892_v44 = vsub.f32 %v18740_v57, %v7143_v4 }
0x12eb   : > { %7191 = vadd.xlane.f32.xlu1 %v7190_v29  ;;  %v7152_v39 = vmul.f32 0.03125, %v7126_v40  ;;  %v7105_v28 = vpop.xlane.xlu1 %7104 }
0x12ec   : > { %v7176_v20 = vmul.f32 %v18850_v22, %v18850_v22  ;;  %v7182_v47 = vmul.f32 %v18862_v35, %v18862_v35  ;;  %v7145_v21 = vmul.f32 0.03125, %v7105_v28  ;;  %v7175_v46 = vmul.f32 %v18892_v44, %v18892_v44 }
0x12ed   : > { %v18868_v15 = vsub.f32 %v18773_v1, %v7152_v39  ;;  %v18938_v28 = vsub.s32 7, %v20623_v63 }
0x12ee   : > { %v7196_v32 = vsel %vm1084_vm2, %v7176_v20, 0.0  ;;  %v7132_v41 = vpop.xlane.xlu0 %7131  ;;  %v7214_v50 = vsel %vm1084_vm2, %v7182_v47, 0.0  ;;  %v18898_v20 = vsub.f32 %v18779_v27, %v7145_v21 }
0x12ef   : > { %7197 = vadd.xlane.f32.xlu1 %v7196_v32  ;;  %v7154_v19 = vmul.f32 0.03125, %v7132_v41  ;;  %v7184_v26 = vmul.f32 %v18868_v15, %v18868_v15  ;;  %v7111_v61 = vpop.xlane.xlu1 %7110  ;;  %v7193_v41 = vsel %vm1084_vm2, %v7175_v46, 0.0  ;;  %20661 = vst [vmem:[#allocation41_spill] sm:$0xff] %v18938_v28 }
0x12f0   : > { %v7147_v48 = vmul.f32 0.03125, %v7111_v61  ;;  %v7177_v57 = vmul.f32 %v18898_v20, %v18898_v20 }
0x12f1   : > { %v18874_v11 = vsub.f32 %v18785_v53, %v7154_v19  ;;  %v7220_v36 = vsel %vm1084_vm2, %v7184_v26, 0.0 }
0x12f2   : > { %v7138_v17 = vpop.xlane.xlu0 %7137  ;;  %v18907_v54 = vsub.f32 %v18791_v14, %v7147_v48 }
0x12f3   : > { %7203 = vadd.xlane.f32.xlu1 %v7202_v10  ;;  %v7156_v49 = vmul.f32 0.03125, %v7138_v17  ;;  %v7186_v6 = vmul.f32 %v18874_v11, %v18874_v11  ;;  %v7117_v12 = vpop.xlane.xlu1 %7116  ;;  %v7199_v10 = vsel %vm1084_vm2, %v7177_v57, 0.0 }
0x12f4   : > { %v7179_v47 = vmul.f32 %v18907_v54, %v18907_v54 }
0x12f5   : > { %v18880_v1 = vsub.f32 %v18797_v33, %v7156_v49  ;;  %v7226_v30 = vsel %vm1084_vm2, %v7186_v6, 0.0 }
0x12f6   : > { %v7205_v49 = vsel %vm1084_vm2, %v7179_v47, 0.0 }
0x12f7   : > { %7209 = vadd.xlane.f32.xlu1 %v7208_v25  ;;  %v7188_v53 = vmul.f32 %v18880_v1, %v18880_v1  ;;  %v7123_v33 = vpop.xlane.xlu1 %7122 }
0x12f8   : > { %v7151_v19 = vmul.f32 0.03125, %v7123_v33 }
0x12f9   : > { %v7232_v42 = vsel %vm1084_vm2, %v7188_v53, 0.0 }
0x12fa   : > { %v18917_v17 = vsub.f32 %v18810_v0, %v7151_v19 }
0x12fb   : > { %7215 = vadd.xlane.f32.xlu1 %v7214_v50  ;;  %v7129_v2 = vpop.xlane.xlu1 %7128 }
0x12fc   : > { %v7153_v14 = vmul.f32 0.03125, %v7129_v2  ;;  %v7183_v6 = vmul.f32 %v18917_v17, %v18917_v17 }
0x12ff   : > { %7221 = vadd.xlane.f32.xlu1 %v7220_v36  ;;  %v7135_v13 = vpop.xlane.xlu1 %7134 }
0x1300   : > { %v7155_v26 = vmul.f32 0.03125, %v7135_v13 }
0x1302   : > { %v18934_v53 = vsub.f32 %v18822_v55, %v7155_v26 }
0x1303   : > { %7227 = vadd.xlane.f32.xlu1 %v7226_v30  ;;  %v7141_v32 = vpop.xlane.xlu1 %7140  ;;  %v18929_v30 = vsub.s32 6, %v20623_v63  ;;  %v18953_v63 = vrot.slane %v18732_v23, %v18938_v28 }
0x1304   : > { %v7187_v55 = vmul.f32 %v18934_v53, %v18934_v53 }
0x1305   : > { %20660 = vst [vmem:[#allocation47_spill] sm:$0xff] %v18929_v30  ;;  %v18942_v61 = vrot.slane %v18732_v23, %v18929_v30  ;;  %v7358_v23 = vld [vmem:[%s20078_s12 + $0x18] sm:$0xff] }
0x1306   : > { %v7229_v21 = vsel %vm1084_vm2, %v7187_v55, 0.0  ;;  %13881 = vmatprep.subr.mxu0 %v7358_v23 }
0x1307   : > { %7233 = vadd.xlane.f32.xlu1 %v7232_v42  ;;  %v7157_v42 = vmul.f32 0.03125, %v7141_v32  ;;  %13882 = vmatpush3.msra.mxu0 %v7358_v23 }
0x1309   : > { %v18946_v2 = vsub.f32 %v18828_v60, %v7157_v42 }
0x130b   : > { %v7189_v60 = vmul.f32 %v18946_v2, %v18946_v2 }
0x136a   : > { %v8733_v9 = vpop.f32.mrf.mxu0 }
0x136b   : > { %v8734_v8 = vadd.f32 %v8733_v9, %v8663_v38  ;;  %v7235_v9 = vsel %vm1084_vm2, %v7189_v60, 0.0 }
0x136c   : > { %v13869_v29 = vpop.f32.mrf.mxu0 }
0x136d   : > { %v18895_v40 = vadd.f32 %v8734_v8, %v18562_v5  ;;  %v7149_v5 = vmul.f32 0.03125, %v7117_v12  ;;  %v7356_v8 = vld [vmem:[%s20078_s12 + $0x8] sm:$0xff]  ;;  %v7355_v29 = vld [vmem:[%s20078_s12] sm:$0xff] }
0x136f   : > { %v8738_v18 = vsel %vm1084_vm2, %v18895_v40, 0.0  ;;  %v18912_v58 = vsub.f32 %v18802_v59, %v7149_v5  ;;  %v18923_v59 = vsub.f32 %v18816_v37, %v7153_v14  ;;  %v7217_v37 = vsel %vm1084_vm2, %v7183_v6, 0.0 }
0x1370   : > { %8739 = vadd.xlane.f32.xlu0 %v8738_v18 }
0x1371   : > { %v7181_v50 = vmul.f32 %v18912_v58, %v18912_v58  ;;  %v7185_v0 = vmul.f32 %v18923_v59, %v18923_v59 }
0x1373   : > { %v7211_v36 = vsel %vm1084_vm2, %v7181_v50, 0.0  ;;  %v7223_v33 = vsel %vm1084_vm2, %v7185_v0, 0.0 }
0x1374   : > { %v7192_v27 = vpop.xlane.xlu1 %7191  ;;  %7194 = vadd.xlane.f32.xlu0 %v7193_v41 }
0x1375   : > { %v7238_v39 = vmul.f32 0.03125, %v7192_v27 }
0x1377   : > { %v7254_v25 = vadd.f32 1e-05, %v7238_v39 }
0x1378   : > { %7200 = vadd.xlane.f32.xlu0 %v7199_v10  ;;  %v7198_v48 = vpop.xlane.xlu1 %7197 }
0x1379   : > { %14966 = vrsqrt.f32 %v7254_v25  ;;  %v7240_v32 = vmul.f32 0.03125, %v7198_v48 }
0x137b   : > { %v7256_v5 = vadd.f32 1e-05, %v7240_v32 }
0x137c   : > { %7206 = vadd.xlane.f32.xlu0 %v7205_v49  ;;  %v7204_v18 = vpop.xlane.xlu1 %7203 }
0x137d   : > { %v7242_v41 = vmul.f32 0.03125, %v7204_v18  ;;  %14968 = vrsqrt.f32 %v7256_v5 }
0x137f   : > { %v7258_v39 = vadd.f32 1e-05, %v7242_v41 }
0x1380   : > { %7212 = vadd.xlane.f32.xlu0 %v7211_v36  ;;  %v7210_v46 = vpop.xlane.xlu1 %7209 }
0x1381   : > { %v7244_v10 = vmul.f32 0.03125, %v7210_v46  ;;  %14970 = vrsqrt.f32 %v7258_v39 }
0x1383   : > { %v7260_v49 = vadd.f32 1e-05, %v7244_v10 }
0x1384   : > { %7218 = vadd.xlane.f32.xlu0 %v7217_v37  ;;  %v7216_v57 = vpop.xlane.xlu1 %7215 }
0x1385   : > { %v7246_v50 = vmul.f32 0.03125, %v7216_v57 }
0x1386   : > { %v14967_v12 = vpop.eup %14966 }
0x1387   : > { %v7286_v4 = vmul.f32 %v14967_v12, %v18842_v34  ;;  %v7357_v34 = vld [vmem:[%s20078_s12 + $0x10] sm:$0xff]  ;;  %v7262_v42 = vadd.f32 1e-05, %v7246_v50 }
0x1388   : > { %7224 = vadd.xlane.f32.xlu0 %v7223_v33  ;;  %13883 = vmatprep.subr.mxu0 %v7357_v34  ;;  %v7222_v25 = vpop.xlane.xlu1 %7221 }
0x1389   : > { %v7306_v38 = vmul.f32 %v18942_v61, %v7286_v4  ;;  %13884 = vmatpush3.msra.mxu0 %v7357_v34  ;;  %v7248_v37 = vmul.f32 0.03125, %v7222_v25 }
0x138a   : > { %13885 = vmatprep.subr.mxu0 %v7356_v8 }
0x138b   : > { %v7326_v13 = vadd.f32 %v18953_v63, %v7306_v38  ;;  %13886 = vmatpush3.msra.mxu0 %v7356_v8  ;;  %v7264_v4 = vadd.f32 1e-05, %v7248_v37 }
0x138c   : > { %7230 = vadd.xlane.f32.xlu0 %v7229_v21  ;;  %13887 = vmatprep.subr.mxu0 %v7355_v29  ;;  %v7228_v6 = vpop.xlane.xlu1 %7227 }
0x138d   : > { %13889 = vmatprep.mubr.msk.f32.mxu0 %vm1084_vm2, %v7326_v13  ;;  %13888 = vmatpush3.msra.mxu0 %v7355_v29  ;;  %v7250_v38 = vmul.f32 0.03125, %v7228_v6  ;;  %v14969_v13 = vpop.eup %14968 }
0x138e   : > { %13953 = vmatprep.subr.mxu0 %v20642_v31  ;;  %v7288_v48 = vmul.f32 %v14969_v13, %v18850_v22  ;;  %v14971_v18 = vpop.eup %14970 }
0x138f   : > { %v7266_v34 = vadd.f32 1e-05, %v7250_v38 }
0x1390   : > { %7236 = vadd.xlane.f32.xlu0 %v7235_v9  ;;  %v7234_v60 = vpop.xlane.xlu1 %7233  ;;  %v7308_v10 = vmul.f32 %v18942_v61, %v7288_v48 }
0x1391   : > { %v7252_v8 = vmul.f32 0.03125, %v7234_v60 }
0x1393   : > { %v7268_v41 = vadd.f32 1e-05, %v7252_v8 }
0x13f9   : > { %v18975_v27 = vpop.xlane.xlu0 %8739 }
0x13fd   : > { %v7195_v19 = vpop.xlane.xlu0 %7194 }
0x13fe   : > { %v7239_v47 = vmul.f32 0.03125, %v7195_v19  ;;  %v7290_v19 = vmul.f32 %v14971_v18, %v18847_v45 }
0x1400   : > { %v7255_v14 = vadd.f32 1e-05, %v7239_v47  ;;  %v7310_v6 = vmul.f32 %v18942_v61, %v7290_v19 }
0x1401   : > { %v7201_v26 = vpop.xlane.xlu0 %7200 }
0x1402   : > { %14972 = vrsqrt.f32 %v7255_v14  ;;  %v7241_v36 = vmul.f32 0.03125, %v7201_v26  ;;  %v7330_v38 = vadd.f32 %v18953_v63, %v7310_v6 }
0x1403   : > { %14974 = vrsqrt.f32 %v7260_v49 }
0x1404   : > { %v7257_v0 = vadd.f32 1e-05, %v7241_v36  ;;  %v7328_v36 = vadd.f32 %v18953_v63, %v7308_v10 }
0x1405   : > { %v7207_v12 = vpop.xlane.xlu0 %7206 }
0x1406   : > { %14976 = vrsqrt.f32 %v7257_v0  ;;  %v7243_v33 = vmul.f32 0.03125, %v7207_v12 }
0x1407   : > { %14978 = vrsqrt.f32 %v7262_v42 }
0x1408   : > { %v7259_v55 = vadd.f32 1e-05, %v7243_v33 }
0x1409   : > { %v7213_v21 = vpop.xlane.xlu0 %7212 }
0x140a   : > { %14980 = vrsqrt.f32 %v7259_v55  ;;  %v7245_v9 = vmul.f32 0.03125, %v7213_v21 }
0x140b   : > { %14982 = vrsqrt.f32 %v7264_v4 }
0x140c   : > { %v7261_v23 = vadd.f32 1e-05, %v7245_v9 }
0x140d   : > { %v7219_v29 = vpop.xlane.xlu0 %7218 }
0x140e   : > { %14984 = vrsqrt.f32 %v7261_v23  ;;  %v7247_v46 = vmul.f32 0.03125, %v7219_v29 }
0x140f   : > { %v14973_v32 = vpop.eup %14972  ;;  %14986 = vrsqrt.f32 %v7266_v34 }
0x1410   : > { %v7263_v57 = vadd.f32 1e-05, %v7247_v46  ;;  %v7287_v5 = vmul.f32 %v14973_v32, %v18892_v44  ;;  %v14975_v25 = vpop.eup %14974 }
0x1411   : > { %v7225_v39 = vpop.xlane.xlu0 %7224  ;;  %v7292_v0 = vmul.f32 %v14975_v25, %v18856_v24 }
0x1412   : > { %14988 = vrsqrt.f32 %v7263_v57  ;;  %v7249_v47 = vmul.f32 0.03125, %v7225_v39  ;;  %v7307_v14 = vmul.f32 %v18942_v61, %v7287_v5 }
0x1413   : > { %v14977_v22 = vpop.eup %14976  ;;  %14990 = vrsqrt.f32 %v7268_v41  ;;  %v7312_v24 = vmul.f32 %v18942_v61, %v7292_v0 }
0x1414   : > { %v7265_v49 = vadd.f32 1e-05, %v7249_v47  ;;  %v7327_v50 = vadd.f32 %v18953_v63, %v7307_v14  ;;  %v7289_v26 = vmul.f32 %v14977_v22, %v18898_v20  ;;  %v14979_v45 = vpop.eup %14978 }
0x1415   : > { %v7231_v44 = vpop.xlane.xlu0 %7230  ;;  %v7294_v21 = vmul.f32 %v14979_v45, %v18862_v35  ;;  %v7332_v29 = vadd.f32 %v18953_v63, %v7312_v24 }
0x1416   : > { %14992 = vrsqrt.f32 %v7265_v49  ;;  %v7251_v42 = vmul.f32 0.03125, %v7231_v44  ;;  %13890 = vmatmul.mubr.msk.f32.vlgmr.msra.gmra.mxu0 %vm1084_vm2, %v7327_v50  ;;  %v7309_v37 = vmul.f32 %v18942_v61, %v7289_v26 }
0x1417   : > { %v14981_v12 = vpop.eup %14980  ;;  %13892 = vmatprep.mubr.msk.f32.mxu0 %vm1084_vm2, %v7328_v36  ;;  %v7314_v48 = vmul.f32 %v18942_v61, %v7294_v21 }
0x1418   : > { %v7267_v33 = vadd.f32 1e-05, %v7251_v42  ;;  %v7329_v20 = vadd.f32 %v18953_v63, %v7309_v37  ;;  %v7291_v55 = vmul.f32 %v14981_v12, %v18907_v54  ;;  %v14983_v13 = vpop.eup %14982  ;;  %v19042_v37 = vld [vmem:[%s20082_s16] sm:$0xff] }
0x1419   : > { %v7237_v4 = vpop.xlane.xlu0 %7236  ;;  %v7296_v35 = vmul.f32 %v14983_v13, %v18868_v15  ;;  %v8764_v52 = vrot.slane %v19042_v37, %v18569_v43 }
0x141a   : > { %14994 = vrsqrt.f32 %v7267_v33  ;;  %v7253_v60 = vmul.f32 0.03125, %v7237_v4  ;;  %13893 = vmatmul.mubr.msk.f32.gmra.mxu0 %vm1084_vm2, %v7329_v20  ;;  %v7311_v9 = vmul.f32 %v18942_v61, %v7291_v55 }
0x141b   : > { %v14985_v23 = vpop.eup %14984  ;;  %13895 = vmatprep.mubr.msk.f32.mxu0 %vm1084_vm2, %v7330_v38  ;;  %v7316_v41 = vmul.f32 %v18942_v61, %v7296_v35 }
0x141c   : > { %v7269_v34 = vadd.f32 1e-05, %v7253_v60  ;;  %v7331_v54 = vadd.f32 %v18953_v63, %v7311_v9  ;;  %v7293_v8 = vmul.f32 %v14985_v23, %v18912_v58  ;;  %v14987_v18 = vpop.eup %14986  ;;  %v7334_v58 = vadd.f32 %v18953_v63, %v7314_v48 }
0x141d   : > { %v7298_v39 = vmul.f32 %v14987_v18, %v18874_v11 }
0x141e   : > { %14996 = vrsqrt.f32 %v7269_v34  ;;  %13896 = vmatmul.mubr.msk.f32.gmra.mxu0 %vm1084_vm2, %v7331_v54  ;;  %v7313_v46 = vmul.f32 %v18942_v61, %v7293_v8 }
0x141f   : > { %v14989_v32 = vpop.eup %14988  ;;  %13898 = vmatprep.mubr.msk.f32.mxu0 %vm1084_vm2, %v7332_v29  ;;  %v7318_v14 = vmul.f32 %v18942_v61, %v7298_v39 }
0x1420   : > { %v7333_v57 = vadd.f32 %v18953_v63, %v7313_v46  ;;  %v7295_v5 = vmul.f32 %v14989_v32, %v18917_v17  ;;  %v14991_v15 = vpop.eup %14990  ;;  %v7336_v17 = vadd.f32 %v18953_v63, %v7316_v41 }
0x1421   : > { %v7300_v22 = vmul.f32 %v14991_v15, %v18880_v1  ;;  %v7338_v44 = vadd.f32 %v18953_v63, %v7318_v14 }
0x1422   : > { %13899 = vmatmul.mubr.msk.f32.gmra.mxu0 %vm1084_vm2, %v7333_v57  ;;  %v7315_v10 = vmul.f32 %v18942_v61, %v7295_v5 }
0x1423   : > { %v14993_v19 = vpop.eup %14992  ;;  %13901 = vmatprep.mubr.msk.f32.mxu0 %vm1084_vm2, %v7334_v58 }
0x1424   : > { %v7335_v25 = vadd.f32 %v18953_v63, %v7315_v10  ;;  %v7297_v47 = vmul.f32 %v14993_v19, %v18923_v59  ;;  %v7320_v59 = vmul.f32 %v18942_v61, %v7300_v22 }
0x1426   : > { %13902 = vmatmul.mubr.msk.f32.gmra.mxu0 %vm1084_vm2, %v7335_v25  ;;  %v7317_v11 = vmul.f32 %v18942_v61, %v7297_v47  ;;  %v7340_v45 = vadd.f32 %v18953_v63, %v7320_v59  ;;  %v8741_v25 = vmul.f32 0.03125, %v18975_v27  ;;  %v7353_v27 = vld [vmem:[%s20663_s1 + $0x10] sm:$0xff] }
0x1427   : > { %v14995_v49 = vpop.eup %14994  ;;  %13904 = vmatprep.mubr.msk.f32.mxu0 %vm1084_vm2, %v7336_v17 }
0x1428   : > { %v7337_v50 = vadd.f32 %v18953_v63, %v7317_v11  ;;  %v7299_v26 = vmul.f32 %v14995_v49, %v18934_v53  ;;  %v19116_v17 = vsub.f32 %v18895_v40, %v8741_v25  ;;  %v7354_v40 = vld [vmem:[%s20663_s1 + $0x18] sm:$0xff]  ;;  %v7352_v11 = vld [vmem:[%s20663_s1 + $0x8] sm:$0xff]  ;;  %v7351_v49 = vld [vmem:[%s20663_s1] sm:$0xff] }
0x1429   : > { %13871 = vmatpush3.msra.mxu1 %v7354_v40 }
0x142a   : > { %13905 = vmatmul.mubr.msk.f32.gmra.mxu0 %vm1084_vm2, %v7337_v50  ;;  %v7319_v36 = vmul.f32 %v18942_v61, %v7299_v26  ;;  %v8743_v14 = vmul.f32 %v19116_v17, %v19116_v17  ;;  %13872 = vmatprep.subr.mxu1 %v20642_v31 }
0x142b   : > { %v14997_v1 = vpop.eup %14996  ;;  %13907 = vmatprep.mubr.msk.f32.mxu0 %vm1084_vm2, %v7338_v44  ;;  %13873 = vmatpush3.msra.mxu1 %v7353_v27 }
0x142c   : > { %v7339_v6 = vadd.f32 %v18953_v63, %v7319_v36  ;;  %v7301_v0 = vmul.f32 %v14997_v1, %v18946_v2  ;;  %v8841_v2 = vrot.slane %v19042_v37, %v18727_v62  ;;  %v8744_v22 = vsel %vm1084_vm2, %v8743_v14, 0.0  ;;  %13874 = vmatprep.subr.mxu1 %v20642_v31 }
0x142d   : > { %13875 = vmatpush3.msra.mxu1 %v7352_v11 }
0x142e   : > { %13908 = vmatmul.mubr.msk.f32.gmra.mxu0 %vm1084_vm2, %v7339_v6  ;;  %v7321_v53 = vmul.f32 %v18942_v61, %v7301_v0  ;;  %13876 = vmatprep.subr.mxu1 %v20642_v31 }
0x142f   : > { %13910 = vmatprep.mubr.msk.f32.mxu0 %vm1084_vm2, %v7340_v45  ;;  %13877 = vmatpush3.msra.mxu1 %v7351_v49 }
0x1430   : > { %v7341_v42 = vadd.f32 %v18953_v63, %v7321_v53  ;;  %13913 = vmatprep.subr.mxu1 %v20642_v31 }
0x1432   : > { %13911 = vmatmul.mubr.msk.f32.gmra.mxu0 %vm1084_vm2, %v7341_v42 }
0x1433   : > { %13961 = vmatprep.mubr.msk.f32.mxu0 %vm15112_vm4, %v20642_v31 }
0x14d6   : > { %v13891_v12 = vpop.f32.mrf.mxu0 }
0x14d7   : > { %v19046_v33 = vadd.f32 %v13891_v12, %v8841_v2 }
0x14d8   : > { %v8956_v61 = vpop.f32.mrf.mxu0 }
0x14d9   : > { %v19048_v20 = vadd.f32 %v8956_v61, %v8841_v2  ;;  %9060 = vrot.lane.b32.xlu1 %v19046_v33, %s20651_s6 }
0x14da   : > { %v13894_v63 = vpop.f32.mrf.mxu0 }
0x14db   : > { %9202 = vxpose.xlu0.b32.start [1/16] (narrow) %v19048_v20, 8  ;;  %v19055_v4 = vadd.f32 %v13894_v63, %v8841_v2 }
0x14dc   : > { %v8966_v55 = vpop.f32.mrf.mxu0 }
0x14dd   : > { %9154 = vrot.lane.b32.xlu1 %v19048_v20, %s20652_s7  ;;  %v19058_v38 = vadd.f32 %v8966_v55, %v8841_v2 }
0x14de   : > { %v13897_v24 = vpop.f32.mrf.mxu0 }
0x14df   : > { %9203 = vxpose.xlu0.b32.cont [2/16] (narrow) %v19046_v33, 8  ;;  %v19071_v9 = vadd.f32 %v13897_v24, %v8841_v2 }
0x14e0   : > { %v8976_v21 = vpop.f32.mrf.mxu0 }
0x14e1   : > { %9064 = vrot.lane.b32.xlu1 %v19055_v4, %s20651_s6  ;;  %v19066_v13 = vadd.f32 %v8976_v21, %v8841_v2  ;;  %v8754_v21 = vrot.slane %v19042_v37, %v18391_v56 }
0x14e2   : > { %v13900_v60 = vpop.f32.mrf.mxu0 }
0x14e3   : > { %9204 = vxpose.xlu0.b32.cont [3/16] (narrow) %v19058_v38, 8  ;;  %v19081_v8 = vadd.f32 %v13900_v60, %v8841_v2 }
0x14e4   : > { %v8986_v23 = vpop.f32.mrf.mxu0 }
0x14e5   : > { %9112 = vrot.lane.b32.xlu1 %v19055_v4, %s20650_s3  ;;  %v19076_v34 = vadd.f32 %v8986_v23, %v8841_v2 }
0x14e6   : > { %v13903_v54 = vpop.f32.mrf.mxu0 }
0x14e7   : > { %9205 = vxpose.xlu0.b32.cont [4/16] (narrow) %v19055_v4, 8  ;;  %v19091_v18 = vadd.f32 %v13903_v54, %v8841_v2  ;;  %v8759_v54 = vrot.slane %v19042_v37, %v18404_v3 }
0x14e8   : > { %v8996_v29 = vpop.f32.mrf.mxu0 }
0x14e9   : > { %9062 = vrot.lane.b32.xlu1 %v19058_v38, %s20651_s6  ;;  %v19086_v48 = vadd.f32 %v8996_v29, %v8841_v2 }
0x14ea   : > { %v13906_v35 = vpop.f32.mrf.mxu0 }
0x14eb   : > { %9206 = vxpose.xlu0.b32.cont [5/16] (narrow) %v19066_v13, 8  ;;  %v19099_v5 = vadd.f32 %v13906_v35, %v8841_v2 }
0x14ec   : > { %v9006_v46 = vpop.f32.mrf.mxu0 }
0x14ed   : > { %9158 = vrot.lane.b32.xlu1 %v19058_v38, %s20652_s7  ;;  %v19096_v32 = vadd.f32 %v9006_v46, %v8841_v2 }
0x14ee   : > { %v13909_v57 = vpop.f32.mrf.mxu0 }
0x14ef   : > { %9207 = vxpose.xlu0.b32.cont [6/16] (narrow) %v19071_v9, 8  ;;  %v19105_v15 = vadd.f32 %v13909_v57, %v8841_v2 }
0x14f0   : > { %v9016_v58 = vpop.f32.mrf.mxu0 }
0x14f1   : > { %9116 = vrot.lane.b32.xlu1 %v19071_v9, %s20650_s3  ;;  %v19102_v41 = vadd.f32 %v9016_v58, %v8841_v2 }
0x14f2   : > { %v13912_v39 = vpop.f32.mrf.mxu0 }
0x14f3   : > { %9208 = vxpose.xlu0.b32.cont [7/16] (narrow) %v19076_v34, 8  ;;  %v19112_v47 = vadd.f32 %v13912_v39, %v8841_v2 }
0x14f4   : > { %v9026_v10 = vpop.f32.mrf.mxu0 }
0x14f5   : > { %9066 = vrot.lane.b32.xlu1 %v19066_v13, %s20651_s6  ;;  %v19108_v19 = vadd.f32 %v9026_v10, %v8841_v2  ;;  %20662 = vst [vmem:[#allocation85_spill] sm:$0xff] %v19112_v47 }
0x14f7   : > { %9209 = vxpose.xlu0.b32.cont [8/16] (narrow) %v19081_v8, 8 }
0x14f9   : > { %9070 = vrot.lane.b32.xlu1 %v19076_v34, %s20651_s6 }
0x14fb   : > { %9210 = vxpose.xlu0.b32.cont [9/16] (narrow) %v19086_v48, 8 }
0x14fd   : > { %9074 = vrot.lane.b32.xlu1 %v19086_v48, %s20651_s6 }
0x14ff   : > { %9211 = vxpose.xlu0.b32.cont [10/16] (narrow) %v19091_v18, 8 }
0x1503   : > { %9212 = vxpose.xlu0.b32.cont [11/16] (narrow) %v19096_v32, 8 }
0x1507   : > { %9213 = vxpose.xlu0.b32.cont [12/16] (narrow) %v19099_v5, 8 }
0x150b   : > { %9214 = vxpose.xlu0.b32.cont [13/16] (narrow) %v19102_v41, 8 }
0x150f   : > { %9215 = vxpose.xlu0.b32.cont [14/16] (narrow) %v19105_v15, 8 }
0x1513   : > { %9216 = vxpose.xlu0.b32.cont [15/16] (narrow) %v19108_v19, 8 }
0x1517   : > { %9217 = vxpose.xlu0.b32.end [16/16] (narrow) %v19112_v47, 8 }
0x1521   : > { %8745 = vadd.xlane.f32.xlu1 %v8744_v22 }
0x1532   : > { %9162 = vrot.lane.b32.xlu1 %v19066_v13, %s20652_s7 }
0x1536   : > { %9120 = vrot.lane.b32.xlu1 %v19081_v8, %s20650_s3 }
0x153a   : > { %9078 = vrot.lane.b32.xlu1 %v19096_v32, %s20651_s6 }
0x153e   : > { %9166 = vrot.lane.b32.xlu1 %v19076_v34, %s20652_s7 }
0x1540   : > { %9058 = vrot.lane.b32.xlu0 %v19048_v20, %s20651_s6 }
0x1542   : > { %9124 = vrot.lane.b32.xlu1 %v19091_v18, %s20650_s3 }
0x1544   : > { %9106 = vrot.lane.b32.xlu0 %v19048_v20, %s20650_s3 }
0x1546   : > { %9082 = vrot.lane.b32.xlu1 %v19102_v41, %s20651_s6 }
0x1548   : > { %9108 = vrot.lane.b32.xlu0 %v19046_v33, %s20650_s3 }
0x154a   : > { %9170 = vrot.lane.b32.xlu1 %v19086_v48, %s20652_s7 }
0x154b   : > { %v19189_v50 = vpop.permute.xlu1 %9060 }
0x154c   : > { %9110 = vrot.lane.b32.xlu0 %v19058_v38, %s20650_s3 }
0x154e   : > { %9128 = vrot.lane.b32.xlu1 %v19099_v5, %s20650_s3 }
0x154f   : > { %v19195_v26 = vpop.permute.xlu1 %9154 }
0x1550   : > { %9068 = vrot.lane.b32.xlu0 %v19071_v9, %s20651_s6 }
0x1552   : > { %9086 = vrot.lane.b32.xlu1 %v19108_v19, %s20651_s6 }
0x1553   : > { %v19199_v44 = vpop.permute.xlu1 %9064 }
0x1554   : > { %9156 = vrot.lane.b32.xlu0 %v19046_v33, %s20652_s7 }
0x1556   : > { %9174 = vrot.lane.b32.xlu1 %v19096_v32, %s20652_s7 }
0x1557   : > { %v19205_v59 = vpop.permute.xlu1 %9112  ;;  %v9218_v12 = vpop.trf.xlu0 }
0x1558   : > { %9114 = vrot.lane.b32.xlu0 %v19066_v13, %s20650_s3 }
0x155a   : > { %9132 = vrot.lane.b32.xlu1 %v19105_v15, %s20650_s3 }
0x155b   : > { %v19209_v36 = vpop.permute.xlu1 %9062 }
0x155c   : > { %9072 = vrot.lane.b32.xlu0 %v19081_v8, %s20651_s6 }
0x155e   : > { %9134 = vrot.lane.b32.xlu1 %v19108_v19, %s20650_s3 }
0x155f   : > { %v19215_v1 = vpop.permute.xlu1 %9158 }
0x1560   : > { %9160 = vrot.lane.b32.xlu0 %v19055_v4, %s20652_s7 }
0x1562   : > { %9136 = vrot.lane.b32.xlu1 %v19112_v47, %s20650_s3 }
0x1563   : > { %v19219_v6 = vpop.permute.xlu1 %9116 }
0x1564   : > { %9118 = vrot.lane.b32.xlu0 %v19076_v34, %s20650_s3 }
0x1566   : > { %9182 = vrot.lane.b32.xlu1 %v19108_v19, %s20652_s7 }
0x1567   : > { %v19225_v0 = vpop.permute.xlu1 %9066 }
0x1568   : > { %9076 = vrot.lane.b32.xlu0 %v19091_v18, %s20651_s6 }
0x156b   : > { %v19229_v45 = vpop.permute.xlu1 %9070 }
0x156c   : > { %9164 = vrot.lane.b32.xlu0 %v19071_v9, %s20652_s7 }
0x156f   : > { %v19231_v53 = vpop.permute.xlu1 %9074 }
0x1570   : > { %9122 = vrot.lane.b32.xlu0 %v19086_v48, %s20650_s3 }
0x1574   : > { %9080 = vrot.lane.b32.xlu0 %v19099_v5, %s20651_s6 }
0x1578   : > { %9168 = vrot.lane.b32.xlu0 %v19081_v8, %s20652_s7 }
0x157c   : > { %9126 = vrot.lane.b32.xlu0 %v19096_v32, %s20650_s3 }
0x1580   : > { %9084 = vrot.lane.b32.xlu0 %v19105_v15, %s20651_s6 }
0x1584   : > { %9172 = vrot.lane.b32.xlu0 %v19091_v18, %s20652_s7 }
0x1588   : > { %9130 = vrot.lane.b32.xlu0 %v19102_v41, %s20650_s3 }
0x158c   : > { %9088 = vrot.lane.b32.xlu0 %v19112_v47, %s20651_s6 }
0x1590   : > { %9176 = vrot.lane.b32.xlu0 %v19099_v5, %s20652_s7 }
0x1594   : > { %9178 = vrot.lane.b32.xlu0 %v19102_v41, %s20652_s7 }
0x1598   : > { %9180 = vrot.lane.b32.xlu0 %v19105_v15, %s20652_s7 }
0x159c   : > { %9184 = vrot.lane.b32.xlu0 %v19112_v47, %s20652_s7 }
0x15aa   : > { %v8746_v42 = vpop.xlane.xlu1 %8745 }
0x15ab   : > { %v8747_v2 = vmul.f32 0.03125, %v8746_v42 }
0x15ad   : > { %v8748_v61 = vadd.f32 1e-05, %v8747_v2 }
0x15ae   : > { %v19260_v58 = vpop.permute.xlu1 %9162 }
0x15af   : > { %14998 = vrsqrt.f32 %v8748_v61 }
0x15b2   : > { %v19233_v63 = vpop.permute.xlu0 %9058  ;;  %v19268_v25 = vpop.permute.xlu1 %9120 }
0x15b3   : > { %9234 = vxpose.xlu1.b32.start [1/16] (narrow) %v19233_v63, 8 }
0x15b6   : > { %v19236_v55 = vpop.permute.xlu0 %9106  ;;  %v19273_v14 = vpop.permute.xlu1 %9078 }
0x15b7   : > { %9235 = vxpose.xlu1.b32.cont [2/16] (narrow) %v19189_v50, 8  ;;  %v14448_v43 = vpack.i.bf16 %v19071_v9, %v19236_v55 }
0x15ba   : > { %v19239_v24 = vpop.permute.xlu0 %9108  ;;  %v19280_v27 = vpop.permute.xlu1 %9166 }
0x15bb   : > { %9236 = vxpose.xlu1.b32.cont [3/16] (narrow) %v19209_v36, 8 }
0x15bc   : > { %v14999_v60 = vpop.eup %14998 }
0x15bd   : > { %v8750_v23 = vmul.f32 %v14999_v60, %v19116_v17 }
0x15be   : > { %v19247_v29 = vpop.permute.xlu0 %9110  ;;  %v19285_v49 = vpop.permute.xlu1 %9124 }
0x15bf   : > { %9237 = vxpose.xlu1.b32.cont [4/16] (narrow) %v19199_v44, 8  ;;  %v8755_v35 = vmul.f32 %v8754_v21, %v8750_v23 }
0x15c1   : > { %v19250_v46 = vadd.f32 %v8759_v54, %v8755_v35 }
0x15c2   : > { %v19252_v57 = vpop.permute.xlu0 %9068 }
0x15c3   : > { %20664 = vst [vmem:[#allocation105_spill] sm:$0xff] %v19250_v46  ;;  %13879 = vmatmul.mubr.msk.f32.vlgmr.msra.gmra.mxu1 %vm1084_vm2, %v19250_v46  ;;  %9238 = vxpose.xlu1.b32.cont [5/16] (narrow) %v19225_v0, 8 }
0x15c4   : > { %13914 = vmatpush3.msra.mxu1 %v9218_v12  ;;  %13915 = vmatprep.mubr.msk.f32.mxu1 %vm15112_vm4, %v20642_v31  ;;  %v19292_v12 = vpop.permute.xlu1 %9082 }
0x15c5   : > { %13918 = vmatprep.subr.mxu1 %v20642_v31 }
0x15c6   : > { %v19262_v39 = vpop.permute.xlu0 %9156 }
0x15c7   : > { %9239 = vxpose.xlu1.b32.cont [6/16] (narrow) %v19252_v57, 8 }
0x15c8   : > { %v19297_v21 = vpop.permute.xlu1 %9170 }
0x15ca   : > { %v19265_v10 = vpop.permute.xlu0 %9114 }
0x15cb   : > { %9240 = vxpose.xlu1.b32.cont [7/16] (narrow) %v19229_v45, 8 }
0x15cc   : > { %v19304_v54 = vpop.permute.xlu1 %9128 }
0x15ce   : > { %v19270_v17 = vpop.permute.xlu0 %9072 }
0x15cf   : > { %9241 = vxpose.xlu1.b32.cont [8/16] (narrow) %v19270_v17, 8 }
0x15d0   : > { %v19309_v62 = vpop.permute.xlu1 %9086 }
0x15d1   : > { %20666 = vst [vmem:[#allocation103_spill] sm:$0xff] %v19309_v62 }
0x15d2   : > { %v19275_v22 = vpop.permute.xlu0 %9160 }
0x15d3   : > { %9242 = vxpose.xlu1.b32.cont [9/16] (narrow) %v19231_v53, 8 }
0x15d4   : > { %v19319_v51 = vpop.permute.xlu1 %9174 }
0x15d6   : > { %v19278_v40 = vpop.permute.xlu0 %9118 }
0x15d8   : > { %v19321_v28 = vpop.permute.xlu1 %9132 }
0x15da   : > { %v19282_v11 = vpop.permute.xlu0 %9076 }
0x15db   : > { %9243 = vxpose.xlu1.b32.cont [10/16] (narrow) %v19282_v11, 8 }
0x15dc   : > { %v19323_v46 = vpop.permute.xlu1 %9134 }
0x15dd   : > { %20668 = vst [vmem:[#allocation50_spill] sm:$0xff] %v19323_v46 }
0x15de   : > { %v19287_v42 = vpop.permute.xlu0 %9164 }
0x15df   : > { %9244 = vxpose.xlu1.b32.cont [11/16] (narrow) %v19273_v14, 8 }
0x15e0   : > { %v19325_v30 = vpop.permute.xlu1 %9136 }
0x15e2   : > { %v19290_v2 = vpop.permute.xlu0 %9122 }
0x15e4   : > { %v19329_v7 = vpop.permute.xlu1 %9182 }
0x15e6   : > { %v19294_v61 = vpop.permute.xlu0 %9080 }
0x15e7   : > { %9245 = vxpose.xlu1.b32.cont [12/16] (narrow) %v19294_v61, 8 }
0x15ea   : > { %v19299_v60 = vpop.permute.xlu0 %9168 }
0x15eb   : > { %9246 = vxpose.xlu1.b32.cont [13/16] (narrow) %v19292_v12, 8 }
0x15ee   : > { %v19302_v23 = vpop.permute.xlu0 %9126 }
0x15f2   : > { %v19306_v35 = vpop.permute.xlu0 %9084 }
0x15f3   : > { %20665 = vst [vmem:[#allocation106_spill] sm:$0xff] %v19306_v35  ;;  %9247 = vxpose.xlu1.b32.cont [14/16] (narrow) %v19306_v35, 8 }
0x15f6   : > { %v19311_v3 = vpop.permute.xlu0 %9172 }
0x15f7   : > { %9248 = vxpose.xlu1.b32.cont [15/16] (narrow) %v19309_v62, 8 }
0x15fa   : > { %v19314_v56 = vpop.permute.xlu0 %9130 }
0x15fe   : > { %v19316_v16 = vpop.permute.xlu0 %9088 }
0x15ff   : > { %20667 = vst [vmem:[#allocation104_spill] sm:$0xff] %v19316_v16  ;;  %9249 = vxpose.xlu1.b32.end [16/16] (narrow) %v19316_v16, 8 }
0x163f   : > { %v9250_v16 = vpop.trf.xlu1 }
0x1683   : > { %v8834_v62 = vpop.f32.mrf.mxu1 }
0x1684   : > { %v8835_v35 = vadd.f32 %v8834_v62, %v8764_v52  ;;  %v19362_v52 = vpop.permute.xlu0 %9176 }
0x1685   : > { %v13880_v47 = vpop.f32.mrf.mxu1 }
0x1686   : > { %9038 = vrot.lane.b32.xlu0 %v8835_v35, %s20650_s3  ;;  %13916 = vmatmul.mubr.msk.f32.vlgmr.msra.gmra.mxu1 %vm1710_vm3, %v8835_v35 }
0x1687   : > { %9036 = vrot.lane.b32.xlu1 %v8835_v35, %s20651_s6  ;;  %13920 = vmatprep.mubr.msk.f32.mxu1 %vm15112_vm4, %v20642_v31 }
0x1688   : > { %13919 = vmatpush3.msra.mxu1 %v9250_v16  ;;  %v19368_v16 = vpop.permute.xlu0 %9178 }
0x1689   : > { %13923 = vmatprep.subr.mxu1 %v20642_v31  ;;  %20669 = vst [vmem:[#allocation42_spill] sm:$0xff] %v19368_v16 }
0x168b   : > { %9040 = vrot.lane.b32.xlu1 %v8835_v35, %s20652_s7  ;;  %v14433_v35 = vpack.i.bf16 %v19233_v63, %v19058_v38  ;;  %v14468_v38 = vpack.i.bf16 %v19252_v57, %v19081_v8  ;;  %v14473_v8 = vpack.i.bf16 %v19262_v39, %v19205_v59  ;;  %v14553_v63 = vpack.i.bf16 %v19311_v3, %v19304_v54 }
0x168c   : > { %v19371_v62 = vpop.permute.xlu0 %9180 }
0x1690   : > { %v19375_v37 = vpop.permute.xlu0 %9184 }
0x16a4   : > { %9266 = vxpose.xlu0.b32.start [1/16] (narrow) %v19236_v55, 8  ;;  %v20672_v55 = vld [vmem:[#allocation103_spill] sm:$0xff] }
0x16a8   : > { %9267 = vxpose.xlu0.b32.cont [2/16] (narrow) %v19239_v24, 8 }
0x16ac   : > { %9268 = vxpose.xlu0.b32.cont [3/16] (narrow) %v19247_v29, 8 }
0x16b0   : > { %9269 = vxpose.xlu0.b32.cont [4/16] (narrow) %v19205_v59, 8 }
0x16b4   : > { %9298 = vxpose.xlu1.b32.start [1/16] (narrow) %v19195_v26, 8  ;;  %9270 = vxpose.xlu0.b32.cont [5/16] (narrow) %v19265_v10, 8 }
0x16b8   : > { %9299 = vxpose.xlu1.b32.cont [2/16] (narrow) %v19262_v39, 8  ;;  %9271 = vxpose.xlu0.b32.cont [6/16] (narrow) %v19219_v6, 8  ;;  %v14568_v39 = vpack.i.bf16 %v19362_v52, %v19321_v28 }
0x16bc   : > { %9300 = vxpose.xlu1.b32.cont [3/16] (narrow) %v19215_v1, 8  ;;  %9272 = vxpose.xlu0.b32.cont [7/16] (narrow) %v19278_v40, 8 }
0x16c0   : > { %9301 = vxpose.xlu1.b32.cont [4/16] (narrow) %v19275_v22, 8  ;;  %9273 = vxpose.xlu0.b32.cont [8/16] (narrow) %v19268_v25, 8 }
0x16c4   : > { %9302 = vxpose.xlu1.b32.cont [5/16] (narrow) %v19260_v58, 8  ;;  %9274 = vxpose.xlu0.b32.cont [9/16] (narrow) %v19290_v2, 8 }
0x16c8   : > { %9303 = vxpose.xlu1.b32.cont [6/16] (narrow) %v19287_v42, 8  ;;  %9275 = vxpose.xlu0.b32.cont [10/16] (narrow) %v19285_v49, 8 }
0x16cc   : > { %9304 = vxpose.xlu1.b32.cont [7/16] (narrow) %v19280_v27, 8  ;;  %9276 = vxpose.xlu0.b32.cont [11/16] (narrow) %v19302_v23, 8 }
0x16d0   : > { %9305 = vxpose.xlu1.b32.cont [8/16] (narrow) %v19299_v60, 8  ;;  %9277 = vxpose.xlu0.b32.cont [12/16] (narrow) %v19304_v54, 8 }
0x16d4   : > { %9306 = vxpose.xlu1.b32.cont [9/16] (narrow) %v19297_v21, 8  ;;  %9278 = vxpose.xlu0.b32.cont [13/16] (narrow) %v19314_v56, 8 }
0x16d8   : > { %9307 = vxpose.xlu1.b32.cont [10/16] (narrow) %v19311_v3, 8  ;;  %9279 = vxpose.xlu0.b32.cont [14/16] (narrow) %v19321_v28, 8 }
0x16dc   : > { %9308 = vxpose.xlu1.b32.cont [11/16] (narrow) %v19319_v51, 8  ;;  %9280 = vxpose.xlu0.b32.cont [15/16] (narrow) %v19323_v46, 8  ;;  %v14438_v46 = vpack.i.bf16 %v19189_v50, %v19055_v4  ;;  %v14488_v4 = vpack.i.bf16 %v19270_v17, %v19091_v18  ;;  %v14508_v18 = vpack.i.bf16 %v19282_v11, %v19099_v5 }
0x16dd   : > { %v14518_v50 = vpack.i.bf16 %v19273_v14, %v19102_v41  ;;  %v14528_v5 = vpack.i.bf16 %v19294_v61, %v19105_v15  ;;  %v14538_v41 = vpack.i.bf16 %v19292_v12, %v19108_v19  ;;  %v20670_v15 = vld [vmem:[#allocation85_spill] sm:$0xff]  ;;  %v14523_v19 = vpack.i.bf16 %v19280_v27, %v19290_v2 }
0x16e0   : > { %9309 = vxpose.xlu1.b32.cont [12/16] (narrow) %v19362_v52, 8  ;;  %9281 = vxpose.xlu0.b32.end [16/16] (narrow) %v19325_v30, 8 }
0x16e4   : > { %9310 = vxpose.xlu1.b32.cont [13/16] (narrow) %v19368_v16, 8  ;;  %v14428_v16 = vpack.i.bf16 %v19046_v33, %v19048_v20  ;;  %v14443_v33 = vpack.i.bf16 %v19209_v36, %v19066_v13  ;;  %v14453_v20 = vpack.i.bf16 %v19239_v24, %v19199_v44  ;;  %v14463_v13 = vpack.i.bf16 %v19195_v26, %v19247_v29 }
0x16e5   : > { %v14493_v26 = vpack.i.bf16 %v19275_v22, %v19219_v6  ;;  %v14503_v44 = vpack.i.bf16 %v19260_v58, %v19278_v40  ;;  %v14513_v36 = vpack.i.bf16 %v19287_v42, %v19268_v25  ;;  %v20671_v6 = vld [vmem:[#allocation106_spill] sm:$0xff]  ;;  %v14558_v24 = vpack.i.bf16 %v19314_v56, %v20672_v55 }
0x16e8   : > { %9311 = vxpose.xlu1.b32.cont [14/16] (narrow) %v19371_v62, 8 }
0x16ec   : > { %9312 = vxpose.xlu1.b32.cont [15/16] (narrow) %v19329_v7, 8 }
0x16f0   : > { %9313 = vxpose.xlu1.b32.end [16/16] (narrow) %v19375_v37, 8 }
0x16f8   : > { %v9039_v9 = vpop.permute.xlu0 %9038 }
0x16f9   : > { %v9037_v47 = vpop.permute.xlu1 %9036 }
0x16fa   : > { %13921 = vmatmul.mubr.msk.f32.vlgmr.msra.gmra.mxu1 %vm1710_vm3, %v9037_v47  ;;  %v14458_v47 = vpack.i.bf16 %v19225_v0, %v19076_v34  ;;  %v14498_v34 = vpack.i.bf16 %v19231_v53, %v19096_v32  ;;  %v14483_v32 = vpack.i.bf16 %v19215_v1, %v19265_v10  ;;  %v14548_v0 = vpack.i.bf16 %v20671_v6, %v20670_v15 }
0x16fb   : > { %13925 = vmatprep.mubr.msk.f32.mxu1 %vm15112_vm4, %v20642_v31  ;;  %v14543_v53 = vpack.i.bf16 %v19297_v21, %v19302_v23 }
0x16fd   : > { %v9041_v59 = vpop.permute.xlu1 %9040 }
0x1709   : > { %14434 = vrot.lane.b32.xlu0 %v14433_v35, %s20653_s8 }
0x170d   : > { %14449 = vrot.lane.b32.xlu0 %v14448_v43, %s20653_s8  ;;  %v14478_v43 = vpack.i.bf16 %v19229_v45, %v19086_v48  ;;  %v14533_v45 = vpack.i.bf16 %v19299_v60, %v19285_v49 }
0x170e   : > { %14429 = vrot.lane.b32.xlu1 %v14428_v16, %s20653_s8 }
0x1711   : > { %14459 = vrot.lane.b32.xlu0 %v14458_v47, %s20653_s8 }
0x1712   : > { %14439 = vrot.lane.b32.xlu1 %v14438_v46, %s20653_s8  ;;  %v20673_v46 = vld [vmem:[#allocation104_spill] sm:$0xff] }
0x1713   : > { %v14563_v57 = vpack.i.bf16 %v20673_v46, %v19319_v51 }
0x1715   : > { %14469 = vrot.lane.b32.xlu0 %v14468_v38, %s20653_s8 }
0x1716   : > { %14444 = vrot.lane.b32.xlu1 %v14443_v33, %s20653_s8 }
0x1719   : > { %14479 = vrot.lane.b32.xlu0 %v14478_v43, %s20653_s8 }
0x171a   : > { %14454 = vrot.lane.b32.xlu1 %v14453_v20, %s20653_s8 }
0x171d   : > { %14489 = vrot.lane.b32.xlu0 %v14488_v4, %s20653_s8 }
0x171e   : > { %14464 = vrot.lane.b32.xlu1 %v14463_v13, %s20653_s8 }
0x1720   : > { %v9282_v48 = vpop.trf.xlu0 }
0x1721   : > { %14499 = vrot.lane.b32.xlu0 %v14498_v34, %s20653_s8  ;;  %13924 = vmatpush3.msra.mxu1 %v9282_v48 }
0x1722   : > { %14474 = vrot.lane.b32.xlu1 %v14473_v8, %s20653_s8  ;;  %13926 = vmatmul.mubr.msk.f32.vlgmr.msra.gmra.mxu1 %vm1710_vm3, %v9039_v9 }
0x1723   : > { %13928 = vmatprep.subr.mxu1 %v20642_v31  ;;  %13930 = vmatprep.mubr.msk.f32.mxu1 %vm15112_vm4, %v20642_v31 }
0x1725   : > { %14509 = vrot.lane.b32.xlu0 %v14508_v18, %s20653_s8 }
0x1726   : > { %14484 = vrot.lane.b32.xlu1 %v14483_v32, %s20653_s8 }
0x1729   : > { %14519 = vrot.lane.b32.xlu0 %v14518_v50, %s20653_s8 }
0x172a   : > { %14494 = vrot.lane.b32.xlu1 %v14493_v26, %s20653_s8 }
0x172d   : > { %14529 = vrot.lane.b32.xlu0 %v14528_v5, %s20653_s8 }
0x172e   : > { %14504 = vrot.lane.b32.xlu1 %v14503_v44, %s20653_s8 }
0x1730   : > { %v9314_v1 = vpop.trf.xlu1 }
0x1731   : > { %13929 = vmatpush3.msra.mxu1 %v9314_v1  ;;  %14539 = vrot.lane.b32.xlu0 %v14538_v41, %s20653_s8 }
0x1732   : > { %14514 = vrot.lane.b32.xlu1 %v14513_v36, %s20653_s8  ;;  %13931 = vmatmul.mubr.msk.f32.vlgmr.msra.gmra.mxu1 %vm1710_vm3, %v9041_v59 }
0x1733   : > { %13933 = vmatprep.subr.mxu1 %v20642_v31  ;;  %13935 = vmatprep.mubr.msk.f32.mxu1 %vm15112_vm4, %v20642_v31 }
0x1735   : > { %14549 = vrot.lane.b32.xlu0 %v14548_v0, %s20653_s8 }
0x1736   : > { %14524 = vrot.lane.b32.xlu1 %v14523_v19, %s20653_s8 }
0x173a   : > { %14534 = vrot.lane.b32.xlu1 %v14533_v45, %s20653_s8 }
0x173e   : > { %14544 = vrot.lane.b32.xlu1 %v14543_v53, %s20653_s8 }
0x1742   : > { %14554 = vrot.lane.b32.xlu1 %v14553_v63, %s20653_s8 }
0x1746   : > { %14559 = vrot.lane.b32.xlu1 %v14558_v24, %s20653_s8  ;;  %v9398_v29 = vpop.f32.mrf.mxu1 }
0x1747   : > { %v19476_v3 = vmul.f32 0.35355338, %v9398_v29 }
0x1748   : > { %v13917_v58 = vpop.f32.mrf.mxu1 }
0x174a   : > { %14564 = vrot.lane.b32.xlu1 %v14563_v57, %s20653_s8 }
0x174e   : > { %14569 = vrot.lane.b32.xlu1 %v14568_v39, %s20653_s8 }
0x1754   : > { %9622 = vmax.xlane.f32.xlu0 %v19476_v3 }
0x177b   : > { %v14435_v10 = vpop.permute.xlu0 %14434 }
0x177c   : > { %v14437_v17 = vunpack.i.h.bf16 %v14435_v10  ;;  %v14436_v61 = vunpack.i.l.bf16 %v14435_v10 }
0x177f   : > { %v14450_v56 = vpop.permute.xlu0 %14449 }
0x1780   : > { %v14430_v25 = vpop.permute.xlu1 %14429  ;;  %v14452_v42 = vunpack.i.h.bf16 %v14450_v56  ;;  %v14451_v18 = vunpack.i.l.bf16 %v14450_v56 }
0x1781   : > { %v14431_v14 = vunpack.i.l.bf16 %v14430_v25  ;;  %v14432_v27 = vunpack.i.h.bf16 %v14430_v25 }
0x1783   : > { %v19479_v22 = vpack.i.bf16 %v14437_v17, %v14431_v14  ;;  %v14460_v51 = vpop.permute.xlu0 %14459 }
0x1784   : > { %v14440_v40 = vpop.permute.xlu1 %14439  ;;  %v14462_v21 = vunpack.i.h.bf16 %v14460_v51  ;;  %v14461_v47 = vunpack.i.l.bf16 %v14460_v51 }
0x1785   : > { %v14442_v11 = vunpack.i.h.bf16 %v14440_v40  ;;  %v14441_v43 = vunpack.i.l.bf16 %v14440_v40 }
0x1787   : > { %v19481_v49 = vpack.i.bf16 %v14442_v11, %v14432_v27  ;;  %v14470_v28 = vpop.permute.xlu0 %14469 }
0x1788   : > { %v14472_v2 = vunpack.i.h.bf16 %v14470_v28  ;;  %v14445_v12 = vpop.permute.xlu1 %14444  ;;  %v14471_v34 = vunpack.i.l.bf16 %v14470_v28 }
0x1789   : > { %v14447_v60 = vunpack.i.h.bf16 %v14445_v12  ;;  %v14446_v23 = vunpack.i.l.bf16 %v14445_v12 }
0x178a   : > { %v19483_v54 = vpack.i.bf16 %v14472_v2, %v14452_v42 }
0x178b   : > { %v19485_v52 = vpack.i.bf16 %v14447_v60, %v14436_v61  ;;  %v19487_v16 = vpack.i.bf16 %v14462_v21, %v14446_v23  ;;  %v14480_v35 = vpop.permute.xlu0 %14479 }
0x178c   : > { %v14482_v38 = vunpack.i.h.bf16 %v14480_v35  ;;  %v14455_v33 = vpop.permute.xlu1 %14454  ;;  %v14481_v44 = vunpack.i.l.bf16 %v14480_v35 }
0x178d   : > { %v14456_v20 = vunpack.i.l.bf16 %v14455_v33  ;;  %v14457_v36 = vunpack.i.h.bf16 %v14455_v33 }
0x178e   : > { %v19489_v4 = vpack.i.bf16 %v14482_v38, %v14461_v47 }
0x178f   : > { %v19491_v13 = vpack.i.bf16 %v14456_v20, %v14441_v43  ;;  %v14490_v9 = vpop.permute.xlu0 %14489 }
0x1790   : > { %v14492_v8 = vunpack.i.h.bf16 %v14490_v9  ;;  %v14465_v48 = vpop.permute.xlu1 %14464  ;;  %v14491_v19 = vunpack.i.l.bf16 %v14490_v9 }
0x1791   : > { %v14467_v32 = vunpack.i.h.bf16 %v14465_v48  ;;  %v14466_v63 = vunpack.i.l.bf16 %v14465_v48 }
0x1792   : > { %v19493_v50 = vpack.i.bf16 %v14492_v8, %v14471_v34 }
0x1793   : > { %v19495_v26 = vpack.i.bf16 %v14467_v32, %v14451_v18  ;;  %v14500_v5 = vpop.permute.xlu0 %14499 }
0x1794   : > { %v14502_v59 = vunpack.i.h.bf16 %v14500_v5  ;;  %v14475_v41 = vpop.permute.xlu1 %14474  ;;  %v14501_v57 = vunpack.i.l.bf16 %v14500_v5 }
0x1795   : > { %v14477_v1 = vunpack.i.h.bf16 %v14475_v41  ;;  %v14476_v10 = vunpack.i.l.bf16 %v14475_v41 }
0x1796   : > { %v19497_v15 = vpack.i.bf16 %v14502_v59, %v14481_v44 }
0x1797   : > { %v19499_v6 = vpack.i.bf16 %v14477_v1, %v14457_v36  ;;  %v14510_v0 = vpop.permute.xlu0 %14509 }
0x1798   : > { %v14512_v45 = vunpack.i.h.bf16 %v14510_v0  ;;  %v14485_v53 = vpop.permute.xlu1 %14484  ;;  %v14511_v51 = vunpack.i.l.bf16 %v14510_v0 }
0x1799   : > { %v14487_v55 = vunpack.i.h.bf16 %v14485_v53  ;;  %v14486_v11 = vunpack.i.l.bf16 %v14485_v53 }
0x179a   : > { %v19501_v24 = vpack.i.bf16 %v14512_v45, %v14491_v19 }
0x179b   : > { %v19503_v29 = vpack.i.bf16 %v14487_v55, %v14466_v63  ;;  %v14520_v46 = vpop.permute.xlu0 %14519 }
0x179c   : > { %v14522_v58 = vunpack.i.h.bf16 %v14520_v46  ;;  %v14495_v39 = vpop.permute.xlu1 %14494  ;;  %v14521_v61 = vunpack.i.l.bf16 %v14520_v46 }
0x179d   : > { %v14497_v56 = vunpack.i.h.bf16 %v14495_v39  ;;  %v14496_v23 = vunpack.i.l.bf16 %v14495_v39 }
0x179e   : > { %v19505_v25 = vpack.i.bf16 %v14522_v58, %v14501_v57 }
0x179f   : > { %v19507_v17 = vpack.i.bf16 %v14497_v56, %v14476_v10  ;;  %v14530_v14 = vpop.permute.xlu0 %14529 }
0x17a0   : > { %v14532_v40 = vunpack.i.h.bf16 %v14530_v14  ;;  %v14505_v27 = vpop.permute.xlu1 %14504  ;;  %v14531_v43 = vunpack.i.l.bf16 %v14530_v14 }
0x17a1   : > { %v14507_v28 = vunpack.i.h.bf16 %v14505_v27  ;;  %v14506_v34 = vunpack.i.l.bf16 %v14505_v27 }
0x17a2   : > { %v19509_v42 = vpack.i.bf16 %v14532_v40, %v14511_v51 }
0x17a3   : > { %v19511_v2 = vpack.i.bf16 %v14507_v28, %v14486_v11  ;;  %v14540_v12 = vpop.permute.xlu0 %14539 }
0x17a4   : > { %v14542_v21 = vunpack.i.h.bf16 %v14540_v12  ;;  %v14515_v60 = vpop.permute.xlu1 %14514  ;;  %v14541_v46 = vunpack.i.l.bf16 %v14540_v12  ;;  %v14583_v12 = vpack.i.bf16 %v19375_v37, %v19329_v7 }
0x17a5   : > { %v14517_v35 = vunpack.i.h.bf16 %v14515_v60  ;;  %v14516_v5 = vunpack.i.l.bf16 %v14515_v60 }
0x17a6   : > { %v19513_v47 = vpack.i.bf16 %v14542_v21, %v14521_v61  ;;  %v14578_v21 = vpack.i.bf16 %v19371_v62, %v19325_v30 }
0x17a7   : > { %v19515_v38 = vpack.i.bf16 %v14517_v35, %v14496_v23  ;;  %v14550_v33 = vpop.permute.xlu0 %14549 }
0x17a8   : > { %v14552_v20 = vunpack.i.h.bf16 %v14550_v33  ;;  %v14525_v9 = vpop.permute.xlu1 %14524  ;;  %v14551_v51 = vunpack.i.l.bf16 %v14550_v33 }
0x17a9   : > { %v14527_v8 = vunpack.i.h.bf16 %v14525_v9  ;;  %v14526_v36 = vunpack.i.l.bf16 %v14525_v9  ;;  %v20674_v9 = vld [vmem:[#allocation50_spill] sm:$0xff] }
0x17aa   : > { %v19517_v48 = vpack.i.bf16 %v14552_v20, %v14531_v43 }
0x17ab   : > { %v19519_v18 = vpack.i.bf16 %v14527_v8, %v14506_v34  ;;  %v20675_v34 = vld [vmem:[#allocation42_spill] sm:$0xff] }
0x17ac   : > { %v14535_v32 = vpop.permute.xlu1 %14534  ;;  %v14573_v8 = vpack.i.bf16 %v20675_v34, %v20674_v9  ;;  %v7362_v34 = vld [vmem:[%s20079_s13 + $0x18] sm:$0xff] }
0x17ad   : > { %v14537_v44 = vunpack.i.h.bf16 %v14535_v32  ;;  %v14536_v45 = vunpack.i.l.bf16 %v14535_v32  ;;  %13954 = vmatpush3.msra.mxu0 %v7362_v34 }
0x17ae   : > { %13955 = vmatprep.subr.mxu0 %v20642_v31 }
0x17af   : > { %v19521_v59 = vpack.i.bf16 %v14537_v44, %v14516_v5 }
0x17b0   : > { %v14545_v41 = vpop.permute.xlu1 %14544 }
0x17b1   : > { %v14547_v1 = vunpack.i.h.bf16 %v14545_v41  ;;  %v14546_v40 = vunpack.i.l.bf16 %v14545_v41 }
0x17b3   : > { %v19523_v0 = vpack.i.bf16 %v14547_v1, %v14526_v36 }
0x17b4   : > { %v19525_v19 = vpop.permute.xlu1 %14554 }
0x17b5   : > { %v14557_v53 = vunpack.i.h.bf16 %v19525_v19 }
0x17b7   : > { %v19528_v63 = vpack.i.bf16 %v14557_v53, %v14536_v45 }
0x17b8   : > { %v14560_v55 = vpop.permute.xlu1 %14559 }
0x17b9   : > { %v14561_v57 = vunpack.i.l.bf16 %v14560_v55 }
0x17ba   : > { %v9470_v58 = vpop.f32.mrf.mxu1 }
0x17bb   : > { %v19530_v39 = vpack.i.bf16 %v14561_v57, %v14541_v46  ;;  %v9619_v10 = vmul.f32 0.35355338, %v9470_v58 }
0x17bc   : > { %v13922_v56 = vpop.f32.mrf.mxu1  ;;  %v14565_v14 = vpop.permute.xlu1 %14564 }
0x17bd   : > { %v14567_v27 = vunpack.i.h.bf16 %v14565_v14  ;;  %v14566_v11 = vunpack.i.l.bf16 %v14565_v14  ;;  %9624 = vmax.xlane.f32.xlu1 %v9619_v10  ;;  %v14562_v14 = vunpack.i.h.bf16 %v14560_v55 }
0x17bf   : > { %v19532_v28 = vpack.i.bf16 %v14567_v27, %v14551_v51  ;;  %v19534_v61 = vpack.i.bf16 %v14566_v11, %v14546_v40 }
0x17c0   : > { %v19546_v37 = vpop.permute.xlu1 %14569 }
0x17ce   : > { %14579 = vrot.lane.b32.xlu1 %v14578_v21, %s20653_s8 }
0x17d2   : > { %14584 = vrot.lane.b32.xlu1 %v14583_v12, %s20653_s8 }
0x17dd   : > { %v9623_v30 = vpop.xlane.xlu0 %9622 }
0x17de   : > { %v9630_v62 = vsub.f32 %v19476_v3, %v9623_v30 }
0x17e0   : > { %v9634_v32 = vmul.f32 1.442695, %v9630_v62 }
0x17e2   : > { %v9542_v60 = vpop.f32.mrf.mxu1  ;;  %15000 = vpow2.f32 %v9634_v32 }
0x17e3   : > { %v9620_v23 = vmul.f32 0.35355338, %v9542_v60 }
0x17e4   : > { %v13927_v35 = vpop.f32.mrf.mxu1 }
0x17e5   : > { %9626 = vmax.xlane.f32.xlu0 %v9620_v23 }
0x17ef   : > { %v15001_v7 = vpop.eup %15000 }
0x17f2   : > { %v9614_v33 = vpop.f32.mrf.mxu1 }
0x17f3   : > { %v9621_v43 = vmul.f32 0.35355338, %v9614_v33 }
0x17f4   : > { %v13932_v20 = vpop.f32.mrf.mxu1 }
0x17f5   : > { %9628 = vmax.xlane.f32.xlu0 %v9621_v43 }
0x180b   : > { %14574 = vrot.lane.b32.xlu0 %v14573_v8, %s20653_s8 }
0x182a   : > { %9642 = vadd.xlane.f32.xlu0 %v15001_v7 }
0x1846   : > { %v9625_v5 = vpop.xlane.xlu1 %9624 }
0x1847   : > { %v9631_v44 = vsub.f32 %v9619_v10, %v9625_v5 }
0x1849   : > { %v9636_v41 = vmul.f32 1.442695, %v9631_v44 }
0x184b   : > { %15002 = vpow2.f32 %v9636_v41  ;;  %v20676_v41 = vld [vmem:[#allocation87_spill] sm:$0xff] }
0x1858   : > { %v19548_v36 = vpop.eup %15002 }
0x1859   : > { %9644 = vadd.xlane.f32.xlu1 %v19548_v36 }
0x186e   : > { %v9627_v1 = vpop.xlane.xlu0 %9626 }
0x186f   : > { %v9632_v45 = vsub.f32 %v9620_v23, %v9627_v1 }
0x1871   : > { %v9638_v53 = vmul.f32 1.442695, %v9632_v45 }
0x1873   : > { %15004 = vpow2.f32 %v9638_v53 }
0x187e   : > { %v9629_v46 = vpop.xlane.xlu0 %9628 }
0x187f   : > { %v9633_v3 = vsub.f32 %v9621_v43, %v9629_v46 }
0x1880   : > { %v19551_v57 = vpop.eup %15004 }
0x1881   : > { %v9640_v58 = vmul.f32 1.442695, %v9633_v3  ;;  %9646 = vadd.xlane.f32.xlu0 %v19551_v57 }
0x1882   : > { %v14575_v56 = vpop.permute.xlu0 %14574 }
0x1883   : > { %15006 = vpow2.f32 %v9640_v58  ;;  %v14577_v10 = vunpack.i.h.bf16 %v14575_v56 }
0x1885   : > { %v14649_v51 = vpack.i.bf16 %v14577_v10, %v14562_v14  ;;  %v20677_v14 = vld [vmem:[#allocation40_spill] sm:$0xff] }
0x1890   : > { %v19554_v40 = vpop.eup %15006 }
0x1891   : > { %9648 = vadd.xlane.f32.xlu1 %v19554_v40 }
0x18ae   : > { %14589 = vxpose.xlu0.b32.start [1/16] (narrow) %v19479_v22, 8  ;;  %v14572_v22 = vunpack.i.h.bf16 %v19546_v37 }
0x18b2   : > { %14591 = vxpose.xlu0.b32.cont [2/16] (narrow) %v19481_v49, 8  ;;  %v14556_v49 = vunpack.i.l.bf16 %v19525_v19 }
0x18b3   : > { %v9643_v27 = vpop.xlane.xlu0 %9642 }
0x18b4   : > { %15008 = vrcp.f32 %v9643_v27 }
0x18b6   : > { %14593 = vxpose.xlu0.b32.cont [3/16] (narrow) %v19485_v52, 8  ;;  %v14580_v52 = vpop.permute.xlu1 %14579 }
0x18ba   : > { %14595 = vxpose.xlu0.b32.cont [4/16] (narrow) %v19491_v13, 8  ;;  %v14585_v13 = vpop.permute.xlu1 %14584 }
0x18be   : > { %14597 = vxpose.xlu0.b32.cont [5/16] (narrow) %v19487_v16, 8  ;;  %v14582_v16 = vunpack.i.h.bf16 %v14580_v52 }
0x18c1   : > { %v15009_v55 = vpop.eup %15008 }
0x18c2   : > { %14599 = vxpose.xlu0.b32.cont [6/16] (narrow) %v19483_v54, 8  ;;  %v9654_v11 = vmul.f32 %v15009_v55, %v15001_v7  ;;  %v14647_v54 = vpack.i.bf16 %v14572_v22, %v14556_v49  ;;  %v7360_v55 = vld [vmem:[%s20079_s13 + $0x8] sm:$0xff] }
0x18c4   : > { %13934 = vmatpush3.xpose.msra.mxu1 %v9654_v11  ;;  %14626 = vxpose.xlu1.b32.start [1/16] (narrow) %v19495_v26, 8  ;;  %v14576_v26 = vunpack.i.l.bf16 %v14575_v56  ;;  %v7361_v56 = vld [vmem:[%s20079_s13 + $0x10] sm:$0xff] }
0x18c5   : > { %13938 = vmatprep.subr.mxu1 %v20642_v31  ;;  %13956 = vmatpush3.msra.mxu0 %v7361_v56 }
0x18c6   : > { %14601 = vxpose.xlu0.b32.cont [7/16] (narrow) %v19489_v4, 8  ;;  %v14571_v4 = vunpack.i.l.bf16 %v19546_v37  ;;  %13957 = vmatprep.subr.mxu0 %v20642_v31 }
0x18c7   : > { %13958 = vmatpush3.msra.mxu0 %v7360_v55 }
0x18c8   : > { %14628 = vxpose.xlu1.b32.cont [2/16] (narrow) %v19499_v6, 8  ;;  %v14587_v6 = vunpack.i.h.bf16 %v14585_v13  ;;  %13959 = vmatprep.subr.mxu0 %v20642_v31 }
0x18ca   : > { %14603 = vxpose.xlu0.b32.cont [8/16] (narrow) %v19493_v50, 8  ;;  %v14651_v50 = vpack.i.bf16 %v14582_v16, %v14571_v4 }
0x18cc   : > { %14630 = vxpose.xlu1.b32.cont [3/16] (narrow) %v19503_v29, 8  ;;  %v14581_v29 = vunpack.i.l.bf16 %v14580_v52  ;;  %v7359_v52 = vld [vmem:[%s20079_s13] sm:$0xff] }
0x18cd   : > { %13960 = vmatpush3.msra.mxu0 %v7359_v52  ;;  %v20682_v52 = vld [vmem:[#allocation93_spill] sm:$0xff] }
0x18ce   : > { %14605 = vxpose.xlu0.b32.cont [9/16] (narrow) %v19497_v15, 8  ;;  %v14586_v15 = vunpack.i.l.bf16 %v14585_v13  ;;  %13975 = vmatprep.subr.mxu0 %v20642_v31 }
0x18d0   : > { %14632 = vxpose.xlu1.b32.cont [4/16] (narrow) %v19507_v17, 8 }
0x18d2   : > { %14607 = vxpose.xlu0.b32.cont [10/16] (narrow) %v19501_v24, 8  ;;  %v14653_v24 = vpack.i.bf16 %v14586_v15, %v14576_v26 }
0x18d4   : > { %14634 = vxpose.xlu1.b32.cont [5/16] (narrow) %v19511_v2, 8 }
0x18d6   : > { %14609 = vxpose.xlu0.b32.cont [11/16] (narrow) %v19505_v25, 8  ;;  %v14655_v25 = vpack.i.bf16 %v14587_v6, %v14581_v29 }
0x18d8   : > { %14636 = vxpose.xlu1.b32.cont [6/16] (narrow) %v19515_v38, 8 }
0x18da   : > { %14611 = vxpose.xlu0.b32.cont [12/16] (narrow) %v19509_v42, 8 }
0x18dc   : > { %14638 = vxpose.xlu1.b32.cont [7/16] (narrow) %v19519_v18, 8 }
0x18de   : > { %14613 = vxpose.xlu0.b32.cont [13/16] (narrow) %v19513_v47, 8 }
0x18e0   : > { %14640 = vxpose.xlu1.b32.cont [8/16] (narrow) %v19521_v59, 8 }
0x18e2   : > { %14615 = vxpose.xlu0.b32.cont [14/16] (narrow) %v19517_v48, 8  ;;  %v9645_v17 = vpop.xlane.xlu1 %9644 }
0x18e3   : > { %15010 = vrcp.f32 %v9645_v17 }
0x18e4   : > { %14642 = vxpose.xlu1.b32.cont [9/16] (narrow) %v19523_v0, 8 }
0x18e6   : > { %14617 = vxpose.xlu0.b32.cont [15/16] (narrow) %v19530_v39, 8 }
0x18e8   : > { %14644 = vxpose.xlu1.b32.cont [10/16] (narrow) %v19528_v63, 8 }
0x18ea   : > { %14619 = vxpose.xlu0.b32.end [16/16] (narrow) %v19532_v28, 8 }
0x18ec   : > { %14646 = vxpose.xlu1.b32.cont [11/16] (narrow) %v19534_v61, 8 }
0x18f0   : > { %14648 = vxpose.xlu1.b32.cont [12/16] (narrow) %v14647_v54, 8  ;;  %v15011_v2 = vpop.eup %15010 }
0x18f1   : > { %v9655_v48 = vmul.f32 %v15011_v2, %v19548_v36 }
0x18f4   : > { %14650 = vxpose.xlu1.b32.cont [13/16] (narrow) %v14649_v51, 8 }
0x18f8   : > { %14652 = vxpose.xlu1.b32.cont [14/16] (narrow) %v14651_v50, 8 }
0x18fc   : > { %14654 = vxpose.xlu1.b32.cont [15/16] (narrow) %v14653_v24, 8 }
0x1900   : > { %14656 = vxpose.xlu1.b32.end [16/16] (narrow) %v14655_v25, 8 }
0x190a   : > { %v9647_v42 = vpop.xlane.xlu0 %9646 }
0x190b   : > { %15012 = vrcp.f32 %v9647_v42 }
0x1918   : > { %v15013_v18 = vpop.eup %15012 }
0x1919   : > { %v9656_v19 = vmul.f32 %v15013_v18, %v19551_v57 }
0x191a   : > { %v9649_v0 = vpop.xlane.xlu1 %9648 }
0x191b   : > { %15014 = vrcp.f32 %v9649_v0 }
0x1928   : > { %v15015_v63 = vpop.eup %15014 }
0x1929   : > { %v9657_v61 = vmul.f32 %v15015_v63, %v19554_v40 }
0x192a   : > { %v14620_v47 = vpop.trf.xlu0 }
0x192b   : > { %v14621_v38 = vunpack.i.l.bf16 %v14620_v47  ;;  %v14624_v59 = vunpack.i.h.bf16 %v14620_v47 }
0x192d   : > { %13936 = vmatmul.mubr.f32.vlgmr.msra.gmra.mxu1 %v14621_v38 }
0x192e   : > { %13939 = vmatpush3.xpose.msra.mxu1 %v9655_v48  ;;  %13940 = vmatprep.mubr.msk.f32.mxu1 %vm15112_vm4, %v20642_v31 }
0x192f   : > { %13943 = vmatprep.subr.mxu1 %v20642_v31 }
0x1931   : > { %13941 = vmatmul.mubr.f32.vlgmr.msra.gmra.mxu1 %v14624_v59 }
0x1932   : > { %13944 = vmatpush3.xpose.msra.mxu1 %v9656_v19  ;;  %13945 = vmatprep.mubr.msk.f32.mxu1 %vm15112_vm4, %v20642_v31 }
0x1933   : > { %13948 = vmatprep.subr.mxu1 %v20642_v31 }
0x1940   : > { %v14657_v39 = vpop.trf.xlu1 }
0x1941   : > { %v14658_v28 = vunpack.i.l.bf16 %v14657_v39  ;;  %v14661_v21 = vunpack.i.h.bf16 %v14657_v39 }
0x1943   : > { %13946 = vmatmul.mubr.f32.vlgmr.msra.gmra.mxu1 %v14658_v28  ;;  %v15043_v28 = vld [vmem:[%s20082_s16] sm:$0xff] }
0x1944   : > { %13949 = vmatpush3.xpose.msra.mxu1 %v9657_v61  ;;  %13950 = vmatprep.mubr.msk.f32.mxu1 %vm15112_vm4, %v20642_v31  ;;  %v20678_v61 = vld [vmem:[#allocation47_spill] sm:$0xff] }
0x1945   : > { %13964 = vmatprep.subr.mxu1 %v20642_v31 }
0x1947   : > { %13951 = vmatmul.mubr.f32.vlgmr.msra.gmra.mxu1 %v14661_v21  ;;  %v10540_v21 = vrot.slane %v15043_v28, %v20678_v61 }
0x1948   : > { %13972 = vmatprep.mubr.msk.f32.mxu1 %vm15112_vm4, %v20642_v31 }
0x19ed   : > { %v10044_v12 = vpop.f32.mrf.mxu1 }
0x19ee   : > { %10258 = vxpose.xlu0.b32.start.end [1/1] (short) (narrow) %v10044_v12, 8 }
0x19ef   : > { %v13937_v60 = vpop.f32.mrf.mxu1 }
0x19f1   : > { %v10114_v23 = vpop.f32.mrf.mxu1 }
0x19f2   : > { %10290 = vxpose.xlu0.b32.start.end [1/1] (short) (narrow) %v10114_v23, 8 }
0x19f3   : > { %v13942_v35 = vpop.f32.mrf.mxu1 }
0x19f4   : > { %v20679_v35 = vld [vmem:[#allocation105_spill] sm:$0xff] }
0x1a03   : > { %v10184_v33 = vpop.f32.mrf.mxu1 }
0x1a04   : > { %10322 = vxpose.xlu0.b32.start.end [1/1] (short) (narrow) %v10184_v33, 8 }
0x1a05   : > { %v13947_v43 = vpop.f32.mrf.mxu1 }
0x1a07   : > { %v10254_v20 = vpop.f32.mrf.mxu1 }
0x1a08   : > { %10354 = vxpose.xlu0.b32.start.end [1/1] (short) (narrow) %v10254_v20, 8 }
0x1a09   : > { %v13952_v9 = vpop.f32.mrf.mxu1 }
0x1a6a   : > { %v10274_v8 = vpop.trf.xlu0 }
0x1a6e   : > { %v10306_v30 = vpop.trf.xlu0 }
0x1a80   : > { %v10338_v62 = vpop.trf.xlu0 }
0x1a81   : > { %v10386_v32 = vcombine.low %v10274_v8, %v10338_v62  ;;  %v10387_v7 = vcombine.high %v10274_v8, %v10338_v62  ;;  %v7366_v62 = vld [vmem:[%s20080_s14 + $0x18] sm:$0xff] }
0x1a82   : > { %13965 = vmatpush3.msra.mxu1 %v7366_v62  ;;  %v10912_v62 = vld [vmem:[%s20084_s18 + $0x60] sm:$0xff] }
0x1a83   : > { %v10394_v36 = vrot.slane %v10386_v32, %v20676_v41  ;;  %v10401_v1 = vrot.slane %v10387_v7, %v20676_v41  ;;  %v7365_v32 = vld [vmem:[%s20080_s14 + $0x10] sm:$0xff]  ;;  %13966 = vmatprep.subr.mxu1 %v20642_v31  ;;  %v7364_v7 = vld [vmem:[%s20080_s14 + $0x8] sm:$0xff] }
0x1a84   : > { %v10370_v37 = vpop.trf.xlu0  ;;  %13967 = vmatpush3.msra.mxu1 %v7365_v32  ;;  %v10911_v32 = vld [vmem:[%s20084_s18 + $0x58] sm:$0xff] }
0x1a85   : > { %v10402_v5 = vcombine.low %v10306_v30, %v10370_v37  ;;  %v10403_v44 = vcombine.high %v10306_v30, %v10370_v37  ;;  %13968 = vmatprep.subr.mxu1 %v20642_v31  ;;  %v7363_v37 = vld [vmem:[%s20080_s14] sm:$0xff] }
0x1a86   : > { %13969 = vmatpush3.msra.mxu1 %v7364_v7  ;;  %v10910_v7 = vld [vmem:[%s20084_s18 + $0x50] sm:$0xff] }
0x1a87   : > { %v10410_v45 = vrot.slane %v10402_v5, %v20676_v41  ;;  %v10417_v53 = vrot.slane %v10403_v44, %v20676_v41  ;;  %13970 = vmatprep.subr.mxu1 %v20642_v31  ;;  %v7374_v5 = vld [vmem:[%s20081_s15 + $0x38] sm:$0xff]  ;;  %v7373_v44 = vld [vmem:[%s20081_s15 + $0x30] sm:$0xff] }
0x1a88   : > { %13971 = vmatpush3.msra.mxu1 %v7363_v37  ;;  %v10909_v37 = vld [vmem:[%s20084_s18 + $0x48] sm:$0xff] }
0x1a89   : > { %v10418_v46 = vcombine.low %v10394_v36, %v10410_v45  ;;  %v10419_v3 = vcombine.high %v10394_v36, %v10410_v45  ;;  %v10434_v57 = vcombine.low %v10401_v1, %v10417_v53  ;;  %v10435_v58 = vcombine.high %v10401_v1, %v10417_v53  ;;  %v7372_v36 = vld [vmem:[%s20081_s15 + $0x28] sm:$0xff]  ;;  %13994 = vmatprep.subr.mxu1 %v20642_v31  ;;  %v7371_v1 = vld [vmem:[%s20081_s15 + $0x20] sm:$0xff]  ;;  %v7370_v45 = vld [vmem:[%s20081_s15 + $0x18] sm:$0xff] }
0x1a8b   : > { %v10426_v10 = vrot.slane %v10418_v46, %v20677_v14  ;;  %v10433_v51 = vrot.slane %v10419_v3, %v20677_v14  ;;  %v10442_v40 = vrot.slane %v10434_v57, %v20677_v14  ;;  %v10449_v27 = vrot.slane %v10435_v58, %v20677_v14  ;;  %v7376_v57 = vld [vmem:[%s20082_s16 + $0x8] sm:$0xff] }
0x1a8c   : > { %v20680_v58 = vld [vmem:[#allocation41_spill] sm:$0xff] }
0x1a8d   : > { %v10454_v11 = vcombine.low %v10426_v10, %v10433_v51  ;;  %v12982_v22 = vcombine.high %v10426_v10, %v10433_v51  ;;  %v10470_v49 = vcombine.low %v10442_v40, %v10449_v27  ;;  %v12983_v54 = vcombine.high %v10442_v40, %v10449_v27  ;;  %v20681_v40 = vld [vmem:[#allocation31_spill] sm:$0xff] }
0x1a8e   : > { %v10631_v56 = vrot.slane %v15043_v28, %v20680_v58  ;;  %v10636_v27 = vrot.slane %v7376_v57, %v20681_v40 }
0x1a8f   : > { %v10461_v16 = vrot.slane %v10454_v11, %v20676_v41  ;;  %v10469_v4 = vrot.slane %v12982_v22, %v20676_v41  ;;  %v10477_v13 = vrot.slane %v10470_v49, %v20676_v41  ;;  %v10485_v50 = vrot.slane %v12983_v54, %v20676_v41  ;;  %v7369_v22 = vld [vmem:[%s20081_s15 + $0x10] sm:$0xff]  ;;  %v7368_v49 = vld [vmem:[%s20081_s15 + $0x8] sm:$0xff]  ;;  %v7367_v54 = vld [vmem:[%s20081_s15] sm:$0xff] }
0x1a91   : > { %v10486_v26 = vcombine.low %v10461_v16, %v10469_v4  ;;  %v10502_v15 = vcombine.low %v10477_v13, %v10485_v50  ;;  %v10487_v6 = vcombine.high %v10461_v16, %v10469_v4  ;;  %v10503_v24 = vcombine.high %v10477_v13, %v10485_v50 }
0x1a92   : > { %v10641_v16 = vrot.slane %v7376_v57, %v20682_v52 }
0x1a93   : > { %v10494_v29 = vrot.slane %v10486_v26, %v20677_v14  ;;  %v10510_v25 = vrot.slane %v10502_v15, %v20677_v14  ;;  %v10501_v17 = vrot.slane %v10487_v6, %v20677_v14  ;;  %v10517_v42 = vrot.slane %v10503_v24, %v20677_v14  ;;  %v20683_v15 = vld [vmem:[#allocation92_spill] sm:$0xff] }
0x1a94   : > { %v10719_v6 = vrot.slane %v7376_v57, %v20683_v15 }
0x1a95   : > { %v10519_v2 = vcombine.high %v10494_v29, %v10510_v25  ;;  %v10520_v47 = vcombine.low %v10501_v17, %v10517_v42  ;;  %v10518_v38 = vcombine.low %v10494_v29, %v10510_v25  ;;  %v10521_v48 = vcombine.high %v10501_v17, %v10517_v42 }
0x1a97   : > { %10523 = vrot.lane.b32.xlu0 %v10519_v2, %s20657_s28  ;;  %10527 = vrot.lane.b32.xlu1 %v10520_v47, %s20656_s27 }
0x1a9b   : > { %10531 = vrot.lane.b32.xlu0 %v10521_v48, %s20658_s0 }
0x1b09   : > { %v10524_v18 = vpop.permute.xlu0 %10523  ;;  %v10528_v0 = vpop.permute.xlu1 %10527 }
0x1b0a   : > { %v10534_v59 = vsel %vm1710_vm3, %v10518_v38, %v10524_v18 }
0x1b0b   : > { %v10535_v19 = vsel %vm6171_vm5, %v10534_v59, %v10528_v0  ;;  %v10821_v59 = vld [vmem:[%s20083_s17 + $0x18] sm:$0xff]  ;;  %v10820_v0 = vld [vmem:[%s20083_s17 + $0x10] sm:$0xff] }
0x1b0d   : > { %v10532_v63 = vpop.permute.xlu0 %10531 }
0x1b0e   : > { %v10536_v39 = vsel %vm6188_vm6, %v10535_v19, %v10532_v63  ;;  %v10819_v19 = vld [vmem:[%s20083_s17 + $0x8] sm:$0xff]  ;;  %v10818_v63 = vld [vmem:[%s20083_s17] sm:$0xff] }
0x1b0f   : > { %13962 = vmatmul.mubr.msk.f32.vlgmr.msra.gmra.mxu0 %vm1084_vm2, %v10536_v39 }
0x1b10   : > { %13991 = vmatprep.mubr.msk.f32.mxu0 %vm15112_vm4, %v20642_v31  ;;  %13976 = vmatpush3.msra.mxu0 %v7374_v5  ;;  %v10908_v5 = vld [vmem:[%s20084_s18 + $0x40] sm:$0xff] }
0x1b11   : > { %13977 = vmatprep.subr.mxu0 %v20642_v31 }
0x1b12   : > { %13978 = vmatpush3.msra.mxu0 %v7373_v44  ;;  %v10907_v44 = vld [vmem:[%s20084_s18 + $0x38] sm:$0xff] }
0x1b13   : > { %13979 = vmatprep.subr.mxu0 %v20642_v31 }
0x1b14   : > { %13980 = vmatpush3.msra.mxu0 %v7372_v36  ;;  %v10906_v36 = vld [vmem:[%s20084_s18 + $0x30] sm:$0xff] }
0x1b15   : > { %13981 = vmatprep.subr.mxu0 %v20642_v31 }
0x1b16   : > { %13982 = vmatpush3.msra.mxu0 %v7371_v1  ;;  %v10905_v1 = vld [vmem:[%s20084_s18 + $0x28] sm:$0xff] }
0x1b17   : > { %13983 = vmatprep.subr.mxu0 %v20642_v31 }
0x1b18   : > { %13984 = vmatpush3.msra.mxu0 %v7370_v45  ;;  %v10904_v45 = vld [vmem:[%s20084_s18 + $0x20] sm:$0xff] }
0x1b19   : > { %13985 = vmatprep.subr.mxu0 %v20642_v31 }
0x1b1a   : > { %13986 = vmatpush3.msra.mxu0 %v7369_v22 }
0x1b1b   : > { %13987 = vmatprep.subr.mxu0 %v20642_v31 }
0x1b1c   : > { %13988 = vmatpush3.msra.mxu0 %v7368_v49  ;;  %v10991_v49 = vld [vmem:[%s20085_s19 + $0x8] sm:$0xff] }
0x1b1d   : > { %13989 = vmatprep.subr.mxu0 %v20642_v31 }
0x1b1e   : > { %13990 = vmatpush3.msra.mxu0 %v7367_v54  ;;  %v10990_v54 = vld [vmem:[%s20085_s19] sm:$0xff] }
0x1b1f   : > { %14040 = vmatprep.subr.mxu0 %v20642_v31 }
0x1bcf   : > { %v10610_v12 = vpop.f32.mrf.mxu0 }
0x1bd0   : > { %v10611_v60 = vadd.f32 %v10610_v12, %v10540_v21  ;;  %v20684_v12 = vld [vmem:[#allocation45_spill] sm:$0xff] }
0x1bd1   : > { %v13963_v23 = vpop.f32.mrf.mxu0 }
0x1bd2   : > { %v10614_v33 = vadd.f32 %v10611_v60, %v20679_v35  ;;  %v10810_v60 = vrot.slane %v7376_v57, %v20684_v12 }
0x1bd4   : > { %v10615_v43 = vsel %vm1084_vm2, %v10614_v33, 0.0 }
0x1bd5   : > { %10616 = vadd.xlane.f32.xlu1 %v10615_v43 }
0x1c5e   : > { %v10617_v20 = vpop.xlane.xlu1 %10616 }
0x1c5f   : > { %v10618_v9 = vmul.f32 0.03125, %v10617_v20 }
0x1c61   : > { %v10619_v34 = vsub.f32 %v10614_v33, %v10618_v9  ;;  %v20685_v33 = vld [vmem:[#allocation39_spill] sm:$0xff] }
0x1c62   : > { %v10815_v43 = vrot.slane %v7376_v57, %v20685_v33  ;;  %v10900_v57 = vld [vmem:[%s20084_s18] sm:$0xff] }
0x1c63   : > { %v10620_v8 = vmul.f32 %v10619_v34, %v10619_v34 }
0x1c65   : > { %v10621_v30 = vsel %vm1084_vm2, %v10620_v8, 0.0  ;;  %v10914_v8 = vld [vmem:[%s20084_s18 + $0x70] sm:$0xff] }
0x1c66   : > { %10622 = vadd.xlane.f32.xlu0 %v10621_v30  ;;  %v10913_v30 = vld [vmem:[%s20084_s18 + $0x68] sm:$0xff] }
0x1cef   : > { %v10623_v53 = vpop.xlane.xlu0 %10622 }
0x1cf0   : > { %v10624_v46 = vmul.f32 0.03125, %v10623_v53  ;;  %v10903_v53 = vld [vmem:[%s20084_s18 + $0x18] sm:$0xff] }
0x1cf2   : > { %v10625_v3 = vadd.f32 1e-05, %v10624_v46  ;;  %v10902_v46 = vld [vmem:[%s20084_s18 + $0x10] sm:$0xff] }
0x1cf4   : > { %15016 = vrsqrt.f32 %v10625_v3  ;;  %v10901_v3 = vld [vmem:[%s20084_s18 + $0x8] sm:$0xff] }
0x1d01   : > { %v15017_v10 = vpop.eup %15016 }
0x1d02   : > { %v10627_v51 = vmul.f32 %v15017_v10, %v10619_v34  ;;  %v10915_v34 = vld [vmem:[%s20084_s18 + $0x78] sm:$0xff]  ;;  %v10992_v10 = vld [vmem:[%s20085_s19 + $0x10] sm:$0xff] }
0x1d04   : > { %v10632_v55 = vmul.f32 %v10631_v56, %v10627_v51  ;;  %v10993_v56 = vld [vmem:[%s20085_s19 + $0x18] sm:$0xff]  ;;  %v19809_v51 = vld [vmem:[%s20091_s25] sm:$0xff] }
0x1d06   : > { %v10637_v11 = vadd.f32 %v10636_v27, %v10632_v55  ;;  %v10825_v27 = vrot.slane %v19809_v51, %v20681_v40 }
0x1d08   : > { %13973 = vmatmul.mubr.msk.f32.vlgmr.msra.gmra.mxu1 %vm1084_vm2, %v10637_v11 }
0x1d09   : > { %14002 = vmatprep.mubr.msk.f32.mxu1 %vm15112_vm4, %v20642_v31  ;;  %13995 = vmatpush3.msra.mxu1 %v10821_v59 }
0x1d0a   : > { %13996 = vmatprep.subr.mxu1 %v20642_v31 }
0x1d0b   : > { %13997 = vmatpush3.msra.mxu1 %v10820_v0 }
0x1d0c   : > { %13998 = vmatprep.subr.mxu1 %v20642_v31 }
0x1d0d   : > { %13999 = vmatpush3.msra.mxu1 %v10819_v19 }
0x1d0e   : > { %14000 = vmatprep.subr.mxu1 %v20642_v31 }
0x1d0f   : > { %14001 = vmatpush3.msra.mxu1 %v10818_v63 }
0x1d10   : > { %14005 = vmatprep.subr.mxu1 %v20642_v31 }
0x1dc8   : > { %v10711_v4 = vpop.f32.mrf.mxu1 }
0x1dc9   : > { %v10712_v13 = vadd.f32 %v10711_v4, %v10641_v16  ;;  %v10919_v16 = vrot.slane %v19809_v51, %v20682_v52 }
0x1dca   : > { %v13974_v50 = vpop.f32.mrf.mxu1 }
0x1dcb   : > { %v10715_v26 = vmax.f32 %v10712_v13, 0.0 }
0x1dcd   : > { %13992 = vmatmul.mubr.msk.f32.vlgmr.msra.gmra.mxu0 %vm6884_vm7, %v10715_v26  ;;  %v19838_v26 = vld [vmem:[%s20089_s23] sm:$0xff] }
0x1dce   : > { %14048 = vmatprep.mubr.msk.f32.mxu0 %vm15112_vm4, %v20642_v31  ;;  %14041 = vmatpush3.msra.mxu0 %v10993_v56 }
0x1dcf   : > { %14042 = vmatprep.subr.mxu0 %v20642_v31 }
0x1dd0   : > { %14043 = vmatpush3.msra.mxu0 %v10992_v10 }
0x1dd1   : > { %14044 = vmatprep.subr.mxu0 %v20642_v31 }
0x1dd2   : > { %14045 = vmatpush3.msra.mxu0 %v10991_v49 }
0x1dd3   : > { %14046 = vmatprep.subr.mxu0 %v20642_v31 }
0x1dd4   : > { %14047 = vmatpush3.msra.mxu0 %v10990_v54 }
0x1dd5   : > { %14051 = vmatprep.subr.mxu0 %v20642_v31 }
0x1e8d   : > { %v10789_v24 = vpop.f32.mrf.mxu0 }
0x1e8e   : > { %v10790_v29 = vadd.f32 %v10789_v24, %v10719_v6  ;;  %v11014_v6 = vrot.slane %v19838_v26, %v20681_v40 }
0x1e8f   : > { %v13993_v25 = vpop.f32.mrf.mxu0 }
0x1e90   : > { %v10793_v17 = vadd.f32 %v10790_v29, %v10637_v11 }
0x1e92   : > { %v10794_v42 = vsel %vm1084_vm2, %v10793_v17, 0.0 }
0x1e93   : > { %10795 = vadd.xlane.f32.xlu0 %v10794_v42 }
0x1f1c   : > { %v10796_v2 = vpop.xlane.xlu0 %10795 }
0x1f1d   : > { %v10797_v47 = vmul.f32 0.03125, %v10796_v2 }
0x1f1f   : > { %v10798_v38 = vsub.f32 %v10793_v17, %v10797_v47 }
0x1f21   : > { %v10799_v48 = vmul.f32 %v10798_v38, %v10798_v38 }
0x1f23   : > { %v10800_v18 = vsel %vm1084_vm2, %v10799_v48, 0.0 }
0x1f24   : > { %10801 = vadd.xlane.f32.xlu1 %v10800_v18 }
0x1fad   : > { %v10802_v39 = vpop.xlane.xlu1 %10801 }
0x1fae   : > { %v10803_v28 = vmul.f32 0.03125, %v10802_v39 }
0x1fb0   : > { %v10804_v21 = vadd.f32 1e-05, %v10803_v28 }
0x1fb2   : > { %15018 = vrsqrt.f32 %v10804_v21 }
0x1fbf   : > { %v15019_v23 = vpop.eup %15018 }
0x1fc0   : > { %v10806_v35 = vmul.f32 %v15019_v23, %v10798_v38 }
0x1fc2   : > { %v10811_v20 = vmul.f32 %v10810_v60, %v10806_v35 }
0x1fc4   : > { %v10816_v9 = vadd.f32 %v10815_v43, %v10811_v20 }
0x1fc6   : > { %14003 = vmatmul.mubr.msk.f32.vlgmr.msra.gmra.mxu1 %vm1084_vm2, %v10816_v9 }
0x1fc7   : > { %14006 = vmatpush3.msra.mxu1 %v10915_v34  ;;  %14037 = vmatprep.mubr.msk.f32.mxu1 %vm15112_vm4, %v20642_v31 }
0x1fc8   : > { %14007 = vmatprep.subr.mxu1 %v20642_v31 }
0x1fc9   : > { %14008 = vmatpush3.msra.mxu1 %v10914_v8 }
0x1fca   : > { %14009 = vmatprep.subr.mxu1 %v20642_v31 }
0x1fcb   : > { %14010 = vmatpush3.msra.mxu1 %v10913_v30 }
0x1fcc   : > { %14011 = vmatprep.subr.mxu1 %v20642_v31 }
0x1fcd   : > { %14012 = vmatpush3.msra.mxu1 %v10912_v62 }
0x1fce   : > { %14013 = vmatprep.subr.mxu1 %v20642_v31 }
0x1fcf   : > { %14014 = vmatpush3.msra.mxu1 %v10911_v32 }
0x1fd0   : > { %14015 = vmatprep.subr.mxu1 %v20642_v31 }
0x1fd1   : > { %14016 = vmatpush3.msra.mxu1 %v10910_v7 }
0x1fd2   : > { %14017 = vmatprep.subr.mxu1 %v20642_v31 }
0x1fd3   : > { %14018 = vmatpush3.msra.mxu1 %v10909_v37 }
0x1fd4   : > { %14019 = vmatprep.subr.mxu1 %v20642_v31 }
0x1fd5   : > { %14020 = vmatpush3.msra.mxu1 %v10908_v5 }
0x1fd6   : > { %14021 = vmatprep.subr.mxu1 %v20642_v31 }
0x1fd7   : > { %14022 = vmatpush3.msra.mxu1 %v10907_v44 }
0x1fd8   : > { %14023 = vmatprep.subr.mxu1 %v20642_v31 }
0x1fd9   : > { %14024 = vmatpush3.msra.mxu1 %v10906_v36 }
0x1fda   : > { %14025 = vmatprep.subr.mxu1 %v20642_v31 }
0x1fdb   : > { %14026 = vmatpush3.msra.mxu1 %v10905_v1 }
0x1fdc   : > { %14027 = vmatprep.subr.mxu1 %v20642_v31 }
0x1fdd   : > { %14028 = vmatpush3.msra.mxu1 %v10904_v45 }
0x1fde   : > { %14029 = vmatprep.subr.mxu1 %v20642_v31 }
0x1fdf   : > { %14030 = vmatpush3.msra.mxu1 %v10903_v53 }
0x1fe0   : > { %14031 = vmatprep.subr.mxu1 %v20642_v31 }
0x1fe1   : > { %14032 = vmatpush3.msra.mxu1 %v10902_v46 }
0x1fe2   : > { %14033 = vmatprep.subr.mxu1 %v20642_v31 }
0x1fe3   : > { %14034 = vmatpush3.msra.mxu1 %v10901_v3 }
0x1fe4   : > { %14035 = vmatprep.subr.mxu1 %v20642_v31 }
0x1fe5   : > { %14036 = vmatpush3.msra.mxu1 %v10900_v57 }
0x1fe6   : > { %14086 = vmatprep.subr.mxu1 %v20642_v31 }
0x2086   : > { %v10895_v55 = vpop.f32.mrf.mxu1 }
0x2087   : > { %v10896_v11 = vadd.f32 %v10895_v55, %v10825_v27 }
0x2088   : > { %v14004_v22 = vpop.f32.mrf.mxu1 }
0x2089   : > { %10899 = vst [vmem:[%s827_s30] sm:$0xff] %v10896_v11  ;;  %14038 = vmatmul.mubr.f32.vlgmr.msra.gmra.mxu1 %v10896_v11  ;;  %s20688_s30 = sld [smem:[#allocation6_spill]] }
0x208a   : > { %14088 = vmatprep.mubr.msk.f32.mxu1 %vm15112_vm4, %v20642_v31 }
0x2149   : > { %v10986_v4 = vpop.f32.mrf.mxu1 }
0x214a   : > { %v19829_v13 = vadd.f32 %v10986_v4, %v10919_v16 }
0x214b   : > { %v14039_v50 = vpop.f32.mrf.mxu1 }
0x214c   : > { %14049 = vmatmul.mubr.msk.f32.vlgmr.msra.gmra.mxu0 %vm1084_vm2, %v19829_v13 }
0x214d   : > { %14053 = vmatprep.mubr.msk.f32.mxu0 %vm15112_vm4, %v20642_v31 }
0x220c   : > { %v11084_v24 = vpop.f32.mrf.mxu0 }
0x220d   : > { %v11085_v29 = vadd.f32 %v11084_v24, %v11014_v6 }
0x220e   : > { %v14050_v25 = vpop.f32.mrf.mxu0 }
0x220f   : > { %11091 = vrot.lane.b32.xlu1 %v11085_v29, %s20650_s3  ;;  %11089 = vrot.lane.b32.xlu0 %v11085_v29, %s20651_s6  ;;  %s20687_s3 = sld [smem:[#allocation124_spill]] }
0x2210   : > { %s20691_s6 = sld [smem:[#allocation125_spill]] }
0x2213   : > { %11093 = vrot.lane.b32.xlu1 %v11085_v29, %s20652_s7  ;;  %11095 = vrot.lane.b32.xlu0 %v11085_v29, %s20653_s8 }
0x2281   : > { %v11092_v17 = vpop.permute.xlu1 %11091  ;;  %v11090_v42 = vpop.permute.xlu0 %11089 }
0x2282   : > { %11099 = vrot.lane.b32.xlu0 %v11092_v17, %s20653_s8  ;;  %11097 = vrot.lane.b32.xlu1 %v11090_v42, %s20653_s8 }
0x2285   : > { %v11094_v2 = vpop.permute.xlu1 %11093  ;;  %v11096_v40 = vpop.permute.xlu0 %11095 }
0x2286   : > { %11101 = vrot.lane.b32.xlu1 %v11094_v2, %s20653_s8 }
0x22a0   : > { %11107 = vxpose.xlu0.b32.start.end [1/1] (short) (narrow) %v11096_v40, 8 }
0x22f4   : > { %v11098_v47 = vpop.permute.xlu1 %11097  ;;  %v11100_v38 = vpop.permute.xlu0 %11099 }
0x22f5   : > { %11139 = vxpose.xlu1.b32.start.end [1/1] (short) (narrow) %v11098_v47, 8  ;;  %11171 = vxpose.xlu0.b32.start.end [1/1] (short) (narrow) %v11100_v38, 8 }
0x22f8   : > { %v11102_v48 = vpop.permute.xlu1 %11101 }
0x22f9   : > { %11203 = vxpose.xlu0.b32.start.end [1/1] (short) (narrow) %v11102_v48, 8 }
0x231c   : > { %v11123_v18 = vpop.trf.xlu0 }
0x231d   : > { %14052 = vmatpush3.msra.mxu0 %v11123_v18 }
0x231e   : > { %14054 = vmatmul.mubr.msk.f32.vlgmr.msra.gmra.mxu0 %vm1710_vm3, %v11085_v29  ;;  %14056 = vmatprep.subr.mxu0 %v20642_v31 }
0x231f   : > { %14058 = vmatprep.mubr.msk.f32.mxu0 %vm15112_vm4, %v20642_v31 }
0x2371   : > { %v11155_v59 = vpop.trf.xlu1  ;;  %v11187_v0 = vpop.trf.xlu0 }
0x2372   : > { %14057 = vmatpush3.msra.mxu0 %v11155_v59 }
0x2373   : > { %14059 = vmatmul.mubr.msk.f32.vlgmr.msra.gmra.mxu0 %vm1710_vm3, %v11090_v42  ;;  %14061 = vmatprep.subr.mxu0 %v20642_v31 }
0x2374   : > { %14062 = vmatpush3.msra.mxu0 %v11187_v0  ;;  %14063 = vmatprep.mubr.msk.f32.mxu0 %vm15112_vm4, %v20642_v31 }
0x2375   : > { %14066 = vmatprep.subr.mxu0 %v20642_v31  ;;  %v11219_v19 = vpop.trf.xlu0 }
0x2377   : > { %14064 = vmatmul.mubr.msk.f32.vlgmr.msra.gmra.mxu0 %vm1710_vm3, %v11092_v17 }
0x2378   : > { %14067 = vmatpush3.msra.mxu0 %v11219_v19  ;;  %14068 = vmatprep.mubr.msk.f32.mxu0 %vm15112_vm4, %v20642_v31 }
0x2379   : > { %14071 = vmatprep.subr.mxu0 %v20642_v31 }
0x237b   : > { %14069 = vmatmul.mubr.msk.f32.vlgmr.msra.gmra.mxu0 %vm1710_vm3, %v11094_v2 }
0x237c   : > { %14073 = vmatprep.mubr.msk.f32.mxu0 %vm15112_vm4, %v20642_v31 }
0x23de   : > { %v11303_v63 = vpop.f32.mrf.mxu0 }
0x23df   : > { %v11523_v39 = vmul.f32 0.35355338, %v11303_v63 }
0x23e0   : > { %v14055_v28 = vpop.f32.mrf.mxu0 }
0x23e1   : > { %v11527_v21 = vsel %vm1710_vm3, %v11523_v39, -inf }
0x23e2   : > { %11528 = vmax.xlane.f32.xlu0 %v11527_v21 }
0x23f8   : > { %11573 = vrot.lane.b32.xlu0 %v11090_v42, %s20654_s5 }
0x2433   : > { %v11375_v60 = vpop.f32.mrf.mxu0 }
0x2434   : > { %v11524_v23 = vmul.f32 0.35355338, %v11375_v60 }
0x2435   : > { %v14060_v35 = vpop.f32.mrf.mxu0 }
0x2436   : > { %v11530_v43 = vsel %vm1710_vm3, %v11524_v23, -inf }
0x2437   : > { %11531 = vmax.xlane.f32.xlu1 %v11530_v43  ;;  %v11447_v20 = vpop.f32.mrf.mxu0 }
0x2438   : > { %v11525_v9 = vmul.f32 0.35355338, %v11447_v20 }
0x2439   : > { %v14065_v34 = vpop.f32.mrf.mxu0 }
0x243a   : > { %v11533_v8 = vsel %vm1710_vm3, %v11525_v9, -inf }
0x243b   : > { %11534 = vmax.xlane.f32.xlu1 %v11533_v8  ;;  %v11519_v30 = vpop.f32.mrf.mxu0 }
0x243c   : > { %v11526_v62 = vmul.f32 0.35355338, %v11519_v30  ;;  %v10997_v30 = vld [vmem:[%s20086_s20 + $0x18] sm:$0xff] }
0x243d   : > { %v14070_v32 = vpop.f32.mrf.mxu0 }
0x243e   : > { %v11536_v7 = vsel %vm1710_vm3, %v11526_v62, -inf }
0x243f   : > { %11537 = vmax.xlane.f32.xlu0 %v11536_v7 }
0x244c   : > { %11571 = vrot.lane.b32.xlu1 %v11085_v29, %s20654_s5 }
0x2455   : > { %11575 = vrot.lane.b32.xlu0 %v11092_v17, %s20654_s5 }
0x246b   : > { %v11529_v37 = vpop.xlane.xlu0 %11528 }
0x246c   : > { %v11539_v5 = vsub.f32 %v11523_v39, %v11529_v37 }
0x246e   : > { %v11543_v44 = vmul.f32 1.442695, %v11539_v5 }
0x246f   : > { %v11574_v3 = vpop.permute.xlu0 %11573 }
0x2470   : > { %15020 = vpow2.f32 %v11543_v44 }
0x247d   : > { %v15021_v36 = vpop.eup %15020 }
0x247e   : > { %v11551_v1 = vsel %vm1710_vm3, %v15021_v36, 0.0 }
0x247f   : > { %11552 = vadd.xlane.f32.xlu0 %v11551_v1 }
0x2495   : > { %11577 = vrot.lane.b32.xlu0 %v11094_v2, %s20654_s5 }
0x24c0   : > { %v11532_v45 = vpop.xlane.xlu1 %11531 }
0x24c1   : > { %v11540_v53 = vsub.f32 %v11524_v23, %v11532_v45 }
0x24c3   : > { %v11545_v46 = vmul.f32 1.442695, %v11540_v53 }
0x24c4   : > { %v11535_v57 = vpop.xlane.xlu1 %11534 }
0x24c5   : > { %15022 = vpow2.f32 %v11545_v46  ;;  %v11541_v56 = vsub.f32 %v11525_v9, %v11535_v57 }
0x24c7   : > { %v11547_v10 = vmul.f32 1.442695, %v11541_v56 }
0x24c8   : > { %v11538_v27 = vpop.xlane.xlu0 %11537  ;;  %v11572_v25 = vpop.permute.xlu1 %11571 }
0x24c9   : > { %15024 = vpow2.f32 %v11547_v10  ;;  %v11542_v55 = vsub.f32 %v11526_v62, %v11538_v27 }
0x24cb   : > { %v11549_v11 = vmul.f32 1.442695, %v11542_v55  ;;  %v10996_v55 = vld [vmem:[%s20086_s20 + $0x10] sm:$0xff] }
0x24cc   : > { %v11576_v6 = vpop.permute.xlu0 %11575 }
0x24cd   : > { %15026 = vpow2.f32 %v11549_v11 }
0x24d2   : > { %v15023_v22 = vpop.eup %15022 }
0x24d3   : > { %v11554_v49 = vsel %vm1710_vm3, %v15023_v22, 0.0 }
0x24d4   : > { %11555 = vadd.xlane.f32.xlu1 %v11554_v49 }
0x24d6   : > { %v15025_v54 = vpop.eup %15024 }
0x24d7   : > { %v11557_v16 = vsel %vm1710_vm3, %v15025_v54, 0.0 }
0x24d8   : > { %11558 = vadd.xlane.f32.xlu0 %v11557_v16  ;;  %v10995_v16 = vld [vmem:[%s20086_s20 + $0x8] sm:$0xff] }
0x24da   : > { %v15027_v4 = vpop.eup %15026 }
0x24db   : > { %v11560_v50 = vsel %vm1710_vm3, %v15027_v4, 0.0 }
0x24dc   : > { %11561 = vadd.xlane.f32.xlu1 %v11560_v50 }
0x2505   : > { %11615 = vxpose.xlu0.b32.start.end [1/1] (short) (narrow) %v11574_v3, 8 }
0x2508   : > { %v11553_v24 = vpop.xlane.xlu0 %11552 }
0x2509   : > { %15028 = vrcp.f32 %v11553_v24 }
0x250c   : > { %v11578_v29 = vpop.permute.xlu0 %11577 }
0x250d   : > { %11679 = vxpose.xlu0.b32.start.end [1/1] (short) (narrow) %v11578_v29, 8  ;;  %v10994_v29 = vld [vmem:[%s20086_s20] sm:$0xff] }
0x250f   : > { %11583 = vxpose.xlu1.b32.start.end [1/1] (short) (narrow) %v11572_v25, 8 }
0x2513   : > { %11647 = vxpose.xlu1.b32.start.end [1/1] (short) (narrow) %v11576_v6, 8 }
0x2516   : > { %v15029_v17 = vpop.eup %15028 }
0x2517   : > { %v11567_v42 = vmul.f32 %v15029_v17, %v15021_v36 }
0x2519   : > { %14072 = vmatpush3.xpose.msk.msra.mxu0 %vm1710_vm3, %v11567_v42 }
0x251a   : > { %14076 = vmatprep.subr.mxu0 %v20642_v31 }
0x255d   : > { %v11556_v2 = vpop.xlane.xlu1 %11555 }
0x2561   : > { %v11559_v48 = vpop.xlane.xlu0 %11558 }
0x2565   : > { %v11562_v40 = vpop.xlane.xlu1 %11561 }
0x2566   : > { %15030 = vrcp.f32 %v11562_v40 }
0x2567   : > { %15032 = vrcp.f32 %v11556_v2 }
0x2568   : > { %15034 = vrcp.f32 %v11559_v48 }
0x2573   : > { %v15031_v47 = vpop.eup %15030 }
0x2574   : > { %v11570_v38 = vmul.f32 %v15031_v47, %v15027_v4  ;;  %v15033_v59 = vpop.eup %15032 }
0x2575   : > { %v11568_v63 = vmul.f32 %v15033_v59, %v15023_v22  ;;  %v15035_v39 = vpop.eup %15034 }
0x2576   : > { %14087 = vmatpush3.xpose.msk.msra.mxu1 %vm1710_vm3, %v11570_v38  ;;  %v11569_v28 = vmul.f32 %v15035_v39, %v15025_v54 }
0x2577   : > { %14102 = vmatprep.subr.mxu1 %v20642_v31 }
0x2581   : > { %v11631_v18 = vpop.trf.xlu0 }
0x2589   : > { %v11695_v0 = vpop.trf.xlu0 }
0x258a   : > { %14089 = vmatmul.mubr.msk.f32.vlgmr.msra.gmra.mxu1 %vm1710_vm3, %v11695_v0 }
0x258b   : > { %v11599_v19 = vpop.trf.xlu1  ;;  %14110 = vmatprep.mubr.msk.f32.mxu1 %vm15112_vm4, %v20642_v31 }
0x258c   : > { %14074 = vmatmul.mubr.msk.f32.vlgmr.msra.gmra.mxu0 %vm1710_vm3, %v11599_v19 }
0x258d   : > { %14077 = vmatpush3.xpose.msk.msra.mxu0 %vm1710_vm3, %v11568_v63  ;;  %14078 = vmatprep.mubr.msk.f32.mxu0 %vm15112_vm4, %v20642_v31 }
0x258e   : > { %14081 = vmatprep.subr.mxu0 %v20642_v31 }
0x258f   : > { %v11663_v21 = vpop.trf.xlu1 }
0x2590   : > { %14079 = vmatmul.mubr.msk.f32.vlgmr.msra.gmra.mxu0 %vm1710_vm3, %v11631_v18 }
0x2591   : > { %14082 = vmatpush3.xpose.msk.msra.mxu0 %vm1710_vm3, %v11569_v28  ;;  %14083 = vmatprep.mubr.msk.f32.mxu0 %vm15112_vm4, %v20642_v31 }
0x2592   : > { %14091 = vmatprep.subr.mxu0 %v20642_v31 }
0x2594   : > { %14084 = vmatmul.mubr.msk.f32.vlgmr.msra.gmra.mxu0 %vm1710_vm3, %v11663_v21 }
0x2595   : > { %14099 = vmatprep.mubr.msk.f32.mxu0 %vm15112_vm4, %v20642_v31  ;;  %14092 = vmatpush3.msra.mxu0 %v10997_v30 }
0x2596   : > { %14093 = vmatprep.subr.mxu0 %v20642_v31 }
0x2597   : > { %14094 = vmatpush3.msra.mxu0 %v10996_v55  ;;  %v12388_v55 = vrot.slane %v19838_v26, %v20683_v15 }
0x2598   : > { %14095 = vmatprep.subr.mxu0 %v20642_v31 }
0x2599   : > { %14096 = vmatpush3.msra.mxu0 %v10995_v16 }
0x259a   : > { %14097 = vmatprep.subr.mxu0 %v20642_v31 }
0x259b   : > { %14098 = vmatpush3.msra.mxu0 %v10994_v29 }
0x259c   : > { %14113 = vmatprep.subr.mxu0 %v20642_v31 }
0x264a   : > { %v12011_v60 = vpop.f32.mrf.mxu1 }
0x264c   : > { %v11783_v23 = vpop.f32.mrf.mxu0  ;;  %v14090_v35 = vpop.f32.mrf.mxu1 }
0x264d   : > { %12015 = vxpose.xlu1.b32.start.end [1/1] (short) (narrow) %v11783_v23, 8 }
0x264e   : > { %v14075_v43 = vpop.f32.mrf.mxu0 }
0x2650   : > { %v11859_v20 = vpop.f32.mrf.mxu0 }
0x2651   : > { %12047 = vxpose.xlu0.b32.start.end [1/1] (short) (narrow) %v11859_v20, 8 }
0x2652   : > { %v14080_v9 = vpop.f32.mrf.mxu0 }
0x2654   : > { %v11935_v34 = vpop.f32.mrf.mxu0 }
0x2655   : > { %12079 = vxpose.xlu1.b32.start.end [1/1] (short) (narrow) %v11935_v34, 8  ;;  %12111 = vxpose.xlu0.b32.start.end [1/1] (short) (narrow) %v12011_v60, 8 }
0x2656   : > { %v14085_v8 = vpop.f32.mrf.mxu0 }
0x26c9   : > { %v12031_v62 = vpop.trf.xlu1 }
0x26cd   : > { %v12063_v32 = vpop.trf.xlu0 }
0x26d1   : > { %v12095_v7 = vpop.trf.xlu1  ;;  %v12127_v37 = vpop.trf.xlu0 }
0x26d2   : > { %v12143_v5 = vcombine.low %v12031_v62, %v12095_v7  ;;  %v12144_v44 = vcombine.high %v12031_v62, %v12095_v7  ;;  %v12159_v36 = vcombine.low %v12063_v32, %v12127_v37  ;;  %v12160_v1 = vcombine.high %v12063_v32, %v12127_v37 }
0x26d4   : > { %v12151_v45 = vrot.slane %v12143_v5, %v20676_v41  ;;  %v12158_v53 = vrot.slane %v12144_v44, %v20676_v41  ;;  %v12167_v46 = vrot.slane %v12159_v36, %v20676_v41  ;;  %v12174_v3 = vrot.slane %v12160_v1, %v20676_v41  ;;  %v11001_v36 = vld [vmem:[%s20087_s21 + $0x18] sm:$0xff]  ;;  %v10998_v1 = vld [vmem:[%s20087_s21] sm:$0xff] }
0x26d5   : > { %14103 = vmatpush3.msra.mxu1 %v11001_v36 }
0x26d6   : > { %v12175_v57 = vcombine.low %v12151_v45, %v12167_v46  ;;  %v12176_v56 = vcombine.high %v12151_v45, %v12167_v46  ;;  %v12191_v10 = vcombine.low %v12158_v53, %v12174_v3  ;;  %v12192_v27 = vcombine.high %v12158_v53, %v12174_v3  ;;  %14104 = vmatprep.subr.mxu1 %v20642_v31  ;;  %v11009_v45 = vld [vmem:[%s20088_s22 + $0x38] sm:$0xff]  ;;  %v11008_v53 = vld [vmem:[%s20088_s22 + $0x30] sm:$0xff]  ;;  %v11007_v46 = vld [vmem:[%s20088_s22 + $0x28] sm:$0xff] }
0x26d7   : > { %v11006_v3 = vld [vmem:[%s20088_s22 + $0x20] sm:$0xff] }
0x26d8   : > { %v12183_v11 = vrot.slane %v12175_v57, %v20677_v14  ;;  %v12190_v22 = vrot.slane %v12176_v56, %v20677_v14  ;;  %v12199_v49 = vrot.slane %v12191_v10, %v20677_v14  ;;  %v12206_v54 = vrot.slane %v12192_v27, %v20677_v14  ;;  %v11005_v57 = vld [vmem:[%s20088_s22 + $0x18] sm:$0xff] }
0x26da   : > { %v12211_v4 = vcombine.low %v12183_v11, %v12190_v22  ;;  %v13001_v50 = vcombine.high %v12183_v11, %v12190_v22  ;;  %v12227_v6 = vcombine.low %v12199_v49, %v12206_v54  ;;  %v13002_v24 = vcombine.high %v12199_v49, %v12206_v54 }
0x26db   : > { %v12393_v49 = vrot.slane %v19838_v26, %v20684_v12  ;;  %v11002_v12 = vld [vmem:[%s20088_s22] sm:$0xff] }
0x26dc   : > { %v12218_v25 = vrot.slane %v12211_v4, %v20676_v41  ;;  %v12226_v17 = vrot.slane %v13001_v50, %v20676_v41  ;;  %v12234_v42 = vrot.slane %v12227_v6, %v20676_v41  ;;  %v12242_v2 = vrot.slane %v13002_v24, %v20676_v41  ;;  %v11004_v4 = vld [vmem:[%s20088_s22 + $0x10] sm:$0xff]  ;;  %v11003_v50 = vld [vmem:[%s20088_s22 + $0x8] sm:$0xff] }
0x26dd   : > { %v12398_v6 = vrot.slane %v19838_v26, %v20685_v33 }
0x26de   : > { %v12243_v40 = vcombine.low %v12218_v25, %v12226_v17  ;;  %v12259_v47 = vcombine.low %v12234_v42, %v12242_v2  ;;  %v12244_v38 = vcombine.high %v12218_v25, %v12226_v17  ;;  %v12260_v48 = vcombine.high %v12234_v42, %v12242_v2  ;;  %v20686_v42 = vld [vmem:[#allocation68_spill] sm:$0xff] }
0x26df   : > { %v12476_v2 = vrot.slane %v19838_v26, %v20686_v42 }
0x26e0   : > { %v12251_v18 = vrot.slane %v12243_v40, %v20677_v14  ;;  %v12267_v59 = vrot.slane %v12259_v47, %v20677_v14  ;;  %v12258_v0 = vrot.slane %v12244_v38, %v20677_v14  ;;  %v12274_v19 = vrot.slane %v12260_v48, %v20677_v14 }
0x26e1   : > { %v12297_v14 = vrot.slane %v19838_v26, %v20682_v52  ;;  %v11000_v52 = vld [vmem:[%s20087_s21 + $0x10] sm:$0xff] }
0x26e2   : > { %v12276_v63 = vcombine.high %v12251_v18, %v12267_v59  ;;  %v12277_v39 = vcombine.low %v12258_v0, %v12274_v19  ;;  %v12275_v28 = vcombine.low %v12251_v18, %v12267_v59  ;;  %v12278_v41 = vcombine.high %v12258_v0, %v12274_v19  ;;  %14105 = vmatpush3.msra.mxu1 %v11000_v52 }
0x26e3   : > { %14106 = vmatprep.subr.mxu1 %v20642_v31 }
0x26e4   : > { %12280 = vrot.lane.b32.xlu1 %v12276_v63, %s20657_s28  ;;  %12284 = vrot.lane.b32.xlu0 %v12277_v39, %s20656_s27  ;;  %v12577_v39 = vld [vmem:[%s20687_s3 + $0x18] sm:$0xff]  ;;  %s20689_s27 = sld [smem:[#allocation9_spill]] }
0x26e8   : > { %12288 = vrot.lane.b32.xlu1 %v12278_v41, %s20658_s0  ;;  %v12575_v41 = vld [vmem:[%s20687_s3 + $0x8] sm:$0xff]  ;;  %s816_s0 = sand.u32 1, %s20688_s30   ;;  %s15050_s30 = scalar_lea.vmem %s15049_s4, 256 }
0x26e9   : > { %s12764_s9 = sshll.u32 %s816_s0, 3  ;;  %s12661_s8 = scalar_lea.sflag [#allocation3], %s816_s0 }
0x26ea   : > { %s13008_s11 = sshll.u32 %s20689_s27, 7  ;;  %s818_s29 = scalar_lea.vmem [#allocation2], %s12764_s9 }
0x26eb   : > { %s12677_s1 = sshll.u32 %s818_s29, 4  ;;  %s20031_s7 = scalar_lea.hbm %s20691_s6, %s13008_s11  ;;  %s12678_s1 = int_to_ptr.vmem [resolvable:$true] %s12677_s1 }
0x26ec   : > { %s15044_s5 = scalar_lea.vmem %s12678_s1, 128  ;;  %p15051_p0 = scmp.lt.s32.totalorder %s12678_s1, %s15049_s4 }
0x26ed   : > { %p15045_p11 = scmp.ne.s32.totalorder %s12678_s1, %s15044_s5  ;;  %p15052_p1 = scmp.lt.s32.totalorder %s15050_s30, %s15044_s5 }
0x26ef   : > { %p15046_p12 = pnand %p15045_p11, %p15297_p5  ;;  %p15053_p2 = por %p15052_p1, %p15051_p0 }
0x26f1   : > { %p15047_p13 = pneg %p15046_p12 }
0x26f3   : > { %p15054_p3 = pnand %p15053_p2, %p15047_p13 }
0x2756   : > { %v12281_v21 = vpop.permute.xlu1 %12280  ;;  %v12285_v23 = vpop.permute.xlu0 %12284 }
0x2757   : > { %v12291_v60 = vsel %vm1710_vm3, %v12275_v28, %v12281_v21  ;;  %v12576_v28 = vld [vmem:[%s20687_s3 + $0x10] sm:$0xff]  ;;  %v12574_v21 = vld [vmem:[%s20687_s3] sm:$0xff] }
0x2758   : > { %v12292_v35 = vsel %vm6171_vm5, %v12291_v60, %v12285_v23 }
0x275a   : > { %v12289_v43 = vpop.permute.xlu1 %12288 }
0x275b   : > { %v12293_v20 = vsel %vm6188_vm6, %v12292_v35, %v12289_v43  ;;  %v12567_v43 = vrot.slane %v19838_v26, %v20678_v61 }
0x275c   : > { %14100 = vmatmul.mubr.msk.f32.vlgmr.msra.gmra.mxu0 %vm1084_vm2, %v12293_v20 }
0x275d   : > { %14129 = vmatprep.mubr.msk.f32.mxu0 %vm15112_vm4, %v20642_v31  ;;  %14114 = vmatpush3.msra.mxu0 %v11009_v45 }
0x275e   : > { %14115 = vmatprep.subr.mxu0 %v20642_v31 }
0x275f   : > { %14116 = vmatpush3.msra.mxu0 %v11008_v53 }
0x2760   : > { %14117 = vmatprep.subr.mxu0 %v20642_v31 }
0x2761   : > { %14118 = vmatpush3.msra.mxu0 %v11007_v46 }
0x2762   : > { %14119 = vmatprep.subr.mxu0 %v20642_v31 }
0x2763   : > { %14120 = vmatpush3.msra.mxu0 %v11006_v3 }
0x2764   : > { %14121 = vmatprep.subr.mxu0 %v20642_v31 }
0x2765   : > { %14122 = vmatpush3.msra.mxu0 %v11005_v57 }
0x2766   : > { %14123 = vmatprep.subr.mxu0 %v20642_v31 }
0x2767   : > { %14124 = vmatpush3.msra.mxu0 %v11004_v4 }
0x2768   : > { %14125 = vmatprep.subr.mxu0 %v20642_v31 }
0x2769   : > { %14126 = vmatpush3.msra.mxu0 %v11003_v50 }
0x276a   : > { %14127 = vmatprep.subr.mxu0 %v20642_v31 }
0x276b   : > { %14128 = vmatpush3.msra.mxu0 %v11002_v12 }
0x281c   : > { %v12367_v9 = vpop.f32.mrf.mxu0 }
0x281d   : > { %v12368_v34 = vadd.f32 %v12367_v9, %v12297_v14  ;;  %v12572_v9 = vrot.slane %v19838_v26, %v20680_v58 }
0x281e   : > { %v14101_v8 = vpop.f32.mrf.mxu0 }
0x281f   : > { %v12371_v30 = vadd.f32 %v12368_v34, %v19829_v13  ;;  %v10999_v13 = vld [vmem:[%s20087_s21 + $0x8] sm:$0xff] }
0x2820   : > { %14107 = vmatpush3.msra.mxu1 %v10999_v13 }
0x2821   : > { %v12372_v62 = vsel %vm1084_vm2, %v12371_v30, 0.0  ;;  %14108 = vmatprep.subr.mxu1 %v20642_v31 }
0x2822   : > { %12373 = vadd.xlane.f32.xlu1 %v12372_v62  ;;  %14109 = vmatpush3.msra.mxu1 %v10998_v1 }
0x2823   : > { %14132 = vmatprep.subr.mxu1 %v20642_v31 }
0x28ab   : > { %v12374_v32 = vpop.xlane.xlu1 %12373 }
0x28ac   : > { %v12375_v7 = vmul.f32 0.03125, %v12374_v32 }
0x28ae   : > { %v12376_v37 = vsub.f32 %v12371_v30, %v12375_v7 }
0x28b0   : > { %v12377_v5 = vmul.f32 %v12376_v37, %v12376_v37 }
0x28b2   : > { %v12378_v44 = vsel %vm1084_vm2, %v12377_v5, 0.0 }
0x28b3   : > { %12379 = vadd.xlane.f32.xlu0 %v12378_v44 }
0x293c   : > { %v12380_v56 = vpop.xlane.xlu0 %12379 }
0x293d   : > { %v12381_v10 = vmul.f32 0.03125, %v12380_v56 }
0x293f   : > { %v12382_v27 = vadd.f32 1e-05, %v12381_v10 }
0x2941   : > { %15036 = vrsqrt.f32 %v12382_v27 }
0x294e   : > { %v15037_v11 = vpop.eup %15036 }
0x294f   : > { %v12384_v22 = vmul.f32 %v15037_v11, %v12376_v37 }
0x2951   : > { %v12389_v54 = vmul.f32 %v12388_v55, %v12384_v22 }
0x2953   : > { %v12394_v16 = vadd.f32 %v12393_v49, %v12389_v54 }
0x2955   : > { %14111 = vmatmul.mubr.msk.f32.vlgmr.msra.gmra.mxu1 %vm1084_vm2, %v12394_v16 }
0x2956   : > { %14140 = vmatprep.mubr.msk.f32.mxu1 %vm15112_vm4, %v20642_v31  ;;  %14133 = vmatpush3.msra.mxu1 %v12577_v39 }
0x2957   : > { %14134 = vmatprep.subr.mxu1 %v20642_v31 }
0x2958   : > { %14135 = vmatpush3.msra.mxu1 %v12576_v28 }
0x2959   : > { %14136 = vmatprep.subr.mxu1 %v20642_v31 }
0x295a   : > { %14137 = vmatpush3.msra.mxu1 %v12575_v41 }
0x295b   : > { %14138 = vmatprep.subr.mxu1 %v20642_v31  ;;  %v12581_v31 = vrot.slane %v19809_v51, %v20683_v15 }
0x295c   : > { %14139 = vmatpush3.msra.mxu1 %v12574_v21 }
0x2a15   : > { %v12468_v24 = vpop.f32.mrf.mxu1 }
0x2a16   : > { %v12469_v29 = vadd.f32 %v12468_v24, %v12398_v6 }
0x2a17   : > { %v14112_v25 = vpop.f32.mrf.mxu1 }
0x2a18   : > { %v12472_v17 = vmax.f32 %v12469_v29, 0.0 }
0x2a1a   : > { %14130 = vmatmul.mubr.msk.f32.vlgmr.msra.gmra.mxu0 %vm6884_vm7, %v12472_v17 }
0x2ada   : > { %v12546_v40 = vpop.f32.mrf.mxu0 }
0x2adb   : > { %v12547_v47 = vadd.f32 %v12546_v40, %v12476_v2 }
0x2adc   : > { %v14131_v38 = vpop.f32.mrf.mxu0 }
0x2add   : > { %v12550_v48 = vadd.f32 %v12547_v47, %v12394_v16 }
0x2adf   : > { %v12551_v18 = vsel %vm1084_vm2, %v12550_v48, 0.0 }
0x2ae0   : > { %12552 = vadd.xlane.f32.xlu1 %v12551_v18 }
0x2b69   : > { %v12553_v59 = vpop.xlane.xlu1 %12552 }
0x2b6a   : > { %v12554_v0 = vmul.f32 0.03125, %v12553_v59 }
0x2b6c   : > { %v12555_v19 = vsub.f32 %v12550_v48, %v12554_v0 }
0x2b6e   : > { %v12556_v33 = vmul.f32 %v12555_v19, %v12555_v19 }
0x2b70   : > { %v12557_v63 = vsel %vm1084_vm2, %v12556_v33, 0.0 }
0x2b71   : > { %12558 = vadd.xlane.f32.xlu1 %v12557_v63 }
0x2bfa   : > { %v12559_v60 = vpop.xlane.xlu1 %12558 }
0x2bfb   : > { %v12560_v23 = vmul.f32 0.03125, %v12559_v60 }
0x2bfd   : > { %v12561_v35 = vadd.f32 1e-05, %v12560_v23 }
0x2bff   : > { %15038 = vrsqrt.f32 %v12561_v35 }
0x2c0c   : > { %v15039_v20 = vpop.eup %15038 }
0x2c0d   : > { %v12563_v14 = vmul.f32 %v15039_v20, %v12555_v19 }
0x2c0f   : > { %v12568_v34 = vmul.f32 %v12567_v43, %v12563_v14 }
0x2c11   : > { %v12573_v8 = vadd.f32 %v12572_v9, %v12568_v34 }
0x2c13   : > { %14141 = vmatmul.mubr.msk.f32.vlgmr.msra.gmra.mxu1 %vm1084_vm2, %v12573_v8 }
0x2cd3   : > { %v12651_v30 = vpop.f32.mrf.mxu1 }
0x2cd4   : > { %v12652_v61 = vadd.f32 %v12651_v30, %v12581_v31 }
0x2cd5   : > { %v14142_v58 = vpop.f32.mrf.mxu1 }
0x2cd6   : > { %12655 = vst [vmem:[%s818_s29] sm:$0xff] %v12652_v61 }
0x2cd7   : > { %15057 = shalt.err (!%p15054_p3)
}
0x2cd8   : > { %s15058_s27 = scalar_lea.hbm %s20031_s7, 128  ;;  %s15062_s11 = scalar_lea.hbm %s20691_s6, 256 }
0x2cd9   : > { %p15059_p4 = scmp.ne.s32.totalorder %s20031_s7, %s15058_s27  ;;  %p15063_p9 = scmp.lt.s32.totalorder %s20031_s7, %s20691_s6 }
0x2cda   : > { %p15064_p10 = scmp.lt.s32.totalorder %s15062_s11, %s15058_s27 }
0x2cdb   : > { %p15060_p7 = pnand %p15059_p4, %p15297_p5 }
0x2cdc   : > { %p15065_p11 = por %p15064_p10, %p15063_p9 }
0x2cdd   : > { %p15061_p8 = pneg %p15060_p7 }
0x2cdf   : > { %p15066_p12 = pnand %p15065_p11, %p15061_p8 }
0x2ce1   : > { %15069 = shalt.err (!%p15066_p12)
}
0x2ce2   : > { %14143 = dma.vmem_to_hbm [thread:$0]  (%p15297_p5), %s12678_s1, 128, %s20031_s7, %s12661_s8  }
0x2ce3 PF: > { %s20692_s10 = sld [smem:[#allocation8_spill]] }
0x2ce4   : > { %s20693_s5 = sld [smem:[#allocation5_spill]] }
0x2ce9   : > { %p14149_p13 = scmp.ge.s32.totalorder %s20692_s10, 2 }
0x2cea   : > { %s12696_s4 = sand.u32 1, %s20693_s5  }
0x2ceb   : > { %p14146_p0 = pnand %p14149_p13, %p15301_p6  ;;  %s12697_s30 = scalar_lea.sflag [#allocation3], %s12696_s4 }
0x2ced   : > { %p14147_p1 = pneg %p14146_p0 }
0x2cef   : > { %15087 = dma.done.wait (%p14147_p1), %s12697_s30, 128  }
0x2cf0   : > { %15089 = vsyncadd (%p14147_p1), %s12697_s30, 4294967168  ;;  %s20695_s30 = sld [smem:[#allocation10_spill]] }
0x2cf1   : > { %s20696_s7 = sld [smem:[#allocation6_spill]] }
0x2cf2   : > { %s20697_s4 = sld [smem:[#allocation7_spill]] }
0x2cf3   : > { %s20698_s8 = sld [smem:[#allocation11_spill]] }
0x2cf6   : > { %p38_p2 = scmp.ge.s32.totalorder %s20695_s30, 4  }
0x2cf8   :  { %40 = sbr.rel (!%p38_p2) target bundleno = 18 (0x12), region = 171 }
0x2cfd   :  { %12702 = vsyncpa [#allocation3], 1 }
0x2cfe   :  { %12704 = vsyncpa [#allocation3 + $0x1], 1 }

</bundles_post_ra>
